<compile_context>
chip_gen: v5e
topology: v5e:2x2
jax: 0.10.0
libtpu: 0.0.40
codegen_flags: <defaults>
</compile_context>

<pallas_src>
import functools

import jax
import jax.numpy as jnp
from jax.experimental import pallas as pl
from jax.experimental.pallas import tpu as pltpu

EPS = 1e-5        # BatchNorm eps
SLOPE = 0.2       # LeakyReLU negative slope


# ----------------------------- Pallas kernels -----------------------------

def _conv_kernel(p_ref, w_ref, b_ref, o_ref, *, act):
    # w: (Cout, K), p: (K, M)  ->  lane-dense (Cout, M) output (M on 128-lane axis).
    # Bias / folded-BN already merged into w_ref / b_ref on the host side.
    y = jnp.dot(w_ref[...], p_ref[...], preferred_element_type=jnp.float32)
    y = y + b_ref[...]
    if act:
        y = jnp.where(y > 0.0, y, SLOPE * y)     # LeakyReLU(0.2)
    o_ref[...] = y.astype(o_ref.dtype)


def _pool_kernel(*refs, inv_wn, affine, act):
    # p: (Wn, C, M) pooling windows with the window dim leading -> VPU adds over
    # lane-dense (C, M) slabs.  Optional folded-BN affine + LeakyReLU epilogue.
    if affine:
        p_ref, s_ref, t_ref, o_ref = refs
    else:
        p_ref, o_ref = refs
    y = jnp.sum(p_ref[...], axis=0) * inv_wn     # AvgPool
    if affine:
        y = y * s_ref[...] + t_ref[...]          # folded BatchNorm affine
    if act:
        y = jnp.where(y > 0.0, y, SLOPE * y)     # LeakyReLU(0.2)
    o_ref[...] = y.astype(o_ref.dtype)


# --------------------------- op wrappers (glue) ----------------------------

def conv2d_cm(x, w, b, scale=None, shift=None, *, stride, padding, act=False):
    """Conv2d on channel-major activations (C, N, H, W).

    im2col -> (K, M) with M = N*OH*OW, matmul (Cout, K) @ (K, M) in Pallas,
    bias + optional folded BatchNorm + LeakyReLU fused into the kernel.
    Returns channel-major (Cout, N, OH, OW).
    """
    C, N, H, W = x.shape
    Cout, Cin, KH, KW = w.shape
    assert Cin == C
    sh, sw = stride
    ph, pw = padding
    xp = jnp.pad(x, ((0, 0), (0, 0), (ph, ph), (pw, pw)))
    OH = (H + 2 * ph - KH) // sh + 1
    OW = (W + 2 * pw - KW) // sw + 1
    M = N * OH * OW
    K = Cin * KH * KW

    # Patch rows ordered (i*KW + j)*Cin + c: a pure leading-axis stack + reshape
    # (no minor-dim transpose in XLA).
    cols = [xp[:, :, i:i + sh * OH:sh, j:j + sw * OW:sw]
            for i in range(KH) for j in range(KW)]
    patches = jnp.stack(cols, axis=0).reshape(K, M)

    # Weight flattened in the matching (KH, KW, Cin) order; fold BN affine in.
    wmat = jnp.transpose(w, (0, 2, 3, 1)).reshape(Cout, K)
    bias = b
    if scale is not None:
        wmat = wmat * scale[:, None]
        bias = b * scale + shift
    bias = bias.reshape(Cout, 1)

    out = pl.pallas_call(
        functools.partial(_conv_kernel, act=act),
        out_shape=jax.ShapeDtypeStruct((Cout, M), jnp.float32),
        grid=(1,),
        in_specs=[
            pl.BlockSpec((K, M), lambda i: (0, 0)),
            pl.BlockSpec((Cout, K), lambda i: (0, 0)),
            pl.BlockSpec((Cout, 1), lambda i: (0, 0)),
        ],
        out_specs=pl.BlockSpec((Cout, M), lambda i: (0, 0)),
        compiler_params=pltpu.CompilerParams(dimension_semantics=("arbitrary",)),
    )(patches, wmat, bias)

    return out.reshape(Cout, N, OH, OW)


def avgpool2d_cm(x, *, kernel, stride, scale=None, shift=None, act=False):
    """AvgPool2d (channel-major, no padding, ceil_mode=False) with optional fused
    BatchNorm affine + LeakyReLU.  Returns channel-major (C, N, OH, OW)."""
    C, N, H, W = x.shape
    kh, kw = kernel
    sh, sw = stride
    OH = (H - kh) // sh + 1
    OW = (W - kw) // sw + 1
    M = N * OH * OW
    Wn = kh * kw

    cols = [x[:, :, i:i + sh * OH:sh, j:j + sw * OW:sw]
            for i in range(kh) for j in range(kw)]
    p = jnp.stack(cols, axis=0).reshape(Wn, C, M)   # window dim leading

    affine = scale is not None
    args = [p]
    in_specs = [pl.BlockSpec((Wn, C, M), lambda i: (0, 0, 0))]
    if affine:
        args += [scale.reshape(C, 1), shift.reshape(C, 1)]
        in_specs += [pl.BlockSpec((C, 1), lambda i: (0, 0)),
                     pl.BlockSpec((C, 1), lambda i: (0, 0))]

    out = pl.pallas_call(
        functools.partial(_pool_kernel, inv_wn=1.0 / Wn, affine=affine, act=act),
        out_shape=jax.ShapeDtypeStruct((C, M), jnp.float32),
        grid=(1,),
        in_specs=in_specs,
        out_specs=pl.BlockSpec((C, M), lambda i: (0, 0)),
        compiler_params=pltpu.CompilerParams(dimension_semantics=("arbitrary",)),
    )(*args)

    return out.reshape(C, N, OH, OW)


# ------------------------------- parameters -------------------------------

def _conv_init(key, cout, cin, kh, kw):
    k1, k2 = jax.random.split(key)
    w = 0.1 * jax.random.normal(k1, (cout, cin, kh, kw), jnp.float32)
    b = 0.05 * jax.random.normal(k2, (cout,), jnp.float32)
    return w, b


def _bn_init(key, c):
    k1, k2, k3, k4 = jax.random.split(key, 4)
    gamma = 1.0 + 0.1 * jax.random.normal(k1, (c,), jnp.float32)
    beta = 0.1 * jax.random.normal(k2, (c,), jnp.float32)
    mean = 0.1 * jax.random.normal(k3, (c,), jnp.float32)
    var = 0.5 + jax.random.uniform(k4, (c,), jnp.float32)
    scale = gamma / jnp.sqrt(var + EPS)
    shift = beta - mean * scale
    return scale, shift


def init_params(key):
    keys = jax.random.split(key, 20)
    P = {"audio": {}, "frame": {}}
    # audio branch conv shapes: (3,1,5,5) (5,3,3,6) (8,5,3,3) (16,8,3,3) (32,16,3,3)
    a_conv = [(3, 1, 5, 5), (5, 3, 3, 6), (8, 5, 3, 3), (16, 8, 3, 3), (32, 16, 3, 3)]
    a_bn = [3, 5, 8, 16, 32]
    for n, (co, ci, kh, kw) in enumerate(a_conv):
        P["audio"][f"c{n}_w"], P["audio"][f"c{n}_b"] = _conv_init(keys[n], co, ci, kh, kw)
    for n, c in enumerate(a_bn):
        P["audio"][f"bn{n}_s"], P["audio"][f"bn{n}_t"] = _bn_init(keys[5 + n], c)
    # frame branch conv shapes: (3,3,7,7) (5,3,5,5) (8,5,2,2) (16,8,3,3) (32,16,3,3)
    f_conv = [(3, 3, 7, 7), (5, 3, 5, 5), (8, 5, 2, 2), (16, 8, 3, 3), (32, 16, 3, 3)]
    f_bn = [3, 5, 8, 16, 32]
    for n, (co, ci, kh, kw) in enumerate(f_conv):
        P["frame"][f"c{n}_w"], P["frame"][f"c{n}_b"] = _conv_init(keys[10 + n], co, ci, kh, kw)
    for n, c in enumerate(f_bn):
        P["frame"][f"bn{n}_s"], P["frame"][f"bn{n}_t"] = _bn_init(keys[15 + n], c)
    return P


# ------------------------------ branches ----------------------------------
# Both branches take and return CHANNEL-MAJOR activations (C, N, H, W).

def audio_branch(x, P):
    # Conv2d(1,3,5,(2,1),1)
    x = conv2d_cm(x, P["c0_w"], P["c0_b"], stride=(2, 1), padding=(1, 1), act=False)
    # AvgPool2d((3,5),2) -> BN(3) -> LeakyReLU
    x = avgpool2d_cm(x, kernel=(3, 5), stride=(2, 2),
                     scale=P["bn0_s"], shift=P["bn0_t"], act=True)
    # Conv2d(3,5,(3,6),2,1) -> BN(5)
    x = conv2d_cm(x, P["c1_w"], P["c1_b"], scale=P["bn1_s"], shift=P["bn1_t"],
                  stride=(2, 2), padding=(1, 1), act=False)
    # AvgPool2d(3,2) -> LeakyReLU
    x = avgpool2d_cm(x, kernel=(3, 3), stride=(2, 2), act=True)
    # Conv2d(5,8,3,1,1) -> BN(8)
    x = conv2d_cm(x, P["c2_w"], P["c2_b"], scale=P["bn2_s"], shift=P["bn2_t"],
                  stride=(1, 1), padding=(1, 1), act=False)
    # Conv2d(8,16,3,1,1) -> BN(16)
    x = conv2d_cm(x, P["c3_w"], P["c3_b"], scale=P["bn3_s"], shift=P["bn3_t"],
                  stride=(1, 1), padding=(1, 1), act=False)
    # Conv2d(16,32,3,1,1)
    x = conv2d_cm(x, P["c4_w"], P["c4_b"], stride=(1, 1), padding=(1, 1), act=False)
    # AvgPool2d((4,5),1) -> BN(32) -> LeakyReLU
    x = avgpool2d_cm(x, kernel=(4, 5), stride=(1, 1),
                     scale=P["bn4_s"], shift=P["bn4_t"], act=True)
    return x


def frame_branch(x, P):
    # Conv2d(3,3,7,2,3)
    x = conv2d_cm(x, P["c0_w"], P["c0_b"], stride=(2, 2), padding=(3, 3), act=False)
    # AvgPool2d(2,2) -> BN(3) -> LeakyReLU
    x = avgpool2d_cm(x, kernel=(2, 2), stride=(2, 2),
                     scale=P["bn0_s"], shift=P["bn0_t"], act=True)
    # Conv2d(3,5,5,2,2)
    x = conv2d_cm(x, P["c1_w"], P["c1_b"], stride=(2, 2), padding=(2, 2), act=False)
    # AvgPool2d(2,2) -> BN(5) -> LeakyReLU
    x = avgpool2d_cm(x, kernel=(2, 2), stride=(2, 2),
                     scale=P["bn1_s"], shift=P["bn1_t"], act=True)
    # Conv2d(5,8,2,1,4) -> BN(8) -> LeakyReLU   (k=2, pad=4 is legal; floor formula holds)
    x = conv2d_cm(x, P["c2_w"], P["c2_b"], scale=P["bn2_s"], shift=P["bn2_t"],
                  stride=(1, 1), padding=(4, 4), act=True)
    # Conv2d(8,16,3,1,1) -> BN(16)
    x = conv2d_cm(x, P["c3_w"], P["c3_b"], scale=P["bn3_s"], shift=P["bn3_t"],
                  stride=(1, 1), padding=(1, 1), act=False)
    # Conv2d(16,32,3,1,1) -> BN(32)
    x = conv2d_cm(x, P["c4_w"], P["c4_b"], scale=P["bn4_s"], shift=P["bn4_t"],
                  stride=(1, 1), padding=(1, 1), act=False)
    # AvgPool2d(2,2) -> LeakyReLU
    x = avgpool2d_cm(x, kernel=(2, 2), stride=(2, 2), act=True)
    return x


@jax.jit
def feature_extractor_forward(f1, v1, v2, params):
    # Batch the two audio inputs into one pass (halves audio-path launches).
    n = v1.shape[0]
    va = jnp.concatenate([v1, v2], axis=0)            # (2N, 1, H, W)
    va_cm = jnp.transpose(va, (1, 0, 2, 3))           # channel-major at boundary only
    a_out = audio_branch(va_cm, params["audio"])      # (32, 2N, oh, ow)
    a_out = jnp.transpose(a_out, (1, 0, 2, 3))        # back to NCHW
    v1_out, v2_out = a_out[:n], a_out[n:]

    f_cm = jnp.transpose(f1, (1, 0, 2, 3))
    f_out = frame_branch(f_cm, params["frame"])
    f1_out = jnp.transpose(f_out, (1, 0, 2, 3))
    return f1_out, v1_out, v2_out


# --------------------------------- main ------------------------------------

if __name__ == "__main__":
    key = jax.random.PRNGKey(0)
    kp, kf, ka1, ka2 = jax.random.split(key, 4)
    params = init_params(kp)

    # f1: video frames NCHW, v1/v2: single-channel spectrogram-like inputs.
    f1 = jax.random.normal(kf, (2, 3, 64, 64), jnp.float32)
    v1 = jax.random.normal(ka1, (2, 1, 80, 64), jnp.float32)
    v2 = jax.random.normal(ka2, (2, 1, 80, 64), jnp.float32)

    f1_out, v1_out, v2_out = feature_extractor_forward(f1, v1, v2, params)
    jax.block_until_ready((f1_out, v1_out, v2_out))

    assert f1_out.shape == (2, 32, 5, 5), f1_out.shape
    assert v1_out.shape == (2, 32, 1, 2), v1_out.shape
    assert v2_out.shape == (2, 32, 1, 2), v2_out.shape
    print("KERNEL_OK")
</pallas_src>

<mosaic_0001>
module attributes {stable_mosaic.version = 11 : i64} {
  func.func @_conv_kernel(%arg0: i32, %arg1: memref<147x2048xf32, #tpu.memory_space<vmem>>, %arg2: memref<3x147xf32, #tpu.memory_space<vmem>>, %arg3: memref<3x1xf32, #tpu.memory_space<vmem>>, %arg4: memref<3x2048xf32, #tpu.memory_space<vmem>>) attributes {dimension_semantics = [#tpu.dimension_semantics<arbitrary>], iteration_bounds = array<i64: 1>, scalar_prefetch = 0 : i64, scratch_operands = 0 : i64, tpu.core_type = #tpu.core_type<tc>, window_params = [{pipeline_mode = #tpu.pipeline_mode<synchronous>, transform_indices = @transform_0, window_bounds = array<i64: 147, 2048>}, {pipeline_mode = #tpu.pipeline_mode<synchronous>, transform_indices = @transform_1, window_bounds = array<i64: 3, 147>}, {pipeline_mode = #tpu.pipeline_mode<synchronous>, transform_indices = @transform_2, window_bounds = array<i64: 3, 1>}, {pipeline_mode = #tpu.pipeline_mode<synchronous>, transform_indices = @transform_3, window_bounds = array<i64: 3, 2048>}]} {
    %c0 = arith.constant 0 : index
    %c0_0 = arith.constant 0 : index
    %0 = vector.load %arg2[%c0, %c0_0] : memref<3x147xf32, #tpu.memory_space<vmem>>, vector<3x147xf32>
    %c0_1 = arith.constant 0 : index
    %c0_2 = arith.constant 0 : index
    %1 = vector.load %arg1[%c0_1, %c0_2] : memref<147x2048xf32, #tpu.memory_space<vmem>>, vector<147x2048xf32>
    %cst = arith.constant dense<0.000000e+00> : vector<3x2048xf32>
    %2 = tpu.matmul %0, %1, %cst {dimension_numbers = #tpu.dot_dimension_numbers<[1], [0], [0], [1], [0, 0, 1, 1], [], []>} : vector<3x147xf32>, vector<147x2048xf32>, vector<3x2048xf32> -> vector<3x2048xf32>
    %c0_3 = arith.constant 0 : index
    %c0_4 = arith.constant 0 : index
    %3 = vector.load %arg3[%c0_3, %c0_4] : memref<3x1xf32, #tpu.memory_space<vmem>>, vector<3x1xf32>
    %4 = vector.broadcast %3 : vector<3x1xf32> to vector<3x2048xf32>
    %5 = arith.addf %2, %4 : vector<3x2048xf32>
    %c0_5 = arith.constant 0 : index
    %c0_6 = arith.constant 0 : index
    %6 = vector.load %arg4[%c0_5, %c0_6] : memref<3x2048xf32, #tpu.memory_space<vmem>>, vector<3x2048xf32>
    tpu.vector_store %arg4[%c0_5, %c0_6], %5 {strides = array<i32>} : memref<3x2048xf32, #tpu.memory_space<vmem>>, vector<3x2048xf32>,
    return
  }
  func.func @transform_0(%arg0: i32) -> (i32, i32) {
    %c0_i32 = arith.constant 0 : i32
    %c0_i32_0 = arith.constant 0 : i32
    %c0_i32_1 = arith.constant 0 : i32
    return %c0_i32, %c0_i32_0 : i32, i32
  }
  func.func @transform_1(%arg0: i32) -> (i32, i32) {
    %c0_i32 = arith.constant 0 : i32
    %c0_i32_0 = arith.constant 0 : i32
    %c0_i32_1 = arith.constant 0 : i32
    return %c0_i32, %c0_i32_0 : i32, i32
  }
  func.func @transform_2(%arg0: i32) -> (i32, i32) {
    %c0_i32 = arith.constant 0 : i32
    %c0_i32_0 = arith.constant 0 : i32
    %c0_i32_1 = arith.constant 0 : i32
    return %c0_i32, %c0_i32_0 : i32, i32
  }
  func.func @transform_3(%arg0: i32) -> (i32, i32) {
    %c0_i32 = arith.constant 0 : i32
    %c0_i32_0 = arith.constant 0 : i32
    %c0_i32_1 = arith.constant 0 : i32
    return %c0_i32, %c0_i32_0 : i32, i32
  }
}

module attributes {stable_mosaic.version = 11 : i64} {
  func.func @_pool_kernel(%arg0: i32, %arg1: memref<4x3x512xf32, #tpu.memory_space<vmem>>, %arg2: memref<3x1xf32, #tpu.memory_space<vmem>>, %arg3: memref<3x1xf32, #tpu.memory_space<vmem>>, %arg4: memref<3x512xf32, #tpu.memory_space<vmem>>) attributes {dimension_semantics = [#tpu.dimension_semantics<arbitrary>], iteration_bounds = array<i64: 1>, scalar_prefetch = 0 : i64, scratch_operands = 0 : i64, tpu.core_type = #tpu.core_type<tc>, window_params = [{pipeline_mode = #tpu.pipeline_mode<synchronous>, transform_indices = @transform_0, window_bounds = array<i64: 4, 3, 512>}, {pipeline_mode = #tpu.pipeline_mode<synchronous>, transform_indices = @transform_1, window_bounds = array<i64: 3, 1>}, {pipeline_mode = #tpu.pipeline_mode<synchronous>, transform_indices = @transform_2, window_bounds = array<i64: 3, 1>}, {pipeline_mode = #tpu.pipeline_mode<synchronous>, transform_indices = @transform_3, window_bounds = array<i64: 3, 512>}]} {
    %c0 = arith.constant 0 : index
    %c0_0 = arith.constant 0 : index
    %c0_1 = arith.constant 0 : index
    %0 = vector.load %arg1[%c0, %c0_0, %c0_1] : memref<4x3x512xf32, #tpu.memory_space<vmem>>, vector<4x3x512xf32>
    %cst = arith.constant dense<0.000000e+00> : vector<3x512xf32>
    %1 = vector.multi_reduction <add>, %0, %cst [0] : vector<4x3x512xf32> to vector<3x512xf32>
    %cst_2 = arith.constant 2.500000e-01 : f32
    %2 = vector.broadcast %cst_2 : f32 to vector<3x512xf32>
    %3 = arith.mulf %1, %2 : vector<3x512xf32>
    %c0_3 = arith.constant 0 : index
    %c0_4 = arith.constant 0 : index
    %4 = vector.load %arg2[%c0_3, %c0_4] : memref<3x1xf32, #tpu.memory_space<vmem>>, vector<3x1xf32>
    %5 = vector.broadcast %4 : vector<3x1xf32> to vector<3x512xf32>
    %6 = arith.mulf %3, %5 : vector<3x512xf32>
    %c0_5 = arith.constant 0 : index
    %c0_6 = arith.constant 0 : index
    %7 = vector.load %arg3[%c0_5, %c0_6] : memref<3x1xf32, #tpu.memory_space<vmem>>, vector<3x1xf32>
    %8 = vector.broadcast %7 : vector<3x1xf32> to vector<3x512xf32>
    %9 = arith.addf %6, %8 : vector<3x512xf32>
    %cst_7 = arith.constant 0.000000e+00 : f32
    %10 = vector.broadcast %cst_7 : f32 to vector<3x512xf32>
    %11 = arith.cmpf ogt, %9, %10 : vector<3x512xf32>
    %cst_8 = arith.constant 2.000000e-01 : f32
    %12 = vector.broadcast %cst_8 : f32 to vector<3x512xf32>
    %13 = arith.mulf %12, %9 : vector<3x512xf32>
    %14 = arith.select %11, %9, %13 : vector<3x512xi1>, vector<3x512xf32>
    %c0_9 = arith.constant 0 : index
    %c0_10 = arith.constant 0 : index
    %15 = vector.load %arg4[%c0_9, %c0_10] : memref<3x512xf32, #tpu.memory_space<vmem>>, vector<3x512xf32>
    tpu.vector_store %arg4[%c0_9, %c0_10], %14 {strides = array<i32>} : memref<3x512xf32, #tpu.memory_space<vmem>>, vector<3x512xf32>,
    return
  }
  func.func @transform_0(%arg0: i32) -> (i32, i32, i32) {
    %c0_i32 = arith.constant 0 : i32
    %c0_i32_0 = arith.constant 0 : i32
    %c0_i32_1 = arith.constant 0 : i32
    %c0_i32_2 = arith.constant 0 : i32
    return %c0_i32, %c0_i32_0, %c0_i32_1 : i32, i32, i32
  }
  func.func @transform_1(%arg0: i32) -> (i32, i32) {
    %c0_i32 = arith.constant 0 : i32
    %c0_i32_0 = arith.constant 0 : i32
    %c0_i32_1 = arith.constant 0 : i32
    return %c0_i32, %c0_i32_0 : i32, i32
  }
  func.func @transform_2(%arg0: i32) -> (i32, i32) {
    %c0_i32 = arith.constant 0 : i32
    %c0_i32_0 = arith.constant 0 : i32
    %c0_i32_1 = arith.constant 0 : i32
    return %c0_i32, %c0_i32_0 : i32, i32
  }
  func.func @transform_3(%arg0: i32) -> (i32, i32) {
    %c0_i32 = arith.constant 0 : i32
    %c0_i32_0 = arith.constant 0 : i32
    %c0_i32_1 = arith.constant 0 : i32
    return %c0_i32, %c0_i32_0 : i32, i32
  }
}

module attributes {stable_mosaic.version = 11 : i64} {
  func.func @_conv_kernel(%arg0: i32, %arg1: memref<75x128xf32, #tpu.memory_space<vmem>>, %arg2: memref<5x75xf32, #tpu.memory_space<vmem>>, %arg3: memref<5x1xf32, #tpu.memory_space<vmem>>, %arg4: memref<5x128xf32, #tpu.memory_space<vmem>>) attributes {dimension_semantics = [#tpu.dimension_semantics<arbitrary>], iteration_bounds = array<i64: 1>, scalar_prefetch = 0 : i64, scratch_operands = 0 : i64, tpu.core_type = #tpu.core_type<tc>, window_params = [{pipeline_mode = #tpu.pipeline_mode<synchronous>, transform_indices = @transform_0, window_bounds = array<i64: 75, 128>}, {pipeline_mode = #tpu.pipeline_mode<synchronous>, transform_indices = @transform_1, window_bounds = array<i64: 5, 75>}, {pipeline_mode = #tpu.pipeline_mode<synchronous>, transform_indices = @transform_2, window_bounds = array<i64: 5, 1>}, {pipeline_mode = #tpu.pipeline_mode<synchronous>, transform_indices = @transform_3, window_bounds = array<i64: 5, 128>}]} {
    %c0 = arith.constant 0 : index
    %c0_0 = arith.constant 0 : index
    %0 = vector.load %arg2[%c0, %c0_0] : memref<5x75xf32, #tpu.memory_space<vmem>>, vector<5x75xf32>
    %c0_1 = arith.constant 0 : index
    %c0_2 = arith.constant 0 : index
    %1 = vector.load %arg1[%c0_1, %c0_2] : memref<75x128xf32, #tpu.memory_space<vmem>>, vector<75x128xf32>
    %cst = arith.constant dense<0.000000e+00> : vector<5x128xf32>
    %2 = tpu.matmul %0, %1, %cst {dimension_numbers = #tpu.dot_dimension_numbers<[1], [0], [0], [1], [0, 0, 1, 1], [], []>} : vector<5x75xf32>, vector<75x128xf32>, vector<5x128xf32> -> vector<5x128xf32>
    %c0_3 = arith.constant 0 : index
    %c0_4 = arith.constant 0 : index
    %3 = vector.load %arg3[%c0_3, %c0_4] : memref<5x1xf32, #tpu.memory_space<vmem>>, vector<5x1xf32>
    %4 = vector.broadcast %3 : vector<5x1xf32> to vector<5x128xf32>
    %5 = arith.addf %2, %4 : vector<5x128xf32>
    %c0_5 = arith.constant 0 : index
    %c0_6 = arith.constant 0 : index
    %6 = vector.load %arg4[%c0_5, %c0_6] : memref<5x128xf32, #tpu.memory_space<vmem>>, vector<5x128xf32>
    tpu.vector_store %arg4[%c0_5, %c0_6], %5 {strides = array<i32>} : memref<5x128xf32, #tpu.memory_space<vmem>>, vector<5x128xf32>,
    return
  }
  func.func @transform_0(%arg0: i32) -> (i32, i32) {
    %c0_i32 = arith.constant 0 : i32
    %c0_i32_0 = arith.constant 0 : i32
    %c0_i32_1 = arith.constant 0 : i32
    return %c0_i32, %c0_i32_0 : i32, i32
  }
  func.func @transform_1(%arg0: i32) -> (i32, i32) {
    %c0_i32 = arith.constant 0 : i32
    %c0_i32_0 = arith.constant 0 : i32
    %c0_i32_1 = arith.constant 0 : i32
    return %c0_i32, %c0_i32_0 : i32, i32
  }
  func.func @transform_2(%arg0: i32) -> (i32, i32) {
    %c0_i32 = arith.constant 0 : i32
    %c0_i32_0 = arith.constant 0 : i32
    %c0_i32_1 = arith.constant 0 : i32
    return %c0_i32, %c0_i32_0 : i32, i32
  }
  func.func @transform_3(%arg0: i32) -> (i32, i32) {
    %c0_i32 = arith.constant 0 : i32
    %c0_i32_0 = arith.constant 0 : i32
    %c0_i32_1 = arith.constant 0 : i32
    return %c0_i32, %c0_i32_0 : i32, i32
  }
}

module attributes {stable_mosaic.version = 11 : i64} {
  func.func @_pool_kernel(%arg0: i32, %arg1: memref<4x5x32xf32, #tpu.memory_space<vmem>>, %arg2: memref<5x1xf32, #tpu.memory_space<vmem>>, %arg3: memref<5x1xf32, #tpu.memory_space<vmem>>, %arg4: memref<5x32xf32, #tpu.memory_space<vmem>>) attributes {dimension_semantics = [#tpu.dimension_semantics<arbitrary>], iteration_bounds = array<i64: 1>, scalar_prefetch = 0 : i64, scratch_operands = 0 : i64, tpu.core_type = #tpu.core_type<tc>, window_params = [{pipeline_mode = #tpu.pipeline_mode<synchronous>, transform_indices = @transform_0, window_bounds = array<i64: 4, 5, 32>}, {pipeline_mode = #tpu.pipeline_mode<synchronous>, transform_indices = @transform_1, window_bounds = array<i64: 5, 1>}, {pipeline_mode = #tpu.pipeline_mode<synchronous>, transform_indices = @transform_2, window_bounds = array<i64: 5, 1>}, {pipeline_mode = #tpu.pipeline_mode<synchronous>, transform_indices = @transform_3, window_bounds = array<i64: 5, 32>}]} {
    %c0 = arith.constant 0 : index
    %c0_0 = arith.constant 0 : index
    %c0_1 = arith.constant 0 : index
    %0 = vector.load %arg1[%c0, %c0_0, %c0_1] : memref<4x5x32xf32, #tpu.memory_space<vmem>>, vector<4x5x32xf32>
    %cst = arith.constant dense<0.000000e+00> : vector<5x32xf32>
    %1 = vector.multi_reduction <add>, %0, %cst [0] : vector<4x5x32xf32> to vector<5x32xf32>
    %cst_2 = arith.constant 2.500000e-01 : f32
    %2 = vector.broadcast %cst_2 : f32 to vector<5x32xf32>
    %3 = arith.mulf %1, %2 : vector<5x32xf32>
    %c0_3 = arith.constant 0 : index
    %c0_4 = arith.constant 0 : index
    %4 = vector.load %arg2[%c0_3, %c0_4] : memref<5x1xf32, #tpu.memory_space<vmem>>, vector<5x1xf32>
    %5 = vector.broadcast %4 : vector<5x1xf32> to vector<5x32xf32>
    %6 = arith.mulf %3, %5 : vector<5x32xf32>
    %c0_5 = arith.constant 0 : index
    %c0_6 = arith.constant 0 : index
    %7 = vector.load %arg3[%c0_5, %c0_6] : memref<5x1xf32, #tpu.memory_space<vmem>>, vector<5x1xf32>
    %8 = vector.broadcast %7 : vector<5x1xf32> to vector<5x32xf32>
    %9 = arith.addf %6, %8 : vector<5x32xf32>
    %cst_7 = arith.constant 0.000000e+00 : f32
    %10 = vector.broadcast %cst_7 : f32 to vector<5x32xf32>
    %11 = arith.cmpf ogt, %9, %10 : vector<5x32xf32>
    %cst_8 = arith.constant 2.000000e-01 : f32
    %12 = vector.broadcast %cst_8 : f32 to vector<5x32xf32>
    %13 = arith.mulf %12, %9 : vector<5x32xf32>
    %14 = arith.select %11, %9, %13 : vector<5x32xi1>, vector<5x32xf32>
    %c0_9 = arith.constant 0 : index
    %c0_10 = arith.constant 0 : index
    %15 = vector.load %arg4[%c0_9, %c0_10] : memref<5x32xf32, #tpu.memory_space<vmem>>, vector<5x32xf32>
    tpu.vector_store %arg4[%c0_9, %c0_10], %14 {strides = array<i32>} : memref<5x32xf32, #tpu.memory_space<vmem>>, vector<5x32xf32>,
    return
  }
  func.func @transform_0(%arg0: i32) -> (i32, i32, i32) {
    %c0_i32 = arith.constant 0 : i32
    %c0_i32_0 = arith.constant 0 : i32
    %c0_i32_1 = arith.constant 0 : i32
    %c0_i32_2 = arith.constant 0 : i32
    return %c0_i32, %c0_i32_0, %c0_i32_1 : i32, i32, i32
  }
  func.func @transform_1(%arg0: i32) -> (i32, i32) {
    %c0_i32 = arith.constant 0 : i32
    %c0_i32_0 = arith.constant 0 : i32
    %c0_i32_1 = arith.constant 0 : i32
    return %c0_i32, %c0_i32_0 : i32, i32
  }
  func.func @transform_2(%arg0: i32) -> (i32, i32) {
    %c0_i32 = arith.constant 0 : i32
    %c0_i32_0 = arith.constant 0 : i32
    %c0_i32_1 = arith.constant 0 : i32
    return %c0_i32, %c0_i32_0 : i32, i32
  }
  func.func @transform_3(%arg0: i32) -> (i32, i32) {
    %c0_i32 = arith.constant 0 : i32
    %c0_i32_0 = arith.constant 0 : i32
    %c0_i32_1 = arith.constant 0 : i32
    return %c0_i32, %c0_i32_0 : i32, i32
  }
}

module attributes {stable_mosaic.version = 11 : i64} {
  func.func @_conv_kernel(%arg0: i32, %arg1: memref<20x242xf32, #tpu.memory_space<vmem>>, %arg2: memref<8x20xf32, #tpu.memory_space<vmem>>, %arg3: memref<8x1xf32, #tpu.memory_space<vmem>>, %arg4: memref<8x242xf32, #tpu.memory_space<vmem>>) attributes {dimension_semantics = [#tpu.dimension_semantics<arbitrary>], iteration_bounds = array<i64: 1>, scalar_prefetch = 0 : i64, scratch_operands = 0 : i64, tpu.core_type = #tpu.core_type<tc>, window_params = [{pipeline_mode = #tpu.pipeline_mode<synchronous>, transform_indices = @transform_0, window_bounds = array<i64: 20, 242>}, {pipeline_mode = #tpu.pipeline_mode<synchronous>, transform_indices = @transform_1, window_bounds = array<i64: 8, 20>}, {pipeline_mode = #tpu.pipeline_mode<synchronous>, transform_indices = @transform_2, window_bounds = array<i64: 8, 1>}, {pipeline_mode = #tpu.pipeline_mode<synchronous>, transform_indices = @transform_3, window_bounds = array<i64: 8, 242>}]} {
    %c0 = arith.constant 0 : index
    %c0_0 = arith.constant 0 : index
    %0 = vector.load %arg2[%c0, %c0_0] : memref<8x20xf32, #tpu.memory_space<vmem>>, vector<8x20xf32>
    %c0_1 = arith.constant 0 : index
    %c0_2 = arith.constant 0 : index
    %1 = vector.load %arg1[%c0_1, %c0_2] : memref<20x242xf32, #tpu.memory_space<vmem>>, vector<20x242xf32>
    %cst = arith.constant dense<0.000000e+00> : vector<8x242xf32>
    %2 = tpu.matmul %0, %1, %cst {dimension_numbers = #tpu.dot_dimension_numbers<[1], [0], [0], [1], [0, 0, 1, 1], [], []>} : vector<8x20xf32>, vector<20x242xf32>, vector<8x242xf32> -> vector<8x242xf32>
    %c0_3 = arith.constant 0 : index
    %c0_4 = arith.constant 0 : index
    %3 = vector.load %arg3[%c0_3, %c0_4] : memref<8x1xf32, #tpu.memory_space<vmem>>, vector<8x1xf32>
    %4 = vector.broadcast %3 : vector<8x1xf32> to vector<8x242xf32>
    %5 = arith.addf %2, %4 : vector<8x242xf32>
    %cst_5 = arith.constant 0.000000e+00 : f32
    %6 = vector.broadcast %cst_5 : f32 to vector<8x242xf32>
    %7 = arith.cmpf ogt, %5, %6 : vector<8x242xf32>
    %cst_6 = arith.constant 2.000000e-01 : f32
    %8 = vector.broadcast %cst_6 : f32 to vector<8x242xf32>
    %9 = arith.mulf %8, %5 : vector<8x242xf32>
    %10 = arith.select %7, %5, %9 : vector<8x242xi1>, vector<8x242xf32>
    %c0_7 = arith.constant 0 : index
    %c0_8 = arith.constant 0 : index
    %11 = vector.load %arg4[%c0_7, %c0_8] : memref<8x242xf32, #tpu.memory_space<vmem>>, vector<8x242xf32>
    tpu.vector_store %arg4[%c0_7, %c0_8], %10 {strides = array<i32>} : memref<8x242xf32, #tpu.memory_space<vmem>>, vector<8x242xf32>,
    return
  }
  func.func @transform_0(%arg0: i32) -> (i32, i32) {
    %c0_i32 = arith.constant 0 : i32
    %c0_i32_0 = arith.constant 0 : i32
    %c0_i32_1 = arith.constant 0 : i32
    return %c0_i32, %c0_i32_0 : i32, i32
  }
  func.func @transform_1(%arg0: i32) -> (i32, i32) {
    %c0_i32 = arith.constant 0 : i32
    %c0_i32_0 = arith.constant 0 : i32
    %c0_i32_1 = arith.constant 0 : i32
    return %c0_i32, %c0_i32_0 : i32, i32
  }
  func.func @transform_2(%arg0: i32) -> (i32, i32) {
    %c0_i32 = arith.constant 0 : i32
    %c0_i32_0 = arith.constant 0 : i32
    %c0_i32_1 = arith.constant 0 : i32
    return %c0_i32, %c0_i32_0 : i32, i32
  }
  func.func @transform_3(%arg0: i32) -> (i32, i32) {
    %c0_i32 = arith.constant 0 : i32
    %c0_i32_0 = arith.constant 0 : i32
    %c0_i32_1 = arith.constant 0 : i32
    return %c0_i32, %c0_i32_0 : i32, i32
  }
}

module attributes {stable_mosaic.version = 11 : i64} {
  func.func @_conv_kernel(%arg0: i32, %arg1: memref<72x242xf32, #tpu.memory_space<vmem>>, %arg2: memref<16x72xf32, #tpu.memory_space<vmem>>, %arg3: memref<16x1xf32, #tpu.memory_space<vmem>>, %arg4: memref<16x242xf32, #tpu.memory_space<vmem>>) attributes {dimension_semantics = [#tpu.dimension_semantics<arbitrary>], iteration_bounds = array<i64: 1>, scalar_prefetch = 0 : i64, scratch_operands = 0 : i64, tpu.core_type = #tpu.core_type<tc>, window_params = [{pipeline_mode = #tpu.pipeline_mode<synchronous>, transform_indices = @transform_0, window_bounds = array<i64: 72, 242>}, {pipeline_mode = #tpu.pipeline_mode<synchronous>, transform_indices = @transform_1, window_bounds = array<i64: 16, 72>}, {pipeline_mode = #tpu.pipeline_mode<synchronous>, transform_indices = @transform_2, window_bounds = array<i64: 16, 1>}, {pipeline_mode = #tpu.pipeline_mode<synchronous>, transform_indices = @transform_3, window_bounds = array<i64: 16, 242>}]} {
    %c0 = arith.constant 0 : index
    %c0_0 = arith.constant 0 : index
    %0 = vector.load %arg2[%c0, %c0_0] : memref<16x72xf32, #tpu.memory_space<vmem>>, vector<16x72xf32>
    %c0_1 = arith.constant 0 : index
    %c0_2 = arith.constant 0 : index
    %1 = vector.load %arg1[%c0_1, %c0_2] : memref<72x242xf32, #tpu.memory_space<vmem>>, vector<72x242xf32>
    %cst = arith.constant dense<0.000000e+00> : vector<16x242xf32>
    %2 = tpu.matmul %0, %1, %cst {dimension_numbers = #tpu.dot_dimension_numbers<[1], [0], [0], [1], [0, 0, 1, 1], [], []>} : vector<16x72xf32>, vector<72x242xf32>, vector<16x242xf32> -> vector<16x242xf32>
    %c0_3 = arith.constant 0 : index
    %c0_4 = arith.constant 0 : index
    %3 = vector.load %arg3[%c0_3, %c0_4] : memref<16x1xf32, #tpu.memory_space<vmem>>, vector<16x1xf32>
    %4 = vector.broadcast %3 : vector<16x1xf32> to vector<16x242xf32>
    %5 = arith.addf %2, %4 : vector<16x242xf32>
    %c0_5 = arith.constant 0 : index
    %c0_6 = arith.constant 0 : index
    %6 = vector.load %arg4[%c0_5, %c0_6] : memref<16x242xf32, #tpu.memory_space<vmem>>, vector<16x242xf32>
    tpu.vector_store %arg4[%c0_5, %c0_6], %5 {strides = array<i32>} : memref<16x242xf32, #tpu.memory_space<vmem>>, vector<16x242xf32>,
    return
  }
  func.func @transform_0(%arg0: i32) -> (i32, i32) {
    %c0_i32 = arith.constant 0 : i32
    %c0_i32_0 = arith.constant 0 : i32
    %c0_i32_1 = arith.constant 0 : i32
    return %c0_i32, %c0_i32_0 : i32, i32
  }
  func.func @transform_1(%arg0: i32) -> (i32, i32) {
    %c0_i32 = arith.constant 0 : i32
    %c0_i32_0 = arith.constant 0 : i32
    %c0_i32_1 = arith.constant 0 : i32
    return %c0_i32, %c0_i32_0 : i32, i32
  }
  func.func @transform_2(%arg0: i32) -> (i32, i32) {
    %c0_i32 = arith.constant 0 : i32
    %c0_i32_0 = arith.constant 0 : i32
    %c0_i32_1 = arith.constant 0 : i32
    return %c0_i32, %c0_i32_0 : i32, i32
  }
  func.func @transform_3(%arg0: i32) -> (i32, i32) {
    %c0_i32 = arith.constant 0 : i32
    %c0_i32_0 = arith.constant 0 : i32
    %c0_i32_1 = arith.constant 0 : i32
    return %c0_i32, %c0_i32_0 : i32, i32
  }
}

module attributes {stable_mosaic.version = 11 : i64} {
  func.func @_conv_kernel(%arg0: i32, %arg1: memref<144x242xf32, #tpu.memory_space<vmem>>, %arg2: memref<32x144xf32, #tpu.memory_space<vmem>>, %arg3: memref<32x1xf32, #tpu.memory_space<vmem>>, %arg4: memref<32x242xf32, #tpu.memory_space<vmem>>) attributes {dimension_semantics = [#tpu.dimension_semantics<arbitrary>], iteration_bounds = array<i64: 1>, scalar_prefetch = 0 : i64, scratch_operands = 0 : i64, tpu.core_type = #tpu.core_type<tc>, window_params = [{pipeline_mode = #tpu.pipeline_mode<synchronous>, transform_indices = @transform_0, window_bounds = array<i64: 144, 242>}, {pipeline_mode = #tpu.pipeline_mode<synchronous>, transform_indices = @transform_1, window_bounds = array<i64: 32, 144>}, {pipeline_mode = #tpu.pipeline_mode<synchronous>, transform_indices = @transform_2, window_bounds = array<i64: 32, 1>}, {pipeline_mode = #tpu.pipeline_mode<synchronous>, transform_indices = @transform_3, window_bounds = array<i64: 32, 242>}]} {
    %c0 = arith.constant 0 : index
    %c0_0 = arith.constant 0 : index
    %0 = vector.load %arg2[%c0, %c0_0] : memref<32x144xf32, #tpu.memory_space<vmem>>, vector<32x144xf32>
    %c0_1 = arith.constant 0 : index
    %c0_2 = arith.constant 0 : index
    %1 = vector.load %arg1[%c0_1, %c0_2] : memref<144x242xf32, #tpu.memory_space<vmem>>, vector<144x242xf32>
    %cst = arith.constant dense<0.000000e+00> : vector<32x242xf32>
    %2 = tpu.matmul %0, %1, %cst {dimension_numbers = #tpu.dot_dimension_numbers<[1], [0], [0], [1], [0, 0, 1, 1], [], []>} : vector<32x144xf32>, vector<144x242xf32>, vector<32x242xf32> -> vector<32x242xf32>
    %c0_3 = arith.constant 0 : index
    %c0_4 = arith.constant 0 : index
    %3 = vector.load %arg3[%c0_3, %c0_4] : memref<32x1xf32, #tpu.memory_space<vmem>>, vector<32x1xf32>
    %4 = vector.broadcast %3 : vector<32x1xf32> to vector<32x242xf32>
    %5 = arith.addf %2, %4 : vector<32x242xf32>
    %c0_5 = arith.constant 0 : index
    %c0_6 = arith.constant 0 : index
    %6 = vector.load %arg4[%c0_5, %c0_6] : memref<32x242xf32, #tpu.memory_space<vmem>>, vector<32x242xf32>
    tpu.vector_store %arg4[%c0_5, %c0_6], %5 {strides = array<i32>} : memref<32x242xf32, #tpu.memory_space<vmem>>, vector<32x242xf32>,
    return
  }
  func.func @transform_0(%arg0: i32) -> (i32, i32) {
    %c0_i32 = arith.constant 0 : i32
    %c0_i32_0 = arith.constant 0 : i32
    %c0_i32_1 = arith.constant 0 : i32
    return %c0_i32, %c0_i32_0 : i32, i32
  }
  func.func @transform_1(%arg0: i32) -> (i32, i32) {
    %c0_i32 = arith.constant 0 : i32
    %c0_i32_0 = arith.constant 0 : i32
    %c0_i32_1 = arith.constant 0 : i32
    return %c0_i32, %c0_i32_0 : i32, i32
  }
  func.func @transform_2(%arg0: i32) -> (i32, i32) {
    %c0_i32 = arith.constant 0 : i32
    %c0_i32_0 = arith.constant 0 : i32
    %c0_i32_1 = arith.constant 0 : i32
    return %c0_i32, %c0_i32_0 : i32, i32
  }
  func.func @transform_3(%arg0: i32) -> (i32, i32) {
    %c0_i32 = arith.constant 0 : i32
    %c0_i32_0 = arith.constant 0 : i32
    %c0_i32_1 = arith.constant 0 : i32
    return %c0_i32, %c0_i32_0 : i32, i32
  }
}

module attributes {stable_mosaic.version = 11 : i64} {
  func.func @_pool_kernel(%arg0: i32, %arg1: memref<4x32x50xf32, #tpu.memory_space<vmem>>, %arg2: memref<32x50xf32, #tpu.memory_space<vmem>>) attributes {dimension_semantics = [#tpu.dimension_semantics<arbitrary>], iteration_bounds = array<i64: 1>, scalar_prefetch = 0 : i64, scratch_operands = 0 : i64, tpu.core_type = #tpu.core_type<tc>, window_params = [{pipeline_mode = #tpu.pipeline_mode<synchronous>, transform_indices = @transform_0, window_bounds = array<i64: 4, 32, 50>}, {pipeline_mode = #tpu.pipeline_mode<synchronous>, transform_indices = @transform_1, window_bounds = array<i64: 32, 50>}]} {
    %c0 = arith.constant 0 : index
    %c0_0 = arith.constant 0 : index
    %c0_1 = arith.constant 0 : index
    %0 = vector.load %arg1[%c0, %c0_0, %c0_1] : memref<4x32x50xf32, #tpu.memory_space<vmem>>, vector<4x32x50xf32>
    %cst = arith.constant dense<0.000000e+00> : vector<32x50xf32>
    %1 = vector.multi_reduction <add>, %0, %cst [0] : vector<4x32x50xf32> to vector<32x50xf32>
    %cst_2 = arith.constant 2.500000e-01 : f32
    %2 = vector.broadcast %cst_2 : f32 to vector<32x50xf32>
    %3 = arith.mulf %1, %2 : vector<32x50xf32>
    %cst_3 = arith.constant 0.000000e+00 : f32
    %4 = vector.broadcast %cst_3 : f32 to vector<32x50xf32>
    %5 = arith.cmpf ogt, %3, %4 : vector<32x50xf32>
    %cst_4 = arith.constant 2.000000e-01 : f32
    %6 = vector.broadcast %cst_4 : f32 to vector<32x50xf32>
    %7 = arith.mulf %6, %3 : vector<32x50xf32>
    %8 = arith.select %5, %3, %7 : vector<32x50xi1>, vector<32x50xf32>
    %c0_5 = arith.constant 0 : index
    %c0_6 = arith.constant 0 : index
    %9 = vector.load %arg2[%c0_5, %c0_6] : memref<32x50xf32, #tpu.memory_space<vmem>>, vector<32x50xf32>
    tpu.vector_store %arg2[%c0_5, %c0_6], %8 {strides = array<i32>} : memref<32x50xf32, #tpu.memory_space<vmem>>, vector<32x50xf32>,
    return
  }
  func.func @transform_0(%arg0: i32) -> (i32, i32, i32) {
    %c0_i32 = arith.constant 0 : i32
    %c0_i32_0 = arith.constant 0 : i32
    %c0_i32_1 = arith.constant 0 : i32
    %c0_i32_2 = arith.constant 0 : i32
    return %c0_i32, %c0_i32_0, %c0_i32_1 : i32, i32, i32
  }
  func.func @transform_1(%arg0: i32) -> (i32, i32) {
    %c0_i32 = arith.constant 0 : i32
    %c0_i32_0 = arith.constant 0 : i32
    %c0_i32_1 = arith.constant 0 : i32
    return %c0_i32, %c0_i32_0 : i32, i32
  }
}

module attributes {stable_mosaic.version = 11 : i64} {
  func.func @_conv_kernel(%arg0: i32, %arg1: memref<25x9672xf32, #tpu.memory_space<vmem>>, %arg2: memref<3x25xf32, #tpu.memory_space<vmem>>, %arg3: memref<3x1xf32, #tpu.memory_space<vmem>>, %arg4: memref<3x9672xf32, #tpu.memory_space<vmem>>) attributes {dimension_semantics = [#tpu.dimension_semantics<arbitrary>], iteration_bounds = array<i64: 1>, scalar_prefetch = 0 : i64, scratch_operands = 0 : i64, tpu.core_type = #tpu.core_type<tc>, window_params = [{pipeline_mode = #tpu.pipeline_mode<synchronous>, transform_indices = @transform_0, window_bounds = array<i64: 25, 9672>}, {pipeline_mode = #tpu.pipeline_mode<synchronous>, transform_indices = @transform_1, window_bounds = array<i64: 3, 25>}, {pipeline_mode = #tpu.pipeline_mode<synchronous>, transform_indices = @transform_2, window_bounds = array<i64: 3, 1>}, {pipeline_mode = #tpu.pipeline_mode<synchronous>, transform_indices = @transform_3, window_bounds = array<i64: 3, 9672>}]} {
    %c0 = arith.constant 0 : index
    %c0_0 = arith.constant 0 : index
    %0 = vector.load %arg2[%c0, %c0_0] : memref<3x25xf32, #tpu.memory_space<vmem>>, vector<3x25xf32>
    %c0_1 = arith.constant 0 : index
    %c0_2 = arith.constant 0 : index
    %1 = vector.load %arg1[%c0_1, %c0_2] : memref<25x9672xf32, #tpu.memory_space<vmem>>, vector<25x9672xf32>
    %cst = arith.constant dense<0.000000e+00> : vector<3x9672xf32>
    %2 = tpu.matmul %0, %1, %cst {dimension_numbers = #tpu.dot_dimension_numbers<[1], [0], [0], [1], [0, 0, 1, 1], [], []>} : vector<3x25xf32>, vector<25x9672xf32>, vector<3x9672xf32> -> vector<3x9672xf32>
    %c0_3 = arith.constant 0 : index
    %c0_4 = arith.constant 0 : index
    %3 = vector.load %arg3[%c0_3, %c0_4] : memref<3x1xf32, #tpu.memory_space<vmem>>, vector<3x1xf32>
    %4 = vector.broadcast %3 : vector<3x1xf32> to vector<3x9672xf32>
    %5 = arith.addf %2, %4 : vector<3x9672xf32>
    %c0_5 = arith.constant 0 : index
    %c0_6 = arith.constant 0 : index
    %6 = vector.load %arg4[%c0_5, %c0_6] : memref<3x9672xf32, #tpu.memory_space<vmem>>, vector<3x9672xf32>
    tpu.vector_store %arg4[%c0_5, %c0_6], %5 {strides = array<i32>} : memref<3x9672xf32, #tpu.memory_space<vmem>>, vector<3x9672xf32>,
    return
  }
  func.func @transform_0(%arg0: i32) -> (i32, i32) {
    %c0_i32 = arith.constant 0 : i32
    %c0_i32_0 = arith.constant 0 : i32
    %c0_i32_1 = arith.constant 0 : i32
    return %c0_i32, %c0_i32_0 : i32, i32
  }
  func.func @transform_1(%arg0: i32) -> (i32, i32) {
    %c0_i32 = arith.constant 0 : i32
    %c0_i32_0 = arith.constant 0 : i32
    %c0_i32_1 = arith.constant 0 : i32
    return %c0_i32, %c0_i32_0 : i32, i32
  }
  func.func @transform_2(%arg0: i32) -> (i32, i32) {
    %c0_i32 = arith.constant 0 : i32
    %c0_i32_0 = arith.constant 0 : i32
    %c0_i32_1 = arith.constant 0 : i32
    return %c0_i32, %c0_i32_0 : i32, i32
  }
  func.func @transform_3(%arg0: i32) -> (i32, i32) {
    %c0_i32 = arith.constant 0 : i32
    %c0_i32_0 = arith.constant 0 : i32
    %c0_i32_1 = arith.constant 0 : i32
    return %c0_i32, %c0_i32_0 : i32, i32
  }
}

module attributes {stable_mosaic.version = 11 : i64} {
  func.func @_pool_kernel(%arg0: i32, %arg1: memref<15x3x2204xf32, #tpu.memory_space<vmem>>, %arg2: memref<3x1xf32, #tpu.memory_space<vmem>>, %arg3: memref<3x1xf32, #tpu.memory_space<vmem>>, %arg4: memref<3x2204xf32, #tpu.memory_space<vmem>>) attributes {dimension_semantics = [#tpu.dimension_semantics<arbitrary>], iteration_bounds = array<i64: 1>, scalar_prefetch = 0 : i64, scratch_operands = 0 : i64, tpu.core_type = #tpu.core_type<tc>, window_params = [{pipeline_mode = #tpu.pipeline_mode<synchronous>, transform_indices = @transform_0, window_bounds = array<i64: 15, 3, 2204>}, {pipeline_mode = #tpu.pipeline_mode<synchronous>, transform_indices = @transform_1, window_bounds = array<i64: 3, 1>}, {pipeline_mode = #tpu.pipeline_mode<synchronous>, transform_indices = @transform_2, window_bounds = array<i64: 3, 1>}, {pipeline_mode = #tpu.pipeline_mode<synchronous>, transform_indices = @transform_3, window_bounds = array<i64: 3, 2204>}]} {
    %c0 = arith.constant 0 : index
    %c0_0 = arith.constant 0 : index
    %c0_1 = arith.constant 0 : index
    %0 = vector.load %arg1[%c0, %c0_0, %c0_1] : memref<15x3x2204xf32, #tpu.memory_space<vmem>>, vector<15x3x2204xf32>
    %cst = arith.constant dense<0.000000e+00> : vector<3x2204xf32>
    %1 = vector.multi_reduction <add>, %0, %cst [0] : vector<15x3x2204xf32> to vector<3x2204xf32>
    %cst_2 = arith.constant 0.0666666701 : f32
    %2 = vector.broadcast %cst_2 : f32 to vector<3x2204xf32>
    %3 = arith.mulf %1, %2 : vector<3x2204xf32>
    %c0_3 = arith.constant 0 : index
    %c0_4 = arith.constant 0 : index
    %4 = vector.load %arg2[%c0_3, %c0_4] : memref<3x1xf32, #tpu.memory_space<vmem>>, vector<3x1xf32>
    %5 = vector.broadcast %4 : vector<3x1xf32> to vector<3x2204xf32>
    %6 = arith.mulf %3, %5 : vector<3x2204xf32>
    %c0_5 = arith.constant 0 : index
    %c0_6 = arith.constant 0 : index
    %7 = vector.load %arg3[%c0_5, %c0_6] : memref<3x1xf32, #tpu.memory_space<vmem>>, vector<3x1xf32>
    %8 = vector.broadcast %7 : vector<3x1xf32> to vector<3x2204xf32>
    %9 = arith.addf %6, %8 : vector<3x2204xf32>
    %cst_7 = arith.constant 0.000000e+00 : f32
    %10 = vector.broadcast %cst_7 : f32 to vector<3x2204xf32>
    %11 = arith.cmpf ogt, %9, %10 : vector<3x2204xf32>
    %cst_8 = arith.constant 2.000000e-01 : f32
    %12 = vector.broadcast %cst_8 : f32 to vector<3x2204xf32>
    %13 = arith.mulf %12, %9 : vector<3x2204xf32>
    %14 = arith.select %11, %9, %13 : vector<3x2204xi1>, vector<3x2204xf32>
    %c0_9 = arith.constant 0 : index
    %c0_10 = arith.constant 0 : index
    %15 = vector.load %arg4[%c0_9, %c0_10] : memref<3x2204xf32, #tpu.memory_space<vmem>>, vector<3x2204xf32>
    tpu.vector_store %arg4[%c0_9, %c0_10], %14 {strides = array<i32>} : memref<3x2204xf32, #tpu.memory_space<vmem>>, vector<3x2204xf32>,
    return
  }
  func.func @transform_0(%arg0: i32) -> (i32, i32, i32) {
    %c0_i32 = arith.constant 0 : i32
    %c0_i32_0 = arith.constant 0 : i32
    %c0_i32_1 = arith.constant 0 : i32
    %c0_i32_2 = arith.constant 0 : i32
    return %c0_i32, %c0_i32_0, %c0_i32_1 : i32, i32, i32
  }
  func.func @transform_1(%arg0: i32) -> (i32, i32) {
    %c0_i32 = arith.constant 0 : i32
    %c0_i32_0 = arith.constant 0 : i32
    %c0_i32_1 = arith.constant 0 : i32
    return %c0_i32, %c0_i32_0 : i32, i32
  }
  func.func @transform_2(%arg0: i32) -> (i32, i32) {
    %c0_i32 = arith.constant 0 : i32
    %c0_i32_0 = arith.constant 0 : i32
    %c0_i32_1 = arith.constant 0 : i32
    return %c0_i32, %c0_i32_0 : i32, i32
  }
  func.func @transform_3(%arg0: i32) -> (i32, i32) {
    %c0_i32 = arith.constant 0 : i32
    %c0_i32_0 = arith.constant 0 : i32
    %c0_i32_1 = arith.constant 0 : i32
    return %c0_i32, %c0_i32_0 : i32, i32
  }
}

module attributes {stable_mosaic.version = 11 : i64} {
  func.func @_conv_kernel(%arg0: i32, %arg1: memref<54x520xf32, #tpu.memory_space<vmem>>, %arg2: memref<5x54xf32, #tpu.memory_space<vmem>>, %arg3: memref<5x1xf32, #tpu.memory_space<vmem>>, %arg4: memref<5x520xf32, #tpu.memory_space<vmem>>) attributes {dimension_semantics = [#tpu.dimension_semantics<arbitrary>], iteration_bounds = array<i64: 1>, scalar_prefetch = 0 : i64, scratch_operands = 0 : i64, tpu.core_type = #tpu.core_type<tc>, window_params = [{pipeline_mode = #tpu.pipeline_mode<synchronous>, transform_indices = @transform_0, window_bounds = array<i64: 54, 520>}, {pipeline_mode = #tpu.pipeline_mode<synchronous>, transform_indices = @transform_1, window_bounds = array<i64: 5, 54>}, {pipeline_mode = #tpu.pipeline_mode<synchronous>, transform_indices = @transform_2, window_bounds = array<i64: 5, 1>}, {pipeline_mode = #tpu.pipeline_mode<synchronous>, transform_indices = @transform_3, window_bounds = array<i64: 5, 520>}]} {
    %c0 = arith.constant 0 : index
    %c0_0 = arith.constant 0 : index
    %0 = vector.load %arg2[%c0, %c0_0] : memref<5x54xf32, #tpu.memory_space<vmem>>, vector<5x54xf32>
    %c0_1 = arith.constant 0 : index
    %c0_2 = arith.constant 0 : index
    %1 = vector.load %arg1[%c0_1, %c0_2] : memref<54x520xf32, #tpu.memory_space<vmem>>, vector<54x520xf32>
    %cst = arith.constant dense<0.000000e+00> : vector<5x520xf32>
    %2 = tpu.matmul %0, %1, %cst {dimension_numbers = #tpu.dot_dimension_numbers<[1], [0], [0], [1], [0, 0, 1, 1], [], []>} : vector<5x54xf32>, vector<54x520xf32>, vector<5x520xf32> -> vector<5x520xf32>
    %c0_3 = arith.constant 0 : index
    %c0_4 = arith.constant 0 : index
    %3 = vector.load %arg3[%c0_3, %c0_4] : memref<5x1xf32, #tpu.memory_space<vmem>>, vector<5x1xf32>
    %4 = vector.broadcast %3 : vector<5x1xf32> to vector<5x520xf32>
    %5 = arith.addf %2, %4 : vector<5x520xf32>
    %c0_5 = arith.constant 0 : index
    %c0_6 = arith.constant 0 : index
    %6 = vector.load %arg4[%c0_5, %c0_6] : memref<5x520xf32, #tpu.memory_space<vmem>>, vector<5x520xf32>
    tpu.vector_store %arg4[%c0_5, %c0_6], %5 {strides = array<i32>} : memref<5x520xf32, #tpu.memory_space<vmem>>, vector<5x520xf32>,
    return
  }
  func.func @transform_0(%arg0: i32) -> (i32, i32) {
    %c0_i32 = arith.constant 0 : i32
    %c0_i32_0 = arith.constant 0 : i32
    %c0_i32_1 = arith.constant 0 : i32
    return %c0_i32, %c0_i32_0 : i32, i32
  }
  func.func @transform_1(%arg0: i32) -> (i32, i32) {
    %c0_i32 = arith.constant 0 : i32
    %c0_i32_0 = arith.constant 0 : i32
    %c0_i32_1 = arith.constant 0 : i32
    return %c0_i32, %c0_i32_0 : i32, i32
  }
  func.func @transform_2(%arg0: i32) -> (i32, i32) {
    %c0_i32 = arith.constant 0 : i32
    %c0_i32_0 = arith.constant 0 : i32
    %c0_i32_1 = arith.constant 0 : i32
    return %c0_i32, %c0_i32_0 : i32, i32
  }
  func.func @transform_3(%arg0: i32) -> (i32, i32) {
    %c0_i32 = arith.constant 0 : i32
    %c0_i32_0 = arith.constant 0 : i32
    %c0_i32_1 = arith.constant 0 : i32
    return %c0_i32, %c0_i32_0 : i32, i32
  }
}

module attributes {stable_mosaic.version = 11 : i64} {
  func.func @_pool_kernel(%arg0: i32, %arg1: memref<9x5x96xf32, #tpu.memory_space<vmem>>, %arg2: memref<5x96xf32, #tpu.memory_space<vmem>>) attributes {dimension_semantics = [#tpu.dimension_semantics<arbitrary>], iteration_bounds = array<i64: 1>, scalar_prefetch = 0 : i64, scratch_operands = 0 : i64, tpu.core_type = #tpu.core_type<tc>, window_params = [{pipeline_mode = #tpu.pipeline_mode<synchronous>, transform_indices = @transform_0, window_bounds = array<i64: 9, 5, 96>}, {pipeline_mode = #tpu.pipeline_mode<synchronous>, transform_indices = @transform_1, window_bounds = array<i64: 5, 96>}]} {
    %c0 = arith.constant 0 : index
    %c0_0 = arith.constant 0 : index
    %c0_1 = arith.constant 0 : index
    %0 = vector.load %arg1[%c0, %c0_0, %c0_1] : memref<9x5x96xf32, #tpu.memory_space<vmem>>, vector<9x5x96xf32>
    %cst = arith.constant dense<0.000000e+00> : vector<5x96xf32>
    %1 = vector.multi_reduction <add>, %0, %cst [0] : vector<9x5x96xf32> to vector<5x96xf32>
    %cst_2 = arith.constant 0.111111112 : f32
    %2 = vector.broadcast %cst_2 : f32 to vector<5x96xf32>
    %3 = arith.mulf %1, %2 : vector<5x96xf32>
    %cst_3 = arith.constant 0.000000e+00 : f32
    %4 = vector.broadcast %cst_3 : f32 to vector<5x96xf32>
    %5 = arith.cmpf ogt, %3, %4 : vector<5x96xf32>
    %cst_4 = arith.constant 2.000000e-01 : f32
    %6 = vector.broadcast %cst_4 : f32 to vector<5x96xf32>
    %7 = arith.mulf %6, %3 : vector<5x96xf32>
    %8 = arith.select %5, %3, %7 : vector<5x96xi1>, vector<5x96xf32>
    %c0_5 = arith.constant 0 : index
    %c0_6 = arith.constant 0 : index
    %9 = vector.load %arg2[%c0_5, %c0_6] : memref<5x96xf32, #tpu.memory_space<vmem>>, vector<5x96xf32>
    tpu.vector_store %arg2[%c0_5, %c0_6], %8 {strides = array<i32>} : memref<5x96xf32, #tpu.memory_space<vmem>>, vector<5x96xf32>,
    return
  }
  func.func @transform_0(%arg0: i32) -> (i32, i32, i32) {
    %c0_i32 = arith.constant 0 : i32
    %c0_i32_0 = arith.constant 0 : i32
    %c0_i32_1 = arith.constant 0 : i32
    %c0_i32_2 = arith.constant 0 : i32
    return %c0_i32, %c0_i32_0, %c0_i32_1 : i32, i32, i32
  }
  func.func @transform_1(%arg0: i32) -> (i32, i32) {
    %c0_i32 = arith.constant 0 : i32
    %c0_i32_0 = arith.constant 0 : i32
    %c0_i32_1 = arith.constant 0 : i32
    return %c0_i32, %c0_i32_0 : i32, i32
  }
}

module attributes {stable_mosaic.version = 11 : i64} {
  func.func @_conv_kernel(%arg0: i32, %arg1: memref<45x96xf32, #tpu.memory_space<vmem>>, %arg2: memref<8x45xf32, #tpu.memory_space<vmem>>, %arg3: memref<8x1xf32, #tpu.memory_space<vmem>>, %arg4: memref<8x96xf32, #tpu.memory_space<vmem>>) attributes {dimension_semantics = [#tpu.dimension_semantics<arbitrary>], iteration_bounds = array<i64: 1>, scalar_prefetch = 0 : i64, scratch_operands = 0 : i64, tpu.core_type = #tpu.core_type<tc>, window_params = [{pipeline_mode = #tpu.pipeline_mode<synchronous>, transform_indices = @transform_0, window_bounds = array<i64: 45, 96>}, {pipeline_mode = #tpu.pipeline_mode<synchronous>, transform_indices = @transform_1, window_bounds = array<i64: 8, 45>}, {pipeline_mode = #tpu.pipeline_mode<synchronous>, transform_indices = @transform_2, window_bounds = array<i64: 8, 1>}, {pipeline_mode = #tpu.pipeline_mode<synchronous>, transform_indices = @transform_3, window_bounds = array<i64: 8, 96>}]} {
    %c0 = arith.constant 0 : index
    %c0_0 = arith.constant 0 : index
    %0 = vector.load %arg2[%c0, %c0_0] : memref<8x45xf32, #tpu.memory_space<vmem>>, vector<8x45xf32>
    %c0_1 = arith.constant 0 : index
    %c0_2 = arith.constant 0 : index
    %1 = vector.load %arg1[%c0_1, %c0_2] : memref<45x96xf32, #tpu.memory_space<vmem>>, vector<45x96xf32>
    %cst = arith.constant dense<0.000000e+00> : vector<8x96xf32>
    %2 = tpu.matmul %0, %1, %cst {dimension_numbers = #tpu.dot_dimension_numbers<[1], [0], [0], [1], [0, 0, 1, 1], [], []>} : vector<8x45xf32>, vector<45x96xf32>, vector<8x96xf32> -> vector<8x96xf32>
    %c0_3 = arith.constant 0 : index
    %c0_4 = arith.constant 0 : index
    %3 = vector.load %arg3[%c0_3, %c0_4] : memref<8x1xf32, #tpu.memory_space<vmem>>, vector<8x1xf32>
    %4 = vector.broadcast %3 : vector<8x1xf32> to vector<8x96xf32>
    %5 = arith.addf %2, %4 : vector<8x96xf32>
    %c0_5 = arith.constant 0 : index
    %c0_6 = arith.constant 0 : index
    %6 = vector.load %arg4[%c0_5, %c0_6] : memref<8x96xf32, #tpu.memory_space<vmem>>, vector<8x96xf32>
    tpu.vector_store %arg4[%c0_5, %c0_6], %5 {strides = array<i32>} : memref<8x96xf32, #tpu.memory_space<vmem>>, vector<8x96xf32>,
    return
  }
  func.func @transform_0(%arg0: i32) -> (i32, i32) {
    %c0_i32 = arith.constant 0 : i32
    %c0_i32_0 = arith.constant 0 : i32
    %c0_i32_1 = arith.constant 0 : i32
    return %c0_i32, %c0_i32_0 : i32, i32
  }
  func.func @transform_1(%arg0: i32) -> (i32, i32) {
    %c0_i32 = arith.constant 0 : i32
    %c0_i32_0 = arith.constant 0 : i32
    %c0_i32_1 = arith.constant 0 : i32
    return %c0_i32, %c0_i32_0 : i32, i32
  }
  func.func @transform_2(%arg0: i32) -> (i32, i32) {
    %c0_i32 = arith.constant 0 : i32
    %c0_i32_0 = arith.constant 0 : i32
    %c0_i32_1 = arith.constant 0 : i32
    return %c0_i32, %c0_i32_0 : i32, i32
  }
  func.func @transform_3(%arg0: i32) -> (i32, i32) {
    %c0_i32 = arith.constant 0 : i32
    %c0_i32_0 = arith.constant 0 : i32
    %c0_i32_1 = arith.constant 0 : i32
    return %c0_i32, %c0_i32_0 : i32, i32
  }
}

module attributes {stable_mosaic.version = 11 : i64} {
  func.func @_conv_kernel(%arg0: i32, %arg1: memref<72x96xf32, #tpu.memory_space<vmem>>, %arg2: memref<16x72xf32, #tpu.memory_space<vmem>>, %arg3: memref<16x1xf32, #tpu.memory_space<vmem>>, %arg4: memref<16x96xf32, #tpu.memory_space<vmem>>) attributes {dimension_semantics = [#tpu.dimension_semantics<arbitrary>], iteration_bounds = array<i64: 1>, scalar_prefetch = 0 : i64, scratch_operands = 0 : i64, tpu.core_type = #tpu.core_type<tc>, window_params = [{pipeline_mode = #tpu.pipeline_mode<synchronous>, transform_indices = @transform_0, window_bounds = array<i64: 72, 96>}, {pipeline_mode = #tpu.pipeline_mode<synchronous>, transform_indices = @transform_1, window_bounds = array<i64: 16, 72>}, {pipeline_mode = #tpu.pipeline_mode<synchronous>, transform_indices = @transform_2, window_bounds = array<i64: 16, 1>}, {pipeline_mode = #tpu.pipeline_mode<synchronous>, transform_indices = @transform_3, window_bounds = array<i64: 16, 96>}]} {
    %c0 = arith.constant 0 : index
    %c0_0 = arith.constant 0 : index
    %0 = vector.load %arg2[%c0, %c0_0] : memref<16x72xf32, #tpu.memory_space<vmem>>, vector<16x72xf32>
    %c0_1 = arith.constant 0 : index
    %c0_2 = arith.constant 0 : index
    %1 = vector.load %arg1[%c0_1, %c0_2] : memref<72x96xf32, #tpu.memory_space<vmem>>, vector<72x96xf32>
    %cst = arith.constant dense<0.000000e+00> : vector<16x96xf32>
    %2 = tpu.matmul %0, %1, %cst {dimension_numbers = #tpu.dot_dimension_numbers<[1], [0], [0], [1], [0, 0, 1, 1], [], []>} : vector<16x72xf32>, vector<72x96xf32>, vector<16x96xf32> -> vector<16x96xf32>
    %c0_3 = arith.constant 0 : index
    %c0_4 = arith.constant 0 : index
    %3 = vector.load %arg3[%c0_3, %c0_4] : memref<16x1xf32, #tpu.memory_space<vmem>>, vector<16x1xf32>
    %4 = vector.broadcast %3 : vector<16x1xf32> to vector<16x96xf32>
    %5 = arith.addf %2, %4 : vector<16x96xf32>
    %c0_5 = arith.constant 0 : index
    %c0_6 = arith.constant 0 : index
    %6 = vector.load %arg4[%c0_5, %c0_6] : memref<16x96xf32, #tpu.memory_space<vmem>>, vector<16x96xf32>
    tpu.vector_store %arg4[%c0_5, %c0_6], %5 {strides = array<i32>} : memref<16x96xf32, #tpu.memory_space<vmem>>, vector<16x96xf32>,
    return
  }
  func.func @transform_0(%arg0: i32) -> (i32, i32) {
    %c0_i32 = arith.constant 0 : i32
    %c0_i32_0 = arith.constant 0 : i32
    %c0_i32_1 = arith.constant 0 : i32
    return %c0_i32, %c0_i32_0 : i32, i32
  }
  func.func @transform_1(%arg0: i32) -> (i32, i32) {
    %c0_i32 = arith.constant 0 : i32
    %c0_i32_0 = arith.constant 0 : i32
    %c0_i32_1 = arith.constant 0 : i32
    return %c0_i32, %c0_i32_0 : i32, i32
  }
  func.func @transform_2(%arg0: i32) -> (i32, i32) {
    %c0_i32 = arith.constant 0 : i32
    %c0_i32_0 = arith.constant 0 : i32
    %c0_i32_1 = arith.constant 0 : i32
    return %c0_i32, %c0_i32_0 : i32, i32
  }
  func.func @transform_3(%arg0: i32) -> (i32, i32) {
    %c0_i32 = arith.constant 0 : i32
    %c0_i32_0 = arith.constant 0 : i32
    %c0_i32_1 = arith.constant 0 : i32
    return %c0_i32, %c0_i32_0 : i32, i32
  }
}

module attributes {stable_mosaic.version = 11 : i64} {
  func.func @_conv_kernel(%arg0: i32, %arg1: memref<144x96xf32, #tpu.memory_space<vmem>>, %arg2: memref<32x144xf32, #tpu.memory_space<vmem>>, %arg3: memref<32x1xf32, #tpu.memory_space<vmem>>, %arg4: memref<32x96xf32, #tpu.memory_space<vmem>>) attributes {dimension_semantics = [#tpu.dimension_semantics<arbitrary>], iteration_bounds = array<i64: 1>, scalar_prefetch = 0 : i64, scratch_operands = 0 : i64, tpu.core_type = #tpu.core_type<tc>, window_params = [{pipeline_mode = #tpu.pipeline_mode<synchronous>, transform_indices = @transform_0, window_bounds = array<i64: 144, 96>}, {pipeline_mode = #tpu.pipeline_mode<synchronous>, transform_indices = @transform_1, window_bounds = array<i64: 32, 144>}, {pipeline_mode = #tpu.pipeline_mode<synchronous>, transform_indices = @transform_2, window_bounds = array<i64: 32, 1>}, {pipeline_mode = #tpu.pipeline_mode<synchronous>, transform_indices = @transform_3, window_bounds = array<i64: 32, 96>}]} {
    %c0 = arith.constant 0 : index
    %c0_0 = arith.constant 0 : index
    %0 = vector.load %arg2[%c0, %c0_0] : memref<32x144xf32, #tpu.memory_space<vmem>>, vector<32x144xf32>
    %c0_1 = arith.constant 0 : index
    %c0_2 = arith.constant 0 : index
    %1 = vector.load %arg1[%c0_1, %c0_2] : memref<144x96xf32, #tpu.memory_space<vmem>>, vector<144x96xf32>
    %cst = arith.constant dense<0.000000e+00> : vector<32x96xf32>
    %2 = tpu.matmul %0, %1, %cst {dimension_numbers = #tpu.dot_dimension_numbers<[1], [0], [0], [1], [0, 0, 1, 1], [], []>} : vector<32x144xf32>, vector<144x96xf32>, vector<32x96xf32> -> vector<32x96xf32>
    %c0_3 = arith.constant 0 : index
    %c0_4 = arith.constant 0 : index
    %3 = vector.load %arg3[%c0_3, %c0_4] : memref<32x1xf32, #tpu.memory_space<vmem>>, vector<32x1xf32>
    %4 = vector.broadcast %3 : vector<32x1xf32> to vector<32x96xf32>
    %5 = arith.addf %2, %4 : vector<32x96xf32>
    %c0_5 = arith.constant 0 : index
    %c0_6 = arith.constant 0 : index
    %6 = vector.load %arg4[%c0_5, %c0_6] : memref<32x96xf32, #tpu.memory_space<vmem>>, vector<32x96xf32>
    tpu.vector_store %arg4[%c0_5, %c0_6], %5 {strides = array<i32>} : memref<32x96xf32, #tpu.memory_space<vmem>>, vector<32x96xf32>,
    return
  }
  func.func @transform_0(%arg0: i32) -> (i32, i32) {
    %c0_i32 = arith.constant 0 : i32
    %c0_i32_0 = arith.constant 0 : i32
    %c0_i32_1 = arith.constant 0 : i32
    return %c0_i32, %c0_i32_0 : i32, i32
  }
  func.func @transform_1(%arg0: i32) -> (i32, i32) {
    %c0_i32 = arith.constant 0 : i32
    %c0_i32_0 = arith.constant 0 : i32
    %c0_i32_1 = arith.constant 0 : i32
    return %c0_i32, %c0_i32_0 : i32, i32
  }
  func.func @transform_2(%arg0: i32) -> (i32, i32) {
    %c0_i32 = arith.constant 0 : i32
    %c0_i32_0 = arith.constant 0 : i32
    %c0_i32_1 = arith.constant 0 : i32
    return %c0_i32, %c0_i32_0 : i32, i32
  }
  func.func @transform_3(%arg0: i32) -> (i32, i32) {
    %c0_i32 = arith.constant 0 : i32
    %c0_i32_0 = arith.constant 0 : i32
    %c0_i32_1 = arith.constant 0 : i32
    return %c0_i32, %c0_i32_0 : i32, i32
  }
}

module attributes {stable_mosaic.version = 11 : i64} {
  func.func @_pool_kernel(%arg0: i32, %arg1: memref<20x32x8xf32, #tpu.memory_space<vmem>>, %arg2: memref<32x1xf32, #tpu.memory_space<vmem>>, %arg3: memref<32x1xf32, #tpu.memory_space<vmem>>, %arg4: memref<32x8xf32, #tpu.memory_space<vmem>>) attributes {dimension_semantics = [#tpu.dimension_semantics<arbitrary>], iteration_bounds = array<i64: 1>, scalar_prefetch = 0 : i64, scratch_operands = 0 : i64, tpu.core_type = #tpu.core_type<tc>, window_params = [{pipeline_mode = #tpu.pipeline_mode<synchronous>, transform_indices = @transform_0, window_bounds = array<i64: 20, 32, 8>}, {pipeline_mode = #tpu.pipeline_mode<synchronous>, transform_indices = @transform_1, window_bounds = array<i64: 32, 1>}, {pipeline_mode = #tpu.pipeline_mode<synchronous>, transform_indices = @transform_2, window_bounds = array<i64: 32, 1>}, {pipeline_mode = #tpu.pipeline_mode<synchronous>, transform_indices = @transform_3, window_bounds = array<i64: 32, 8>}]} {
    %c0 = arith.constant 0 : index
    %c0_0 = arith.constant 0 : index
    %c0_1 = arith.constant 0 : index
    %0 = vector.load %arg1[%c0, %c0_0, %c0_1] : memref<20x32x8xf32, #tpu.memory_space<vmem>>, vector<20x32x8xf32>
    %cst = arith.constant dense<0.000000e+00> : vector<32x8xf32>
    %1 = vector.multi_reduction <add>, %0, %cst [0] : vector<20x32x8xf32> to vector<32x8xf32>
    %cst_2 = arith.constant 5.000000e-02 : f32
    %2 = vector.broadcast %cst_2 : f32 to vector<32x8xf32>
    %3 = arith.mulf %1, %2 : vector<32x8xf32>
    %c0_3 = arith.constant 0 : index
    %c0_4 = arith.constant 0 : index
    %4 = vector.load %arg2[%c0_3, %c0_4] : memref<32x1xf32, #tpu.memory_space<vmem>>, vector<32x1xf32>
    %5 = vector.broadcast %4 : vector<32x1xf32> to vector<32x8xf32>
    %6 = arith.mulf %3, %5 : vector<32x8xf32>
    %c0_5 = arith.constant 0 : index
    %c0_6 = arith.constant 0 : index
    %7 = vector.load %arg3[%c0_5, %c0_6] : memref<32x1xf32, #tpu.memory_space<vmem>>, vector<32x1xf32>
    %8 = vector.broadcast %7 : vector<32x1xf32> to vector<32x8xf32>
    %9 = arith.addf %6, %8 : vector<32x8xf32>
    %cst_7 = arith.constant 0.000000e+00 : f32
    %10 = vector.broadcast %cst_7 : f32 to vector<32x8xf32>
    %11 = arith.cmpf ogt, %9, %10 : vector<32x8xf32>
    %cst_8 = arith.constant 2.000000e-01 : f32
    %12 = vector.broadcast %cst_8 : f32 to vector<32x8xf32>
    %13 = arith.mulf %12, %9 : vector<32x8xf32>
    %14 = arith.select %11, %9, %13 : vector<32x8xi1>, vector<32x8xf32>
    %c0_9 = arith.constant 0 : index
    %c0_10 = arith.constant 0 : index
    %15 = vector.load %arg4[%c0_9, %c0_10] : memref<32x8xf32, #tpu.memory_space<vmem>>, vector<32x8xf32>
    tpu.vector_store %arg4[%c0_9, %c0_10], %14 {strides = array<i32>} : memref<32x8xf32, #tpu.memory_space<vmem>>, vector<32x8xf32>,
    return
  }
  func.func @transform_0(%arg0: i32) -> (i32, i32, i32) {
    %c0_i32 = arith.constant 0 : i32
    %c0_i32_0 = arith.constant 0 : i32
    %c0_i32_1 = arith.constant 0 : i32
    %c0_i32_2 = arith.constant 0 : i32
    return %c0_i32, %c0_i32_0, %c0_i32_1 : i32, i32, i32
  }
  func.func @transform_1(%arg0: i32) -> (i32, i32) {
    %c0_i32 = arith.constant 0 : i32
    %c0_i32_0 = arith.constant 0 : i32
    %c0_i32_1 = arith.constant 0 : i32
    return %c0_i32, %c0_i32_0 : i32, i32
  }
  func.func @transform_2(%arg0: i32) -> (i32, i32) {
    %c0_i32 = arith.constant 0 : i32
    %c0_i32_0 = arith.constant 0 : i32
    %c0_i32_1 = arith.constant 0 : i32
    return %c0_i32, %c0_i32_0 : i32, i32
  }
  func.func @transform_3(%arg0: i32) -> (i32, i32) {
    %c0_i32 = arith.constant 0 : i32
    %c0_i32_0 = arith.constant 0 : i32
    %c0_i32_1 = arith.constant 0 : i32
    return %c0_i32, %c0_i32_0 : i32, i32
  }
}

</mosaic_0001>

<bundles_post_ra>
// kernel: feature_extractor_forward.24
= control target key start
LH: loop header
LB: loop body
LE: loop exit
PB: predicated region body
PF: predicated region fallthrough
CT: control target
= control target key end

     0   :  { %vm333_vm0 = vcmask 1042432   ;;  %vm330_vm1 = vcmask 154624   ;;  %vm1046_vm2 = vcmask 1043456   ;;  %s2161_s0 = inlined_call_operand.vmem [shape: f32[147,2048], index: 0, kind: input, shape index: {}]   ;;  %s2162_s1 = inlined_call_operand.vmem [shape: f32[3,147], index: 1, kind: input, shape index: {}]   ;;  %s2163_s2 = inlined_call_operand.vmem [shape: f32[3,1], index: 2, kind: input, shape index: {}]   ;;  %s2164_s3 = inlined_call_operand.vmem [shape: f32[3,2048], index: 3, kind: output, shape index: {}]  }
   0x1   :  { %v255_v0 = vld [vmem:[%s2161_s0 + $0x780] sm:$0xff]  ;;  %v256_v1 = vld [vmem:[%s2161_s0 + $0x788] sm:$0xff]  ;;  %v257_v9 = vld [vmem:[%s2161_s0 + $0x790] sm:$0xff] }
   0x2   :  { %v304_v2 = vld [vmem:[%s2161_s0 + $0x908] sm:$0x7]  ;;  %382 = vmatpush.msra.mxu0 %v255_v0  ;;  %422 = vmatpush.msra.mxu2 %v256_v1  ;;  %v239_v3 = vld [vmem:[%s2161_s0 + $0x700] sm:$0xff]  ;;  %v305_v10 = vld [vmem:[%s2161_s0 + $0x910] sm:$0x7] }
   0x3   :  { %v240_v4 = vld [vmem:[%s2161_s0 + $0x708] sm:$0xff]  ;;  %1077 = vmatpush.msk.msra.mxu3 %vm333_vm0, %v304_v2  ;;  %v223_v6 = vld [vmem:[%s2161_s0 + $0x680] sm:$0xff]  ;;  %462 = vmatpush.msra.mxu1 %v257_v9  ;;  %v241_v12 = vld [vmem:[%s2161_s0 + $0x710] sm:$0xff] }
   0x4   :  { %v288_v5 = vld [vmem:[%s2161_s0 + $0x888] sm:$0xff]  ;;  %383 = vmatpush.msra.mxu0 %v239_v3  ;;  %423 = vmatpush.msra.mxu2 %v240_v4  ;;  %v207_v11 = vld [vmem:[%s2161_s0 + $0x600] sm:$0xff]  ;;  %v225_v14 = vld [vmem:[%s2161_s0 + $0x690] sm:$0xff] }
   0x5   :  { %v224_v7 = vld [vmem:[%s2161_s0 + $0x688] sm:$0xff]  ;;  %456 = vmatpush.msra.mxu3 %v288_v5  ;;  %463 = vmatpush.msra.mxu1 %v241_v12  ;;  %v289_v15 = vld [vmem:[%s2161_s0 + $0x890] sm:$0xff]  ;;  %v191_v16 = vld [vmem:[%s2161_s0 + $0x580] sm:$0xff] }
   0x6   :  { %v272_v8 = vld [vmem:[%s2161_s0 + $0x808] sm:$0xff]  ;;  %384 = vmatpush.msra.mxu0 %v223_v6  ;;  %424 = vmatpush.msra.mxu2 %v224_v7  ;;  %v14_v18 = vld [vmem:[%s2162_s1] sm:$0x77]  ;;  %v209_v19 = vld [vmem:[%s2161_s0 + $0x610] sm:$0xff] }
   0x7   :  { %v208_v13 = vld [vmem:[%s2161_s0 + $0x608] sm:$0xff]  ;;  %457 = vmatpush.msra.mxu3 %v272_v8  ;;  %464 = vmatpush.msra.mxu1 %v225_v14  ;;  %v273_v20 = vld [vmem:[%s2161_s0 + $0x810] sm:$0xff]  ;;  %v175_v21 = vld [vmem:[%s2161_s0 + $0x500] sm:$0xff]  ;;  %326 = vst [vmem:[#allocation1] ss:$2 sm:$0xff] %v14_v18 }
   0x8   :  { %385 = vmatpush.msra.mxu0 %v207_v11  ;;  %v192_v17 = vld [vmem:[%s2161_s0 + $0x588] sm:$0xff]  ;;  %425 = vmatpush.msra.mxu2 %v208_v13  ;;  %v193_v23 = vld [vmem:[%s2161_s0 + $0x590] sm:$0xff]  ;;  %v159_v24 = vld [vmem:[%s2161_s0 + $0x480] sm:$0xff] }
   0x9   :  { %1079 = vmatpush.msk.msrb.mxu3 %vm333_vm0, %v305_v10  ;;  %v176_v22 = vld [vmem:[%s2161_s0 + $0x508] sm:$0xff]  ;;  %465 = vmatpush.msra.mxu1 %v209_v19  ;;  %v177_v26 = vld [vmem:[%s2161_s0 + $0x510] sm:$0xff]  ;;  %v143_v27 = vld [vmem:[%s2161_s0 + $0x400] sm:$0xff] }
   0xa   :  { %386 = vmatpush.msra.mxu0 %v191_v16  ;;  %426 = vmatpush.msra.mxu2 %v192_v17  ;;  %v160_v25 = vld [vmem:[%s2161_s0 + $0x488] sm:$0xff]  ;;  %v258_v29 = vld [vmem:[%s2161_s0 + $0x798] sm:$0xff]  ;;  %v127_v30 = vld [vmem:[%s2161_s0 + $0x380] sm:$0xff] }
   0xb   :  { %496 = vmatpush.msrb.mxu3 %v289_v15  ;;  %466 = vmatpush.msra.mxu1 %v193_v23  ;;  %v144_v28 = vld [vmem:[%s2161_s0 + $0x408] sm:$0xff]  ;;  %v161_v33 = vld [vmem:[%s2161_s0 + $0x490] sm:$0xff]  ;;  %v242_v34 = vld [vmem:[%s2161_s0 + $0x718] sm:$0xff] }
   0xc   :  { %387 = vmatpush.msra.mxu0 %v175_v21  ;;  %427 = vmatpush.msra.mxu2 %v176_v22  ;;  %v128_v32 = vld [vmem:[%s2161_s0 + $0x388] sm:$0xff]  ;;  %v111_v35 = vld [vmem:[%s2161_s0 + $0x300] sm:$0xff]  ;;  %v145_v37 = vld [vmem:[%s2161_s0 + $0x410] sm:$0xff] }
   0xd   :  { %497 = vmatpush.msrb.mxu3 %v273_v20  ;;  %467 = vmatpush.msra.mxu1 %v177_v26  ;;  %v112_v36 = vld [vmem:[%s2161_s0 + $0x308] sm:$0xff]  ;;  %v226_v38 = vld [vmem:[%s2161_s0 + $0x698] sm:$0xff]  ;;  %v95_v39 = vld [vmem:[%s2161_s0 + $0x280] sm:$0xff] }
   0xe   :  { %388 = vmatpush.msra.mxu0 %v159_v24  ;;  %428 = vmatpush.msra.mxu2 %v160_v25  ;;  %v1227_v31 = vld.sshfl [vmem:[#allocation1 + $0x8] sm:$0xff pattern:$0x75316420]  ;;  %v129_v41 = vld [vmem:[%s2161_s0 + $0x390] sm:$0xff]  ;;  %v210_v42 = vld [vmem:[%s2161_s0 + $0x618] sm:$0xff] }
   0xf   :  { %1078 = vmatmul.msk.f32.vlgmr.msra.gmra.mxu3 %vm330_vm1, %v1227_v31  ;;  %468 = vmatpush.msra.mxu1 %v161_v33  ;;  %v96_v40 = vld [vmem:[%s2161_s0 + $0x288] sm:$0xff]  ;;  %v79_v43 = vld [vmem:[%s2161_s0 + $0x200] sm:$0xff]  ;;  %v113_v45 = vld [vmem:[%s2161_s0 + $0x310] sm:$0xff] }
  0x10   :  { %389 = vmatpush.msra.mxu0 %v143_v27  ;;  %429 = vmatpush.msra.mxu2 %v144_v28  ;;  %v80_v44 = vld [vmem:[%s2161_s0 + $0x208] sm:$0xff]  ;;  %v194_v46 = vld [vmem:[%s2161_s0 + $0x598] sm:$0xff]  ;;  %v63_v47 = vld [vmem:[%s2161_s0 + $0x180] sm:$0xff] }
  0x11   :  { %502 = vmatpush.msra.mxu3 %v258_v29  ;;  %469 = vmatpush.msra.mxu1 %v145_v37  ;;  %v64_v48 = vld [vmem:[%s2161_s0 + $0x188] sm:$0xff]  ;;  %v97_v49 = vld [vmem:[%s2161_s0 + $0x290] sm:$0xff]  ;;  %v178_v50 = vld [vmem:[%s2161_s0 + $0x518] sm:$0xff] }
  0x12   :  { %390 = vmatpush.msra.mxu0 %v127_v30  ;;  %430 = vmatpush.msra.mxu2 %v128_v32  ;;  %v47_v51 = vld [vmem:[%s2161_s0 + $0x100] sm:$0xff]  ;;  %v48_v52 = vld [vmem:[%s2161_s0 + $0x108] sm:$0xff]  ;;  %v81_v53 = vld [vmem:[%s2161_s0 + $0x210] sm:$0xff] }
  0x13   :  { %503 = vmatpush.msra.mxu3 %v242_v34  ;;  %470 = vmatpush.msra.mxu1 %v129_v41  ;;  %v162_v54 = vld [vmem:[%s2161_s0 + $0x498] sm:$0xff]  ;;  %v31_v55 = vld [vmem:[%s2161_s0 + $0x80] sm:$0xff]  ;;  %v32_v56 = vld [vmem:[%s2161_s0 + $0x88] sm:$0xff] }
  0x14   :  { %391 = vmatpush.msra.mxu0 %v111_v35  ;;  %431 = vmatpush.msra.mxu2 %v112_v36  ;;  %v65_v57 = vld [vmem:[%s2161_s0 + $0x190] sm:$0xff]  ;;  %v146_v58 = vld [vmem:[%s2161_s0 + $0x418] sm:$0xff]  ;;  %v15_v59 = vld [vmem:[%s2161_s0] sm:$0xff] }
  0x15   :  { %504 = vmatpush.msra.mxu3 %v226_v38  ;;  %471 = vmatpush.msra.mxu1 %v113_v45  ;;  %v16_v60 = vld [vmem:[%s2161_s0 + $0x8] sm:$0xff]  ;;  %v49_v61 = vld [vmem:[%s2161_s0 + $0x110] sm:$0xff]  ;;  %v130_v62 = vld [vmem:[%s2161_s0 + $0x398] sm:$0xff] }
  0x16   :  { %392 = vmatpush.msra.mxu0 %v95_v39  ;;  %432 = vmatpush.msra.mxu2 %v96_v40  ;;  %v303_v63 = vld [vmem:[%s2161_s0 + $0x900] sm:$0x7]  ;;  %v33_v1 = vld [vmem:[%s2161_s0 + $0x90] sm:$0xff]  ;;  %v114_v2 = vld [vmem:[%s2161_s0 + $0x318] sm:$0xff] }
  0x17   :  { %505 = vmatpush.msra.mxu3 %v210_v42  ;;  %472 = vmatpush.msra.mxu1 %v97_v49  ;;  %v1327_v0 = vld.sshfl [vmem:[#allocation1] sm:$0xff pattern:$0x75316420]  ;;  %v98_v4 = vld [vmem:[%s2161_s0 + $0x298] sm:$0xff]  ;;  %v17_v7 = vld [vmem:[%s2161_s0 + $0x10] sm:$0xff]  ;;  %v1111_v42 = vmov 0  }
  0x18   :  { %393 = vmatpush.msra.mxu0 %v79_v43  ;;  %433 = vmatpush.msra.mxu2 %v80_v44  ;;  %v259_v3 = vld [vmem:[%s2161_s0 + $0x7a0] sm:$0xff]  ;;  %v82_v8 = vld [vmem:[%s2161_s0 + $0x218] sm:$0xff]  ;;  %v308_v11 = vld [vmem:[%s2161_s0 + $0x928] sm:$0x7] }
  0x19   :  { %506 = vmatpush.msra.mxu3 %v194_v46  ;;  %473 = vmatpush.msra.mxu1 %v81_v53  ;;  %v287_v5 = vld [vmem:[%s2161_s0 + $0x880] sm:$0xff]  ;;  %v66_v12 = vld [vmem:[%s2161_s0 + $0x198] sm:$0xff]  ;;  %v292_v16 = vld [vmem:[%s2161_s0 + $0x8a8] sm:$0xff] }
  0x1a   :  { %394 = vmatpush.msra.mxu0 %v63_v47  ;;  %434 = vmatpush.msra.mxu2 %v64_v48  ;;  %v243_v6 = vld [vmem:[%s2161_s0 + $0x720] sm:$0xff]  ;;  %v306_v13 = vld [vmem:[%s2161_s0 + $0x918] sm:$0x7]  ;;  %v276_v20 = vld [vmem:[%s2161_s0 + $0x828] sm:$0xff] }
  0x1b   :  { %507 = vmatpush.msra.mxu3 %v178_v50  ;;  %474 = vmatpush.msra.mxu1 %v65_v57  ;;  %v271_v9 = vld [vmem:[%s2161_s0 + $0x800] sm:$0xff]  ;;  %v50_v15 = vld [vmem:[%s2161_s0 + $0x118] sm:$0xff]  ;;  %v309_v22 = vld [vmem:[%s2161_s0 + $0x930] sm:$0x7] }
  0x1c   :  { %395 = vmatpush.msra.mxu0 %v47_v51  ;;  %435 = vmatpush.msra.mxu2 %v48_v52  ;;  %v227_v10 = vld [vmem:[%s2161_s0 + $0x6a0] sm:$0xff]  ;;  %v290_v17 = vld [vmem:[%s2161_s0 + $0x898] sm:$0xff]  ;;  %v260_v26 = vld [vmem:[%s2161_s0 + $0x7a8] sm:$0xff] }
  0x1d   :  { %508 = vmatpush.msra.mxu3 %v162_v54  ;;  %475 = vmatpush.msra.mxu1 %v49_v61  ;;  %v211_v14 = vld [vmem:[%s2161_s0 + $0x620] sm:$0xff]  ;;  %v34_v19 = vld [vmem:[%s2161_s0 + $0x98] sm:$0xff]  ;;  %v293_v27 = vld [vmem:[%s2161_s0 + $0x8b0] sm:$0xff] }
  0x1e   :  { %396 = vmatpush.msra.mxu0 %v31_v55  ;;  %436 = vmatpush.msra.mxu2 %v32_v56  ;;  %v195_v18 = vld [vmem:[%s2161_s0 + $0x5a0] sm:$0xff]  ;;  %v274_v21 = vld [vmem:[%s2161_s0 + $0x818] sm:$0xff]  ;;  %v244_v30 = vld [vmem:[%s2161_s0 + $0x728] sm:$0xff] }
  0x1f   :  { %509 = vmatpush.msra.mxu3 %v146_v58  ;;  %476 = vmatpush.msra.mxu1 %v33_v1  ;;  %v18_v23 = vld [vmem:[%s2161_s0 + $0x18] sm:$0xff]  ;;  %v179_v24 = vld [vmem:[%s2161_s0 + $0x520] sm:$0xff]  ;;  %v277_v32 = vld [vmem:[%s2161_s0 + $0x830] sm:$0xff] }
  0x20   :  { %397 = vmatpush.msra.mxu0 %v15_v59  ;;  %437 = vmatpush.msra.mxu2 %v16_v60  ;;  %v307_v25 = vld [vmem:[%s2161_s0 + $0x920] sm:$0x7]  ;;  %v228_v35 = vld [vmem:[%s2161_s0 + $0x6a8] sm:$0xff]  ;;  %v261_v36 = vld [vmem:[%s2161_s0 + $0x7b0] sm:$0xff] }
  0x21   :  { %510 = vmatpush.msra.mxu3 %v130_v62  ;;  %438 = vmatmul.f32.vlgmr.msra.gmra.mxu2 %v1327_v0  ;;  %v163_v28 = vld [vmem:[%s2161_s0 + $0x4a0] sm:$0xff]  ;;  %v262_v37 = vld [vmem:[%s2161_s0 + $0x7b8] sm:$0xff]  ;;  %v212_v39 = vld [vmem:[%s2161_s0 + $0x628] sm:$0xff] }
  0x22   :  { %1075 = vmatpush.msk.msrb.mxu0 %vm333_vm0, %v303_v63  ;;  %542 = vmatpush.msrb.mxu2 %v259_v3  ;;  %v291_v29 = vld [vmem:[%s2161_s0 + $0x8a0] sm:$0xff]  ;;  %v246_v40 = vld [vmem:[%s2161_s0 + $0x738] sm:$0xff]  ;;  %v245_v43 = vld [vmem:[%s2161_s0 + $0x730] sm:$0xff] }
  0x23   :  { %511 = vmatpush.msra.mxu3 %v114_v2  ;;  %398 = vmatmul.f32.vlgmr.msra.gmra.mxu0 %v1327_v0  ;;  %v147_v33 = vld [vmem:[%s2161_s0 + $0x420] sm:$0xff]  ;;  %v196_v45 = vld [vmem:[%s2161_s0 + $0x5a8] sm:$0xff]  ;;  %v230_v46 = vld [vmem:[%s2161_s0 + $0x6b8] sm:$0xff] }
  0x24   :  { %1080 = vmatmul.msk.f32.vlgmr.msrb.gmra.mxu3 %vm330_vm1, %v1227_v31  ;;  %416 = vmatpush.msrb.mxu0 %v287_v5  ;;  %v275_v34 = vld [vmem:[%s2161_s0 + $0x820] sm:$0xff]  ;;  %v229_v47 = vld [vmem:[%s2161_s0 + $0x6b0] sm:$0xff]  ;;  %v180_v49 = vld [vmem:[%s2161_s0 + $0x528] sm:$0xff] }
  0x25   :  { %512 = vmatpush.msra.mxu3 %v98_v4  ;;  %543 = vmatpush.msrb.mxu2 %v243_v6  ;;  %v131_v38 = vld [vmem:[%s2161_s0 + $0x3a0] sm:$0xff]  ;;  %v214_v50 = vld [vmem:[%s2161_s0 + $0x638] sm:$0xff]  ;;  %v213_v51 = vld [vmem:[%s2161_s0 + $0x630] sm:$0xff] }
  0x26   :  { %477 = vmatpush.msra.mxu1 %v17_v7  ;;  %417 = vmatpush.msrb.mxu0 %v271_v9  ;;  %v319_v41 = vld [vmem:[%s2163_s2] sm:$0x7]  ;;  %v164_v53 = vld [vmem:[%s2161_s0 + $0x4a8] sm:$0xff]  ;;  %v198_v54 = vld [vmem:[%s2161_s0 + $0x5b8] sm:$0xff] }
  0x27   :  { %513 = vmatpush.msra.mxu3 %v82_v8  ;;  %544 = vmatpush.msrb.mxu2 %v227_v10  ;;  %v115_v44 = vld [vmem:[%s2161_s0 + $0x320] sm:$0xff]  ;;  %v197_v55 = vld [vmem:[%s2161_s0 + $0x5b0] sm:$0xff]  ;;  %v148_v57 = vld [vmem:[%s2161_s0 + $0x428] sm:$0xff] }
  0x28   :  { %1085 = vmatpush.msk.msrb.mxu1 %vm333_vm0, %v308_v11  ;;  %1081 = vmatpush.msk.msra.mxu0 %vm333_vm0, %v306_v13  ;;  %v99_v48 = vld [vmem:[%s2161_s0 + $0x2a0] sm:$0xff]  ;;  %v182_v58 = vld [vmem:[%s2161_s0 + $0x538] sm:$0xff]  ;;  %v181_v59 = vld [vmem:[%s2161_s0 + $0x530] sm:$0xff] }
  0x29   :  { %514 = vmatpush.msra.mxu3 %v66_v12  ;;  %478 = vmatmul.f32.vlgmr.msra.gmra.mxu1 %v1327_v0  ;;  %v83_v52 = vld [vmem:[%s2161_s0 + $0x220] sm:$0xff]  ;;  %v132_v61 = vld [vmem:[%s2161_s0 + $0x3a8] sm:$0xff]  ;;  %v166_v62 = vld [vmem:[%s2161_s0 + $0x4b8] sm:$0xff] }
  0x2a   :  { %545 = vmatpush.msrb.mxu2 %v211_v14  ;;  %616 = vmatpush.msrb.mxu1 %v292_v16  ;;  %v67_v56 = vld [vmem:[%s2161_s0 + $0x1a0] sm:$0xff]  ;;  %v165_v63 = vld [vmem:[%s2161_s0 + $0x4b0] sm:$0xff]  ;;  %v116_v2 = vld [vmem:[%s2161_s0 + $0x328] sm:$0xff] }
  0x2b   :  { %515 = vmatpush.msra.mxu3 %v50_v15  ;;  %536 = vmatpush.msra.mxu0 %v290_v17  ;;  %v51_v60 = vld [vmem:[%s2161_s0 + $0x120] sm:$0xff]  ;;  %v150_v3 = vld [vmem:[%s2161_s0 + $0x438] sm:$0xff]  ;;  %v149_v4 = vld [vmem:[%s2161_s0 + $0x430] sm:$0xff] }
  0x2c   :  { %546 = vmatpush.msrb.mxu2 %v195_v18  ;;  %617 = vmatpush.msrb.mxu1 %v276_v20  ;;  %v35_v1 = vld [vmem:[%s2161_s0 + $0xa0] sm:$0xff]  ;;  %v100_v6 = vld [vmem:[%s2161_s0 + $0x2a8] sm:$0xff]  ;;  %v134_v7 = vld [vmem:[%s2161_s0 + $0x3b8] sm:$0xff] }
  0x2d   :  { %516 = vmatpush.msra.mxu3 %v34_v19  ;;  %537 = vmatpush.msra.mxu0 %v274_v21  ;;  %v19_v5 = vld [vmem:[%s2161_s0 + $0x20] sm:$0xff]  ;;  %v133_v8 = vld [vmem:[%s2161_s0 + $0x3b0] sm:$0xff]  ;;  %v84_v9 = vld [vmem:[%s2161_s0 + $0x228] sm:$0xff] }
  0x2e   :  { %1087 = vmatpush.msk.msra.mxu1 %vm333_vm0, %v309_v22  ;;  %1076 = vmatmul.msk.f32.vlgmr.msrb.gmra.mxu0 %vm330_vm1, %v1227_v31  ;;  %v118_v10 = vld [vmem:[%s2161_s0 + $0x338] sm:$0xff]  ;;  %v117_v12 = vld [vmem:[%s2161_s0 + $0x330] sm:$0xff]  ;;  %v68_v13 = vld [vmem:[%s2161_s0 + $0x1a8] sm:$0xff] }
  0x2f   :  { %517 = vmatpush.msra.mxu3 %v18_v23  ;;  %547 = vmatpush.msrb.mxu2 %v179_v24  ;;  %v310_v11 = vld [vmem:[%s2161_s0 + $0x938] sm:$0x7]  ;;  %v52_v16 = vld [vmem:[%s2161_s0 + $0x128] sm:$0xff]  ;;  %v101_v17 = vld [vmem:[%s2161_s0 + $0x2b0] sm:$0xff] }
  0x30   :  { %518 = vmatmul.f32.vlgmr.msra.gmra.mxu3 %v1327_v0  ;;  %582 = vmatpush.msrb.mxu0 %v260_v26  ;;  %v102_v14 = vld [vmem:[%s2161_s0 + $0x2b8] sm:$0xff]  ;;  %v85_v20 = vld [vmem:[%s2161_s0 + $0x230] sm:$0xff]  ;;  %v311_v21 = vld [vmem:[%s2161_s0 + $0x940] sm:$0x7] }
  0x31   :  { %1083 = vmatpush.msk.msrb.mxu3 %vm333_vm0, %v307_v25  ;;  %656 = vmatpush.msra.mxu1 %v293_v27  ;;  %v294_v15 = vld [vmem:[%s2161_s0 + $0x8b8] sm:$0xff]  ;;  %v36_v22 = vld [vmem:[%s2161_s0 + $0xa8] sm:$0xff]  ;;  %v69_v24 = vld [vmem:[%s2161_s0 + $0x1b0] sm:$0xff] }
  0x32   :  { %548 = vmatpush.msrb.mxu2 %v163_v28  ;;  %583 = vmatpush.msrb.mxu0 %v244_v30  ;;  %v86_v18 = vld [vmem:[%s2161_s0 + $0x238] sm:$0xff]  ;;  %v295_v25 = vld [vmem:[%s2161_s0 + $0x8c0] sm:$0xff]  ;;  %v20_v26 = vld [vmem:[%s2161_s0 + $0x28] sm:$0xff] }
  0x33   :  { %576 = vmatpush.msrb.mxu3 %v291_v29  ;;  %657 = vmatpush.msra.mxu1 %v277_v32  ;;  %v278_v19 = vld [vmem:[%s2161_s0 + $0x838] sm:$0xff]  ;;  %v53_v28 = vld [vmem:[%s2161_s0 + $0x130] sm:$0xff]  ;;  %v263_v29 = vld [vmem:[%s2161_s0 + $0x7c0] sm:$0xff] }
  0x34   :  { %549 = vmatpush.msrb.mxu2 %v147_v33  ;;  %584 = vmatpush.msrb.mxu0 %v228_v35  ;;  %v70_v23 = vld [vmem:[%s2161_s0 + $0x1b8] sm:$0xff]  ;;  %v279_v30 = vld [vmem:[%s2161_s0 + $0x840] sm:$0xff]  ;;  %v312_v33 = vld [vmem:[%s2161_s0 + $0x948] sm:$0x7] }
  0x35   :  { %577 = vmatpush.msrb.mxu3 %v275_v34  ;;  %1086 = vmatmul.msk.f32.vlgmr.msrb.gmra.mxu1 %vm330_vm1, %v1227_v31  ;;  %v54_v27 = vld [vmem:[%s2161_s0 + $0x138] sm:$0xff]  ;;  %v37_v34 = vld [vmem:[%s2161_s0 + $0xb0] sm:$0xff]  ;;  %v247_v35 = vld [vmem:[%s2161_s0 + $0x740] sm:$0xff] }
  0x36   :  { %662 = vmatpush.msrb.mxu1 %v262_v37  ;;  %1108 = vset.pattern.permute.xlu0 %v1111_v42  ;;  %v38_v32 = vld [vmem:[%s2161_s0 + $0xb8] sm:$0xff]  ;;  %v296_v37 = vld [vmem:[%s2161_s0 + $0x8c8] sm:$0xff]  ;;  %v313_v42 = vld [vmem:[%s2161_s0 + $0x950] sm:$0x7] }
  0x37   :  { %622 = vmatpush.msra.mxu3 %v261_v36  ;;  %550 = vmatpush.msrb.mxu2 %v131_v38  ;;  %v22_v36 = vld [vmem:[%s2161_s0 + $0x38] sm:$0xff]  ;;  %v21_v38 = vld [vmem:[%s2161_s0 + $0x30] sm:$0xff] }
  0x38   :  { %585 = vmatpush.msrb.mxu0 %v212_v39  ;;  %663 = vmatpush.msrb.mxu1 %v246_v40  ;;  %v231_v39 = vld [vmem:[%s2161_s0 + $0x6c0] sm:$0xff]  ;;  %v280_v40 = vld [vmem:[%s2161_s0 + $0x848] sm:$0xff] }
  0x39   :  { %322 = vperm.xlu0 %1108, %v319_v41   ;;  %623 = vmatpush.msra.mxu3 %v245_v43  ;;  %v264_v41 = vld [vmem:[%s2161_s0 + $0x7c8] sm:$0xff]  ;;  %v215_v43 = vld [vmem:[%s2161_s0 + $0x640] sm:$0xff] }
  0x3a   :  { %1082 = vmatmul.msk.f32.vlgmr.msra.gmra.mxu0 %vm330_vm1, %v1227_v31  ;;  %551 = vmatpush.msrb.mxu2 %v115_v44  ;;  %v265_v44 = vld [vmem:[%s2161_s0 + $0x7d0] sm:$0xff] }
  0x3b   :  { %586 = vmatpush.msrb.mxu0 %v196_v45  ;;  %664 = vmatpush.msrb.mxu1 %v230_v46  ;;  %v248_v45 = vld [vmem:[%s2161_s0 + $0x748] sm:$0xff]  ;;  %v297_v46 = vld [vmem:[%s2161_s0 + $0x8d0] sm:$0xff] }
  0x3c   :  { %624 = vmatpush.msra.mxu3 %v229_v47  ;;  %552 = vmatpush.msrb.mxu2 %v99_v48  ;;  %v199_v47 = vld [vmem:[%s2161_s0 + $0x5c0] sm:$0xff]  ;;  %v249_v48 = vld [vmem:[%s2161_s0 + $0x750] sm:$0xff] }
  0x3d   :  { %587 = vmatpush.msrb.mxu0 %v180_v49  ;;  %665 = vmatpush.msrb.mxu1 %v214_v50  ;;  %v232_v49 = vld [vmem:[%s2161_s0 + $0x6c8] sm:$0xff]  ;;  %v281_v50 = vld [vmem:[%s2161_s0 + $0x850] sm:$0xff] }
  0x3e   :  { %625 = vmatpush.msra.mxu3 %v213_v51  ;;  %553 = vmatpush.msrb.mxu2 %v83_v52  ;;  %v183_v51 = vld [vmem:[%s2161_s0 + $0x540] sm:$0xff]  ;;  %v233_v52 = vld [vmem:[%s2161_s0 + $0x6d0] sm:$0xff] }
  0x3f   :  { %588 = vmatpush.msrb.mxu0 %v164_v53  ;;  %666 = vmatpush.msrb.mxu1 %v198_v54  ;;  %v266_v53 = vld [vmem:[%s2161_s0 + $0x7d8] sm:$0xff]  ;;  %v216_v54 = vld [vmem:[%s2161_s0 + $0x648] sm:$0xff] }
  0x40   :  { %626 = vmatpush.msra.mxu3 %v197_v55  ;;  %554 = vmatpush.msrb.mxu2 %v67_v56  ;;  %v167_v55 = vld [vmem:[%s2161_s0 + $0x4c0] sm:$0xff]  ;;  %v217_v56 = vld [vmem:[%s2161_s0 + $0x650] sm:$0xff] }
  0x41   :  { %589 = vmatpush.msrb.mxu0 %v148_v57  ;;  %667 = vmatpush.msrb.mxu1 %v182_v58  ;;  %v250_v57 = vld [vmem:[%s2161_s0 + $0x758] sm:$0xff]  ;;  %v200_v58 = vld [vmem:[%s2161_s0 + $0x5c8] sm:$0xff] }
  0x42   :  { %627 = vmatpush.msra.mxu3 %v181_v59  ;;  %555 = vmatpush.msrb.mxu2 %v51_v60  ;;  %v151_v59 = vld [vmem:[%s2161_s0 + $0x440] sm:$0xff]  ;;  %v201_v60 = vld [vmem:[%s2161_s0 + $0x5d0] sm:$0xff] }
  0x43   :  { %590 = vmatpush.msrb.mxu0 %v132_v61  ;;  %668 = vmatpush.msrb.mxu1 %v166_v62  ;;  %v234_v61 = vld [vmem:[%s2161_s0 + $0x6d8] sm:$0xff]  ;;  %v184_v62 = vld [vmem:[%s2161_s0 + $0x548] sm:$0xff] }
  0x44   :  { %628 = vmatpush.msra.mxu3 %v165_v63  ;;  %556 = vmatpush.msrb.mxu2 %v35_v1  ;;  %v135_v63 = vld [vmem:[%s2161_s0 + $0x3c0] sm:$0xff]  ;;  %v185_v1 = vld [vmem:[%s2161_s0 + $0x550] sm:$0xff] }
  0x45   :  { %591 = vmatpush.msrb.mxu0 %v116_v2  ;;  %669 = vmatpush.msrb.mxu1 %v150_v3  ;;  %v218_v2 = vld [vmem:[%s2161_s0 + $0x658] sm:$0xff]  ;;  %v168_v3 = vld [vmem:[%s2161_s0 + $0x4c8] sm:$0xff] }
  0x46   :  { %629 = vmatpush.msra.mxu3 %v149_v4  ;;  %557 = vmatpush.msrb.mxu2 %v19_v5  ;;  %v119_v4 = vld [vmem:[%s2161_s0 + $0x340] sm:$0xff]  ;;  %v169_v5 = vld [vmem:[%s2161_s0 + $0x4d0] sm:$0xff] }
  0x47   :  { %592 = vmatpush.msrb.mxu0 %v100_v6  ;;  %670 = vmatpush.msrb.mxu1 %v134_v7  ;;  %v202_v6 = vld [vmem:[%s2161_s0 + $0x5d8] sm:$0xff]  ;;  %v152_v7 = vld [vmem:[%s2161_s0 + $0x448] sm:$0xff] }
  0x48   :  { %558 = vmatmul.f32.vlgmr.msrb.gmra.mxu2 %v1327_v0  ;;  %630 = vmatpush.msra.mxu3 %v133_v8  ;;  %v103_v8 = vld [vmem:[%s2161_s0 + $0x2c0] sm:$0xff] }
  0x49   :  { %593 = vmatpush.msrb.mxu0 %v84_v9  ;;  %671 = vmatpush.msrb.mxu1 %v118_v10  ;;  %v153_v9 = vld [vmem:[%s2161_s0 + $0x450] sm:$0xff]  ;;  %v186_v10 = vld [vmem:[%s2161_s0 + $0x558] sm:$0xff] }
  0x4a   :  { %1089 = vmatpush.msk.msra.mxu2 %vm333_vm0, %v310_v11  ;;  %631 = vmatpush.msra.mxu3 %v117_v12  ;;  %v136_v11 = vld [vmem:[%s2161_s0 + $0x3c8] sm:$0xff]  ;;  %v87_v12 = vld [vmem:[%s2161_s0 + $0x240] sm:$0xff] }
  0x4b   :  { %594 = vmatpush.msrb.mxu0 %v68_v13  ;;  %672 = vmatpush.msrb.mxu1 %v102_v14  ;;  %v137_v13 = vld [vmem:[%s2161_s0 + $0x3d0] sm:$0xff]  ;;  %v170_v14 = vld [vmem:[%s2161_s0 + $0x4d8] sm:$0xff] }
  0x4c   :  { %696 = vmatpush.msra.mxu2 %v294_v15  ;;  %1084 = vmatmul.msk.f32.vlgmr.msrb.gmra.mxu3 %vm330_vm1, %v1227_v31  ;;  %v120_v15 = vld [vmem:[%s2161_s0 + $0x348] sm:$0xff] }
  0x4d   :  { %595 = vmatpush.msrb.mxu0 %v52_v16  ;;  %632 = vmatpush.msra.mxu3 %v101_v17  ;;  %v71_v16 = vld [vmem:[%s2161_s0 + $0x1c0] sm:$0xff]  ;;  %v121_v17 = vld [vmem:[%s2161_s0 + $0x350] sm:$0xff] }
  0x4e   :  { %673 = vmatpush.msrb.mxu1 %v86_v18  ;;  %697 = vmatpush.msra.mxu2 %v278_v19  ;;  %v154_v18 = vld [vmem:[%s2161_s0 + $0x458] sm:$0xff]  ;;  %v104_v19 = vld [vmem:[%s2161_s0 + $0x2c8] sm:$0xff] }
  0x4f   :  { %1088 = vmatmul.msk.f32.vlgmr.msra.gmra.mxu1 %vm330_vm1, %v1227_v31  ;;  %633 = vmatpush.msra.mxu3 %v85_v20  ;;  %v55_v20 = vld [vmem:[%s2161_s0 + $0x140] sm:$0xff] }
  0x50   :  { %1091 = vmatpush.msk.msrb.mxu2 %vm333_vm0, %v311_v21  ;;  %596 = vmatpush.msrb.mxu0 %v36_v22  ;;  %v105_v21 = vld [vmem:[%s2161_s0 + $0x2d0] sm:$0xff]  ;;  %v138_v22 = vld [vmem:[%s2161_s0 + $0x3d8] sm:$0xff] }
  0x51   :  { %674 = vmatpush.msrb.mxu1 %v70_v23  ;;  %634 = vmatpush.msra.mxu3 %v69_v24  ;;  %v88_v23 = vld [vmem:[%s2161_s0 + $0x248] sm:$0xff]  ;;  %v39_v24 = vld [vmem:[%s2161_s0 + $0xc0] sm:$0xff] }
  0x52   :  { %1090 = vmatmul.msk.f32.vlgmr.msra.gmra.mxu2 %vm330_vm1, %v1227_v31  ;;  %597 = vmatpush.msrb.mxu0 %v20_v26  ;;  %v122_v26 = vld [vmem:[%s2161_s0 + $0x358] sm:$0xff] }
  0x53   :  { %736 = vmatpush.msrb.mxu2 %v295_v25  ;;  %675 = vmatpush.msrb.mxu1 %v54_v27  ;;  %v89_v25 = vld [vmem:[%s2161_s0 + $0x250] sm:$0xff]  ;;  %v72_v27 = vld [vmem:[%s2161_s0 + $0x1c8] sm:$0xff] }
  0x54   :  { %598 = vmatmul.f32.vlgmr.msrb.gmra.mxu0 %v1327_v0  ;;  %635 = vmatpush.msra.mxu3 %v53_v28  ;;  %v23_v28 = vld [vmem:[%s2161_s0 + $0x40] sm:$0xff] }
  0x55   :  { %702 = vmatpush.msra.mxu0 %v263_v29  ;;  %737 = vmatpush.msrb.mxu2 %v279_v30  ;;  %v73_v29 = vld [vmem:[%s2161_s0 + $0x1d0] sm:$0xff]  ;;  %v106_v30 = vld [vmem:[%s2161_s0 + $0x2d8] sm:$0xff] }
  0x56   :  { %676 = vmatpush.msrb.mxu1 %v38_v32  ;;  %636 = vmatpush.msra.mxu3 %v37_v34  ;;  %v56_v32 = vld [vmem:[%s2161_s0 + $0x148] sm:$0xff]  ;;  %v57_v34 = vld [vmem:[%s2161_s0 + $0x150] sm:$0xff] }
  0x57   :  { %1093 = vmatpush.msk.msra.mxu2 %vm333_vm0, %v312_v33  ;;  %703 = vmatpush.msra.mxu0 %v247_v35  ;;  %v314_v33 = vld [vmem:[%s2161_s0 + $0x958] sm:$0x7] }
  0x58   :  { %677 = vmatpush.msrb.mxu1 %v22_v36  ;;  %637 = vmatpush.msra.mxu3 %v21_v38  ;;  %v90_v35 = vld [vmem:[%s2161_s0 + $0x258] sm:$0xff]  ;;  %v40_v36 = vld [vmem:[%s2161_s0 + $0xc8] sm:$0xff]  ;;  %v41_v38 = vld [vmem:[%s2161_s0 + $0xd0] sm:$0xff] }
  0x59   :  { %776 = vmatpush.msra.mxu2 %v296_v37  ;;  %678 = vmatmul.f32.vlgmr.msrb.gmra.mxu1 %v1327_v0  ;;  %v298_v37 = vld [vmem:[%s2161_s0 + $0x8d8] sm:$0xff] }
  0x5a   :  { %704 = vmatpush.msra.mxu0 %v231_v39  ;;  %638 = vmatmul.f32.vlgmr.msra.gmra.mxu3 %v1327_v0  ;;  %v74_v39 = vld [vmem:[%s2161_s0 + $0x1d8] sm:$0xff] }
  0x5b   :  { %777 = vmatpush.msra.mxu2 %v280_v40  ;;  %742 = vmatpush.msrb.mxu3 %v264_v41  ;;  %v24_v40 = vld [vmem:[%s2161_s0 + $0x48] sm:$0xff]  ;;  %v282_v41 = vld [vmem:[%s2161_s0 + $0x858] sm:$0xff] }
  0x5c   :  { %1095 = vmatpush.msk.msra.mxu1 %vm333_vm0, %v313_v42  ;;  %705 = vmatpush.msra.mxu0 %v215_v43  ;;  %v25_v42 = vld [vmem:[%s2161_s0 + $0x50] sm:$0xff]  ;;  %v58_v43 = vld [vmem:[%s2161_s0 + $0x158] sm:$0xff] }
  0x5d   :  { %1092 = vmatmul.msk.f32.vlgmr.msrb.gmra.mxu2 %vm330_vm1, %v1227_v31  ;;  %743 = vmatpush.msrb.mxu3 %v248_v45  ;;  %v315_v45 = vld [vmem:[%s2161_s0 + $0x960] sm:$0x7] }
  0x5e   :  { %782 = vmatpush.msrb.mxu2 %v265_v44  ;;  %816 = vmatpush.msra.mxu1 %v297_v46  ;;  %v267_v44 = vld [vmem:[%s2161_s0 + $0x7e0] sm:$0xff]  ;;  %v42_v46 = vld [vmem:[%s2161_s0 + $0xd8] sm:$0xff] }
  0x5f   :  { %706 = vmatpush.msra.mxu0 %v199_v47  ;;  %744 = vmatpush.msrb.mxu3 %v232_v49  ;;  %v316_v47 = vld [vmem:[%s2161_s0 + $0x968] sm:$0x7]  ;;  %v299_v49 = vld [vmem:[%s2161_s0 + $0x8e0] sm:$0xff] }
  0x60   :  { %783 = vmatpush.msrb.mxu2 %v249_v48  ;;  %817 = vmatpush.msra.mxu1 %v281_v50  ;;  %v251_v48 = vld [vmem:[%s2161_s0 + $0x760] sm:$0xff]  ;;  %v26_v50 = vld [vmem:[%s2161_s0 + $0x58] sm:$0xff] }
  0x61   :  { %707 = vmatpush.msra.mxu0 %v183_v51  ;;  %745 = vmatpush.msrb.mxu3 %v216_v54  ;;  %v300_v51 = vld [vmem:[%s2161_s0 + $0x8e8] sm:$0xff] }
  0x62   :  { %784 = vmatpush.msrb.mxu2 %v233_v52  ;;  %822 = vmatpush.msrb.mxu1 %v266_v53  ;;  %v235_v52 = vld [vmem:[%s2161_s0 + $0x6e0] sm:$0xff]  ;;  %v284_v54 = vld [vmem:[%s2161_s0 + $0x868] sm:$0xff] }
  0x63   :  { %708 = vmatpush.msra.mxu0 %v167_v55  ;;  %746 = vmatpush.msrb.mxu3 %v200_v58  ;;  %v283_v53 = vld [vmem:[%s2161_s0 + $0x860] sm:$0xff]  ;;  %v268_v55 = vld [vmem:[%s2161_s0 + $0x7e8] sm:$0xff]  ;;  %v317_v58 = vld [vmem:[%s2161_s0 + $0x970] sm:$0x7] }
  0x64   :  { %785 = vmatpush.msrb.mxu2 %v217_v56  ;;  %823 = vmatpush.msrb.mxu1 %v250_v57  ;;  %v219_v56 = vld [vmem:[%s2161_s0 + $0x660] sm:$0xff]  ;;  %v269_v57 = vld [vmem:[%s2161_s0 + $0x7f0] sm:$0xff] }
  0x65   :  { %709 = vmatpush.msra.mxu0 %v151_v59  ;;  %747 = vmatpush.msrb.mxu3 %v184_v62  ;;  %v252_v59 = vld [vmem:[%s2161_s0 + $0x768] sm:$0xff]  ;;  %v301_v62 = vld [vmem:[%s2161_s0 + $0x8f0] sm:$0xff] }
  0x66   :  { %786 = vmatpush.msrb.mxu2 %v201_v60  ;;  %824 = vmatpush.msrb.mxu1 %v234_v61  ;;  %v203_v60 = vld [vmem:[%s2161_s0 + $0x5e0] sm:$0xff]  ;;  %v253_v61 = vld [vmem:[%s2161_s0 + $0x770] sm:$0xff] }
  0x67   :  { %710 = vmatpush.msra.mxu0 %v135_v63  ;;  %748 = vmatpush.msrb.mxu3 %v168_v3  ;;  %v187_v63 = vld [vmem:[%s2161_s0 + $0x560] sm:$0xff]  ;;  %v220_v3 = vld [vmem:[%s2161_s0 + $0x668] sm:$0xff] }
  0x68   :  { %787 = vmatpush.msrb.mxu2 %v185_v1  ;;  %825 = vmatpush.msrb.mxu1 %v218_v2  ;;  %v237_v1 = vld [vmem:[%s2161_s0 + $0x6f0] sm:$0xff] }
  0x69   :  { %711 = vmatpush.msra.mxu0 %v119_v4  ;;  %749 = vmatpush.msrb.mxu3 %v152_v7  ;;  %v285_v2 = vld [vmem:[%s2161_s0 + $0x870] sm:$0xff]  ;;  %v171_v4 = vld [vmem:[%s2161_s0 + $0x4e0] sm:$0xff]  ;;  %v204_v7 = vld [vmem:[%s2161_s0 + $0x5e8] sm:$0xff] }
  0x6a   :  { %788 = vmatpush.msrb.mxu2 %v169_v5  ;;  %826 = vmatpush.msrb.mxu1 %v202_v6  ;;  %v221_v5 = vld [vmem:[%s2161_s0 + $0x670] sm:$0xff]  ;;  %v270_v6 = vld [vmem:[%s2161_s0 + $0x7f8] sm:$0xff] }
  0x6b   :  { %712 = vmatpush.msra.mxu0 %v103_v8  ;;  %750 = vmatpush.msrb.mxu3 %v136_v11  ;;  %v155_v8 = vld [vmem:[%s2161_s0 + $0x460] sm:$0xff]  ;;  %v188_v11 = vld [vmem:[%s2161_s0 + $0x568] sm:$0xff] }
  0x6c   :  { %789 = vmatpush.msrb.mxu2 %v153_v9  ;;  %827 = vmatpush.msrb.mxu1 %v186_v10  ;;  %v205_v9 = vld [vmem:[%s2161_s0 + $0x5f0] sm:$0xff]  ;;  %v254_v10 = vld [vmem:[%s2161_s0 + $0x778] sm:$0xff] }
  0x6d   :  { %713 = vmatpush.msra.mxu0 %v87_v12  ;;  %751 = vmatpush.msrb.mxu3 %v120_v15  ;;  %v139_v12 = vld [vmem:[%s2161_s0 + $0x3e0] sm:$0xff]  ;;  %v172_v15 = vld [vmem:[%s2161_s0 + $0x4e8] sm:$0xff] }
  0x6e   :  { %790 = vmatpush.msrb.mxu2 %v137_v13  ;;  %828 = vmatpush.msrb.mxu1 %v170_v14  ;;  %v189_v13 = vld [vmem:[%s2161_s0 + $0x570] sm:$0xff]  ;;  %v238_v14 = vld [vmem:[%s2161_s0 + $0x6f8] sm:$0xff] }
  0x6f   :  { %714 = vmatpush.msra.mxu0 %v71_v16  ;;  %752 = vmatpush.msrb.mxu3 %v104_v19  ;;  %v123_v16 = vld [vmem:[%s2161_s0 + $0x360] sm:$0xff]  ;;  %v156_v19 = vld [vmem:[%s2161_s0 + $0x468] sm:$0xff] }
  0x70   :  { %791 = vmatpush.msrb.mxu2 %v121_v17  ;;  %829 = vmatpush.msrb.mxu1 %v154_v18  ;;  %v173_v17 = vld [vmem:[%s2161_s0 + $0x4f0] sm:$0xff]  ;;  %v222_v18 = vld [vmem:[%s2161_s0 + $0x678] sm:$0xff] }
  0x71   :  { %715 = vmatpush.msra.mxu0 %v55_v20  ;;  %753 = vmatpush.msrb.mxu3 %v88_v23  ;;  %v107_v20 = vld [vmem:[%s2161_s0 + $0x2e0] sm:$0xff]  ;;  %v140_v23 = vld [vmem:[%s2161_s0 + $0x3e8] sm:$0xff] }
  0x72   :  { %792 = vmatpush.msrb.mxu2 %v105_v21  ;;  %830 = vmatpush.msrb.mxu1 %v138_v22  ;;  %v157_v21 = vld [vmem:[%s2161_s0 + $0x470] sm:$0xff]  ;;  %v206_v22 = vld [vmem:[%s2161_s0 + $0x5f8] sm:$0xff] }
  0x73   :  { %716 = vmatpush.msra.mxu0 %v39_v24  ;;  %754 = vmatpush.msrb.mxu3 %v72_v27  ;;  %v91_v24 = vld [vmem:[%s2161_s0 + $0x260] sm:$0xff]  ;;  %v124_v27 = vld [vmem:[%s2161_s0 + $0x368] sm:$0xff] }
  0x74   :  { %793 = vmatpush.msrb.mxu2 %v89_v25  ;;  %831 = vmatpush.msrb.mxu1 %v122_v26  ;;  %v141_v25 = vld [vmem:[%s2161_s0 + $0x3f0] sm:$0xff]  ;;  %v190_v26 = vld [vmem:[%s2161_s0 + $0x578] sm:$0xff] }
  0x75   :  { %1094 = vmatmul.msk.f32.vlgmr.msra.gmra.mxu2 %vm330_vm1, %v1227_v31  ;;  %717 = vmatpush.msra.mxu0 %v23_v28  ;;  %v75_v28 = vld [vmem:[%s2161_s0 + $0x1e0] sm:$0xff] }
  0x76   :  { %794 = vmatpush.msrb.mxu2 %v73_v29  ;;  %832 = vmatpush.msrb.mxu1 %v106_v30  ;;  %v125_v29 = vld [vmem:[%s2161_s0 + $0x370] sm:$0xff]  ;;  %v174_v30 = vld [vmem:[%s2161_s0 + $0x4f8] sm:$0xff] }
  0x77   :  { %718 = vmatmul.f32.vlgmr.msra.gmra.mxu0 %v1327_v0  ;;  %755 = vmatpush.msrb.mxu3 %v56_v32  ;;  %v108_v32 = vld [vmem:[%s2161_s0 + $0x2e8] sm:$0xff] }
  0x78   :  { %1097 = vmatpush.msk.msrb.mxu0 %vm333_vm0, %v314_v33  ;;  %795 = vmatpush.msrb.mxu2 %v57_v34  ;;  %v59_v33 = vld [vmem:[%s2161_s0 + $0x160] sm:$0xff]  ;;  %v109_v34 = vld [vmem:[%s2161_s0 + $0x2f0] sm:$0xff] }
  0x79   :  { %833 = vmatpush.msrb.mxu1 %v90_v35  ;;  %756 = vmatpush.msrb.mxu3 %v40_v36  ;;  %v158_v35 = vld [vmem:[%s2161_s0 + $0x478] sm:$0xff]  ;;  %v92_v36 = vld [vmem:[%s2161_s0 + $0x268] sm:$0xff] }
  0x7a   :  { %1096 = vmatmul.msk.f32.vlgmr.msra.gmra.mxu1 %vm330_vm1, %v1227_v31  ;;  %856 = vmatpush.msrb.mxu0 %v298_v37  ;;  %v43_v37 = vld [vmem:[%s2161_s0 + $0xe0] sm:$0xff] }
  0x7b   :  { %796 = vmatpush.msrb.mxu2 %v41_v38  ;;  %834 = vmatpush.msrb.mxu1 %v74_v39  ;;  %v93_v38 = vld [vmem:[%s2161_s0 + $0x270] sm:$0xff]  ;;  %v142_v39 = vld [vmem:[%s2161_s0 + $0x3f8] sm:$0xff] }
  0x7c   :  { %757 = vmatpush.msrb.mxu3 %v24_v40  ;;  %857 = vmatpush.msrb.mxu0 %v282_v41  ;;  %v76_v40 = vld [vmem:[%s2161_s0 + $0x1e8] sm:$0xff]  ;;  %v27_v41 = vld [vmem:[%s2161_s0 + $0x60] sm:$0xff] }
  0x7d   :  { %758 = vmatmul.f32.vlgmr.msrb.gmra.mxu3 %v1327_v0  ;;  %797 = vmatpush.msrb.mxu2 %v25_v42  ;;  %v1109_v42 = vld.sshfl [vmem:[#allocation1 + $0x8] sm:$0xff pattern:$0x75316420] }
  0x7e   :  { %835 = vmatpush.msrb.mxu1 %v58_v43  ;;  %862 = vmatpush.msra.mxu3 %v267_v44  ;;  %v77_v43 = vld [vmem:[%s2161_s0 + $0x1f0] sm:$0xff]  ;;  %v126_v44 = vld [vmem:[%s2161_s0 + $0x378] sm:$0xff] }
  0x7f   :  { %1099 = vmatpush.msk.msra.mxu0 %vm333_vm0, %v315_v45  ;;  %798 = vmatmul.f32.vlgmr.msrb.gmra.mxu2 %v1327_v0  ;;  %v60_v45 = vld [vmem:[%s2161_s0 + $0x168] sm:$0xff] }
  0x80   :  { %836 = vmatpush.msrb.mxu1 %v42_v46  ;;  %1101 = vmatpush.msk.msra.mxu2 %vm333_vm0, %v316_v47  ;;  %v318_v46 = vld [vmem:[%s2161_s0 + $0x978] sm:$0x7]  ;;  %v61_v47 = vld [vmem:[%s2161_s0 + $0x170] sm:$0xff] }
  0x81   :  { %863 = vmatpush.msra.mxu3 %v251_v48  ;;  %896 = vmatpush.msra.mxu0 %v299_v49  ;;  %v110_v48 = vld [vmem:[%s2161_s0 + $0x2f8] sm:$0xff]  ;;  %v44_v49 = vld [vmem:[%s2161_s0 + $0xe8] sm:$0xff] }
  0x82   :  { %837 = vmatpush.msrb.mxu1 %v26_v50  ;;  %936 = vmatpush.msra.mxu2 %v300_v51  ;;  %v45_v51 = vld [vmem:[%s2161_s0 + $0xf0] sm:$0xff] }
  0x83   :  { %864 = vmatpush.msra.mxu3 %v235_v52  ;;  %897 = vmatpush.msra.mxu0 %v283_v53  ;;  %v302_v52 = vld [vmem:[%s2161_s0 + $0x8f8] sm:$0xff] }
  0x84   :  { %838 = vmatmul.f32.vlgmr.msrb.gmra.mxu1 %v1327_v0  ;;  %1098 = vmatmul.msk.f32.vlgmr.msrb.gmra.mxu0 %vm330_vm1, %v1227_v31  ;;  %v236_v31 = vld [vmem:[%s2161_s0 + $0x6e8] sm:$0xff]  ;;  %v94_v53 = vld [vmem:[%s2161_s0 + $0x278] sm:$0xff] }
  0x85   :  { %937 = vmatpush.msra.mxu2 %v284_v54  ;;  %902 = vmatpush.msrb.mxu0 %v268_v55  ;;  %v29_v55 = vld [vmem:[%s2161_s0 + $0x70] sm:$0xff] }
  0x86   :  { %865 = vmatpush.msra.mxu3 %v219_v56  ;;  %1103 = vmatpush.msk.msra.mxu1 %vm333_vm0, %v317_v58  ;;  %v78_v56 = vld [vmem:[%s2161_s0 + $0x1f8] sm:$0xff]  ;;  %v1110_v58 = vld.sshfl [vmem:[#allocation1] sm:$0xff pattern:$0x75316420] }
  0x87   :  { %942 = vmatpush.msrb.mxu2 %v269_v57  ;;  %903 = vmatpush.msrb.mxu0 %v252_v59  ;;  %v286_v57 = vld [vmem:[%s2161_s0 + $0x878] sm:$0xff] }
  0x88   :  { %866 = vmatpush.msra.mxu3 %v203_v60  ;;  %976 = vmatpush.msra.mxu1 %v301_v62  ;;  %v62_v59 = vld [vmem:[%s2161_s0 + $0x178] sm:$0xff] }
  0x89   :  { %943 = vmatpush.msrb.mxu2 %v253_v61  ;;  %904 = vmatpush.msrb.mxu0 %v236_v31  ;;  %v46_v60 = vld [vmem:[%s2161_s0 + $0xf8] sm:$0xff] }
  0x8a   :  { %867 = vmatpush.msra.mxu3 %v187_v63  ;;  %977 = vmatpush.msra.mxu1 %v285_v2  ;;  %v30_v31 = vld [vmem:[%s2161_s0 + $0x78] sm:$0xff] }
  0x8b   :  { %944 = vmatpush.msrb.mxu2 %v237_v1  ;;  %905 = vmatpush.msrb.mxu0 %v220_v3 }
  0x8c   :  { %868 = vmatpush.msra.mxu3 %v171_v4  ;;  %982 = vmatpush.msrb.mxu1 %v270_v6 }
  0x8d   :  { %945 = vmatpush.msrb.mxu2 %v221_v5  ;;  %906 = vmatpush.msrb.mxu0 %v204_v7 }
  0x8e   :  { %869 = vmatpush.msra.mxu3 %v155_v8  ;;  %983 = vmatpush.msrb.mxu1 %v254_v10 }
  0x8f   :  { %946 = vmatpush.msrb.mxu2 %v205_v9  ;;  %907 = vmatpush.msrb.mxu0 %v188_v11 }
  0x90   :  { %870 = vmatpush.msra.mxu3 %v139_v12  ;;  %984 = vmatpush.msrb.mxu1 %v238_v14 }
  0x91   :  { %947 = vmatpush.msrb.mxu2 %v189_v13  ;;  %908 = vmatpush.msrb.mxu0 %v172_v15 }
  0x92   :  { %871 = vmatpush.msra.mxu3 %v123_v16  ;;  %985 = vmatpush.msrb.mxu1 %v222_v18  ;;  %v459_v50 = vpop.f32.mrf.mxu3 }
  0x93   :  { %948 = vmatpush.msrb.mxu2 %v173_v17  ;;  %909 = vmatpush.msrb.mxu0 %v156_v19 }
  0x94   :  { %872 = vmatpush.msra.mxu3 %v107_v20  ;;  %986 = vmatpush.msrb.mxu1 %v206_v22 }
  0x95   :  { %949 = vmatpush.msrb.mxu2 %v157_v21  ;;  %910 = vmatpush.msrb.mxu0 %v140_v23 }
  0x96   :  { %873 = vmatpush.msra.mxu3 %v91_v24  ;;  %987 = vmatpush.msrb.mxu1 %v190_v26 }
  0x97   :  { %950 = vmatpush.msrb.mxu2 %v141_v25  ;;  %911 = vmatpush.msrb.mxu0 %v124_v27 }
  0x98   :  { %874 = vmatpush.msra.mxu3 %v75_v28  ;;  %988 = vmatpush.msrb.mxu1 %v174_v30 }
  0x99   :  { %951 = vmatpush.msrb.mxu2 %v125_v29  ;;  %912 = vmatpush.msrb.mxu0 %v108_v32 }
  0x9a   :  { %875 = vmatpush.msra.mxu3 %v59_v33  ;;  %989 = vmatpush.msrb.mxu1 %v158_v35 }
  0x9b   :  { %952 = vmatpush.msrb.mxu2 %v109_v34  ;;  %913 = vmatpush.msrb.mxu0 %v92_v36 }
  0x9c   :  { %876 = vmatpush.msra.mxu3 %v43_v37  ;;  %1100 = vmatmul.msk.f32.vlgmr.msra.gmra.mxu0 %vm330_vm1, %v1109_v42 }
  0x9d   :  { %953 = vmatpush.msrb.mxu2 %v93_v38  ;;  %990 = vmatpush.msrb.mxu1 %v142_v39 }
  0x9e   :  { %914 = vmatpush.msrb.mxu0 %v76_v40  ;;  %1102 = vmatmul.msk.f32.vlgmr.msra.gmra.mxu2 %vm330_vm1, %v1109_v42 }
  0x9f   :  { %877 = vmatpush.msra.mxu3 %v27_v41  ;;  %954 = vmatpush.msrb.mxu2 %v77_v43 }
  0xa0   :  { %991 = vmatpush.msrb.mxu1 %v126_v44  ;;  %878 = vmatmul.f32.vlgmr.msra.gmra.mxu3 %v1327_v0  ;;  %v28_v0 = vld [vmem:[%s2161_s0 + $0x68] sm:$0xff]  ;;  %v399_v54 = vpop.f32.mrf.mxu0 }
  0xa1   :  { %915 = vmatpush.msrb.mxu0 %v60_v45  ;;  %1105 = vmatpush.msk.msrb.mxu3 %vm333_vm0, %v318_v46 }
  0xa2   :  { %955 = vmatpush.msrb.mxu2 %v61_v47  ;;  %992 = vmatpush.msrb.mxu1 %v110_v48 }
  0xa3   :  { %916 = vmatpush.msrb.mxu0 %v44_v49  ;;  %1016 = vmatpush.msrb.mxu3 %v302_v52 }
  0xa4   :  { %956 = vmatpush.msrb.mxu2 %v45_v51  ;;  %993 = vmatpush.msrb.mxu1 %v94_v53  ;;  %v439_v61 = vpop.f32.mrf.mxu2 }
  0xa5   :  { %917 = vmatpush.msrb.mxu0 %v28_v0  ;;  %1104 = vmatmul.msk.f32.vlgmr.msra.gmra.mxu1 %vm330_vm1, %v1109_v42 }
  0xa6   :  { %918 = vmatmul.f32.vlgmr.msrb.gmra.mxu0 %v1110_v58  ;;  %957 = vmatpush.msrb.mxu2 %v29_v55  ;;  %v479_v8 = vpop.f32.mrf.mxu1 }
  0xa7   :  { %994 = vmatpush.msrb.mxu1 %v78_v56  ;;  %958 = vmatmul.f32.vlgmr.msrb.gmra.mxu2 %v1110_v58  ;;  %v499_v62 = vpop.f32.mrf.mxu3 }
  0xa8   :  { %1017 = vmatpush.msrb.mxu3 %v286_v57 }
  0xa9   :  { %995 = vmatpush.msrb.mxu1 %v62_v59  ;;  %1106 = vmatmul.msk.f32.vlgmr.msrb.gmra.mxu3 %vm330_vm1, %v1109_v42 }
  0xab   :  { %996 = vmatpush.msrb.mxu1 %v46_v60  ;;  %v2111_v63 = vpop.permute.xlu0 %322  ;;  %v419_v3 = vpop.f32.mrf.mxu0 }
  0xac   :  { %v440_v1 = vadd.f32 %v439_v61, %v2111_v63  ;;  %v400_v2 = vadd.f32 %v399_v54, %v2111_v63  ;;  %v480_v11 = vadd.f32 %v479_v8, %v2111_v63 }
  0xad   :  { %997 = vmatpush.msrb.mxu1 %v30_v31 }
  0xae   :  { %998 = vmatmul.f32.vlgmr.msrb.gmra.mxu1 %v1110_v58  ;;  %v460_v4 = vadd.f32 %v459_v50, %v440_v1  ;;  %v420_v5 = vadd.f32 %v419_v3, %v400_v2  ;;  %v500_v14 = vadd.f32 %v499_v62, %v480_v11 }
  0xb0   :  { %v1038_v6 = vrot.slane %v460_v4, 4 }
  0xb2   :  { %v1047_v7 = vsel %vm1046_vm2, %v420_v5, %v1038_v6  ;;  %v619_v17 = vpop.f32.mrf.mxu1 }
  0xb3   :  { %1063 = vst [vmem:[%s2164_s3] sm:$0x77] %v1047_v7  ;;  %v519_v9 = vpop.f32.mrf.mxu3 }
  0xb4   :  { %v520_v10 = vadd.f32 %v519_v9, %v2111_v63 }
  0xb7   :  { %v539_v12 = vpop.f32.mrf.mxu0 }
  0xb8   :  { %v540_v13 = vadd.f32 %v539_v12, %v520_v10 }
  0xba   :  { %v1039_v15 = vrot.slane %v540_v13, 4 }
  0xbc   :  { %v1048_v16 = vsel %vm1046_vm2, %v500_v14, %v1039_v15 }
  0xbd   :  { %1064 = vst [vmem:[%s2164_s3 + $0x8] sm:$0x77] %v1048_v16 }
  0xcb   :  { %v559_v19 = vpop.f32.mrf.mxu2 }
  0xcc   :  { %v659_v18 = vpop.f32.mrf.mxu1  ;;  %v560_v21 = vadd.f32 %v559_v19, %v2111_v63 }
  0xcf   :  { %v579_v23 = vpop.f32.mrf.mxu3 }
  0xd0   :  { %v580_v25 = vadd.f32 %v579_v23, %v560_v21 }
  0xd1   :  { %v599_v20 = vpop.f32.mrf.mxu0 }
  0xd2   :  { %v600_v22 = vadd.f32 %v599_v20, %v2111_v63 }
  0xd4   :  { %v620_v24 = vadd.f32 %v619_v17, %v600_v22 }
  0xd5   :  { %v699_v30 = vpop.f32.mrf.mxu2 }
  0xd6   :  { %v1040_v26 = vrot.slane %v620_v24, 4  ;;  %v679_v27 = vpop.f32.mrf.mxu1 }
  0xd7   :  { %v680_v29 = vadd.f32 %v679_v27, %v2111_v63 }
  0xd8   :  { %v1049_v28 = vsel %vm1046_vm2, %v580_v25, %v1040_v26 }
  0xd9   :  { %1065 = vst [vmem:[%s2164_s3 + $0x10] sm:$0x77] %v1049_v28  ;;  %v700_v32 = vadd.f32 %v699_v30, %v680_v29 }
  0xdb   :  { %v1041_v35 = vrot.slane %v700_v32, 4 }
  0xdd   :  { %v639_v33 = vpop.f32.mrf.mxu3 }
  0xde   :  { %v640_v34 = vadd.f32 %v639_v33, %v2111_v63 }
  0xe0   :  { %v660_v36 = vadd.f32 %v659_v18, %v640_v34  ;;  %v739_v38 = vpop.f32.mrf.mxu2 }
  0xe2   :  { %v1050_v37 = vsel %vm1046_vm2, %v660_v36, %v1041_v35 }
  0xe3   :  { %1066 = vst [vmem:[%s2164_s3 + $0x18] sm:$0x77] %v1050_v37 }
  0xf4   :  { %v719_v41 = vpop.f32.mrf.mxu0 }
  0xf5   :  { %v720_v43 = vadd.f32 %v719_v41, %v2111_v63 }
  0xf7   :  { %v819_v39 = vpop.f32.mrf.mxu1  ;;  %v740_v52 = vadd.f32 %v739_v38, %v720_v43 }
  0xf8   :  { %v779_v40 = vpop.f32.mrf.mxu2 }
 0x100   :  { %v759_v42 = vpop.f32.mrf.mxu3 }
 0x101   :  { %v839_v44 = vpop.f32.mrf.mxu1  ;;  %v760_v45 = vadd.f32 %v759_v42, %v2111_v63  ;;  %v859_v47 = vpop.f32.mrf.mxu0 }
 0x102   :  { %v840_v46 = vadd.f32 %v839_v44, %v2111_v63  ;;  %v799_v49 = vpop.f32.mrf.mxu2 }
 0x103   :  { %v780_v48 = vadd.f32 %v779_v40, %v760_v45  ;;  %v800_v50 = vadd.f32 %v799_v49, %v2111_v63 }
 0x104   :  { %v860_v51 = vadd.f32 %v859_v47, %v840_v46 }
 0x105   :  { %v1042_v53 = vrot.slane %v780_v48, 4  ;;  %v820_v0 = vadd.f32 %v819_v39, %v800_v50 }
 0x106   :  { %v1043_v54 = vrot.slane %v860_v51, 4 }
 0x107   :  { %v1051_v55 = vsel %vm1046_vm2, %v740_v52, %v1042_v53 }
 0x108   :  { %1067 = vst [vmem:[%s2164_s3 + $0x20] sm:$0x77] %v1051_v55  ;;  %v1052_v56 = vsel %vm1046_vm2, %v820_v0, %v1043_v54 }
 0x109   :  { %1068 = vst [vmem:[%s2164_s3 + $0x28] sm:$0x77] %v1052_v56 }
 0x119   :  { %v899_v57 = vpop.f32.mrf.mxu0 }
 0x121   :  { %v939_v58 = vpop.f32.mrf.mxu2 }
 0x122   :  { %v979_v59 = vpop.f32.mrf.mxu1 }
 0x123   :  { %v919_v60 = vpop.f32.mrf.mxu0  ;;  %v879_v62 = vpop.f32.mrf.mxu3 }
 0x124   :  { %v920_v61 = vadd.f32 %v919_v60, %v2111_v63  ;;  %v880_v31 = vadd.f32 %v879_v62, %v2111_v63 }
 0x126   :  { %v940_v1 = vadd.f32 %v939_v58, %v920_v61  ;;  %v900_v2 = vadd.f32 %v899_v57, %v880_v31 }
 0x128   :  { %v1044_v3 = vrot.slane %v940_v1, 4 }
 0x12a   :  { %v1053_v4 = vsel %vm1046_vm2, %v900_v2, %v1044_v3  ;;  %v959_v5 = vpop.f32.mrf.mxu2 }
 0x12b   :  { %1069 = vst [vmem:[%s2164_s3 + $0x30] sm:$0x77] %v1053_v4  ;;  %v999_v6 = vpop.f32.mrf.mxu1  ;;  %v960_v7 = vadd.f32 %v959_v5, %v2111_v63 }
 0x12c   :  { %v1000_v8 = vadd.f32 %v999_v6, %v2111_v63  ;;  %v1019_v9 = vpop.f32.mrf.mxu3 }
 0x12d   :  { %v980_v11 = vadd.f32 %v979_v59, %v960_v7 }
 0x12e   :  { %v1020_v10 = vadd.f32 %v1019_v9, %v1000_v8 }
 0x130   :  { %v1045_v12 = vrot.slane %v1020_v10, 4 }
 0x132   :  { %v1054_v13 = vsel %vm1046_vm2, %v980_v11, %v1045_v12 }
 0x133   :  { %1070 = vst [vmem:[%s2164_s3 + $0x38] sm:$0x77] %v1054_v13 }

// kernel: feature_extractor_forward.25
= control target key start
LH: loop header
LB: loop body
LE: loop exit
PB: predicated region body
PF: predicated region fallthrough
CT: control target
= control target key end

     0   :  { %v157_v0 = vmov 0   ;;  %vm73_vm0 = vcmask 1042432   ;;  %vm144_vm4 = vcmask 1043456   ;;  %s230_s1 = inlined_call_operand.vmem [shape: f32[3,1], index: 1, kind: input, shape index: {}]   ;;  %s231_s2 = inlined_call_operand.vmem [shape: f32[3,1], index: 2, kind: input, shape index: {}]   ;;  %s232_s0 = inlined_call_operand.vmem [shape: f32[4,3,512], index: 0, kind: input, shape index: {}]   ;;  %s233_s3 = inlined_call_operand.vmem [shape: f32[3,512], index: 3, kind: output, shape index: {}]  }
   0x1   :  { %156 = vset.pattern.permute.xlu0 %v157_v0  ;;  %v106_v1 = vld [vmem:[%s230_s1] sm:$0x7]  ;;  %v15_v4 = vld [vmem:[%s232_s0 + $0x8] sm:$0x77]  ;;  %v16_v5 = vld [vmem:[%s232_s0 + $0x10] sm:$0x77] }
   0x2   :  { %109 = vperm.xlu0 %156, %v106_v1   ;;  %v116_v2 = vld [vmem:[%s231_s2] sm:$0x7]  ;;  %v17_v6 = vld [vmem:[%s232_s0 + $0x18] sm:$0x77]  ;;  %32 = vst [vmem:[#allocation1 + $0x10] ss:$2 sm:$0xff] %v15_v4 }
   0x3   :  { %v14_v3 = vld [vmem:[%s232_s0] sm:$0x77]  ;;  %38 = vst [vmem:[#allocation1 + $0x20] ss:$2 sm:$0xff] %v16_v5  ;;  %v19_v10 = vld [vmem:[%s232_s0 + $0x28] sm:$0x77] }
   0x4   :  { %30 = vst [vmem:[#allocation1] ss:$2 sm:$0xff] %v14_v3  ;;  %v18_v7 = vld [vmem:[%s232_s0 + $0x20] sm:$0x77]  ;;  %v20_v11 = vld [vmem:[%s232_s0 + $0x30] sm:$0x77] }
   0x5   :  { %40 = vst [vmem:[#allocation1 + $0x30] ss:$2 sm:$0xff] %v17_v6  ;;  %v21_v12 = vld [vmem:[%s232_s0 + $0x38] sm:$0x77] }
   0x9   :  { %v35_v13 = vld.sshfl [vmem:[#allocation1 + $0x10] sm:$0xff pattern:$0x75316420]  ;;  %v36_v14 = vld.sshfl [vmem:[#allocation1 + $0x18] sm:$0xff pattern:$0x75316420] }
   0xa   :  { %119 = vperm.xlu0 %156, %v116_v2   ;;  %v41_v15 = vld.sshfl [vmem:[#allocation1 + $0x20] sm:$0xff pattern:$0x75316420]  ;;  %v42_v16 = vld.sshfl [vmem:[#allocation1 + $0x28] sm:$0xff pattern:$0x75316420] }
   0xb   :  { %v33_v8 = vld.sshfl [vmem:[#allocation1] sm:$0xff pattern:$0x75316420]  ;;  %v34_v9 = vld.sshfl [vmem:[#allocation1 + $0x8] sm:$0xff pattern:$0x75316420] }
   0xc   :  { %45 = vst [vmem:[#allocation1] ss:$2 sm:$0xff] %v18_v7  ;;  %v43_v17 = vld.sshfl [vmem:[#allocation1 + $0x30] sm:$0xff pattern:$0x75316420]  ;;  %v74_v19 = vsel %vm73_vm0, %v33_v8, 0.0 }
   0xd   :  { %v44_v18 = vld.sshfl [vmem:[#allocation1 + $0x38] sm:$0xff pattern:$0x75316420]  ;;  %46 = vst [vmem:[#allocation1 + $0x10] ss:$2 sm:$0xff] %v19_v10  ;;  %v75_v20 = vsel %vm73_vm0, %v41_v15, 0.0 }
   0xe   :  { %51 = vst [vmem:[#allocation1 + $0x20] ss:$2 sm:$0xff] %v20_v11  ;;  %v81_v22 = vsel %vm73_vm0, %v34_v9, 0.0  ;;  %v82_v23 = vsel %vm73_vm0, %v42_v16, 0.0  ;;  %v88_v24 = vsel %vm73_vm0, %v35_v13, 0.0  ;;  %v89_v26 = vsel %vm73_vm0, %v43_v17, 0.0 }
   0xf   :  { %52 = vst [vmem:[#allocation1 + $0x30] ss:$2 sm:$0xff] %v21_v12  ;;  %v95_v27 = vsel %vm73_vm0, %v36_v14, 0.0  ;;  %v96_v28 = vsel %vm73_vm0, %v44_v18, 0.0  ;;  %v76_v31 = vadd.f32 %v75_v20, %v74_v19  ;;  %v83_v34 = vadd.f32 %v82_v23, %v81_v22 }
  0x10   :  { %v90_v35 = vadd.f32 %v89_v26, %v88_v24  ;;  %v97_v36 = vadd.f32 %v96_v28, %v95_v27 }
  0x13   :  { %v47_v21 = vld.sshfl [vmem:[#allocation1] sm:$0xff pattern:$0x75316420]  ;;  %v48_v25 = vld.sshfl [vmem:[#allocation1 + $0x8] sm:$0xff pattern:$0x75316420] }
  0x14   :  { %v49_v29 = vld.sshfl [vmem:[#allocation1 + $0x10] sm:$0xff pattern:$0x75316420]  ;;  %v50_v30 = vld.sshfl [vmem:[#allocation1 + $0x18] sm:$0xff pattern:$0x75316420] }
  0x15   :  { %v53_v32 = vld.sshfl [vmem:[#allocation1 + $0x20] sm:$0xff pattern:$0x75316420]  ;;  %v77_v33 = vsel %vm73_vm0, %v47_v21, 0.0  ;;  %v84_v38 = vsel %vm73_vm0, %v48_v25, 0.0  ;;  %v91_v39 = vsel %vm73_vm0, %v49_v29, 0.0 }
  0x16   :  { %v54_v37 = vld.sshfl [vmem:[#allocation1 + $0x28] sm:$0xff pattern:$0x75316420]  ;;  %v98_v40 = vsel %vm73_vm0, %v50_v30, 0.0  ;;  %v78_v43 = vadd.f32 %v77_v33, %v76_v31  ;;  %v85_v44 = vadd.f32 %v84_v38, %v83_v34  ;;  %v92_v45 = vadd.f32 %v91_v39, %v90_v35 }
  0x17   :  { %v55_v41 = vld.sshfl [vmem:[#allocation1 + $0x30] sm:$0xff pattern:$0x75316420]  ;;  %v56_v42 = vld.sshfl [vmem:[#allocation1 + $0x38] sm:$0xff pattern:$0x75316420]  ;;  %v99_v46 = vadd.f32 %v98_v40, %v97_v36 }
  0x18   :  { %v79_v47 = vsel %vm73_vm0, %v53_v32, 0.0  ;;  %v86_v48 = vsel %vm73_vm0, %v54_v37, 0.0  ;;  %v93_v49 = vsel %vm73_vm0, %v55_v41, 0.0  ;;  %v100_v50 = vsel %vm73_vm0, %v56_v42, 0.0 }
  0x19   :  { %v80_v51 = vadd.f32 %v79_v47, %v78_v43  ;;  %v87_v52 = vadd.f32 %v86_v48, %v85_v44  ;;  %v94_v53 = vadd.f32 %v93_v49, %v92_v45  ;;  %v101_v54 = vadd.f32 %v100_v50, %v99_v46 }
  0x1b   :  { %v102_v56 = vmul.f32 0.25, %v80_v51  ;;  %v103_v57 = vmul.f32 0.25, %v87_v52  ;;  %v104_v58 = vmul.f32 0.25, %v94_v53  ;;  %v105_v59 = vmul.f32 0.25, %v101_v54 }
  0x74   :  { %v110_v55 = vpop.permute.xlu0 %109 }
  0x75   :  { %v112_v60 = vmul.f32 %v110_v55, %v102_v56  ;;  %v113_v61 = vmul.f32 %v110_v55, %v103_v57  ;;  %v114_v62 = vmul.f32 %v110_v55, %v104_v58  ;;  %v115_v63 = vmul.f32 %v110_v55, %v105_v59 }
  0x7c   :  { %v120_v0 = vpop.permute.xlu0 %119 }
  0x7d   :  { %v122_v1 = vadd.f32 %v120_v0, %v112_v60  ;;  %v123_v2 = vadd.f32 %v120_v0, %v113_v61  ;;  %v124_v3 = vadd.f32 %v120_v0, %v114_v62  ;;  %v125_v4 = vadd.f32 %v120_v0, %v115_v63 }
  0x7f   :  { %vm127_vm1 = vcmp.gt.f32.partialorder %v123_v2, 0.0  ;;  %vm129_vm2 = vcmp.gt.f32.partialorder %v125_v4, 0.0  ;;  %v130_v5 = vmul.f32 0.2, %v122_v1  ;;  %v131_v6 = vmul.f32 0.2, %v123_v2 }
  0x80   :  { %vm126_vm3 = vcmp.gt.f32.partialorder %v122_v1, 0.0  ;;  %v132_v7 = vmul.f32 0.2, %v124_v3  ;;  %v133_v8 = vmul.f32 0.2, %v125_v4  ;;  %vm128_vm5 = vcmp.gt.f32.partialorder %v124_v3, 0.0 }
  0x81   :  { %v135_v9 = vsel %vm127_vm1, %v123_v2, %v131_v6  ;;  %v134_v12 = vsel %vm126_vm3, %v122_v1, %v130_v5 }
  0x82   :  { %v137_v10 = vsel %vm129_vm2, %v125_v4, %v133_v8  ;;  %v142_v11 = vrot.slane %v135_v9, 4  ;;  %v136_v14 = vsel %vm128_vm5, %v124_v3, %v132_v7 }
  0x83   :  { %v143_v13 = vrot.slane %v137_v10, 4 }
  0x84   :  { %v145_v15 = vsel %vm144_vm4, %v134_v12, %v142_v11 }
  0x85   :  { %v146_v16 = vsel %vm144_vm4, %v136_v14, %v143_v13  ;;  %149 = vst [vmem:[%s233_s3] sm:$0x77] %v145_v15 }
  0x86   :  { %150 = vst [vmem:[%s233_s3 + $0x8] sm:$0x77] %v146_v16 }

// kernel: feature_extractor_forward.26
= control target key start
LH: loop header
LB: loop body
LE: loop exit
PB: predicated region body
PF: predicated region fallthrough
CT: control target
= control target key end

     0   :  { %vm35_vm0 = vcmask 1042432   ;;  %v68_v2 = vmov 0   ;;  %vm31_vm1 = vcmask 613376   ;;  %s128_s0 = inlined_call_operand.vmem [shape: f32[75,128], index: 0, kind: input, shape index: {}]   ;;  %s129_s2 = inlined_call_operand.vmem [shape: f32[5,1], index: 2, kind: input, shape index: {}]   ;;  %s130_s1 = inlined_call_operand.vmem [shape: f32[5,75], index: 1, kind: input, shape index: {}]   ;;  %s131_s3 = inlined_call_operand.vmem [shape: f32[5,128], index: 3, kind: output, shape index: {}]  }
   0x1   :  { %v24_v0 = vld [vmem:[%s128_s0 + $0x48] sm:$0x7]  ;;  %v23_v1 = vld [vmem:[%s128_s0 + $0x40] sm:$0xff]  ;;  %67 = vset.pattern.permute.xlu0 %v68_v2  ;;  %v22_v3 = vld [vmem:[%s128_s0 + $0x38] sm:$0xff] }
   0x2   :  { %64 = vmatpush.msk.msra.mxu0 %vm35_vm0, %v24_v0  ;;  %v25_v4 = vld [vmem:[%s129_s2] sm:$0x1f]  ;;  %v21_v5 = vld [vmem:[%s128_s0 + $0x30] sm:$0xff]  ;;  %v20_v6 = vld [vmem:[%s128_s0 + $0x28] sm:$0xff] }
   0x3   :  { %28 = vperm.xlu0 %67, %v25_v4   ;;  %v19_v7 = vld [vmem:[%s128_s0 + $0x20] sm:$0xff]  ;;  %v18_v8 = vld [vmem:[%s128_s0 + $0x18] sm:$0xff]  ;;  %v17_v9 = vld [vmem:[%s128_s0 + $0x10] sm:$0xff] }
   0x4   :  { %46 = vmatpush.msra.mxu0 %v23_v1  ;;  %v16_v10 = vld [vmem:[%s128_s0 + $0x8] sm:$0xff]  ;;  %v15_v11 = vld [vmem:[%s128_s0] sm:$0xff] }
   0x5   :  { %v14_v12 = vld [vmem:[%s130_s1] sm:$0x1f] }
   0x6   :  { %47 = vmatpush.msra.mxu0 %v22_v3 }
   0x8   :  { %48 = vmatpush.msra.mxu0 %v21_v5 }
   0xa   :  { %49 = vmatpush.msra.mxu0 %v20_v6 }
   0xc   :  { %50 = vmatpush.msra.mxu0 %v19_v7 }
   0xe   :  { %51 = vmatpush.msra.mxu0 %v18_v8 }
  0x10   :  { %52 = vmatpush.msra.mxu0 %v17_v9 }
  0x12   :  { %53 = vmatpush.msra.mxu0 %v16_v10 }
  0x14   :  { %54 = vmatpush.msra.mxu0 %v15_v11 }
  0x15   :  { %65 = vmatmul.msk.f32.vlgmr.msra.gmra.mxu0 %vm31_vm1, %v14_v12 }
  0x75   :  { %v29_v13 = vpop.permute.xlu0 %28 }
  0x92   :  { %v56_v14 = vpop.f32.mrf.mxu0 }
  0x93   :  { %v57_v15 = vadd.f32 %v56_v14, %v29_v13 }
  0x95   :  { %59 = vst [vmem:[%s131_s3] sm:$0x1f] %v57_v15 }

// kernel: feature_extractor_forward.27
= control target key start
LH: loop header
LB: loop body
LE: loop exit
PB: predicated region body
PF: predicated region fallthrough
CT: control target
= control target key end

     0   :  { %v51_v0 = vmov 0   ;;  %vm18_vm0 = vcmask 258048   ;;  %s98_s1 = inlined_call_operand.vmem [shape: f32[5,1], index: 1, kind: input, shape index: {}]   ;;  %s99_s2 = inlined_call_operand.vmem [shape: f32[5,1], index: 2, kind: input, shape index: {}]   ;;  %s100_s0 = inlined_call_operand.vmem [shape: f32[4,5,32], index: 0, kind: input, shape index: {}]   ;;  %s101_s3 = inlined_call_operand.vmem [shape: f32[5,32], index: 3, kind: output, shape index: {}]  }
   0x1   :  { %50 = vset.pattern.permute.xlu0 %v51_v0  ;;  %v27_v1 = vld [vmem:[%s98_s1] sm:$0x1f]  ;;  %v15_v4 = vld [vmem:[%s100_s0 + $0x8] sm:$0x1f]  ;;  %v16_v7 = vld [vmem:[%s100_s0 + $0x10] sm:$0x1f] }
   0x2   :  { %30 = vperm.xlu0 %50, %v27_v1   ;;  %v34_v2 = vld [vmem:[%s99_s2] sm:$0x1f]  ;;  %v20_v6 = vsel %vm18_vm0, %v15_v4, 0.0  ;;  %v22_v9 = vsel %vm18_vm0, %v16_v7, 0.0  ;;  %v17_v10 = vld [vmem:[%s100_s0 + $0x18] sm:$0x1f] }
   0x3   :  { %v14_v3 = vld [vmem:[%s100_s0] sm:$0x1f]  ;;  %v24_v12 = vsel %vm18_vm0, %v17_v10, 0.0 }
   0x4   :  { %v19_v5 = vsel %vm18_vm0, %v14_v3, 0.0 }
   0x5   :  { %v21_v8 = vadd.f32 %v20_v6, %v19_v5 }
   0x7   :  { %v23_v11 = vadd.f32 %v22_v9, %v21_v8 }
   0x9   :  { %v25_v13 = vadd.f32 %v24_v12, %v23_v11 }
   0xa   :  { %37 = vperm.xlu0 %50, %v34_v2  }
   0xb   :  { %v26_v15 = vmul.f32 0.25, %v25_v13 }
  0x74   :  { %v31_v14 = vpop.permute.xlu0 %30 }
  0x75   :  { %v33_v16 = vmul.f32 %v31_v14, %v26_v15 }
  0x7c   :  { %v38_v17 = vpop.permute.xlu0 %37 }
  0x7d   :  { %v40_v18 = vadd.f32 %v38_v17, %v33_v16 }
  0x7f   :  { %vm41_vm1 = vcmp.gt.f32.partialorder %v40_v18, 0.0  ;;  %v42_v19 = vmul.f32 0.2, %v40_v18 }
  0x81   :  { %v43_v20 = vsel %vm41_vm1, %v40_v18, %v42_v19 }
  0x82   :  { %44 = vst.msk [vmem:[%s101_s3] sm:$0x1f] %vm18_vm0, %v43_v20 }

// kernel: feature_extractor_forward.28
= control target key start
LH: loop header
LB: loop body
LE: loop exit
PB: predicated region body
PF: predicated region fallthrough
CT: control target
= control target key end

     0   :  { %vm31_vm0 = vcmask 1043456   ;;  %v97_v3 = vmov 0   ;;  %vm27_vm1 = vcmask 162816   ;;  %vm85_vm4 = vcmask 932864   ;;  %s148_s0 = inlined_call_operand.vmem [shape: f32[20,242], index: 0, kind: input, shape index: {}]   ;;  %s149_s2 = inlined_call_operand.vmem [shape: f32[8,1], index: 2, kind: input, shape index: {}]   ;;  %s150_s1 = inlined_call_operand.vmem [shape: f32[8,20], index: 1, kind: input, shape index: {}]   ;;  %s151_s3 = inlined_call_operand.vmem [shape: f32[8,242], index: 3, kind: output, shape index: {}]  }
   0x1   :  { %v19_v0 = vld [vmem:[%s148_s0 + $0x20] sm:$0xf]  ;;  %v20_v1 = vld [vmem:[%s148_s0 + $0x28] sm:$0xf]  ;;  %v17_v2 = vld [vmem:[%s148_s0 + $0x10] sm:$0xff]  ;;  %96 = vset.pattern.permute.xlu0 %v97_v3 }
   0x2   :  { %91 = vmatpush.msk.msra.mxu0 %vm31_vm0, %v19_v0  ;;  %93 = vmatpush.msk.msra.mxu1 %vm31_vm0, %v20_v1  ;;  %v18_v4 = vld [vmem:[%s148_s0 + $0x18] sm:$0xff]  ;;  %v15_v5 = vld [vmem:[%s148_s0] sm:$0xff]  ;;  %v16_v6 = vld [vmem:[%s148_s0 + $0x8] sm:$0xff] }
   0x3   :  { %v21_v7 = vld [vmem:[%s149_s2] sm:$0xff] }
   0x4   :  { %52 = vmatpush.msra.mxu0 %v17_v2  ;;  %72 = vmatpush.msra.mxu1 %v18_v4  ;;  %v14_v8 = vld [vmem:[%s150_s1] sm:$0xff] }
   0x5   :  { %24 = vperm.xlu0 %96, %v21_v7  }
   0x6   :  { %53 = vmatpush.msra.mxu0 %v15_v5  ;;  %73 = vmatpush.msra.mxu1 %v16_v6 }
   0x7   :  { %92 = vmatmul.msk.f32.vlgmr.msra.gmra.mxu0 %vm27_vm1, %v14_v8  ;;  %94 = vmatmul.msk.f32.vlgmr.msra.gmra.mxu1 %vm27_vm1, %v14_v8 }
  0x77   :  { %v25_v9 = vpop.permute.xlu0 %24 }
  0x84   :  { %v55_v10 = vpop.f32.mrf.mxu0  ;;  %v75_v11 = vpop.f32.mrf.mxu1 }
  0x85   :  { %v56_v12 = vadd.f32 %v55_v10, %v25_v9  ;;  %v76_v13 = vadd.f32 %v75_v11, %v25_v9 }
  0x87   :  { %vm78_vm2 = vcmp.gt.f32.partialorder %v56_v12, 0.0  ;;  %v80_v14 = vmul.f32 0.2, %v56_v12  ;;  %vm79_vm3 = vcmp.gt.f32.partialorder %v76_v13, 0.0  ;;  %v81_v15 = vmul.f32 0.2, %v76_v13 }
  0x89   :  { %v82_v16 = vsel %vm78_vm2, %v56_v12, %v80_v14  ;;  %v83_v17 = vsel %vm79_vm3, %v76_v13, %v81_v15 }
  0x8a   :  { %84 = vst [vmem:[%s151_s3] sm:$0xff] %v82_v16 }
  0x8b   :  { %86 = vst.msk [vmem:[%s151_s3 + $0x8] sm:$0xff] %vm85_vm4, %v83_v17 }

// kernel: feature_extractor_forward.29
= control target key start
LH: loop header
LB: loop body
LE: loop exit
PB: predicated region body
PF: predicated region fallthrough
CT: control target
= control target key end

     0   :  { %v132_v3 = vmov 0   ;;  %vm46_vm0 = vcmask 588800   ;;  %vm100_vm1 = vcmask 932864   ;;  %s231_s0 = inlined_call_operand.vmem [shape: f32[72,242], index: 0, kind: input, shape index: {}]   ;;  %s232_s1 = inlined_call_operand.vmem [shape: f32[16,72], index: 1, kind: input, shape index: {}]   ;;  %s233_s2 = inlined_call_operand.vmem [shape: f32[16,1], index: 2, kind: input, shape index: {}]   ;;  %s234_s3 = inlined_call_operand.vmem [shape: f32[16,242], index: 3, kind: output, shape index: {}]  }
   0x1   :  { %v32_v0 = vld [vmem:[%s231_s0 + $0x80] sm:$0xff]  ;;  %v33_v1 = vld [vmem:[%s231_s0 + $0x88] sm:$0xff]  ;;  %v30_v2 = vld [vmem:[%s231_s0 + $0x70] sm:$0xff]  ;;  %131 = vset.pattern.permute.xlu0 %v132_v3 }
   0x2   :  { %60 = vmatpush.msra.mxu0 %v32_v0  ;;  %112 = vmatpush.msra.mxu2 %v32_v0  ;;  %v31_v4 = vld [vmem:[%s231_s0 + $0x78] sm:$0xff]  ;;  %v28_v5 = vld [vmem:[%s231_s0 + $0x60] sm:$0xff]  ;;  %v29_v6 = vld [vmem:[%s231_s0 + $0x68] sm:$0xff] }
   0x3   :  { %83 = vmatpush.msra.mxu1 %v33_v1  ;;  %121 = vmatpush.msra.mxu3 %v33_v1  ;;  %v26_v7 = vld [vmem:[%s231_s0 + $0x50] sm:$0xff]  ;;  %v27_v8 = vld [vmem:[%s231_s0 + $0x58] sm:$0xff]  ;;  %v24_v9 = vld [vmem:[%s231_s0 + $0x40] sm:$0xff] }
   0x4   :  { %61 = vmatpush.msra.mxu0 %v30_v2  ;;  %113 = vmatpush.msra.mxu2 %v30_v2  ;;  %v25_v10 = vld [vmem:[%s231_s0 + $0x48] sm:$0xff]  ;;  %v22_v11 = vld [vmem:[%s231_s0 + $0x30] sm:$0xff]  ;;  %v23_v12 = vld [vmem:[%s231_s0 + $0x38] sm:$0xff] }
   0x5   :  { %84 = vmatpush.msra.mxu1 %v31_v4  ;;  %122 = vmatpush.msra.mxu3 %v31_v4  ;;  %v20_v13 = vld [vmem:[%s231_s0 + $0x20] sm:$0xff]  ;;  %v21_v14 = vld [vmem:[%s231_s0 + $0x28] sm:$0xff]  ;;  %v18_v15 = vld [vmem:[%s231_s0 + $0x10] sm:$0xff] }
   0x6   :  { %62 = vmatpush.msra.mxu0 %v28_v5  ;;  %114 = vmatpush.msra.mxu2 %v28_v5  ;;  %v19_v16 = vld [vmem:[%s231_s0 + $0x18] sm:$0xff]  ;;  %v16_v17 = vld [vmem:[%s231_s0] sm:$0xff]  ;;  %v17_v18 = vld [vmem:[%s231_s0 + $0x8] sm:$0xff] }
   0x7   :  { %85 = vmatpush.msra.mxu1 %v29_v6  ;;  %123 = vmatpush.msra.mxu3 %v29_v6  ;;  %v14_v19 = vld [vmem:[%s232_s1] sm:$0xff]  ;;  %v15_v20 = vld [vmem:[%s232_s1 + $0x8] sm:$0xff] }
   0x8   :  { %63 = vmatpush.msra.mxu0 %v26_v7  ;;  %115 = vmatpush.msra.mxu2 %v26_v7  ;;  %v34_v21 = vld [vmem:[%s233_s2] sm:$0xff]  ;;  %v35_v22 = vld [vmem:[%s233_s2 + $0x8] sm:$0xff] }
   0x9   :  { %86 = vmatpush.msra.mxu1 %v27_v8  ;;  %124 = vmatpush.msra.mxu3 %v27_v8 }
   0xa   :  { %64 = vmatpush.msra.mxu0 %v24_v9  ;;  %116 = vmatpush.msra.mxu2 %v24_v9 }
   0xb   :  { %87 = vmatpush.msra.mxu1 %v25_v10  ;;  %125 = vmatpush.msra.mxu3 %v25_v10 }
   0xc   :  { %65 = vmatpush.msra.mxu0 %v22_v11  ;;  %117 = vmatpush.msra.mxu2 %v22_v11 }
   0xd   :  { %88 = vmatpush.msra.mxu1 %v23_v12  ;;  %126 = vmatpush.msra.mxu3 %v23_v12 }
   0xe   :  { %66 = vmatpush.msra.mxu0 %v20_v13  ;;  %118 = vmatpush.msra.mxu2 %v20_v13 }
   0xf   :  { %89 = vmatpush.msra.mxu1 %v21_v14  ;;  %127 = vmatpush.msra.mxu3 %v21_v14 }
  0x10   :  { %67 = vmatpush.msra.mxu0 %v18_v15  ;;  %119 = vmatpush.msra.mxu2 %v18_v15 }
  0x11   :  { %90 = vmatpush.msra.mxu1 %v19_v16  ;;  %128 = vmatpush.msra.mxu3 %v19_v16 }
  0x12   :  { %68 = vmatpush.msra.mxu0 %v16_v17  ;;  %120 = vmatpush.msra.mxu2 %v16_v17 }
  0x13   :  { %91 = vmatpush.msra.mxu1 %v17_v18  ;;  %129 = vmatpush.msra.mxu3 %v17_v18 }
  0x14   :  { %108 = vmatmul.msk.f32.vlgmr.msra.gmra.mxu0 %vm46_vm0, %v14_v19  ;;  %109 = vmatmul.msk.f32.vlgmr.msra.gmra.mxu2 %vm46_vm0, %v15_v20 }
  0x15   :  { %110 = vmatmul.msk.f32.vlgmr.msra.gmra.mxu1 %vm46_vm0, %v14_v19  ;;  %111 = vmatmul.msk.f32.vlgmr.msra.gmra.mxu3 %vm46_vm0, %v15_v20 }
  0x16   :  { %38 = vperm.xlu0 %131, %v34_v21  }
  0x1e   :  { %43 = vperm.xlu0 %131, %v35_v22  }
  0x88   :  { %v39_v23 = vpop.permute.xlu0 %38 }
  0x90   :  { %v44_v28 = vpop.permute.xlu0 %43 }
  0x91   :  { %v70_v24 = vpop.f32.mrf.mxu0 }
  0x92   :  { %v71_v25 = vadd.f32 %v70_v24, %v39_v23  ;;  %v93_v26 = vpop.f32.mrf.mxu1 }
  0x93   :  { %v94_v27 = vadd.f32 %v93_v26, %v39_v23 }
  0x94   :  { %99 = vst [vmem:[%s234_s3] sm:$0xff] %v71_v25 }
  0x95   :  { %101 = vst.msk [vmem:[%s234_s3 + $0x8] sm:$0xff] %vm100_vm1, %v94_v27 }
  0x97   :  { %v73_v29 = vpop.f32.mrf.mxu2 }
  0x98   :  { %v74_v30 = vadd.f32 %v73_v29, %v44_v28  ;;  %v96_v31 = vpop.f32.mrf.mxu3 }
  0x99   :  { %v97_v32 = vadd.f32 %v96_v31, %v44_v28 }
  0x9a   :  { %102 = vst [vmem:[%s234_s3 + $0x10] sm:$0xff] %v74_v30 }
  0x9b   :  { %103 = vst.msk [vmem:[%s234_s3 + $0x18] sm:$0xff] %vm100_vm1, %v97_v32 }

// kernel: feature_extractor_forward.30
= control target key start
LH: loop header
LB: loop body
LE: loop exit
PB: predicated region body
PF: predicated region fallthrough
CT: control target
= control target key end

     0   :  { %v235_v15 = vmov 0   ;;  %vm82_vm0 = vcmask 130048   ;;  %vm212_vm1 = vcmask 932864   ;;  %s436_s0 = inlined_call_operand.vmem [shape: f32[144,242], index: 0, kind: input, shape index: {}]   ;;  %s437_s1 = inlined_call_operand.vmem [shape: f32[32,144], index: 1, kind: input, shape index: {}]   ;;  %s438_s2 = inlined_call_operand.vmem [shape: f32[32,1], index: 2, kind: input, shape index: {}]   ;;  %s439_s3 = inlined_call_operand.vmem [shape: f32[32,242], index: 3, kind: output, shape index: {}]  }
   0x1   :  { %v52_v0 = vld [vmem:[%s436_s0 + $0xf0] sm:$0xff]  ;;  %v53_v1 = vld [vmem:[%s436_s0 + $0xf8] sm:$0xff]  ;;  %v50_v2 = vld [vmem:[%s436_s0 + $0xe0] sm:$0xff]  ;;  %233 = vset.pattern.permute.xlu0 %v235_v15  ;;  %234 = vset.pattern.permute.xlu1 %v235_v15 }
   0x2   :  { %95 = vmatpush.msra.mxu0 %v52_v0  ;;  %153 = vmatpush.msra.mxu2 %v53_v1  ;;  %v51_v3 = vld [vmem:[%s436_s0 + $0xe8] sm:$0xff]  ;;  %v48_v4 = vld [vmem:[%s436_s0 + $0xd0] sm:$0xff]  ;;  %v49_v5 = vld [vmem:[%s436_s0 + $0xd8] sm:$0xff] }
   0x3   :  { %v46_v6 = vld [vmem:[%s436_s0 + $0xc0] sm:$0xff]  ;;  %v47_v7 = vld [vmem:[%s436_s0 + $0xc8] sm:$0xff]  ;;  %v44_v8 = vld [vmem:[%s436_s0 + $0xb0] sm:$0xff] }
   0x4   :  { %96 = vmatpush.msra.mxu0 %v50_v2  ;;  %154 = vmatpush.msra.mxu2 %v51_v3  ;;  %v45_v9 = vld [vmem:[%s436_s0 + $0xb8] sm:$0xff]  ;;  %v42_v10 = vld [vmem:[%s436_s0 + $0xa0] sm:$0xff]  ;;  %v43_v11 = vld [vmem:[%s436_s0 + $0xa8] sm:$0xff] }
   0x5   :  { %v40_v12 = vld [vmem:[%s436_s0 + $0x90] sm:$0xff]  ;;  %v41_v13 = vld [vmem:[%s436_s0 + $0x98] sm:$0xff]  ;;  %v54_v17 = vld [vmem:[%s436_s0 + $0x100] sm:$0xff] }
   0x6   :  { %97 = vmatpush.msra.mxu0 %v48_v4  ;;  %155 = vmatpush.msra.mxu2 %v49_v5  ;;  %v56_v14 = vld [vmem:[%s436_s0 + $0x110] sm:$0xff]  ;;  %v57_v16 = vld [vmem:[%s436_s0 + $0x118] sm:$0xff]  ;;  %v38_v18 = vld [vmem:[%s436_s0 + $0x80] sm:$0xff] }
   0x7   :  { %v39_v19 = vld [vmem:[%s436_s0 + $0x88] sm:$0xff]  ;;  %138 = vmatpush.msra.mxu1 %v56_v14  ;;  %196 = vmatpush.msra.mxu3 %v57_v16  ;;  %v36_v22 = vld [vmem:[%s436_s0 + $0x70] sm:$0xff]  ;;  %v37_v23 = vld [vmem:[%s436_s0 + $0x78] sm:$0xff] }
   0x8   :  { %98 = vmatpush.msra.mxu0 %v46_v6  ;;  %156 = vmatpush.msra.mxu2 %v47_v7  ;;  %v55_v20 = vld [vmem:[%s436_s0 + $0x108] sm:$0xff]  ;;  %v34_v24 = vld [vmem:[%s436_s0 + $0x60] sm:$0xff]  ;;  %v32_v27 = vld [vmem:[%s436_s0 + $0x50] sm:$0xff] }
   0x9   :  { %v15_v21 = vld [vmem:[%s437_s1 + $0x8] sm:$0xff]  ;;  %139 = vmatpush.msra.mxu1 %v54_v17  ;;  %197 = vmatpush.msra.mxu3 %v55_v20  ;;  %v58_v26 = vld [vmem:[%s438_s2] sm:$0xff]  ;;  %v33_v28 = vld [vmem:[%s436_s0 + $0x58] sm:$0xff] }
   0xa   :  { %99 = vmatpush.msra.mxu0 %v44_v8  ;;  %157 = vmatpush.msra.mxu2 %v45_v9  ;;  %v35_v25 = vld [vmem:[%s436_s0 + $0x68] sm:$0xff]  ;;  %v30_v29 = vld [vmem:[%s436_s0 + $0x40] sm:$0xff]  ;;  %v17_v31 = vld [vmem:[%s437_s1 + $0x18] sm:$0xff] }
   0xb   :  { %224 = vmatmul.msk.f32.vlgmr.msra.gmra.mxu1 %vm82_vm0, %v15_v21  ;;  %228 = vmatmul.msk.f32.vlgmr.msra.gmra.mxu3 %vm82_vm0, %v15_v21  ;;  %v31_v30 = vld [vmem:[%s436_s0 + $0x48] sm:$0xff]  ;;  %v28_v32 = vld [vmem:[%s436_s0 + $0x30] sm:$0xff]  ;;  %v29_v33 = vld [vmem:[%s436_s0 + $0x38] sm:$0xff] }
   0xc   :  { %100 = vmatpush.msra.mxu0 %v42_v10  ;;  %158 = vmatpush.msra.mxu2 %v43_v11  ;;  %v26_v34 = vld [vmem:[%s436_s0 + $0x20] sm:$0xff]  ;;  %v27_v35 = vld [vmem:[%s436_s0 + $0x28] sm:$0xff]  ;;  %v60_v36 = vld [vmem:[%s438_s2 + $0x10] sm:$0xff] }
   0xd   :  { %64 = vperm.xlu0 %233, %v58_v26   ;;  %v59_v37 = vld [vmem:[%s438_s2 + $0x8] sm:$0xff]  ;;  %v24_v38 = vld [vmem:[%s436_s0 + $0x10] sm:$0xff]  ;;  %v25_v39 = vld [vmem:[%s436_s0 + $0x18] sm:$0xff]  ;;  %74 = vperm.xlu1 %234, %v60_v36  }
   0xe   :  { %101 = vmatpush.msra.mxu0 %v40_v12  ;;  %159 = vmatpush.msra.mxu2 %v41_v13  ;;  %v22_v40 = vld [vmem:[%s436_s0] sm:$0xff]  ;;  %v23_v41 = vld [vmem:[%s436_s0 + $0x8] sm:$0xff]  ;;  %v61_v44 = vld [vmem:[%s438_s2 + $0x18] sm:$0xff] }
   0xf   :  { %v14_v42 = vld [vmem:[%s437_s1] sm:$0xff]  ;;  %v19_v43 = vld [vmem:[%s437_s1 + $0x28] sm:$0xff]  ;;  %v16_v45 = vld [vmem:[%s437_s1 + $0x10] sm:$0xff] }
  0x10   :  { %102 = vmatpush.msra.mxu0 %v38_v18  ;;  %160 = vmatpush.msra.mxu2 %v39_v19  ;;  %v21_v46 = vld [vmem:[%s437_s1 + $0x38] sm:$0xff]  ;;  %v18_v47 = vld [vmem:[%s437_s1 + $0x20] sm:$0xff]  ;;  %v20_v48 = vld [vmem:[%s437_s1 + $0x30] sm:$0xff] }
  0x12   :  { %103 = vmatpush.msra.mxu0 %v36_v22  ;;  %161 = vmatpush.msra.mxu2 %v37_v23 }
  0x13   :  { %225 = vmatmul.msk.f32.gmra.mxu1 %vm82_vm0, %v17_v31  ;;  %229 = vmatmul.msk.f32.gmra.mxu3 %vm82_vm0, %v17_v31 }
  0x14   :  { %104 = vmatpush.msra.mxu0 %v34_v24  ;;  %162 = vmatpush.msra.mxu2 %v35_v25 }
  0x15   :  { %69 = vperm.xlu0 %233, %v59_v37   ;;  %79 = vperm.xlu1 %234, %v61_v44  }
  0x16   :  { %105 = vmatpush.msra.mxu0 %v32_v27  ;;  %163 = vmatpush.msra.mxu2 %v33_v28 }
  0x18   :  { %106 = vmatpush.msra.mxu0 %v30_v29  ;;  %164 = vmatpush.msra.mxu2 %v31_v30 }
  0x1a   :  { %107 = vmatpush.msra.mxu0 %v28_v32  ;;  %165 = vmatpush.msra.mxu2 %v29_v33 }
  0x1b   :  { %226 = vmatmul.msk.f32.gmra.mxu1 %vm82_vm0, %v19_v43  ;;  %230 = vmatmul.msk.f32.gmra.mxu3 %vm82_vm0, %v19_v43 }
  0x1c   :  { %108 = vmatpush.msra.mxu0 %v26_v34  ;;  %166 = vmatpush.msra.mxu2 %v27_v35 }
  0x1e   :  { %109 = vmatpush.msra.mxu0 %v24_v38  ;;  %167 = vmatpush.msra.mxu2 %v25_v39 }
  0x20   :  { %110 = vmatpush.msra.mxu0 %v22_v40  ;;  %168 = vmatpush.msra.mxu2 %v23_v41 }
  0x21   :  { %111 = vmatmul.f32.vlgmr.msra.gmra.mxu0 %v14_v42  ;;  %169 = vmatmul.f32.vlgmr.msra.gmra.mxu2 %v14_v42 }
  0x23   :  { %227 = vmatmul.msk.f32.gmra.mxu1 %vm82_vm0, %v21_v46  ;;  %231 = vmatmul.msk.f32.gmra.mxu3 %vm82_vm0, %v21_v46 }
  0x29   :  { %114 = vmatmul.f32.gmra.mxu0 %v16_v45  ;;  %172 = vmatmul.f32.gmra.mxu2 %v16_v45 }
  0x31   :  { %117 = vmatmul.f32.gmra.mxu0 %v18_v47  ;;  %175 = vmatmul.f32.gmra.mxu2 %v18_v47 }
  0x39   :  { %120 = vmatmul.f32.gmra.mxu0 %v20_v48  ;;  %178 = vmatmul.f32.gmra.mxu2 %v20_v48 }
  0x7f   :  { %v65_v50 = vpop.permute.xlu0 %64  ;;  %v75_v0 = vpop.permute.xlu1 %74 }
  0x87   :  { %v70_v57 = vpop.permute.xlu0 %69  ;;  %v80_v10 = vpop.permute.xlu1 %79 }
  0x88   :  { %v141_v49 = vpop.f32.mrf.mxu1 }
  0x8e   :  { %v199_v52 = vpop.f32.mrf.mxu3 }
  0x90   :  { %v144_v55 = vpop.f32.mrf.mxu1 }
  0x96   :  { %v202_v62 = vpop.f32.mrf.mxu3 }
  0x98   :  { %v147_v2 = vpop.f32.mrf.mxu1 }
  0x9e   :  { %v112_v51 = vpop.f32.mrf.mxu0  ;;  %v205_v8 = vpop.f32.mrf.mxu3 }
  0x9f   :  { %v113_v53 = vadd.f32 %v112_v51, %v65_v50 }
  0xa0   :  { %v150_v13 = vpop.f32.mrf.mxu1 }
  0xa1   :  { %v142_v54 = vadd.f32 %v141_v49, %v113_v53 }
  0xa3   :  { %211 = vst [vmem:[%s439_s3] sm:$0xff] %v142_v54 }
  0xa4   :  { %v170_v56 = vpop.f32.mrf.mxu2 }
  0xa5   :  { %v171_v58 = vadd.f32 %v170_v56, %v65_v50 }
  0xa6   :  { %v115_v59 = vpop.f32.mrf.mxu0  ;;  %v208_v18 = vpop.f32.mrf.mxu3 }
  0xa7   :  { %v200_v60 = vadd.f32 %v199_v52, %v171_v58  ;;  %v116_v61 = vadd.f32 %v115_v59, %v70_v57 }
  0xa9   :  { %213 = vst.msk [vmem:[%s439_s3 + $0x8] sm:$0xff] %vm212_vm1, %v200_v60  ;;  %v145_v63 = vadd.f32 %v144_v55, %v116_v61 }
  0xab   :  { %214 = vst [vmem:[%s439_s3 + $0x10] sm:$0xff] %v145_v63 }
  0xac   :  { %v173_v1 = vpop.f32.mrf.mxu2 }
  0xad   :  { %v174_v3 = vadd.f32 %v173_v1, %v70_v57 }
  0xae   :  { %v118_v4 = vpop.f32.mrf.mxu0 }
  0xaf   :  { %v119_v5 = vadd.f32 %v118_v4, %v75_v0  ;;  %v203_v6 = vadd.f32 %v202_v62, %v174_v3 }
  0xb1   :  { %215 = vst.msk [vmem:[%s439_s3 + $0x18] sm:$0xff] %vm212_vm1, %v203_v6  ;;  %v148_v7 = vadd.f32 %v147_v2, %v119_v5 }
  0xb3   :  { %216 = vst [vmem:[%s439_s3 + $0x20] sm:$0xff] %v148_v7 }
  0xb4   :  { %v176_v9 = vpop.f32.mrf.mxu2 }
  0xb5   :  { %v177_v11 = vadd.f32 %v176_v9, %v75_v0 }
  0xb6   :  { %v121_v12 = vpop.f32.mrf.mxu0 }
  0xb7   :  { %v122_v14 = vadd.f32 %v121_v12, %v80_v10  ;;  %v206_v15 = vadd.f32 %v205_v8, %v177_v11 }
  0xb9   :  { %217 = vst.msk [vmem:[%s439_s3 + $0x28] sm:$0xff] %vm212_vm1, %v206_v15  ;;  %v151_v16 = vadd.f32 %v150_v13, %v122_v14 }
  0xbb   :  { %218 = vst [vmem:[%s439_s3 + $0x30] sm:$0xff] %v151_v16 }
  0xbc   :  { %v179_v17 = vpop.f32.mrf.mxu2 }
  0xbd   :  { %v180_v19 = vadd.f32 %v179_v17, %v80_v10 }
  0xbf   :  { %v209_v20 = vadd.f32 %v208_v18, %v180_v19 }
  0xc1   :  { %219 = vst.msk [vmem:[%s439_s3 + $0x38] sm:$0xff] %vm212_vm1, %v209_v20 }

// kernel: feature_extractor_forward.31
= control target key start
LH: loop header
LB: loop body
LE: loop exit
PB: predicated region body
PF: predicated region fallthrough
CT: control target
= control target key end

     0   :  { %vm24_vm0 = vcmask 408576   ;;  %s167_s0 = inlined_call_operand.vmem [shape: f32[4,32,50], index: 0, kind: input, shape index: {}]   ;;  %s168_s1 = inlined_call_operand.vmem [shape: f32[32,50], index: 1, kind: output, shape index: {}]  }
   0x1   :  { %v8_v0 = vld [vmem:[%s167_s0] sm:$0xff]  ;;  %v9_v7 = vld [vmem:[%s167_s0 + $0x8] sm:$0xff]  ;;  %v10_v14 = vld [vmem:[%s167_s0 + $0x10] sm:$0xff] }
   0x2   :  { %v12_v1 = vld [vmem:[%s167_s0 + $0x20] sm:$0xff]  ;;  %v25_v4 = vsel %vm24_vm0, %v8_v0, 0.0  ;;  %v13_v8 = vld [vmem:[%s167_s0 + $0x28] sm:$0xff]  ;;  %v32_v12 = vsel %vm24_vm0, %v9_v7, 0.0  ;;  %v14_v18 = vld [vmem:[%s167_s0 + $0x30] sm:$0xff]  ;;  %v39_v21 = vsel %vm24_vm0, %v10_v14, 0.0 }
   0x3   :  { %v16_v2 = vld [vmem:[%s167_s0 + $0x40] sm:$0xff]  ;;  %v26_v5 = vsel %vm24_vm0, %v12_v1, 0.0  ;;  %v17_v10 = vld [vmem:[%s167_s0 + $0x48] sm:$0xff]  ;;  %v33_v13 = vsel %vm24_vm0, %v13_v8, 0.0  ;;  %v18_v19 = vld [vmem:[%s167_s0 + $0x50] sm:$0xff]  ;;  %v40_v24 = vsel %vm24_vm0, %v14_v18, 0.0 }
   0x4   :  { %v20_v3 = vld [vmem:[%s167_s0 + $0x60] sm:$0xff]  ;;  %v28_v6 = vsel %vm24_vm0, %v16_v2, 0.0  ;;  %v27_v9 = vadd.f32 %v26_v5, %v25_v4  ;;  %v21_v11 = vld [vmem:[%s167_s0 + $0x68] sm:$0xff]  ;;  %v34_v16 = vadd.f32 %v33_v13, %v32_v12  ;;  %v35_v17 = vsel %vm24_vm0, %v17_v10, 0.0  ;;  %v22_v20 = vld [vmem:[%s167_s0 + $0x70] sm:$0xff] }
   0x5   :  { %v30_v15 = vsel %vm24_vm0, %v20_v3, 0.0  ;;  %v37_v23 = vsel %vm24_vm0, %v21_v11, 0.0  ;;  %v42_v25 = vsel %vm24_vm0, %v18_v19, 0.0  ;;  %v11_v26 = vld [vmem:[%s167_s0 + $0x18] sm:$0xff]  ;;  %v41_v30 = vadd.f32 %v40_v24, %v39_v21 }
   0x6   :  { %v29_v22 = vadd.f32 %v28_v6, %v27_v9  ;;  %v15_v27 = vld [vmem:[%s167_s0 + $0x38] sm:$0xff]  ;;  %v36_v29 = vadd.f32 %v35_v17, %v34_v16  ;;  %v46_v32 = vsel %vm24_vm0, %v11_v26, 0.0  ;;  %v44_v35 = vsel %vm24_vm0, %v22_v20, 0.0 }
   0x7   :  { %v19_v28 = vld [vmem:[%s167_s0 + $0x58] sm:$0xff]  ;;  %v47_v33 = vsel %vm24_vm0, %v15_v27, 0.0  ;;  %v43_v39 = vadd.f32 %v42_v25, %v41_v30 }
   0x8   :  { %v23_v31 = vld [vmem:[%s167_s0 + $0x78] sm:$0xff]  ;;  %v31_v34 = vadd.f32 %v30_v15, %v29_v22  ;;  %v48_v36 = vadd.f32 %v47_v33, %v46_v32  ;;  %v49_v37 = vsel %vm24_vm0, %v19_v28, 0.0  ;;  %v38_v38 = vadd.f32 %v37_v23, %v36_v29 }
   0x9   :  { %v51_v40 = vsel %vm24_vm0, %v23_v31, 0.0  ;;  %v45_v44 = vadd.f32 %v44_v35, %v43_v39 }
   0xa   :  { %v53_v41 = vmul.f32 0.25, %v31_v34  ;;  %v50_v42 = vadd.f32 %v49_v37, %v48_v36  ;;  %v54_v43 = vmul.f32 0.25, %v38_v38 }
   0xb   :  { %v55_v48 = vmul.f32 0.25, %v45_v44 }
   0xc   :  { %vm57_vm1 = vcmp.gt.f32.partialorder %v53_v41, 0.0  ;;  %v61_v45 = vmul.f32 0.2, %v53_v41  ;;  %v52_v46 = vadd.f32 %v51_v40, %v50_v42  ;;  %vm58_vm2 = vcmp.gt.f32.partialorder %v54_v43, 0.0 }
   0xd   :  { %v62_v47 = vmul.f32 0.2, %v54_v43  ;;  %vm59_vm3 = vcmp.gt.f32.partialorder %v55_v48, 0.0  ;;  %v63_v52 = vmul.f32 0.2, %v55_v48 }
   0xe   :  { %v65_v49 = vsel %vm57_vm1, %v53_v41, %v61_v45  ;;  %v56_v50 = vmul.f32 0.25, %v52_v46 }
   0xf   :  { %69 = vst.msk [vmem:[%s168_s1] sm:$0xff] %vm24_vm0, %v65_v49  ;;  %v66_v51 = vsel %vm58_vm2, %v54_v43, %v62_v47  ;;  %v67_v54 = vsel %vm59_vm3, %v55_v48, %v63_v52 }
  0x10   :  { %70 = vst.msk [vmem:[%s168_s1 + $0x8] sm:$0xff] %vm24_vm0, %v66_v51  ;;  %vm60_vm4 = vcmp.gt.f32.partialorder %v56_v50, 0.0  ;;  %v64_v53 = vmul.f32 0.2, %v56_v50 }
  0x11   :  { %71 = vst.msk [vmem:[%s168_s1 + $0x10] sm:$0xff] %vm24_vm0, %v67_v54 }
  0x12   :  { %v68_v55 = vsel %vm60_vm4, %v56_v50, %v64_v53 }
  0x13   :  { %72 = vst.msk [vmem:[%s168_s1 + $0x18] sm:$0xff] %vm24_vm0, %v68_v55 }

// kernel: feature_extractor_forward.16
= control target key start
LH: loop header
LB: loop body
LE: loop exit
PB: predicated region body
PF: predicated region fallthrough
CT: control target
= control target key end

     0   :  { %vm329_vm0 = vcmask 1040384   ;;  %v2469_v3 = vmov 0   ;;  %vm325_vm1 = vcmask 203776   ;;  %vm2192_vm2 = vcmask 1043456   ;;  %s3873_s0 = inlined_call_operand.vmem [shape: f32[25,9672], index: 0, kind: input, shape index: {}]   ;;  %s3874_s1 = inlined_call_operand.vmem [shape: f32[3,25], index: 1, kind: input, shape index: {}]   ;;  %s3875_s2 = inlined_call_operand.vmem [shape: f32[3,1], index: 2, kind: input, shape index: {}]   ;;  %s3876_s3 = inlined_call_operand.vmem [shape: f32[3,9672], index: 3, kind: output, shape index: {}]  }
   0x1   :  { %v245_v0 = vld [vmem:[%s3873_s0 + $0x730] sm:$0x1]  ;;  %v246_v1 = vld [vmem:[%s3873_s0 + $0x738] sm:$0x1]  ;;  %2467 = vset.pattern.permute.xlu0 %v2469_v3  ;;  %v244_v5 = vld [vmem:[%s3873_s0 + $0x728] sm:$0x1] }
   0x2   :  { %v169_v2 = vld [vmem:[%s3873_s0 + $0x4d0] sm:$0xff]  ;;  %2318 = vmatpush.msk.msra.mxu2 %vm329_vm0, %v245_v0  ;;  %2320 = vmatpush.msk.msra.mxu3 %vm329_vm0, %v246_v1  ;;  %v170_v4 = vld [vmem:[%s3873_s0 + $0x4d8] sm:$0xff]  ;;  %v243_v8 = vld [vmem:[%s3873_s0 + $0x720] sm:$0x1]  ;;  %vm2306_vm3 = vcmask 1042432   ;;  %vm2307_vm4 = vcmask 587780  }
   0x3   :  { %v93_v6 = vld [vmem:[%s3873_s0 + $0x270] sm:$0xff]  ;;  %2316 = vmatpush.msk.msra.mxu1 %vm329_vm0, %v244_v5  ;;  %v94_v7 = vld [vmem:[%s3873_s0 + $0x278] sm:$0xff]  ;;  %v168_v9 = vld [vmem:[%s3873_s0 + $0x4c8] sm:$0xff]  ;;  %2314 = vmatpush.msk.msra.mxu0 %vm329_vm0, %v243_v8 }
   0x4   :  { %611 = vmatpush.msra.mxu2 %v169_v2  ;;  %631 = vmatpush.msra.mxu3 %v170_v4  ;;  %v17_v10 = vld [vmem:[%s3873_s0 + $0x10] sm:$0xff]  ;;  %v18_v11 = vld [vmem:[%s3873_s0 + $0x18] sm:$0xff]  ;;  %v167_v12 = vld [vmem:[%s3873_s0 + $0x4c0] sm:$0xff] }
   0x5   :  { %591 = vmatpush.msra.mxu1 %v168_v9  ;;  %v92_v13 = vld [vmem:[%s3873_s0 + $0x268] sm:$0xff]  ;;  %v2536_v14 = vld [vmem:[%s3874_s1] sm:$0x7]  ;;  %v250_v15 = vld [vmem:[%s3873_s0 + $0x758] sm:$0x1]  ;;  %571 = vmatpush.msra.mxu0 %v167_v12 }
   0x6   :  { %612 = vmatpush.msra.mxu2 %v93_v6  ;;  %632 = vmatpush.msra.mxu3 %v94_v7  ;;  %v249_v16 = vld [vmem:[%s3873_s0 + $0x750] sm:$0x1]  ;;  %v91_v17 = vld [vmem:[%s3873_s0 + $0x260] sm:$0xff]  ;;  %v16_v18 = vld [vmem:[%s3873_s0 + $0x8] sm:$0xff] }
   0x7   :  { %592 = vmatpush.msra.mxu1 %v92_v13  ;;  %v174_v19 = vld [vmem:[%s3873_s0 + $0x4f8] sm:$0xff]  ;;  %v173_v20 = vld [vmem:[%s3873_s0 + $0x4f0] sm:$0xff]  ;;  %v15_v21 = vld [vmem:[%s3873_s0] sm:$0xff]  ;;  %572 = vmatpush.msra.mxu0 %v91_v17 }
   0x8   :  { %613 = vmatpush.msra.mxu2 %v17_v10  ;;  %633 = vmatpush.msra.mxu3 %v18_v11  ;;  %v98_v22 = vld [vmem:[%s3873_s0 + $0x298] sm:$0xff]  ;;  %v248_v23 = vld [vmem:[%s3873_s0 + $0x748] sm:$0x1]  ;;  %v97_v24 = vld [vmem:[%s3873_s0 + $0x290] sm:$0xff] }
   0x9   :  { %2319 = vmatmul.msk.f32.vlgmr.msra.gmra.mxu2 %vm325_vm1, %v2536_v14  ;;  %2321 = vmatmul.msk.f32.vlgmr.msra.gmra.mxu3 %vm325_vm1, %v2536_v14  ;;  %v22_v25 = vld [vmem:[%s3873_s0 + $0x38] sm:$0xff]  ;;  %v247_v26 = vld [vmem:[%s3873_s0 + $0x740] sm:$0x1]  ;;  %v172_v27 = vld [vmem:[%s3873_s0 + $0x4e8] sm:$0xff] }
   0xa   :  { %2328 = vmatpush.msk.msrb.mxu3 %vm329_vm0, %v250_v15  ;;  %2326 = vmatpush.msk.msrb.mxu2 %vm329_vm0, %v249_v16  ;;  %v21_v28 = vld [vmem:[%s3873_s0 + $0x30] sm:$0xff]  ;;  %v254_v29 = vld [vmem:[%s3873_s0 + $0x778] sm:$0x1]  ;;  %v171_v30 = vld [vmem:[%s3873_s0 + $0x4e0] sm:$0xff] }
   0xb   :  { %593 = vmatpush.msra.mxu1 %v16_v18  ;;  %573 = vmatpush.msra.mxu0 %v15_v21  ;;  %v96_v31 = vld [vmem:[%s3873_s0 + $0x288] sm:$0xff]  ;;  %v253_v32 = vld [vmem:[%s3873_s0 + $0x770] sm:$0x1]  ;;  %v178_v33 = vld [vmem:[%s3873_s0 + $0x518] sm:$0xff] }
   0xc   :  { %711 = vmatpush.msrb.mxu3 %v174_v19  ;;  %691 = vmatpush.msrb.mxu2 %v173_v20  ;;  %v95_v34 = vld [vmem:[%s3873_s0 + $0x280] sm:$0xff]  ;;  %v20_v35 = vld [vmem:[%s3873_s0 + $0x28] sm:$0xff]  ;;  %v177_v36 = vld [vmem:[%s3873_s0 + $0x510] sm:$0xff] }
   0xd   :  { %2317 = vmatmul.msk.f32.vlgmr.msra.gmra.mxu1 %vm325_vm1, %v2536_v14  ;;  %2315 = vmatmul.msk.f32.vlgmr.msra.gmra.mxu0 %vm325_vm1, %v2536_v14  ;;  %v102_v37 = vld [vmem:[%s3873_s0 + $0x2b8] sm:$0xff]  ;;  %v19_v38 = vld [vmem:[%s3873_s0 + $0x20] sm:$0xff]  ;;  %v252_v39 = vld [vmem:[%s3873_s0 + $0x768] sm:$0x1] }
   0xe   :  { %712 = vmatpush.msrb.mxu3 %v98_v22  ;;  %2324 = vmatpush.msk.msrb.mxu1 %vm329_vm0, %v248_v23  ;;  %v101_v40 = vld [vmem:[%s3873_s0 + $0x2b0] sm:$0xff]  ;;  %v26_v41 = vld [vmem:[%s3873_s0 + $0x58] sm:$0xff]  ;;  %v251_v42 = vld [vmem:[%s3873_s0 + $0x760] sm:$0x1] }
   0xf   :  { %692 = vmatpush.msrb.mxu2 %v97_v24  ;;  %2322 = vmatpush.msk.msrb.mxu0 %vm329_vm0, %v247_v26  ;;  %v176_v43 = vld [vmem:[%s3873_s0 + $0x508] sm:$0xff]  ;;  %v25_v44 = vld [vmem:[%s3873_s0 + $0x50] sm:$0xff]  ;;  %v258_v45 = vld [vmem:[%s3873_s0 + $0x798] sm:$0x1] }
  0x10   :  { %713 = vmatpush.msrb.mxu3 %v22_v25  ;;  %671 = vmatpush.msrb.mxu1 %v172_v27  ;;  %v319_v46 = vld [vmem:[%s3875_s2] sm:$0x7]  ;;  %v100_v48 = vld [vmem:[%s3873_s0 + $0x2a8] sm:$0xff]  ;;  %v257_v49 = vld [vmem:[%s3873_s0 + $0x790] sm:$0x1] }
  0x11   :  { %693 = vmatpush.msrb.mxu2 %v21_v28  ;;  %2329 = vmatmul.msk.f32.vlgmr.msrb.gmra.mxu3 %vm325_vm1, %v2536_v14  ;;  %v175_v47 = vld [vmem:[%s3873_s0 + $0x500] sm:$0xff]  ;;  %v182_v50 = vld [vmem:[%s3873_s0 + $0x538] sm:$0xff]  ;;  %v24_v52 = vld [vmem:[%s3873_s0 + $0x48] sm:$0xff] }
  0x12   :  { %2327 = vmatmul.msk.f32.vlgmr.msrb.gmra.mxu2 %vm325_vm1, %v2536_v14  ;;  %2336 = vmatpush.msk.msra.mxu3 %vm329_vm0, %v254_v29  ;;  %v99_v51 = vld [vmem:[%s3873_s0 + $0x2a0] sm:$0xff]  ;;  %v181_v53 = vld [vmem:[%s3873_s0 + $0x530] sm:$0xff]  ;;  %v106_v54 = vld [vmem:[%s3873_s0 + $0x2d8] sm:$0xff] }
  0x13   :  { %651 = vmatpush.msrb.mxu0 %v171_v30  ;;  %672 = vmatpush.msrb.mxu1 %v96_v31  ;;  %v23_v55 = vld [vmem:[%s3873_s0 + $0x40] sm:$0xff]  ;;  %v256_v56 = vld [vmem:[%s3873_s0 + $0x788] sm:$0x1]  ;;  %v105_v57 = vld [vmem:[%s3873_s0 + $0x2d0] sm:$0xff] }
  0x14   :  { %2334 = vmatpush.msk.msra.mxu2 %vm329_vm0, %v253_v32  ;;  %791 = vmatpush.msra.mxu3 %v178_v33  ;;  %v30_v58 = vld [vmem:[%s3873_s0 + $0x78] sm:$0xff]  ;;  %v255_v59 = vld [vmem:[%s3873_s0 + $0x780] sm:$0x1]  ;;  %v180_v60 = vld [vmem:[%s3873_s0 + $0x528] sm:$0xff] }
  0x15   :  { %652 = vmatpush.msrb.mxu0 %v95_v34  ;;  %673 = vmatpush.msrb.mxu1 %v20_v35  ;;  %v29_v61 = vld [vmem:[%s3873_s0 + $0x70] sm:$0xff]  ;;  %v262_v62 = vld [vmem:[%s3873_s0 + $0x7b8] sm:$0x1]  ;;  %v179_v63 = vld [vmem:[%s3873_s0 + $0x520] sm:$0xff] }
  0x16   :  { %771 = vmatpush.msra.mxu2 %v177_v36  ;;  %2325 = vmatmul.msk.f32.vlgmr.msrb.gmra.mxu1 %vm325_vm1, %v2536_v14  ;;  %v104_v0 = vld [vmem:[%s3873_s0 + $0x2c8] sm:$0xff]  ;;  %v261_v1 = vld [vmem:[%s3873_s0 + $0x7b0] sm:$0x1]  ;;  %v186_v2 = vld [vmem:[%s3873_s0 + $0x558] sm:$0xff] }
  0x17   :  { %792 = vmatpush.msra.mxu3 %v102_v37  ;;  %653 = vmatpush.msrb.mxu0 %v19_v38  ;;  %v103_v3 = vld [vmem:[%s3873_s0 + $0x2c0] sm:$0xff]  ;;  %v28_v4 = vld [vmem:[%s3873_s0 + $0x68] sm:$0xff]  ;;  %v185_v5 = vld [vmem:[%s3873_s0 + $0x550] sm:$0xff] }
  0x18   :  { %2332 = vmatpush.msk.msra.mxu1 %vm329_vm0, %v252_v39  ;;  %772 = vmatpush.msra.mxu2 %v101_v40  ;;  %v110_v6 = vld [vmem:[%s3873_s0 + $0x2f8] sm:$0xff]  ;;  %v27_v7 = vld [vmem:[%s3873_s0 + $0x60] sm:$0xff]  ;;  %v260_v8 = vld [vmem:[%s3873_s0 + $0x7a8] sm:$0x1] }
  0x19   :  { %2323 = vmatmul.msk.f32.vlgmr.msrb.gmra.mxu0 %vm325_vm1, %v2536_v14  ;;  %793 = vmatpush.msra.mxu3 %v26_v41  ;;  %v109_v9 = vld [vmem:[%s3873_s0 + $0x2f0] sm:$0xff]  ;;  %v34_v10 = vld [vmem:[%s3873_s0 + $0x98] sm:$0xff]  ;;  %v259_v11 = vld [vmem:[%s3873_s0 + $0x7a0] sm:$0x1] }
  0x1a   :  { %2330 = vmatpush.msk.msra.mxu0 %vm329_vm0, %v251_v42  ;;  %751 = vmatpush.msra.mxu1 %v176_v43  ;;  %v184_v12 = vld [vmem:[%s3873_s0 + $0x548] sm:$0xff]  ;;  %v33_v13 = vld [vmem:[%s3873_s0 + $0x90] sm:$0xff]  ;;  %v266_v15 = vld [vmem:[%s3873_s0 + $0x7d8] sm:$0x1] }
  0x1b   :  { %773 = vmatpush.msra.mxu2 %v25_v44  ;;  %2337 = vmatmul.msk.f32.vlgmr.msra.gmra.mxu3 %vm325_vm1, %v2536_v14  ;;  %v183_v16 = vld [vmem:[%s3873_s0 + $0x540] sm:$0xff]  ;;  %v108_v17 = vld [vmem:[%s3873_s0 + $0x2e8] sm:$0xff]  ;;  %v265_v18 = vld [vmem:[%s3873_s0 + $0x7d0] sm:$0x1] }
  0x1c   :  { %2335 = vmatmul.msk.f32.vlgmr.msra.gmra.mxu2 %vm325_vm1, %v2536_v14  ;;  %2344 = vmatpush.msk.msrb.mxu3 %vm329_vm0, %v258_v45  ;;  %v190_v19 = vld [vmem:[%s3873_s0 + $0x578] sm:$0xff]  ;;  %v107_v20 = vld [vmem:[%s3873_s0 + $0x2e0] sm:$0xff]  ;;  %v32_v21 = vld [vmem:[%s3873_s0 + $0x88] sm:$0xff] }
  0x1d   :  { %322 = vperm.xlu0 %2467, %v319_v46   ;;  %731 = vmatpush.msra.mxu0 %v175_v47  ;;  %v189_v22 = vld [vmem:[%s3873_s0 + $0x570] sm:$0xff]  ;;  %v114_v23 = vld [vmem:[%s3873_s0 + $0x318] sm:$0xff]  ;;  %v31_v24 = vld [vmem:[%s3873_s0 + $0x80] sm:$0xff] }
  0x1e   :  { %752 = vmatpush.msra.mxu1 %v100_v48  ;;  %2342 = vmatpush.msk.msrb.mxu2 %vm329_vm0, %v257_v49  ;;  %v264_v25 = vld [vmem:[%s3873_s0 + $0x7c8] sm:$0x1]  ;;  %v113_v26 = vld [vmem:[%s3873_s0 + $0x310] sm:$0xff]  ;;  %v38_v27 = vld [vmem:[%s3873_s0 + $0xb8] sm:$0xff] }
  0x1f   :  { %871 = vmatpush.msrb.mxu3 %v182_v50  ;;  %732 = vmatpush.msra.mxu0 %v99_v51  ;;  %v263_v28 = vld [vmem:[%s3873_s0 + $0x7c0] sm:$0x1]  ;;  %v188_v29 = vld [vmem:[%s3873_s0 + $0x568] sm:$0xff]  ;;  %v37_v30 = vld [vmem:[%s3873_s0 + $0xb0] sm:$0xff] }
  0x20   :  { %753 = vmatpush.msra.mxu1 %v24_v52  ;;  %851 = vmatpush.msrb.mxu2 %v181_v53  ;;  %v270_v31 = vld [vmem:[%s3873_s0 + $0x7f8] sm:$0x1]  ;;  %v187_v32 = vld [vmem:[%s3873_s0 + $0x560] sm:$0xff]  ;;  %v112_v33 = vld [vmem:[%s3873_s0 + $0x308] sm:$0xff] }
  0x21   :  { %2333 = vmatmul.msk.f32.vlgmr.msra.gmra.mxu1 %vm325_vm1, %v2536_v14  ;;  %872 = vmatpush.msrb.mxu3 %v106_v54  ;;  %v269_v34 = vld [vmem:[%s3873_s0 + $0x7f0] sm:$0x1]  ;;  %v194_v35 = vld [vmem:[%s3873_s0 + $0x598] sm:$0xff]  ;;  %v111_v36 = vld [vmem:[%s3873_s0 + $0x300] sm:$0xff] }
  0x22   :  { %733 = vmatpush.msra.mxu0 %v23_v55  ;;  %2340 = vmatpush.msk.msrb.mxu1 %vm329_vm0, %v256_v56  ;;  %v36_v37 = vld [vmem:[%s3873_s0 + $0xa8] sm:$0xff]  ;;  %v193_v38 = vld [vmem:[%s3873_s0 + $0x590] sm:$0xff]  ;;  %v118_v39 = vld [vmem:[%s3873_s0 + $0x338] sm:$0xff] }
  0x23   :  { %852 = vmatpush.msrb.mxu2 %v105_v57  ;;  %2331 = vmatmul.msk.f32.vlgmr.msra.gmra.mxu0 %vm325_vm1, %v2536_v14  ;;  %v35_v40 = vld [vmem:[%s3873_s0 + $0xa0] sm:$0xff]  ;;  %v268_v41 = vld [vmem:[%s3873_s0 + $0x7e8] sm:$0x1]  ;;  %v117_v42 = vld [vmem:[%s3873_s0 + $0x330] sm:$0xff] }
  0x24   :  { %873 = vmatpush.msrb.mxu3 %v30_v58  ;;  %2338 = vmatpush.msk.msrb.mxu0 %vm329_vm0, %v255_v59  ;;  %v42_v43 = vld [vmem:[%s3873_s0 + $0xd8] sm:$0xff]  ;;  %v267_v44 = vld [vmem:[%s3873_s0 + $0x7e0] sm:$0x1]  ;;  %v192_v45 = vld [vmem:[%s3873_s0 + $0x588] sm:$0xff] }
  0x25   :  { %831 = vmatpush.msrb.mxu1 %v180_v60  ;;  %853 = vmatpush.msrb.mxu2 %v29_v61  ;;  %v41_v46 = vld [vmem:[%s3873_s0 + $0xd0] sm:$0xff]  ;;  %v274_v47 = vld [vmem:[%s3873_s0 + $0x818] sm:$0x1]  ;;  %v191_v48 = vld [vmem:[%s3873_s0 + $0x580] sm:$0xff] }
  0x26   :  { %2345 = vmatmul.msk.f32.vlgmr.msrb.gmra.mxu3 %vm325_vm1, %v2536_v14  ;;  %2343 = vmatmul.msk.f32.vlgmr.msrb.gmra.mxu2 %vm325_vm1, %v2536_v14  ;;  %v116_v49 = vld [vmem:[%s3873_s0 + $0x328] sm:$0xff]  ;;  %v273_v50 = vld [vmem:[%s3873_s0 + $0x810] sm:$0x1]  ;;  %v198_v51 = vld [vmem:[%s3873_s0 + $0x5b8] sm:$0xff] }
  0x27   :  { %2352 = vmatpush.msk.msra.mxu3 %vm329_vm0, %v262_v62  ;;  %811 = vmatpush.msrb.mxu0 %v179_v63  ;;  %v115_v52 = vld [vmem:[%s3873_s0 + $0x320] sm:$0xff]  ;;  %v40_v53 = vld [vmem:[%s3873_s0 + $0xc8] sm:$0xff]  ;;  %v197_v54 = vld [vmem:[%s3873_s0 + $0x5b0] sm:$0xff] }
  0x28   :  { %832 = vmatpush.msrb.mxu1 %v104_v0  ;;  %2350 = vmatpush.msk.msra.mxu2 %vm329_vm0, %v261_v1  ;;  %v122_v55 = vld [vmem:[%s3873_s0 + $0x358] sm:$0xff]  ;;  %v39_v56 = vld [vmem:[%s3873_s0 + $0xc0] sm:$0xff]  ;;  %v272_v57 = vld [vmem:[%s3873_s0 + $0x808] sm:$0x1] }
  0x29   :  { %951 = vmatpush.msra.mxu3 %v186_v2  ;;  %812 = vmatpush.msrb.mxu0 %v103_v3  ;;  %v121_v58 = vld [vmem:[%s3873_s0 + $0x350] sm:$0xff]  ;;  %v46_v59 = vld [vmem:[%s3873_s0 + $0xf8] sm:$0xff]  ;;  %v271_v60 = vld [vmem:[%s3873_s0 + $0x800] sm:$0x1] }
  0x2a   :  { %833 = vmatpush.msrb.mxu1 %v28_v4  ;;  %931 = vmatpush.msra.mxu2 %v185_v5  ;;  %v196_v61 = vld [vmem:[%s3873_s0 + $0x5a8] sm:$0xff]  ;;  %v45_v62 = vld [vmem:[%s3873_s0 + $0xf0] sm:$0xff]  ;;  %v278_v63 = vld [vmem:[%s3873_s0 + $0x838] sm:$0x1] }
  0x2b   :  { %2341 = vmatmul.msk.f32.vlgmr.msrb.gmra.mxu1 %vm325_vm1, %v2536_v14  ;;  %952 = vmatpush.msra.mxu3 %v110_v6  ;;  %v195_v0 = vld [vmem:[%s3873_s0 + $0x5a0] sm:$0xff]  ;;  %v120_v1 = vld [vmem:[%s3873_s0 + $0x348] sm:$0xff]  ;;  %v277_v2 = vld [vmem:[%s3873_s0 + $0x830] sm:$0x1] }
  0x2c   :  { %813 = vmatpush.msrb.mxu0 %v27_v7  ;;  %2348 = vmatpush.msk.msra.mxu1 %vm329_vm0, %v260_v8  ;;  %v202_v3 = vld [vmem:[%s3873_s0 + $0x5d8] sm:$0xff]  ;;  %v119_v4 = vld [vmem:[%s3873_s0 + $0x340] sm:$0xff]  ;;  %v44_v5 = vld [vmem:[%s3873_s0 + $0xe8] sm:$0xff] }
  0x2d   :  { %932 = vmatpush.msra.mxu2 %v109_v9  ;;  %2339 = vmatmul.msk.f32.vlgmr.msrb.gmra.mxu0 %vm325_vm1, %v2536_v14  ;;  %v201_v6 = vld [vmem:[%s3873_s0 + $0x5d0] sm:$0xff]  ;;  %v126_v7 = vld [vmem:[%s3873_s0 + $0x378] sm:$0xff]  ;;  %v43_v8 = vld [vmem:[%s3873_s0 + $0xe0] sm:$0xff] }
  0x2e   :  { %953 = vmatpush.msra.mxu3 %v34_v10  ;;  %2346 = vmatpush.msk.msra.mxu0 %vm329_vm0, %v259_v11  ;;  %v276_v9 = vld [vmem:[%s3873_s0 + $0x828] sm:$0x1]  ;;  %v125_v10 = vld [vmem:[%s3873_s0 + $0x370] sm:$0xff]  ;;  %v50_v11 = vld [vmem:[%s3873_s0 + $0x118] sm:$0xff] }
  0x2f   :  { %911 = vmatpush.msra.mxu1 %v184_v12  ;;  %933 = vmatpush.msra.mxu2 %v33_v13  ;;  %v275_v12 = vld [vmem:[%s3873_s0 + $0x820] sm:$0x1]  ;;  %v200_v13 = vld [vmem:[%s3873_s0 + $0x5c8] sm:$0xff]  ;;  %vm2308_vm5 = vmor %vm2307_vm4, %vm2306_vm3 }
  0x30   :  { %2353 = vmatmul.msk.f32.vlgmr.msra.gmra.mxu3 %vm325_vm1, %v2536_v14  ;;  %2351 = vmatmul.msk.f32.vlgmr.msra.gmra.mxu2 %vm325_vm1, %v2536_v14 }
  0x31   :  { %2360 = vmatpush.msk.msrb.mxu3 %vm329_vm0, %v266_v15  ;;  %891 = vmatpush.msra.mxu0 %v183_v16  ;;  %v49_v15 = vld [vmem:[%s3873_s0 + $0x110] sm:$0xff]  ;;  %v282_v16 = vld [vmem:[%s3873_s0 + $0x858] sm:$0x1] }
  0x32   :  { %912 = vmatpush.msra.mxu1 %v108_v17  ;;  %2358 = vmatpush.msk.msrb.mxu2 %vm329_vm0, %v265_v18  ;;  %v199_v17 = vld [vmem:[%s3873_s0 + $0x5c0] sm:$0xff]  ;;  %v124_v18 = vld [vmem:[%s3873_s0 + $0x368] sm:$0xff] }
  0x33   :  { %1031 = vmatpush.msrb.mxu3 %v190_v19  ;;  %892 = vmatpush.msra.mxu0 %v107_v20  ;;  %v281_v19 = vld [vmem:[%s3873_s0 + $0x850] sm:$0x1]  ;;  %v206_v20 = vld [vmem:[%s3873_s0 + $0x5f8] sm:$0xff] }
  0x34   :  { %913 = vmatpush.msra.mxu1 %v32_v21  ;;  %1011 = vmatpush.msrb.mxu2 %v189_v22  ;;  %v123_v21 = vld [vmem:[%s3873_s0 + $0x360] sm:$0xff]  ;;  %v48_v22 = vld [vmem:[%s3873_s0 + $0x108] sm:$0xff] }
  0x35   :  { %2349 = vmatmul.msk.f32.vlgmr.msra.gmra.mxu1 %vm325_vm1, %v2536_v14  ;;  %1032 = vmatpush.msrb.mxu3 %v114_v23  ;;  %v205_v23 = vld [vmem:[%s3873_s0 + $0x5f0] sm:$0xff] }
  0x36   :  { %893 = vmatpush.msra.mxu0 %v31_v24  ;;  %2356 = vmatpush.msk.msrb.mxu1 %vm329_vm0, %v264_v25  ;;  %v130_v24 = vld [vmem:[%s3873_s0 + $0x398] sm:$0xff]  ;;  %v47_v25 = vld [vmem:[%s3873_s0 + $0x100] sm:$0xff] }
  0x37   :  { %1012 = vmatpush.msrb.mxu2 %v113_v26  ;;  %2347 = vmatmul.msk.f32.vlgmr.msra.gmra.mxu0 %vm325_vm1, %v2536_v14  ;;  %v280_v26 = vld [vmem:[%s3873_s0 + $0x848] sm:$0x1] }
  0x38   :  { %1033 = vmatpush.msrb.mxu3 %v38_v27  ;;  %2354 = vmatpush.msk.msrb.mxu0 %vm329_vm0, %v263_v28  ;;  %v129_v27 = vld [vmem:[%s3873_s0 + $0x390] sm:$0xff]  ;;  %v54_v28 = vld [vmem:[%s3873_s0 + $0x138] sm:$0xff] }
  0x39   :  { %991 = vmatpush.msrb.mxu1 %v188_v29  ;;  %1013 = vmatpush.msrb.mxu2 %v37_v30  ;;  %v279_v29 = vld [vmem:[%s3873_s0 + $0x840] sm:$0x1]  ;;  %v204_v30 = vld [vmem:[%s3873_s0 + $0x5e8] sm:$0xff] }
  0x3a   :  { %2361 = vmatmul.msk.f32.vlgmr.msrb.gmra.mxu3 %vm325_vm1, %v2536_v14  ;;  %2359 = vmatmul.msk.f32.vlgmr.msrb.gmra.mxu2 %vm325_vm1, %v2536_v14 }
  0x3b   :  { %2368 = vmatpush.msk.msra.mxu3 %vm329_vm0, %v270_v31  ;;  %971 = vmatpush.msrb.mxu0 %v187_v32  ;;  %v53_v31 = vld [vmem:[%s3873_s0 + $0x130] sm:$0xff]  ;;  %v286_v32 = vld [vmem:[%s3873_s0 + $0x878] sm:$0x1] }
  0x3c   :  { %992 = vmatpush.msrb.mxu1 %v112_v33  ;;  %2366 = vmatpush.msk.msra.mxu2 %vm329_vm0, %v269_v34  ;;  %v203_v33 = vld [vmem:[%s3873_s0 + $0x5e0] sm:$0xff]  ;;  %v128_v34 = vld [vmem:[%s3873_s0 + $0x388] sm:$0xff] }
  0x3d   :  { %1111 = vmatpush.msra.mxu3 %v194_v35  ;;  %972 = vmatpush.msrb.mxu0 %v111_v36  ;;  %v285_v35 = vld [vmem:[%s3873_s0 + $0x870] sm:$0x1]  ;;  %v210_v36 = vld [vmem:[%s3873_s0 + $0x618] sm:$0xff] }
  0x3e   :  { %993 = vmatpush.msrb.mxu1 %v36_v37  ;;  %1091 = vmatpush.msra.mxu2 %v193_v38  ;;  %v127_v37 = vld [vmem:[%s3873_s0 + $0x380] sm:$0xff]  ;;  %v52_v38 = vld [vmem:[%s3873_s0 + $0x128] sm:$0xff] }
  0x3f   :  { %2357 = vmatmul.msk.f32.vlgmr.msrb.gmra.mxu1 %vm325_vm1, %v2536_v14  ;;  %1112 = vmatpush.msra.mxu3 %v118_v39  ;;  %v209_v39 = vld [vmem:[%s3873_s0 + $0x610] sm:$0xff] }
  0x40   :  { %973 = vmatpush.msrb.mxu0 %v35_v40  ;;  %2364 = vmatpush.msk.msra.mxu1 %vm329_vm0, %v268_v41  ;;  %v134_v40 = vld [vmem:[%s3873_s0 + $0x3b8] sm:$0xff]  ;;  %v51_v41 = vld [vmem:[%s3873_s0 + $0x120] sm:$0xff] }
  0x41   :  { %1092 = vmatpush.msra.mxu2 %v117_v42  ;;  %2355 = vmatmul.msk.f32.vlgmr.msrb.gmra.mxu0 %vm325_vm1, %v2536_v14  ;;  %v284_v42 = vld [vmem:[%s3873_s0 + $0x868] sm:$0x1] }
  0x42   :  { %1113 = vmatpush.msra.mxu3 %v42_v43  ;;  %2362 = vmatpush.msk.msra.mxu0 %vm329_vm0, %v267_v44  ;;  %v133_v43 = vld [vmem:[%s3873_s0 + $0x3b0] sm:$0xff]  ;;  %v58_v44 = vld [vmem:[%s3873_s0 + $0x158] sm:$0xff] }
  0x43   :  { %1071 = vmatpush.msra.mxu1 %v192_v45  ;;  %1093 = vmatpush.msra.mxu2 %v41_v46  ;;  %v283_v45 = vld [vmem:[%s3873_s0 + $0x860] sm:$0x1]  ;;  %v208_v46 = vld [vmem:[%s3873_s0 + $0x608] sm:$0xff] }
  0x44   :  { %2369 = vmatmul.msk.f32.vlgmr.msra.gmra.mxu3 %vm325_vm1, %v2536_v14  ;;  %2367 = vmatmul.msk.f32.vlgmr.msra.gmra.mxu2 %vm325_vm1, %v2536_v14 }
  0x45   :  { %2376 = vmatpush.msk.msrb.mxu3 %vm329_vm0, %v274_v47  ;;  %1051 = vmatpush.msra.mxu0 %v191_v48  ;;  %v57_v47 = vld [vmem:[%s3873_s0 + $0x150] sm:$0xff]  ;;  %v290_v48 = vld [vmem:[%s3873_s0 + $0x898] sm:$0x1] }
  0x46   :  { %1072 = vmatpush.msra.mxu1 %v116_v49  ;;  %2374 = vmatpush.msk.msrb.mxu2 %vm329_vm0, %v273_v50  ;;  %v207_v49 = vld [vmem:[%s3873_s0 + $0x600] sm:$0xff]  ;;  %v132_v50 = vld [vmem:[%s3873_s0 + $0x3a8] sm:$0xff] }
  0x47   :  { %1191 = vmatpush.msrb.mxu3 %v198_v51  ;;  %1052 = vmatpush.msra.mxu0 %v115_v52  ;;  %v289_v51 = vld [vmem:[%s3873_s0 + $0x890] sm:$0x1]  ;;  %v214_v52 = vld [vmem:[%s3873_s0 + $0x638] sm:$0xff] }
  0x48   :  { %1073 = vmatpush.msra.mxu1 %v40_v53  ;;  %1171 = vmatpush.msrb.mxu2 %v197_v54  ;;  %v131_v53 = vld [vmem:[%s3873_s0 + $0x3a0] sm:$0xff]  ;;  %v56_v54 = vld [vmem:[%s3873_s0 + $0x148] sm:$0xff] }
  0x49   :  { %2365 = vmatmul.msk.f32.vlgmr.msra.gmra.mxu1 %vm325_vm1, %v2536_v14  ;;  %1192 = vmatpush.msrb.mxu3 %v122_v55  ;;  %v213_v55 = vld [vmem:[%s3873_s0 + $0x630] sm:$0xff] }
  0x4a   :  { %1053 = vmatpush.msra.mxu0 %v39_v56  ;;  %2372 = vmatpush.msk.msrb.mxu1 %vm329_vm0, %v272_v57  ;;  %v138_v56 = vld [vmem:[%s3873_s0 + $0x3d8] sm:$0xff]  ;;  %v55_v57 = vld [vmem:[%s3873_s0 + $0x140] sm:$0xff] }
  0x4b   :  { %1172 = vmatpush.msrb.mxu2 %v121_v58  ;;  %2363 = vmatmul.msk.f32.vlgmr.msra.gmra.mxu0 %vm325_vm1, %v2536_v14  ;;  %v288_v58 = vld [vmem:[%s3873_s0 + $0x888] sm:$0x1] }
  0x4c   :  { %1193 = vmatpush.msrb.mxu3 %v46_v59  ;;  %2370 = vmatpush.msk.msrb.mxu0 %vm329_vm0, %v271_v60  ;;  %v137_v59 = vld [vmem:[%s3873_s0 + $0x3d0] sm:$0xff]  ;;  %v62_v60 = vld [vmem:[%s3873_s0 + $0x178] sm:$0xff] }
  0x4d   :  { %1151 = vmatpush.msrb.mxu1 %v196_v61  ;;  %1173 = vmatpush.msrb.mxu2 %v45_v62  ;;  %v287_v61 = vld [vmem:[%s3873_s0 + $0x880] sm:$0x1]  ;;  %v212_v62 = vld [vmem:[%s3873_s0 + $0x628] sm:$0xff] }
  0x4e   :  { %2377 = vmatmul.msk.f32.vlgmr.msrb.gmra.mxu3 %vm325_vm1, %v2536_v14  ;;  %2375 = vmatmul.msk.f32.vlgmr.msrb.gmra.mxu2 %vm325_vm1, %v2536_v14 }
  0x4f   :  { %2384 = vmatpush.msk.msra.mxu3 %vm329_vm0, %v278_v63  ;;  %1131 = vmatpush.msrb.mxu0 %v195_v0  ;;  %v61_v63 = vld [vmem:[%s3873_s0 + $0x170] sm:$0xff]  ;;  %v294_v0 = vld [vmem:[%s3873_s0 + $0x8b8] sm:$0x1] }
  0x50   :  { %1152 = vmatpush.msrb.mxu1 %v120_v1  ;;  %2382 = vmatpush.msk.msra.mxu2 %vm329_vm0, %v277_v2  ;;  %v211_v1 = vld [vmem:[%s3873_s0 + $0x620] sm:$0xff]  ;;  %v136_v2 = vld [vmem:[%s3873_s0 + $0x3c8] sm:$0xff] }
  0x51   :  { %1271 = vmatpush.msra.mxu3 %v202_v3  ;;  %1132 = vmatpush.msrb.mxu0 %v119_v4  ;;  %v293_v3 = vld [vmem:[%s3873_s0 + $0x8b0] sm:$0x1]  ;;  %v218_v4 = vld [vmem:[%s3873_s0 + $0x658] sm:$0xff] }
  0x52   :  { %1153 = vmatpush.msrb.mxu1 %v44_v5  ;;  %1251 = vmatpush.msra.mxu2 %v201_v6  ;;  %v135_v5 = vld [vmem:[%s3873_s0 + $0x3c0] sm:$0xff]  ;;  %v60_v6 = vld [vmem:[%s3873_s0 + $0x168] sm:$0xff] }
  0x53   :  { %2373 = vmatmul.msk.f32.vlgmr.msrb.gmra.mxu1 %vm325_vm1, %v2536_v14  ;;  %1272 = vmatpush.msra.mxu3 %v126_v7  ;;  %v217_v7 = vld [vmem:[%s3873_s0 + $0x650] sm:$0xff] }
  0x54   :  { %1133 = vmatpush.msrb.mxu0 %v43_v8  ;;  %2380 = vmatpush.msk.msra.mxu1 %vm329_vm0, %v276_v9  ;;  %v142_v8 = vld [vmem:[%s3873_s0 + $0x3f8] sm:$0xff]  ;;  %v59_v9 = vld [vmem:[%s3873_s0 + $0x160] sm:$0xff] }
  0x55   :  { %1252 = vmatpush.msra.mxu2 %v125_v10  ;;  %2371 = vmatmul.msk.f32.vlgmr.msrb.gmra.mxu0 %vm325_vm1, %v2536_v14  ;;  %v292_v10 = vld [vmem:[%s3873_s0 + $0x8a8] sm:$0x1] }
  0x56   :  { %1273 = vmatpush.msra.mxu3 %v50_v11  ;;  %2378 = vmatpush.msk.msra.mxu0 %vm329_vm0, %v275_v12  ;;  %v141_v11 = vld [vmem:[%s3873_s0 + $0x3f0] sm:$0xff]  ;;  %v66_v12 = vld [vmem:[%s3873_s0 + $0x198] sm:$0xff] }
  0x57   :  { %1231 = vmatpush.msra.mxu1 %v200_v13  ;;  %1253 = vmatpush.msra.mxu2 %v49_v15  ;;  %v291_v13 = vld [vmem:[%s3873_s0 + $0x8a0] sm:$0x1]  ;;  %v216_v15 = vld [vmem:[%s3873_s0 + $0x648] sm:$0xff] }
  0x58   :  { %2385 = vmatmul.msk.f32.vlgmr.msra.gmra.mxu3 %vm325_vm1, %v2536_v14  ;;  %2383 = vmatmul.msk.f32.vlgmr.msra.gmra.mxu2 %vm325_vm1, %v2536_v14 }
  0x59   :  { %2392 = vmatpush.msk.msrb.mxu3 %vm329_vm0, %v282_v16  ;;  %1211 = vmatpush.msra.mxu0 %v199_v17  ;;  %v65_v16 = vld [vmem:[%s3873_s0 + $0x190] sm:$0xff]  ;;  %v298_v17 = vld [vmem:[%s3873_s0 + $0x8d8] sm:$0x1] }
  0x5a   :  { %1232 = vmatpush.msra.mxu1 %v124_v18  ;;  %2390 = vmatpush.msk.msrb.mxu2 %vm329_vm0, %v281_v19  ;;  %v215_v18 = vld [vmem:[%s3873_s0 + $0x640] sm:$0xff]  ;;  %v140_v19 = vld [vmem:[%s3873_s0 + $0x3e8] sm:$0xff] }
  0x5b   :  { %1351 = vmatpush.msrb.mxu3 %v206_v20  ;;  %1212 = vmatpush.msra.mxu0 %v123_v21  ;;  %v297_v20 = vld [vmem:[%s3873_s0 + $0x8d0] sm:$0x1]  ;;  %v222_v21 = vld [vmem:[%s3873_s0 + $0x678] sm:$0xff] }
  0x5c   :  { %1233 = vmatpush.msra.mxu1 %v48_v22  ;;  %1331 = vmatpush.msrb.mxu2 %v205_v23  ;;  %v139_v22 = vld [vmem:[%s3873_s0 + $0x3e0] sm:$0xff]  ;;  %v64_v23 = vld [vmem:[%s3873_s0 + $0x188] sm:$0xff] }
  0x5d   :  { %2381 = vmatmul.msk.f32.vlgmr.msra.gmra.mxu1 %vm325_vm1, %v2536_v14  ;;  %1352 = vmatpush.msrb.mxu3 %v130_v24  ;;  %v221_v24 = vld [vmem:[%s3873_s0 + $0x670] sm:$0xff] }
  0x5e   :  { %1213 = vmatpush.msra.mxu0 %v47_v25  ;;  %2388 = vmatpush.msk.msrb.mxu1 %vm329_vm0, %v280_v26  ;;  %v146_v25 = vld [vmem:[%s3873_s0 + $0x418] sm:$0xff]  ;;  %v63_v26 = vld [vmem:[%s3873_s0 + $0x180] sm:$0xff] }
  0x5f   :  { %1332 = vmatpush.msrb.mxu2 %v129_v27  ;;  %2379 = vmatmul.msk.f32.vlgmr.msra.gmra.mxu0 %vm325_vm1, %v2536_v14  ;;  %v296_v27 = vld [vmem:[%s3873_s0 + $0x8c8] sm:$0x1] }
  0x60   :  { %1353 = vmatpush.msrb.mxu3 %v54_v28  ;;  %2386 = vmatpush.msk.msrb.mxu0 %vm329_vm0, %v279_v29  ;;  %v145_v28 = vld [vmem:[%s3873_s0 + $0x410] sm:$0xff]  ;;  %v70_v29 = vld [vmem:[%s3873_s0 + $0x1b8] sm:$0xff] }
  0x61   :  { %1311 = vmatpush.msrb.mxu1 %v204_v30  ;;  %1333 = vmatpush.msrb.mxu2 %v53_v31  ;;  %v295_v30 = vld [vmem:[%s3873_s0 + $0x8c0] sm:$0x1]  ;;  %v220_v31 = vld [vmem:[%s3873_s0 + $0x668] sm:$0xff] }
  0x62   :  { %2393 = vmatmul.msk.f32.vlgmr.msrb.gmra.mxu3 %vm325_vm1, %v2536_v14  ;;  %2391 = vmatmul.msk.f32.vlgmr.msrb.gmra.mxu2 %vm325_vm1, %v2536_v14 }
  0x63   :  { %2400 = vmatpush.msk.msra.mxu3 %vm329_vm0, %v286_v32  ;;  %1291 = vmatpush.msrb.mxu0 %v203_v33  ;;  %v69_v32 = vld [vmem:[%s3873_s0 + $0x1b0] sm:$0xff]  ;;  %v302_v33 = vld [vmem:[%s3873_s0 + $0x8f8] sm:$0x1] }
  0x64   :  { %1312 = vmatpush.msrb.mxu1 %v128_v34  ;;  %2398 = vmatpush.msk.msra.mxu2 %vm329_vm0, %v285_v35  ;;  %v219_v34 = vld [vmem:[%s3873_s0 + $0x660] sm:$0xff]  ;;  %v144_v35 = vld [vmem:[%s3873_s0 + $0x408] sm:$0xff] }
  0x65   :  { %1431 = vmatpush.msra.mxu3 %v210_v36  ;;  %1292 = vmatpush.msrb.mxu0 %v127_v37  ;;  %v301_v36 = vld [vmem:[%s3873_s0 + $0x8f0] sm:$0x1]  ;;  %v226_v37 = vld [vmem:[%s3873_s0 + $0x698] sm:$0xff] }
  0x66   :  { %1313 = vmatpush.msrb.mxu1 %v52_v38  ;;  %1411 = vmatpush.msra.mxu2 %v209_v39  ;;  %v143_v39 = vld [vmem:[%s3873_s0 + $0x400] sm:$0xff] }
  0x67   :  { %2389 = vmatmul.msk.f32.vlgmr.msrb.gmra.mxu1 %vm325_vm1, %v2536_v14  ;;  %1432 = vmatpush.msra.mxu3 %v134_v40  ;;  %v68_v40 = vld [vmem:[%s3873_s0 + $0x1a8] sm:$0xff] }
  0x68   :  { %1293 = vmatpush.msrb.mxu0 %v51_v41  ;;  %2396 = vmatpush.msk.msra.mxu1 %vm329_vm0, %v284_v42  ;;  %v225_v41 = vld [vmem:[%s3873_s0 + $0x690] sm:$0xff] }
  0x69   :  { %1412 = vmatpush.msra.mxu2 %v133_v43  ;;  %2387 = vmatmul.msk.f32.vlgmr.msrb.gmra.mxu0 %vm325_vm1, %v2536_v14 }
  0x6a   :  { %1433 = vmatpush.msra.mxu3 %v58_v44  ;;  %2394 = vmatpush.msk.msra.mxu0 %vm329_vm0, %v283_v45  ;;  %v150_v44 = vld [vmem:[%s3873_s0 + $0x438] sm:$0xff]  ;;  %v67_v45 = vld [vmem:[%s3873_s0 + $0x1a0] sm:$0xff] }
  0x6b   :  { %1391 = vmatpush.msra.mxu1 %v208_v46  ;;  %1413 = vmatpush.msra.mxu2 %v57_v47  ;;  %v300_v47 = vld [vmem:[%s3873_s0 + $0x8e8] sm:$0x1] }
  0x6c   :  { %2401 = vmatmul.msk.f32.vlgmr.msra.gmra.mxu3 %vm325_vm1, %v2536_v14  ;;  %2399 = vmatmul.msk.f32.vlgmr.msra.gmra.mxu2 %vm325_vm1, %v2536_v14 }
  0x6d   :  { %2408 = vmatpush.msk.msrb.mxu3 %vm329_vm0, %v290_v48  ;;  %1371 = vmatpush.msra.mxu0 %v207_v49  ;;  %v149_v48 = vld [vmem:[%s3873_s0 + $0x430] sm:$0xff]  ;;  %v74_v49 = vld [vmem:[%s3873_s0 + $0x1d8] sm:$0xff] }
  0x6e   :  { %1392 = vmatpush.msra.mxu1 %v132_v50  ;;  %2406 = vmatpush.msk.msrb.mxu2 %vm329_vm0, %v289_v51  ;;  %v299_v51 = vld [vmem:[%s3873_s0 + $0x8e0] sm:$0x1] }
  0x6f   :  { %1511 = vmatpush.msrb.mxu3 %v214_v52  ;;  %1372 = vmatpush.msra.mxu0 %v131_v53  ;;  %v224_v52 = vld [vmem:[%s3873_s0 + $0x688] sm:$0xff] }
  0x70   :  { %1393 = vmatpush.msra.mxu1 %v56_v54  ;;  %1491 = vmatpush.msrb.mxu2 %v213_v55  ;;  %v73_v54 = vld [vmem:[%s3873_s0 + $0x1d0] sm:$0xff] }
  0x71   :  { %2397 = vmatmul.msk.f32.vlgmr.msra.gmra.mxu1 %vm325_vm1, %v2536_v14  ;;  %1512 = vmatpush.msrb.mxu3 %v138_v56 }
  0x72   :  { %1373 = vmatpush.msra.mxu0 %v55_v57  ;;  %2404 = vmatpush.msk.msrb.mxu1 %vm329_vm0, %v288_v58  ;;  %v3381_v57 = vld [vmem:[%s3874_s1] sm:$0x7]  ;;  %v306_v58 = vld [vmem:[%s3873_s0 + $0x918] sm:$0x1] }
  0x73   :  { %1492 = vmatpush.msrb.mxu2 %v137_v59  ;;  %2395 = vmatmul.msk.f32.vlgmr.msra.gmra.mxu0 %vm325_vm1, %v2536_v14 }
  0x74   :  { %1513 = vmatpush.msrb.mxu3 %v62_v60  ;;  %2402 = vmatpush.msk.msrb.mxu0 %vm329_vm0, %v287_v61  ;;  %v223_v60 = vld [vmem:[%s3873_s0 + $0x680] sm:$0xff]  ;;  %v148_v61 = vld [vmem:[%s3873_s0 + $0x428] sm:$0xff] }
  0x75   :  { %1471 = vmatpush.msrb.mxu1 %v212_v62  ;;  %1493 = vmatpush.msrb.mxu2 %v61_v63  ;;  %v305_v63 = vld [vmem:[%s3873_s0 + $0x910] sm:$0x1] }
  0x76   :  { %2409 = vmatmul.msk.f32.vlgmr.msrb.gmra.mxu3 %vm325_vm1, %v2536_v14  ;;  %2407 = vmatmul.msk.f32.vlgmr.msrb.gmra.mxu2 %vm325_vm1, %v2536_v14 }
  0x77   :  { %2416 = vmatpush.msk.msra.mxu3 %vm329_vm0, %v294_v0  ;;  %1451 = vmatpush.msrb.mxu0 %v211_v1  ;;  %v230_v0 = vld [vmem:[%s3873_s0 + $0x6b8] sm:$0xff] }
  0x78   :  { %1472 = vmatpush.msrb.mxu1 %v136_v2  ;;  %2414 = vmatpush.msk.msra.mxu2 %vm329_vm0, %v293_v3  ;;  %v147_v3 = vld [vmem:[%s3873_s0 + $0x420] sm:$0xff] }
  0x79   :  { %1591 = vmatpush.msra.mxu3 %v218_v4  ;;  %1452 = vmatpush.msrb.mxu0 %v135_v5  ;;  %v72_v4 = vld [vmem:[%s3873_s0 + $0x1c8] sm:$0xff] }
  0x7a   :  { %1473 = vmatpush.msrb.mxu1 %v60_v6  ;;  %1571 = vmatpush.msra.mxu2 %v217_v7 }
  0x7b   :  { %2405 = vmatmul.msk.f32.vlgmr.msrb.gmra.mxu1 %vm325_vm1, %v2536_v14  ;;  %1592 = vmatpush.msra.mxu3 %v142_v8 }
  0x7c   :  { %1453 = vmatpush.msrb.mxu0 %v59_v9  ;;  %2412 = vmatpush.msk.msra.mxu1 %vm329_vm0, %v292_v10  ;;  %v229_v9 = vld [vmem:[%s3873_s0 + $0x6b0] sm:$0xff] }
  0x7d   :  { %1572 = vmatpush.msra.mxu2 %v141_v11  ;;  %2403 = vmatmul.msk.f32.vlgmr.msrb.gmra.mxu0 %vm325_vm1, %v2536_v14 }
  0x7e   :  { %1593 = vmatpush.msra.mxu3 %v66_v12  ;;  %2410 = vmatpush.msk.msra.mxu0 %vm329_vm0, %v291_v13  ;;  %v154_v13 = vld [vmem:[%s3873_s0 + $0x458] sm:$0xff] }
  0x7f   :  { %1551 = vmatpush.msra.mxu1 %v216_v15  ;;  %1573 = vmatpush.msra.mxu2 %v65_v16  ;;  %v71_v15 = vld [vmem:[%s3873_s0 + $0x1c0] sm:$0xff] }
  0x80   :  { %2417 = vmatmul.msk.f32.vlgmr.msra.gmra.mxu3 %vm325_vm1, %v2536_v14  ;;  %2415 = vmatmul.msk.f32.vlgmr.msra.gmra.mxu2 %vm325_vm1, %v2536_v14 }
  0x81   :  { %2424 = vmatpush.msk.msrb.mxu3 %vm329_vm0, %v298_v17  ;;  %1531 = vmatpush.msra.mxu0 %v215_v18  ;;  %v304_v18 = vld [vmem:[%s3873_s0 + $0x908] sm:$0x1] }
  0x82   :  { %1552 = vmatpush.msra.mxu1 %v140_v19  ;;  %2422 = vmatpush.msk.msrb.mxu2 %vm329_vm0, %v297_v20  ;;  %v153_v19 = vld [vmem:[%s3873_s0 + $0x450] sm:$0xff] }
  0x83   :  { %1671 = vmatpush.msrb.mxu3 %v222_v21  ;;  %1532 = vmatpush.msra.mxu0 %v139_v22  ;;  %v78_v21 = vld [vmem:[%s3873_s0 + $0x1f8] sm:$0xff] }
  0x84   :  { %1553 = vmatpush.msra.mxu1 %v64_v23  ;;  %1651 = vmatpush.msrb.mxu2 %v221_v24  ;;  %v303_v23 = vld [vmem:[%s3873_s0 + $0x900] sm:$0x1]  ;;  %v228_v24 = vld [vmem:[%s3873_s0 + $0x6a8] sm:$0xff] }
  0x85   :  { %2413 = vmatmul.msk.f32.vlgmr.msra.gmra.mxu1 %vm325_vm1, %v2536_v14  ;;  %1672 = vmatpush.msrb.mxu3 %v146_v25 }
  0x86   :  { %1533 = vmatpush.msra.mxu0 %v63_v26  ;;  %2420 = vmatpush.msk.msrb.mxu1 %vm329_vm0, %v296_v27  ;;  %v77_v26 = vld [vmem:[%s3873_s0 + $0x1f0] sm:$0xff]  ;;  %v310_v27 = vld [vmem:[%s3873_s0 + $0x938] sm:$0x1] }
  0x87   :  { %1652 = vmatpush.msrb.mxu2 %v145_v28  ;;  %2411 = vmatmul.msk.f32.vlgmr.msra.gmra.mxu0 %vm325_vm1, %v2536_v14  ;;  %v227_v28 = vld [vmem:[%s3873_s0 + $0x6a0] sm:$0xff] }
  0x88   :  { %1673 = vmatpush.msrb.mxu3 %v70_v29  ;;  %2418 = vmatpush.msk.msrb.mxu0 %vm329_vm0, %v295_v30  ;;  %v152_v29 = vld [vmem:[%s3873_s0 + $0x448] sm:$0xff]  ;;  %v309_v30 = vld [vmem:[%s3873_s0 + $0x930] sm:$0x1] }
  0x89   :  { %1631 = vmatpush.msrb.mxu1 %v220_v31  ;;  %1653 = vmatpush.msrb.mxu2 %v69_v32  ;;  %v234_v31 = vld [vmem:[%s3873_s0 + $0x6d8] sm:$0xff] }
  0x8a   :  { %2425 = vmatmul.msk.f32.vlgmr.msrb.gmra.mxu3 %vm325_vm1, %v2536_v14  ;;  %v595_v38 = vpop.f32.mrf.mxu1  ;;  %2423 = vmatmul.msk.f32.vlgmr.msrb.gmra.mxu2 %vm325_vm1, %v2536_v14  ;;  %v575_v42 = vpop.f32.mrf.mxu0 }
  0x8b   :  { %2432 = vmatpush.msk.msra.mxu3 %vm329_vm0, %v302_v33  ;;  %1611 = vmatpush.msrb.mxu0 %v219_v34  ;;  %v151_v33 = vld [vmem:[%s3873_s0 + $0x440] sm:$0xff]  ;;  %v76_v34 = vld [vmem:[%s3873_s0 + $0x1e8] sm:$0xff] }
  0x8c   :  { %1632 = vmatpush.msrb.mxu1 %v144_v35  ;;  %v615_v43 = vpop.f32.mrf.mxu2  ;;  %2430 = vmatpush.msk.msra.mxu2 %vm329_vm0, %v301_v36  ;;  %v635_v46 = vpop.f32.mrf.mxu3 }
  0x8d   :  { %1751 = vmatpush.msra.mxu3 %v226_v37  ;;  %1612 = vmatpush.msrb.mxu0 %v143_v39 }
  0x8e   :  { %1633 = vmatpush.msrb.mxu1 %v68_v40  ;;  %1731 = vmatpush.msra.mxu2 %v225_v41  ;;  %v158_v41 = vld [vmem:[%s3873_s0 + $0x478] sm:$0xff] }
  0x8f   :  { %2421 = vmatmul.msk.f32.vlgmr.msrb.gmra.mxu1 %vm325_vm1, %v2536_v14  ;;  %v3362_v50 = vpop.permute.xlu0 %322  ;;  %1752 = vmatpush.msra.mxu3 %v150_v44 }
  0x90   :  { %1613 = vmatpush.msrb.mxu0 %v67_v45  ;;  %v576_v53 = vadd.f32 %v575_v42, %v3362_v50  ;;  %v596_v14 = vadd.f32 %v595_v38, %v3362_v50  ;;  %2428 = vmatpush.msk.msra.mxu1 %vm329_vm0, %v300_v47  ;;  %v616_v55 = vadd.f32 %v615_v43, %v3362_v50  ;;  %v233_v38 = vld [vmem:[%s3873_s0 + $0x6d0] sm:$0xff]  ;;  %v75_v42 = vld [vmem:[%s3873_s0 + $0x1e0] sm:$0xff]  ;;  %v308_v45 = vld [vmem:[%s3873_s0 + $0x928] sm:$0x1] }
  0x91   :  { %1732 = vmatpush.msra.mxu2 %v149_v48  ;;  %v636_v56 = vadd.f32 %v635_v46, %v3362_v50  ;;  %2419 = vmatmul.msk.f32.vlgmr.msrb.gmra.mxu0 %vm325_vm1, %v3381_v57  ;;  %v157_v46 = vld [vmem:[%s3873_s0 + $0x470] sm:$0xff] }
  0x92   :  { %1753 = vmatpush.msra.mxu3 %v74_v49  ;;  %v2154_v59 = vrot.slane %v596_v14, 4  ;;  %2426 = vmatpush.msk.msra.mxu0 %vm329_vm0, %v299_v51  ;;  %v82_v49 = vld [vmem:[%s3873_s0 + $0x218] sm:$0xff]  ;;  %v307_v51 = vld [vmem:[%s3873_s0 + $0x920] sm:$0x1] }
  0x93   :  { %1711 = vmatpush.msra.mxu1 %v224_v52  ;;  %v2155_v62 = vrot.slane %v636_v56, 4  ;;  %1733 = vmatpush.msra.mxu2 %v73_v54  ;;  %v675_v2 = vpop.f32.mrf.mxu1  ;;  %v232_v52 = vld [vmem:[%s3873_s0 + $0x6c8] sm:$0xff]  ;;  %v81_v54 = vld [vmem:[%s3873_s0 + $0x210] sm:$0xff]  ;;  %v231_v56 = vld [vmem:[%s3873_s0 + $0x6c0] sm:$0xff] }
  0x94   :  { %2433 = vmatmul.msk.f32.vlgmr.msra.gmra.mxu3 %vm325_vm1, %v3381_v57  ;;  %v2193_v1 = vsel %vm2192_vm2, %v576_v53, %v2154_v59  ;;  %2431 = vmatmul.msk.f32.vlgmr.msra.gmra.mxu2 %vm325_vm1, %v3381_v57  ;;  %v676_v6 = vadd.f32 %v675_v2, %v3362_v50  ;;  %v715_v8 = vpop.f32.mrf.mxu3  ;;  %v313_v59 = vld [vmem:[%s3873_s0 + $0x950] sm:$0x1] }
  0x95   :  { %2440 = vmatpush.msk.msrb.mxu3 %vm329_vm0, %v306_v58  ;;  %2269 = vst [vmem:[%s3876_s3] sm:$0x77] %v2193_v1  ;;  %v2194_v5 = vsel %vm2192_vm2, %v616_v55, %v2155_v62  ;;  %v695_v7 = vpop.f32.mrf.mxu2  ;;  %1691 = vmatpush.msra.mxu0 %v223_v60  ;;  %v716_v12 = vadd.f32 %v715_v8, %v3362_v50  ;;  %v314_v55 = vld [vmem:[%s3873_s0 + $0x958] sm:$0x1]  ;;  %v156_v58 = vld [vmem:[%s3873_s0 + $0x468] sm:$0xff]  ;;  %v155_v62 = vld [vmem:[%s3873_s0 + $0x460] sm:$0xff] }
  0x96   :  { %1712 = vmatpush.msra.mxu1 %v148_v61  ;;  %2270 = vst [vmem:[%s3876_s3 + $0x8] sm:$0x77] %v2194_v5  ;;  %v655_v10 = vpop.f32.mrf.mxu0  ;;  %v696_v11 = vadd.f32 %v695_v7, %v3362_v50  ;;  %2438 = vmatpush.msk.msrb.mxu2 %vm329_vm0, %v305_v63  ;;  %v2156_v16 = vrot.slane %v676_v6, 4  ;;  %v238_v60 = vld [vmem:[%s3873_s0 + $0x6f8] sm:$0xff]  ;;  %v80_v63 = vld [vmem:[%s3873_s0 + $0x208] sm:$0xff]  ;;  %v237_v2 = vld [vmem:[%s3873_s0 + $0x6f0] sm:$0xff] }
  0x97   :  { %1831 = vmatpush.msrb.mxu3 %v230_v0  ;;  %v656_v17 = vadd.f32 %v655_v10, %v3362_v50  ;;  %1692 = vmatpush.msra.mxu0 %v147_v3  ;;  %v2157_v20 = vrot.slane %v716_v12, 4  ;;  %v162_v5 = vld [vmem:[%s3873_s0 + $0x498] sm:$0xff]  ;;  %v79_v6 = vld [vmem:[%s3873_s0 + $0x200] sm:$0xff]  ;;  %v312_v10 = vld [vmem:[%s3873_s0 + $0x948] sm:$0x1] }
  0x98   :  { %1713 = vmatpush.msra.mxu1 %v72_v4  ;;  %1811 = vmatpush.msrb.mxu2 %v229_v9 }
  0x99   :  { %2429 = vmatmul.msk.f32.vlgmr.msra.gmra.mxu1 %vm325_vm1, %v3381_v57  ;;  %v2195_v22 = vsel %vm2192_vm2, %v656_v17, %v2156_v16  ;;  %1832 = vmatpush.msrb.mxu3 %v154_v13  ;;  %v2196_v25 = vsel %vm2192_vm2, %v696_v11, %v2157_v20  ;;  %v161_v11 = vld [vmem:[%s3873_s0 + $0x490] sm:$0xff]  ;;  %v311_v16 = vld [vmem:[%s3873_s0 + $0x940] sm:$0x1]  ;;  %v236_v17 = vld [vmem:[%s3873_s0 + $0x6e8] sm:$0xff] }
  0x9a   :  { %1693 = vmatpush.msra.mxu0 %v71_v15  ;;  %2271 = vst [vmem:[%s3876_s3 + $0x10] sm:$0x77] %v2195_v22  ;;  %2436 = vmatpush.msk.msrb.mxu1 %vm329_vm0, %v304_v18  ;;  %v86_v15 = vld [vmem:[%s3873_s0 + $0x238] sm:$0xff]  ;;  %v85_v20 = vld [vmem:[%s3873_s0 + $0x230] sm:$0xff]  ;;  %v235_v22 = vld [vmem:[%s3873_s0 + $0x6e0] sm:$0xff] }
  0x9b   :  { %1812 = vmatpush.msrb.mxu2 %v153_v19  ;;  %2272 = vst [vmem:[%s3876_s3 + $0x18] sm:$0x77] %v2196_v25  ;;  %2427 = vmatmul.msk.f32.vlgmr.msra.gmra.mxu0 %vm325_vm1, %v3381_v57  ;;  %v242_v25 = vld [vmem:[%s3873_s0 + $0x718] sm:$0xff] }
  0x9c   :  { %1833 = vmatpush.msrb.mxu3 %v78_v21  ;;  %2434 = vmatpush.msk.msrb.mxu0 %vm329_vm0, %v303_v23  ;;  %v318_v21 = vld [vmem:[%s3873_s0 + $0x978] sm:$0x1]  ;;  %v160_v23 = vld [vmem:[%s3873_s0 + $0x488] sm:$0xff] }
  0x9d   :  { %1791 = vmatpush.msrb.mxu1 %v228_v24  ;;  %1813 = vmatpush.msrb.mxu2 %v77_v26  ;;  %v317_v24 = vld [vmem:[%s3873_s0 + $0x970] sm:$0x1] }
  0x9e   :  { %2441 = vmatmul.msk.f32.vlgmr.msrb.gmra.mxu3 %vm325_vm1, %v3381_v57  ;;  %v755_v32 = vpop.f32.mrf.mxu1  ;;  %2439 = vmatmul.msk.f32.vlgmr.msrb.gmra.mxu2 %vm325_vm1, %v3381_v57  ;;  %v795_v37 = vpop.f32.mrf.mxu3 }
  0x9f   :  { %2448 = vmatpush.msk.msra.mxu3 %vm329_vm0, %v310_v27  ;;  %v756_v35 = vadd.f32 %v755_v32, %v3362_v50  ;;  %v775_v36 = vpop.f32.mrf.mxu2  ;;  %1771 = vmatpush.msrb.mxu0 %v227_v28  ;;  %v796_v40 = vadd.f32 %v795_v37, %v3362_v50  ;;  %v159_v27 = vld [vmem:[%s3873_s0 + $0x480] sm:$0xff]  ;;  %v84_v28 = vld [vmem:[%s3873_s0 + $0x228] sm:$0xff] }
  0xa0   :  { %1792 = vmatpush.msrb.mxu1 %v152_v29  ;;  %v776_v39 = vadd.f32 %v775_v36, %v3362_v50  ;;  %2446 = vmatpush.msk.msra.mxu2 %vm329_vm0, %v309_v30  ;;  %v735_v44 = vpop.f32.mrf.mxu0 }
  0xa1   :  { %1911 = vmatpush.msra.mxu3 %v234_v31  ;;  %v2158_v43 = vrot.slane %v756_v35, 4  ;;  %1772 = vmatpush.msrb.mxu0 %v151_v33  ;;  %v736_v47 = vadd.f32 %v735_v44, %v3362_v50  ;;  %v2159_v48 = vrot.slane %v796_v40, 4  ;;  %v241_v31 = vld [vmem:[%s3873_s0 + $0x710] sm:$0xff]  ;;  %v83_v35 = vld [vmem:[%s3873_s0 + $0x220] sm:$0xff] }
  0xa2   :  { %1793 = vmatpush.msrb.mxu1 %v76_v34  ;;  %1891 = vmatpush.msra.mxu2 %v233_v38  ;;  %v166_v34 = vld [vmem:[%s3873_s0 + $0x4b8] sm:$0xff]  ;;  %v165_v40 = vld [vmem:[%s3873_s0 + $0x4b0] sm:$0xff]  ;;  %v315_v44 = vld [vmem:[%s3873_s0 + $0x960] sm:$0x1] }
  0xa3   :  { %2437 = vmatmul.msk.f32.vlgmr.msrb.gmra.mxu1 %vm325_vm1, %v3381_v57  ;;  %1912 = vmatpush.msra.mxu3 %v158_v41  ;;  %v2197_v53 = vsel %vm2192_vm2, %v736_v47, %v2158_v43  ;;  %v2198_v14 = vsel %vm2192_vm2, %v776_v39, %v2159_v48  ;;  %v316_v39 = vld [vmem:[%s3873_s0 + $0x968] sm:$0x1]  ;;  %v90_v43 = vld [vmem:[%s3873_s0 + $0x258] sm:$0xff]  ;;  %v89_v48 = vld [vmem:[%s3873_s0 + $0x250] sm:$0xff] }
  0xa4   :  { %1773 = vmatpush.msrb.mxu0 %v75_v42  ;;  %2444 = vmatpush.msk.msra.mxu1 %vm329_vm0, %v308_v45  ;;  %2273 = vst [vmem:[%s3876_s3 + $0x20] sm:$0x77] %v2197_v53  ;;  %v240_v45 = vld [vmem:[%s3873_s0 + $0x708] sm:$0xff] }
  0xa5   :  { %1892 = vmatpush.msra.mxu2 %v157_v46  ;;  %2435 = vmatmul.msk.f32.vlgmr.msrb.gmra.mxu0 %vm325_vm1, %v3381_v57  ;;  %2274 = vst [vmem:[%s3876_s3 + $0x28] sm:$0x77] %v2198_v14  ;;  %v88_v14 = vld [vmem:[%s3873_s0 + $0x248] sm:$0xff] }
  0xa6   :  { %1913 = vmatpush.msra.mxu3 %v82_v49  ;;  %2442 = vmatpush.msk.msra.mxu0 %vm329_vm0, %v307_v51  ;;  %v239_v49 = vld [vmem:[%s3873_s0 + $0x700] sm:$0xff]  ;;  %v164_v51 = vld [vmem:[%s3873_s0 + $0x4a8] sm:$0xff] }
  0xa7   :  { %1871 = vmatpush.msra.mxu1 %v232_v52  ;;  %1893 = vmatpush.msra.mxu2 %v81_v54  ;;  %v163_v52 = vld [vmem:[%s3873_s0 + $0x4a0] sm:$0xff] }
  0xa8   :  { %2449 = vmatmul.msk.f32.vlgmr.msra.gmra.mxu3 %vm325_vm1, %v3381_v57  ;;  %v835_v61 = vpop.f32.mrf.mxu1  ;;  %2447 = vmatmul.msk.f32.vlgmr.msra.gmra.mxu2 %vm325_vm1, %v3381_v57 }
  0xa9   :  { %2456 = vmatpush.msk.msrb.mxu3 %vm329_vm0, %v314_v55  ;;  %v836_v0 = vadd.f32 %v835_v61, %v3362_v50  ;;  %v875_v1 = vpop.f32.mrf.mxu3  ;;  %1851 = vmatpush.msra.mxu0 %v231_v56  ;;  %v855_v3 = vpop.f32.mrf.mxu2  ;;  %v87_v56 = vld [vmem:[%s3873_s0 + $0x240] sm:$0xff] }
  0xaa   :  { %1872 = vmatpush.msra.mxu1 %v156_v58  ;;  %v876_v4 = vadd.f32 %v875_v1, %v3362_v50  ;;  %2454 = vmatpush.msk.msrb.mxu2 %vm329_vm0, %v313_v59  ;;  %v815_v8 = vpop.f32.mrf.mxu0  ;;  %v856_v9 = vadd.f32 %v855_v3, %v3362_v50 }
  0xab   :  { %1991 = vmatpush.msrb.mxu3 %v238_v60  ;;  %v2160_v7 = vrot.slane %v836_v0, 4  ;;  %1852 = vmatpush.msra.mxu0 %v155_v62  ;;  %v816_v12 = vadd.f32 %v815_v8, %v3362_v50 }
  0xac   :  { %1873 = vmatpush.msra.mxu1 %v80_v63  ;;  %v2161_v13 = vrot.slane %v876_v4, 4  ;;  %1971 = vmatpush.msrb.mxu2 %v237_v2 }
  0xad   :  { %2445 = vmatmul.msk.f32.vlgmr.msra.gmra.mxu1 %vm325_vm1, %v3381_v57  ;;  %1992 = vmatpush.msrb.mxu3 %v162_v5  ;;  %v2199_v18 = vsel %vm2192_vm2, %v816_v12, %v2160_v7 }
  0xae   :  { %1853 = vmatpush.msra.mxu0 %v79_v6  ;;  %v2200_v19 = vsel %vm2192_vm2, %v856_v9, %v2161_v13  ;;  %2452 = vmatpush.msk.msrb.mxu1 %vm329_vm0, %v312_v10  ;;  %2275 = vst [vmem:[%s3876_s3 + $0x30] sm:$0x77] %v2199_v18 }
  0xaf   :  { %1972 = vmatpush.msrb.mxu2 %v161_v11  ;;  %2443 = vmatmul.msk.f32.vlgmr.msra.gmra.mxu0 %vm325_vm1, %v3381_v57  ;;  %2276 = vst [vmem:[%s3876_s3 + $0x38] sm:$0x77] %v2200_v19 }
  0xb0   :  { %1993 = vmatpush.msrb.mxu3 %v86_v15  ;;  %2450 = vmatpush.msk.msrb.mxu0 %vm329_vm0, %v311_v16 }
  0xb1   :  { %1951 = vmatpush.msrb.mxu1 %v236_v17  ;;  %1973 = vmatpush.msrb.mxu2 %v85_v20 }
  0xb2   :  { %2457 = vmatmul.msk.f32.vlgmr.msrb.gmra.mxu3 %vm325_vm1, %v3381_v57  ;;  %v915_v26 = vpop.f32.mrf.mxu1  ;;  %2455 = vmatmul.msk.f32.vlgmr.msrb.gmra.mxu2 %vm325_vm1, %v3381_v57 }
  0xb3   :  { %2464 = vmatpush.msk.msra.mxu3 %vm329_vm0, %v318_v21  ;;  %v916_v29 = vadd.f32 %v915_v26, %v3362_v50  ;;  %v955_v30 = vpop.f32.mrf.mxu3  ;;  %1931 = vmatpush.msrb.mxu0 %v235_v22  ;;  %v935_v32 = vpop.f32.mrf.mxu2 }
  0xb4   :  { %1952 = vmatpush.msrb.mxu1 %v160_v23  ;;  %v956_v33 = vadd.f32 %v955_v30, %v3362_v50  ;;  %2462 = vmatpush.msk.msra.mxu2 %vm329_vm0, %v317_v24  ;;  %v895_v37 = vpop.f32.mrf.mxu0  ;;  %v936_v38 = vadd.f32 %v935_v32, %v3362_v50 }
  0xb5   :  { %2071 = vmatpush.msra.mxu3 %v242_v25  ;;  %v2162_v36 = vrot.slane %v916_v29, 4  ;;  %1932 = vmatpush.msrb.mxu0 %v159_v27  ;;  %v896_v41 = vadd.f32 %v895_v37, %v3362_v50 }
  0xb6   :  { %1953 = vmatpush.msrb.mxu1 %v84_v28  ;;  %v2163_v42 = vrot.slane %v956_v33, 4  ;;  %2051 = vmatpush.msra.mxu2 %v241_v31 }
  0xb7   :  { %2453 = vmatmul.msk.f32.vlgmr.msrb.gmra.mxu1 %vm325_vm1, %v3381_v57  ;;  %2072 = vmatpush.msra.mxu3 %v166_v34  ;;  %v2201_v46 = vsel %vm2192_vm2, %v896_v41, %v2162_v36 }
  0xb8   :  { %1933 = vmatpush.msrb.mxu0 %v83_v35  ;;  %v2202_v47 = vsel %vm2192_vm2, %v936_v38, %v2163_v42  ;;  %2460 = vmatpush.msk.msra.mxu1 %vm329_vm0, %v316_v39  ;;  %2277 = vst [vmem:[%s3876_s3 + $0x40] sm:$0x77] %v2201_v46 }
  0xb9   :  { %2052 = vmatpush.msra.mxu2 %v165_v40  ;;  %2451 = vmatmul.msk.f32.vlgmr.msrb.gmra.mxu0 %vm325_vm1, %v3381_v57  ;;  %2278 = vst [vmem:[%s3876_s3 + $0x48] sm:$0x77] %v2202_v47 }
  0xba   :  { %2073 = vmatpush.msra.mxu3 %v90_v43  ;;  %2458 = vmatpush.msk.msra.mxu0 %vm329_vm0, %v315_v44 }
  0xbb   :  { %2031 = vmatpush.msra.mxu1 %v240_v45  ;;  %2053 = vmatpush.msra.mxu2 %v89_v48 }
  0xbc   :  { %2465 = vmatmul.msk.f32.vlgmr.msra.gmra.mxu3 %vm325_vm1, %v3381_v57  ;;  %v995_v53 = vpop.f32.mrf.mxu1  ;;  %2463 = vmatmul.msk.f32.vlgmr.msra.gmra.mxu2 %vm325_vm1, %v3381_v57 }
  0xbd   :  { %2011 = vmatpush.msra.mxu0 %v239_v49  ;;  %v996_v54 = vadd.f32 %v995_v53, %v3362_v50  ;;  %v1035_v55 = vpop.f32.mrf.mxu3  ;;  %2032 = vmatpush.msra.mxu1 %v164_v51  ;;  %v1015_v58 = vpop.f32.mrf.mxu2 }
  0xbe   :  { %v1036_v59 = vadd.f32 %v1035_v55, %v3362_v50  ;;  %v975_v61 = vpop.f32.mrf.mxu0  ;;  %v1016_v62 = vadd.f32 %v1015_v58, %v3362_v50 }
  0xbf   :  { %2012 = vmatpush.msra.mxu0 %v163_v52  ;;  %v2164_v60 = vrot.slane %v996_v54, 4  ;;  %2033 = vmatpush.msra.mxu1 %v88_v14  ;;  %v976_v63 = vadd.f32 %v975_v61, %v3362_v50 }
  0xc0   :  { %v2165_v0 = vrot.slane %v1036_v59, 4  ;;  %2461 = vmatmul.msk.f32.vlgmr.msra.gmra.mxu1 %vm325_vm1, %v3381_v57 }
  0xc1   :  { %2013 = vmatpush.msra.mxu0 %v87_v56  ;;  %v2203_v1 = vsel %vm2192_vm2, %v976_v63, %v2164_v60 }
  0xc2   :  { %2459 = vmatmul.msk.f32.vlgmr.msra.gmra.mxu0 %vm325_vm1, %v3381_v57  ;;  %v2204_v2 = vsel %vm2192_vm2, %v1016_v62, %v2165_v0  ;;  %2279 = vst [vmem:[%s3876_s3 + $0x50] sm:$0x77] %v2203_v1 }
  0xc3   :  { %2280 = vst [vmem:[%s3876_s3 + $0x58] sm:$0x77] %v2204_v2 }
  0xc6   :  { %v1075_v3 = vpop.f32.mrf.mxu1 }
  0xc7   :  { %v1076_v4 = vadd.f32 %v1075_v3, %v3362_v50  ;;  %v1115_v5 = vpop.f32.mrf.mxu3  ;;  %v1095_v6 = vpop.f32.mrf.mxu2 }
  0xc8   :  { %v1116_v7 = vadd.f32 %v1115_v5, %v3362_v50  ;;  %v1055_v8 = vpop.f32.mrf.mxu0  ;;  %v1096_v9 = vadd.f32 %v1095_v6, %v3362_v50 }
  0xc9   :  { %v2166_v57 = vrot.slane %v1076_v4, 4  ;;  %v1056_v10 = vadd.f32 %v1055_v8, %v3362_v50 }
  0xca   :  { %v2167_v11 = vrot.slane %v1116_v7, 4 }
  0xcb   :  { %v2205_v12 = vsel %vm2192_vm2, %v1056_v10, %v2166_v57 }
  0xcc   :  { %v2206_v13 = vsel %vm2192_vm2, %v1096_v9, %v2167_v11  ;;  %2281 = vst [vmem:[%s3876_s3 + $0x60] sm:$0x77] %v2205_v12 }
  0xcd   :  { %2282 = vst [vmem:[%s3876_s3 + $0x68] sm:$0x77] %v2206_v13 }
  0xd0   :  { %v1155_v15 = vpop.f32.mrf.mxu1 }
  0xd1   :  { %v1156_v16 = vadd.f32 %v1155_v15, %v3362_v50  ;;  %v1195_v17 = vpop.f32.mrf.mxu3  ;;  %v1175_v18 = vpop.f32.mrf.mxu2 }
  0xd2   :  { %v1196_v19 = vadd.f32 %v1195_v17, %v3362_v50  ;;  %v1135_v21 = vpop.f32.mrf.mxu0  ;;  %v1176_v22 = vadd.f32 %v1175_v18, %v3362_v50 }
  0xd3   :  { %v2168_v20 = vrot.slane %v1156_v16, 4  ;;  %v1136_v23 = vadd.f32 %v1135_v21, %v3362_v50 }
  0xd4   :  { %v2169_v24 = vrot.slane %v1196_v19, 4 }
  0xd5   :  { %v2207_v25 = vsel %vm2192_vm2, %v1136_v23, %v2168_v20 }
  0xd6   :  { %v2208_v26 = vsel %vm2192_vm2, %v1176_v22, %v2169_v24  ;;  %2283 = vst [vmem:[%s3876_s3 + $0x70] sm:$0x77] %v2207_v25 }
  0xd7   :  { %2284 = vst [vmem:[%s3876_s3 + $0x78] sm:$0x77] %v2208_v26 }
  0xda   :  { %v1235_v27 = vpop.f32.mrf.mxu1 }
  0xdb   :  { %v1236_v28 = vadd.f32 %v1235_v27, %v3362_v50  ;;  %v1275_v29 = vpop.f32.mrf.mxu3  ;;  %v1255_v30 = vpop.f32.mrf.mxu2 }
  0xdc   :  { %v1276_v31 = vadd.f32 %v1275_v29, %v3362_v50  ;;  %v1215_v33 = vpop.f32.mrf.mxu0  ;;  %v1256_v34 = vadd.f32 %v1255_v30, %v3362_v50 }
  0xdd   :  { %v2170_v32 = vrot.slane %v1236_v28, 4  ;;  %v1216_v35 = vadd.f32 %v1215_v33, %v3362_v50 }
  0xde   :  { %v2171_v36 = vrot.slane %v1276_v31, 4 }
  0xdf   :  { %v2209_v37 = vsel %vm2192_vm2, %v1216_v35, %v2170_v32 }
  0xe0   :  { %v2210_v38 = vsel %vm2192_vm2, %v1256_v34, %v2171_v36  ;;  %2285 = vst [vmem:[%s3876_s3 + $0x80] sm:$0x77] %v2209_v37 }
  0xe1   :  { %2286 = vst [vmem:[%s3876_s3 + $0x88] sm:$0x77] %v2210_v38 }
  0xe4   :  { %v1315_v39 = vpop.f32.mrf.mxu1 }
  0xe5   :  { %v1316_v40 = vadd.f32 %v1315_v39, %v3362_v50  ;;  %v1355_v41 = vpop.f32.mrf.mxu3  ;;  %v1335_v42 = vpop.f32.mrf.mxu2 }
  0xe6   :  { %v1356_v43 = vadd.f32 %v1355_v41, %v3362_v50  ;;  %v1295_v45 = vpop.f32.mrf.mxu0  ;;  %v1336_v46 = vadd.f32 %v1335_v42, %v3362_v50 }
  0xe7   :  { %v2172_v44 = vrot.slane %v1316_v40, 4  ;;  %v1296_v47 = vadd.f32 %v1295_v45, %v3362_v50 }
  0xe8   :  { %v2173_v48 = vrot.slane %v1356_v43, 4 }
  0xe9   :  { %v2211_v49 = vsel %vm2192_vm2, %v1296_v47, %v2172_v44 }
  0xea   :  { %v2212_v51 = vsel %vm2192_vm2, %v1336_v46, %v2173_v48  ;;  %2287 = vst [vmem:[%s3876_s3 + $0x90] sm:$0x77] %v2211_v49 }
  0xeb   :  { %2288 = vst [vmem:[%s3876_s3 + $0x98] sm:$0x77] %v2212_v51 }
  0xee   :  { %v1395_v52 = vpop.f32.mrf.mxu1 }
  0xef   :  { %v1396_v53 = vadd.f32 %v1395_v52, %v3362_v50  ;;  %v1435_v14 = vpop.f32.mrf.mxu3  ;;  %v1415_v54 = vpop.f32.mrf.mxu2 }
  0xf0   :  { %v1436_v55 = vadd.f32 %v1435_v14, %v3362_v50  ;;  %v1375_v58 = vpop.f32.mrf.mxu0  ;;  %v1416_v59 = vadd.f32 %v1415_v54, %v3362_v50 }
  0xf1   :  { %v2174_v56 = vrot.slane %v1396_v53, 4  ;;  %v1376_v60 = vadd.f32 %v1375_v58, %v3362_v50 }
  0xf2   :  { %v2175_v61 = vrot.slane %v1436_v55, 4 }
  0xf3   :  { %v2213_v62 = vsel %vm2192_vm2, %v1376_v60, %v2174_v56 }
  0xf4   :  { %v2214_v63 = vsel %vm2192_vm2, %v1416_v59, %v2175_v61  ;;  %2289 = vst [vmem:[%s3876_s3 + $0xa0] sm:$0x77] %v2213_v62 }
  0xf5   :  { %2290 = vst [vmem:[%s3876_s3 + $0xa8] sm:$0x77] %v2214_v63 }
  0xf8   :  { %v1475_v0 = vpop.f32.mrf.mxu1 }
  0xf9   :  { %v1476_v1 = vadd.f32 %v1475_v0, %v3362_v50  ;;  %v1515_v2 = vpop.f32.mrf.mxu3  ;;  %v1495_v3 = vpop.f32.mrf.mxu2 }
  0xfa   :  { %v1516_v4 = vadd.f32 %v1515_v2, %v3362_v50  ;;  %v1455_v6 = vpop.f32.mrf.mxu0  ;;  %v1496_v7 = vadd.f32 %v1495_v3, %v3362_v50 }
  0xfb   :  { %v2176_v5 = vrot.slane %v1476_v1, 4  ;;  %v1456_v57 = vadd.f32 %v1455_v6, %v3362_v50 }
  0xfc   :  { %v2177_v8 = vrot.slane %v1516_v4, 4 }
  0xfd   :  { %v2215_v9 = vsel %vm2192_vm2, %v1456_v57, %v2176_v5 }
  0xfe   :  { %v2216_v10 = vsel %vm2192_vm2, %v1496_v7, %v2177_v8  ;;  %2291 = vst [vmem:[%s3876_s3 + $0xb0] sm:$0x77] %v2215_v9 }
  0xff   :  { %2292 = vst [vmem:[%s3876_s3 + $0xb8] sm:$0x77] %v2216_v10 }
 0x102   :  { %v1555_v11 = vpop.f32.mrf.mxu1 }
 0x103   :  { %v1556_v12 = vadd.f32 %v1555_v11, %v3362_v50  ;;  %v1595_v13 = vpop.f32.mrf.mxu3  ;;  %v1575_v15 = vpop.f32.mrf.mxu2 }
 0x104   :  { %v1596_v16 = vadd.f32 %v1595_v13, %v3362_v50  ;;  %v1535_v18 = vpop.f32.mrf.mxu0  ;;  %v1576_v19 = vadd.f32 %v1575_v15, %v3362_v50 }
 0x105   :  { %v2178_v17 = vrot.slane %v1556_v12, 4  ;;  %v1536_v20 = vadd.f32 %v1535_v18, %v3362_v50 }
 0x106   :  { %v2179_v21 = vrot.slane %v1596_v16, 4 }
 0x107   :  { %v2217_v22 = vsel %vm2192_vm2, %v1536_v20, %v2178_v17 }
 0x108   :  { %v2218_v23 = vsel %vm2192_vm2, %v1576_v19, %v2179_v21  ;;  %2293 = vst [vmem:[%s3876_s3 + $0xc0] sm:$0x77] %v2217_v22 }
 0x109   :  { %2294 = vst [vmem:[%s3876_s3 + $0xc8] sm:$0x77] %v2218_v23 }
 0x10c   :  { %v1635_v24 = vpop.f32.mrf.mxu1 }
 0x10d   :  { %v1636_v25 = vadd.f32 %v1635_v24, %v3362_v50  ;;  %v1675_v26 = vpop.f32.mrf.mxu3  ;;  %v1655_v27 = vpop.f32.mrf.mxu2 }
 0x10e   :  { %v1676_v28 = vadd.f32 %v1675_v26, %v3362_v50  ;;  %v1615_v30 = vpop.f32.mrf.mxu0  ;;  %v1656_v31 = vadd.f32 %v1655_v27, %v3362_v50 }
 0x10f   :  { %v2180_v29 = vrot.slane %v1636_v25, 4  ;;  %v1616_v32 = vadd.f32 %v1615_v30, %v3362_v50 }
 0x110   :  { %v2181_v33 = vrot.slane %v1676_v28, 4 }
 0x111   :  { %v2219_v34 = vsel %vm2192_vm2, %v1616_v32, %v2180_v29 }
 0x112   :  { %v2220_v35 = vsel %vm2192_vm2, %v1656_v31, %v2181_v33  ;;  %2295 = vst [vmem:[%s3876_s3 + $0xd0] sm:$0x77] %v2219_v34 }
 0x113   :  { %2296 = vst [vmem:[%s3876_s3 + $0xd8] sm:$0x77] %v2220_v35 }
 0x116   :  { %v1715_v36 = vpop.f32.mrf.mxu1 }
 0x117   :  { %v1716_v37 = vadd.f32 %v1715_v36, %v3362_v50  ;;  %v1755_v38 = vpop.f32.mrf.mxu3  ;;  %v1735_v39 = vpop.f32.mrf.mxu2 }
 0x118   :  { %v1756_v40 = vadd.f32 %v1755_v38, %v3362_v50  ;;  %v1695_v42 = vpop.f32.mrf.mxu0  ;;  %v1736_v43 = vadd.f32 %v1735_v39, %v3362_v50 }
 0x119   :  { %v2182_v41 = vrot.slane %v1716_v37, 4  ;;  %v1696_v44 = vadd.f32 %v1695_v42, %v3362_v50 }
 0x11a   :  { %v2183_v45 = vrot.slane %v1756_v40, 4 }
 0x11b   :  { %v2221_v46 = vsel %vm2192_vm2, %v1696_v44, %v2182_v41 }
 0x11c   :  { %v2222_v47 = vsel %vm2192_vm2, %v1736_v43, %v2183_v45  ;;  %2297 = vst [vmem:[%s3876_s3 + $0xe0] sm:$0x77] %v2221_v46 }
 0x11d   :  { %2298 = vst [vmem:[%s3876_s3 + $0xe8] sm:$0x77] %v2222_v47 }
 0x120   :  { %v1795_v48 = vpop.f32.mrf.mxu1 }
 0x121   :  { %v1796_v49 = vadd.f32 %v1795_v48, %v3362_v50  ;;  %v1835_v51 = vpop.f32.mrf.mxu3  ;;  %v1815_v52 = vpop.f32.mrf.mxu2 }
 0x122   :  { %v1836_v53 = vadd.f32 %v1835_v51, %v3362_v50  ;;  %v1775_v54 = vpop.f32.mrf.mxu0  ;;  %v1816_v55 = vadd.f32 %v1815_v52, %v3362_v50 }
 0x123   :  { %v2184_v14 = vrot.slane %v1796_v49, 4  ;;  %v1776_v56 = vadd.f32 %v1775_v54, %v3362_v50 }
 0x124   :  { %v2185_v58 = vrot.slane %v1836_v53, 4 }
 0x125   :  { %v2223_v59 = vsel %vm2192_vm2, %v1776_v56, %v2184_v14 }
 0x126   :  { %v2224_v60 = vsel %vm2192_vm2, %v1816_v55, %v2185_v58  ;;  %2299 = vst [vmem:[%s3876_s3 + $0xf0] sm:$0x77] %v2223_v59 }
 0x127   :  { %2300 = vst [vmem:[%s3876_s3 + $0xf8] sm:$0x77] %v2224_v60 }
 0x12a   :  { %v1875_v61 = vpop.f32.mrf.mxu1 }
 0x12b   :  { %v1876_v62 = vadd.f32 %v1875_v61, %v3362_v50  ;;  %v1915_v63 = vpop.f32.mrf.mxu3  ;;  %v1895_v0 = vpop.f32.mrf.mxu2 }
 0x12c   :  { %v1916_v1 = vadd.f32 %v1915_v63, %v3362_v50  ;;  %v1855_v3 = vpop.f32.mrf.mxu0  ;;  %v1896_v4 = vadd.f32 %v1895_v0, %v3362_v50 }
 0x12d   :  { %v2186_v2 = vrot.slane %v1876_v62, 4  ;;  %v1856_v5 = vadd.f32 %v1855_v3, %v3362_v50 }
 0x12e   :  { %v2187_v6 = vrot.slane %v1916_v1, 4 }
 0x12f   :  { %v2225_v7 = vsel %vm2192_vm2, %v1856_v5, %v2186_v2 }
 0x130   :  { %v2226_v57 = vsel %vm2192_vm2, %v1896_v4, %v2187_v6  ;;  %2301 = vst [vmem:[%s3876_s3 + $0x100] sm:$0x77] %v2225_v7 }
 0x131   :  { %2302 = vst [vmem:[%s3876_s3 + $0x108] sm:$0x77] %v2226_v57 }
 0x134   :  { %v1955_v8 = vpop.f32.mrf.mxu1 }
 0x135   :  { %v1956_v9 = vadd.f32 %v1955_v8, %v3362_v50  ;;  %v1995_v10 = vpop.f32.mrf.mxu3  ;;  %v1975_v11 = vpop.f32.mrf.mxu2 }
 0x136   :  { %v1996_v12 = vadd.f32 %v1995_v10, %v3362_v50  ;;  %v1935_v15 = vpop.f32.mrf.mxu0  ;;  %v1976_v16 = vadd.f32 %v1975_v11, %v3362_v50 }
 0x137   :  { %v2188_v13 = vrot.slane %v1956_v9, 4  ;;  %v1936_v17 = vadd.f32 %v1935_v15, %v3362_v50 }
 0x138   :  { %v2189_v18 = vrot.slane %v1996_v12, 4 }
 0x139   :  { %v2227_v19 = vsel %vm2192_vm2, %v1936_v17, %v2188_v13 }
 0x13a   :  { %v2228_v20 = vsel %vm2192_vm2, %v1976_v16, %v2189_v18  ;;  %2303 = vst [vmem:[%s3876_s3 + $0x110] sm:$0x77] %v2227_v19 }
 0x13b   :  { %2304 = vst [vmem:[%s3876_s3 + $0x118] sm:$0x77] %v2228_v20 }
 0x13d   :  { %v2035_v21 = vpop.f32.mrf.mxu1 }
 0x13e   :  { %v2036_v22 = vadd.f32 %v2035_v21, %v3362_v50 }
 0x13f   :  { %v2015_v23 = vpop.f32.mrf.mxu0  ;;  %v2075_v24 = vpop.f32.mrf.mxu3 }
 0x140   :  { %v2016_v25 = vadd.f32 %v2015_v23, %v3362_v50  ;;  %v2055_v26 = vpop.f32.mrf.mxu2  ;;  %v2076_v27 = vadd.f32 %v2075_v24, %v3362_v50  ;;  %v2190_v28 = vrot.slane %v2036_v22, 4 }
 0x141   :  { %v2056_v29 = vadd.f32 %v2055_v26, %v3362_v50 }
 0x142   :  { %v2191_v30 = vrot.slane %v2076_v27, 4  ;;  %v2229_v31 = vsel %vm2192_vm2, %v2016_v25, %v2190_v28 }
 0x143   :  { %2305 = vst [vmem:[%s3876_s3 + $0x120] sm:$0x77] %v2229_v31 }
 0x144   :  { %v2230_v32 = vsel %vm2192_vm2, %v2056_v29, %v2191_v30 }
 0x145   :  { %2309 = vst.msk [vmem:[%s3876_s3 + $0x128] sm:$0x77] %vm2308_vm5, %v2230_v32 }

// kernel: feature_extractor_forward.17
= control target key start
LH: loop header
LB: loop body
LE: loop exit
PB: predicated region body
PF: predicated region fallthrough
CT: control target
= control target key end

     0   :  { %v1669_v0 = vmov 0   ;;  %vm3313_vm0 = vcmask 1042432   ;;  %vm1456_vm1 = vcmask 223232   ;;  %s3309_s1 = inlined_call_operand.vmem [shape: f32[3,1], index: 1, kind: input, shape index: {}]   ;;  %s3310_s0 = inlined_call_operand.vmem [shape: f32[15,3,2204], index: 0, kind: input, shape index: {}]   ;;  %s3311_s2 = inlined_call_operand.vmem [shape: f32[3,1], index: 2, kind: input, shape index: {}]   ;;  %s3312_s3 = inlined_call_operand.vmem [shape: f32[3,2204], index: 3, kind: output, shape index: {}]  }
   0x1   :  { %1668 = vset.pattern.permute.xlu0 %v1669_v0  ;;  %v1504_v1 = vld [vmem:[%s3309_s1] sm:$0x7]  ;;  %v15_v3 = vld [vmem:[%s3310_s0 + $0x8] sm:$0x77]  ;;  %v16_v5 = vld [vmem:[%s3310_s0 + $0x10] sm:$0x77] }
   0x2   :  { %1507 = vperm.xlu0 %1668, %v1504_v1   ;;  %v14_v2 = vld [vmem:[%s3310_s0] sm:$0x77]  ;;  %v17_v6 = vld [vmem:[%s3310_s0 + $0x18] sm:$0x77]  ;;  %286 = vst [vmem:[#allocation1 + $0x10] ss:$2 sm:$0xff] %v15_v3 }
   0x3   :  { %v1528_v4 = vld [vmem:[%s3311_s2] sm:$0x7]  ;;  %284 = vst [vmem:[#allocation1] ss:$2 sm:$0xff] %v14_v2  ;;  %v19_v10 = vld [vmem:[%s3310_s0 + $0x28] sm:$0x77] }
   0x4   :  { %288 = vst [vmem:[#allocation1 + $0x20] ss:$2 sm:$0xff] %v16_v5  ;;  %v18_v7 = vld [vmem:[%s3310_s0 + $0x20] sm:$0x77]  ;;  %v20_v11 = vld [vmem:[%s3310_s0 + $0x30] sm:$0x77] }
   0x5   :  { %290 = vst [vmem:[#allocation1 + $0x30] ss:$2 sm:$0xff] %v17_v6  ;;  %v21_v14 = vld [vmem:[%s3310_s0 + $0x38] sm:$0x77]  ;;  %v22_v19 = vld [vmem:[%s3310_s0 + $0x40] sm:$0x77] }
   0x6   :  { %v23_v22 = vld [vmem:[%s3310_s0 + $0x48] sm:$0x77]  ;;  %v24_v25 = vld [vmem:[%s3310_s0 + $0x50] sm:$0x77]  ;;  %v25_v26 = vld [vmem:[%s3310_s0 + $0x58] sm:$0x77] }
   0x7   :  { %v26_v29 = vld [vmem:[%s3310_s0 + $0x60] sm:$0x77]  ;;  %v27_v34 = vld [vmem:[%s3310_s0 + $0x68] sm:$0x77]  ;;  %v28_v35 = vld [vmem:[%s3310_s0 + $0x70] sm:$0x77] }
   0x8   :  { %v29_v40 = vld [vmem:[%s3310_s0 + $0x78] sm:$0x77]  ;;  %v30_v41 = vld [vmem:[%s3310_s0 + $0x80] sm:$0x77]  ;;  %v31_v43 = vld [vmem:[%s3310_s0 + $0x88] sm:$0x77] }
   0x9   :  { %v1721_v12 = vld.sshfl [vmem:[#allocation1 + $0x10] sm:$0xff pattern:$0x75316420]  ;;  %v1723_v13 = vld.sshfl [vmem:[#allocation1 + $0x18] sm:$0xff pattern:$0x75316420] }
   0xa   :  { %1531 = vperm.xlu0 %1668, %v1528_v4   ;;  %v1711_v8 = vld.sshfl [vmem:[#allocation1] sm:$0xff pattern:$0x75316420]  ;;  %v1713_v9 = vld.sshfl [vmem:[#allocation1 + $0x8] sm:$0xff pattern:$0x75316420] }
   0xb   :  { %299 = vst [vmem:[#allocation1] ss:$2 sm:$0xff] %v18_v7  ;;  %v1728_v15 = vld.sshfl [vmem:[#allocation1 + $0x20] sm:$0xff pattern:$0x75316420] }
   0xc   :  { %v1730_v16 = vld.sshfl [vmem:[#allocation1 + $0x28] sm:$0xff pattern:$0x75316420]  ;;  %v1732_v17 = vld.sshfl [vmem:[#allocation1 + $0x30] sm:$0xff pattern:$0x75316420] }
   0xd   :  { %3314 = vst [vmem:[#allocation2_spill] sm:$0xff] %v1730_v16  ;;  %v1734_v18 = vld.sshfl [vmem:[#allocation1 + $0x38] sm:$0xff pattern:$0x75316420]  ;;  %v32_v49 = vld [vmem:[%s3310_s0 + $0x90] sm:$0x77] }
   0xe   :  { %3315 = vst [vmem:[#allocation3_spill] sm:$0xff] %v1732_v17  ;;  %v33_v52 = vld [vmem:[%s3310_s0 + $0x98] sm:$0x77]  ;;  %v34_v53 = vld [vmem:[%s3310_s0 + $0xa0] sm:$0x77] }
   0xf   :  { %3316 = vst [vmem:[#allocation4_spill] sm:$0xff] %v1734_v18  ;;  %v35_v56 = vld [vmem:[%s3310_s0 + $0xa8] sm:$0x77]  ;;  %v36_v61 = vld [vmem:[%s3310_s0 + $0xb0] sm:$0x77] }
  0x10   :  { %300 = vst [vmem:[#allocation1 + $0x10] ss:$2 sm:$0xff] %v19_v10  ;;  %v37_v62 = vld [vmem:[%s3310_s0 + $0xb8] sm:$0x77]  ;;  %v38_v0 = vld [vmem:[%s3310_s0 + $0xc0] sm:$0x77] }
  0x11   :  { %301 = vst [vmem:[#allocation1 + $0x20] ss:$2 sm:$0xff] %v20_v11  ;;  %v39_v5 = vld [vmem:[%s3310_s0 + $0xc8] sm:$0x77]  ;;  %v40_v11 = vld [vmem:[%s3310_s0 + $0xd0] sm:$0x77] }
  0x12   :  { %302 = vst [vmem:[#allocation1 + $0x30] ss:$2 sm:$0xff] %v21_v14  ;;  %v1739_v20 = vld.sshfl [vmem:[#allocation1] sm:$0xff pattern:$0x75316420] }
  0x13   :  { %3317 = vst [vmem:[#allocation5_spill] sm:$0xff] %v1739_v20  ;;  %v1741_v21 = vld.sshfl [vmem:[#allocation1 + $0x8] sm:$0xff pattern:$0x75316420]  ;;  %v41_v14 = vld [vmem:[%s3310_s0 + $0xd8] sm:$0x77] }
  0x14   :  { %3318 = vst [vmem:[#allocation6_spill] sm:$0xff] %v1741_v21  ;;  %v96_v17 = vld [vmem:[%s3310_s0 + $0x290] sm:$0x77] }
  0x15   :  { %311 = vst [vmem:[#allocation1] ss:$2 sm:$0xff] %v22_v19 }
  0x17   :  { %v1746_v23 = vld.sshfl [vmem:[#allocation1 + $0x10] sm:$0xff pattern:$0x75316420]  ;;  %v1748_v24 = vld.sshfl [vmem:[#allocation1 + $0x18] sm:$0xff pattern:$0x75316420] }
  0x18   :  { %3319 = vst [vmem:[#allocation7_spill] sm:$0xff] %v1746_v23  ;;  %v1756_v27 = vld.sshfl [vmem:[#allocation1 + $0x20] sm:$0xff pattern:$0x75316420]  ;;  %v68_v23 = vld [vmem:[%s3310_s0 + $0x1b0] sm:$0x77] }
  0x19   :  { %3320 = vst [vmem:[#allocation8_spill] sm:$0xff] %v1748_v24  ;;  %v1758_v28 = vld.sshfl [vmem:[#allocation1 + $0x28] sm:$0xff pattern:$0x75316420] }
  0x1a   :  { %3321 = vst [vmem:[#allocation9_spill] sm:$0xff] %v1756_v27  ;;  %v1763_v30 = vld.sshfl [vmem:[#allocation1 + $0x30] sm:$0xff pattern:$0x75316420]  ;;  %v59_v27 = vld [vmem:[%s3310_s0 + $0x168] sm:$0x77] }
  0x1b   :  { %3322 = vst [vmem:[#allocation10_spill] sm:$0xff] %v1758_v28  ;;  %v1765_v31 = vld.sshfl [vmem:[#allocation1 + $0x38] sm:$0xff pattern:$0x75316420] }
  0x1c   :  { %3323 = vst [vmem:[#allocation11_spill] sm:$0xff] %v1763_v30  ;;  %v1767_v32 = vld.sshfl [vmem:[#allocation1] sm:$0xff pattern:$0x75316420] }
  0x1d   :  { %314 = vst [vmem:[#allocation1 + $0x10] ss:$2 sm:$0xff] %v23_v22  ;;  %v1769_v33 = vld.sshfl [vmem:[#allocation1 + $0x8] sm:$0xff pattern:$0x75316420] }
  0x1e   :  { %3324 = vst [vmem:[#allocation12_spill] sm:$0xff] %v1765_v31 }
  0x1f   :  { %3325 = vst [vmem:[#allocation13_spill] sm:$0xff] %v1767_v32 }
  0x20   :  { %3326 = vst [vmem:[#allocation14_spill] sm:$0xff] %v1769_v33 }
  0x21   :  { %315 = vst [vmem:[#allocation1 + $0x20] ss:$2 sm:$0xff] %v24_v25 }
  0x22   :  { %316 = vst [vmem:[#allocation1 + $0x30] ss:$2 sm:$0xff] %v25_v26 }
  0x23   :  { %323 = vst [vmem:[#allocation1] ss:$2 sm:$0xff] %v26_v29  ;;  %v42_v29 = vld [vmem:[%s3310_s0 + $0xe0] sm:$0x77] }
  0x24   :  { %v1777_v36 = vld.sshfl [vmem:[#allocation1 + $0x10] sm:$0xff pattern:$0x75316420]  ;;  %v1779_v37 = vld.sshfl [vmem:[#allocation1 + $0x18] sm:$0xff pattern:$0x75316420] }
  0x25   :  { %324 = vst [vmem:[#allocation1 + $0x10] ss:$2 sm:$0xff] %v27_v34 }
  0x28   :  { %v1781_v38 = vld.sshfl [vmem:[#allocation1 + $0x20] sm:$0xff pattern:$0x75316420]  ;;  %v1783_v39 = vld.sshfl [vmem:[#allocation1 + $0x28] sm:$0xff pattern:$0x75316420] }
  0x29   :  { %325 = vst [vmem:[#allocation1 + $0x20] ss:$2 sm:$0xff] %v28_v35  ;;  %v1791_v42 = vld.sshfl [vmem:[#allocation1 + $0x30] sm:$0xff pattern:$0x75316420] }
  0x2a   :  { %v1796_v44 = vld.sshfl [vmem:[#allocation1 + $0x38] sm:$0xff pattern:$0x75316420]  ;;  %v1798_v45 = vld.sshfl [vmem:[#allocation1] sm:$0xff pattern:$0x75316420] }
  0x2b   :  { %3327 = vst [vmem:[#allocation15_spill] sm:$0xff] %v1796_v44  ;;  %v1800_v46 = vld.sshfl [vmem:[#allocation1 + $0x8] sm:$0xff pattern:$0x75316420] }
  0x2c   :  { %3328 = vst [vmem:[#allocation16_spill] sm:$0xff] %v1798_v45  ;;  %v1802_v47 = vld.sshfl [vmem:[#allocation1 + $0x10] sm:$0xff pattern:$0x75316420]  ;;  %v95_v45 = vld [vmem:[%s3310_s0 + $0x288] sm:$0x77] }
  0x2d   :  { %326 = vst [vmem:[#allocation1 + $0x30] ss:$2 sm:$0xff] %v29_v40  ;;  %v1804_v48 = vld.sshfl [vmem:[#allocation1 + $0x18] sm:$0xff pattern:$0x75316420] }
  0x2e   :  { %3329 = vst [vmem:[#allocation17_spill] sm:$0xff] %v1800_v46  ;;  %v43_v40 = vld [vmem:[%s3310_s0 + $0xe8] sm:$0x77] }
  0x2f   :  { %3330 = vst [vmem:[#allocation18_spill] sm:$0xff] %v1802_v47 }
  0x30   :  { %3331 = vst [vmem:[#allocation19_spill] sm:$0xff] %v1804_v48  ;;  %v1809_v50 = vld.sshfl [vmem:[#allocation1 + $0x20] sm:$0xff pattern:$0x75316420] }
  0x31   :  { %335 = vst [vmem:[#allocation1] ss:$2 sm:$0xff] %v30_v41  ;;  %v1811_v51 = vld.sshfl [vmem:[#allocation1 + $0x28] sm:$0xff pattern:$0x75316420] }
  0x32   :  { %3332 = vst [vmem:[#allocation20_spill] sm:$0xff] %v1809_v50  ;;  %v44_v41 = vld [vmem:[%s3310_s0 + $0xf0] sm:$0x77]  ;;  %v67_v50 = vld [vmem:[%s3310_s0 + $0x1a8] sm:$0x77] }
  0x33   :  { %3333 = vst [vmem:[#allocation21_spill] sm:$0xff] %v1811_v51 }
  0x34   :  { %336 = vst [vmem:[#allocation1 + $0x10] ss:$2 sm:$0xff] %v31_v43  ;;  %v1819_v54 = vld.sshfl [vmem:[#allocation1 + $0x30] sm:$0xff pattern:$0x75316420] }
  0x35   :  { %341 = vst [vmem:[#allocation1 + $0x20] ss:$2 sm:$0xff] %v32_v49  ;;  %v1821_v55 = vld.sshfl [vmem:[#allocation1 + $0x38] sm:$0xff pattern:$0x75316420] }
  0x36   :  { %3334 = vst [vmem:[#allocation22_spill] sm:$0xff] %v1819_v54  ;;  %v45_v43 = vld [vmem:[%s3310_s0 + $0xf8] sm:$0x77] }
  0x37   :  { %3335 = vst [vmem:[#allocation23_spill] sm:$0xff] %v1821_v55 }
  0x38   :  { %342 = vst [vmem:[#allocation1 + $0x30] ss:$2 sm:$0xff] %v33_v52  ;;  %v1826_v57 = vld.sshfl [vmem:[#allocation1] sm:$0xff pattern:$0x75316420] }
  0x39   :  { %3336 = vst [vmem:[#allocation24_spill] sm:$0xff] %v1826_v57  ;;  %v1828_v58 = vld.sshfl [vmem:[#allocation1 + $0x8] sm:$0xff pattern:$0x75316420] }
  0x3a   :  { %3337 = vst [vmem:[#allocation25_spill] sm:$0xff] %v1828_v58 }
  0x3b   :  { %347 = vst [vmem:[#allocation1] ss:$2 sm:$0xff] %v34_v53  ;;  %v1830_v59 = vld.sshfl [vmem:[#allocation1 + $0x10] sm:$0xff pattern:$0x75316420] }
  0x3c   :  { %3338 = vst [vmem:[#allocation26_spill] sm:$0xff] %v1830_v59  ;;  %v1832_v60 = vld.sshfl [vmem:[#allocation1 + $0x18] sm:$0xff pattern:$0x75316420]  ;;  %v51_v59 = vld [vmem:[%s3310_s0 + $0x128] sm:$0x77] }
  0x3d   :  { %3339 = vst [vmem:[#allocation27_spill] sm:$0xff] %v1832_v60  ;;  %v1840_v63 = vld.sshfl [vmem:[#allocation1 + $0x20] sm:$0xff pattern:$0x75316420]  ;;  %v48_v60 = vld [vmem:[%s3310_s0 + $0x110] sm:$0x77] }
  0x3e   :  { %348 = vst [vmem:[#allocation1 + $0x10] ss:$2 sm:$0xff] %v35_v56  ;;  %v1845_v1 = vld.sshfl [vmem:[#allocation1 + $0x28] sm:$0xff pattern:$0x75316420] }
  0x3f   :  { %v1847_v2 = vld.sshfl [vmem:[#allocation1 + $0x30] sm:$0xff pattern:$0x75316420]  ;;  %v1849_v3 = vld.sshfl [vmem:[#allocation1 + $0x38] sm:$0xff pattern:$0x75316420] }
  0x40   :  { %349 = vst [vmem:[#allocation1 + $0x20] ss:$2 sm:$0xff] %v36_v61 }
  0x41   :  { %350 = vst [vmem:[#allocation1 + $0x30] ss:$2 sm:$0xff] %v37_v62 }
  0x42   :  { %v1851_v4 = vld.sshfl [vmem:[#allocation1] sm:$0xff pattern:$0x75316420]  ;;  %v1856_v6 = vld.sshfl [vmem:[#allocation1 + $0x8] sm:$0xff pattern:$0x75316420] }
  0x43   :  { %3340 = vst [vmem:[#allocation28_spill] sm:$0xff] %v1856_v6 }
  0x44   :  { %359 = vst [vmem:[#allocation1] ss:$2 sm:$0xff] %v38_v0  ;;  %v46_v0 = vld [vmem:[%s3310_s0 + $0x100] sm:$0x77] }
  0x45   :  { %v1858_v7 = vld.sshfl [vmem:[#allocation1 + $0x10] sm:$0xff pattern:$0x75316420]  ;;  %v1860_v10 = vld.sshfl [vmem:[#allocation1 + $0x18] sm:$0xff pattern:$0x75316420] }
  0x46   :  { %3341 = vst [vmem:[#allocation29_spill] sm:$0xff] %v1858_v7 }
  0x47   :  { %3342 = vst [vmem:[#allocation30_spill] sm:$0xff] %v1860_v10  ;;  %v1868_v19 = vld.sshfl [vmem:[#allocation1 + $0x20] sm:$0xff pattern:$0x75316420] }
  0x48   :  { %360 = vst [vmem:[#allocation1 + $0x10] ss:$2 sm:$0xff] %v39_v5  ;;  %v1870_v22 = vld.sshfl [vmem:[#allocation1 + $0x28] sm:$0xff pattern:$0x75316420] }
  0x49   :  { %3343 = vst [vmem:[#allocation31_spill] sm:$0xff] %v1868_v19  ;;  %v1872_v25 = vld.sshfl [vmem:[#allocation1 + $0x30] sm:$0xff pattern:$0x75316420] }
  0x4a   :  { %3344 = vst [vmem:[#allocation32_spill] sm:$0xff] %v1870_v22  ;;  %v1874_v26 = vld.sshfl [vmem:[#allocation1 + $0x38] sm:$0xff pattern:$0x75316420] }
  0x4b   :  { %3345 = vst [vmem:[#allocation33_spill] sm:$0xff] %v1872_v25  ;;  %v1879_v34 = vld.sshfl [vmem:[#allocation1] sm:$0xff pattern:$0x75316420] }
  0x4c   :  { %3346 = vst [vmem:[#allocation34_spill] sm:$0xff] %v1874_v26  ;;  %v1881_v35 = vld.sshfl [vmem:[#allocation1 + $0x8] sm:$0xff pattern:$0x75316420] }
  0x4d   :  { %361 = vst [vmem:[#allocation1 + $0x20] ss:$2 sm:$0xff] %v40_v11 }
  0x4e   :  { %368 = vst [vmem:[#allocation1 + $0x30] ss:$2 sm:$0xff] %v41_v14  ;;  %v47_v14 = vld [vmem:[%s3310_s0 + $0x108] sm:$0x77] }
  0x4f   :  { %3347 = vst [vmem:[#allocation35_spill] sm:$0xff] %v1879_v34  ;;  %v1892_v49 = vld.sshfl [vmem:[#allocation1 + $0x10] sm:$0xff pattern:$0x75316420] }
  0x50   :  { %3348 = vst [vmem:[#allocation36_spill] sm:$0xff] %v1881_v35  ;;  %v1894_v52 = vld.sshfl [vmem:[#allocation1 + $0x18] sm:$0xff pattern:$0x75316420] }
  0x51   :  { %371 = vst [vmem:[#allocation1] ss:$2 sm:$0xff] %v42_v29 }
  0x52   :  { %3349 = vst [vmem:[#allocation37_spill] sm:$0xff] %v1892_v49 }
  0x53   :  { %3350 = vst [vmem:[#allocation38_spill] sm:$0xff] %v1894_v52 }
  0x54   :  { %v1896_v53 = vld.sshfl [vmem:[#allocation1 + $0x20] sm:$0xff pattern:$0x75316420]  ;;  %v1898_v56 = vld.sshfl [vmem:[#allocation1 + $0x28] sm:$0xff pattern:$0x75316420] }
  0x55   :  { %3351 = vst [vmem:[#allocation39_spill] sm:$0xff] %v1896_v53  ;;  %v1900_v61 = vld.sshfl [vmem:[#allocation1 + $0x30] sm:$0xff pattern:$0x75316420]  ;;  %v50_v53 = vld [vmem:[%s3310_s0 + $0x120] sm:$0x77] }
  0x56   :  { %3352 = vst [vmem:[#allocation40_spill] sm:$0xff] %v1898_v56  ;;  %v1902_v62 = vld.sshfl [vmem:[#allocation1 + $0x38] sm:$0xff pattern:$0x75316420] }
  0x57   :  { %372 = vst [vmem:[#allocation1 + $0x10] ss:$2 sm:$0xff] %v43_v40 }
  0x58   :  { %373 = vst [vmem:[#allocation1 + $0x20] ss:$2 sm:$0xff] %v44_v41  ;;  %v1907_v5 = vld.sshfl [vmem:[#allocation1] sm:$0xff pattern:$0x75316420] }
  0x59   :  { %374 = vst [vmem:[#allocation1 + $0x30] ss:$2 sm:$0xff] %v45_v43  ;;  %v1909_v11 = vld.sshfl [vmem:[#allocation1 + $0x8] sm:$0xff pattern:$0x75316420] }
  0x5a   :  { %383 = vst [vmem:[#allocation1] ss:$2 sm:$0xff] %v46_v0  ;;  %v49_v43 = vld [vmem:[%s3310_s0 + $0x118] sm:$0x77] }
  0x5e   :  { %v1914_v29 = vld.sshfl [vmem:[#allocation1 + $0x10] sm:$0xff pattern:$0x75316420]  ;;  %v1916_v56 = vld.sshfl [vmem:[#allocation1 + $0x18] sm:$0xff pattern:$0x75316420] }
  0x5f   :  { %3353 = vst [vmem:[#allocation41_spill] sm:$0xff] %v1916_v56  ;;  %v1921_v40 = vld.sshfl [vmem:[#allocation1 + $0x20] sm:$0xff pattern:$0x75316420] }
  0x60   :  { %3354 = vst [vmem:[#allocation42_spill] sm:$0xff] %v1921_v40  ;;  %v1923_v41 = vld.sshfl [vmem:[#allocation1 + $0x28] sm:$0xff pattern:$0x75316420] }
  0x61   :  { %3355 = vst [vmem:[#allocation43_spill] sm:$0xff] %v1923_v41  ;;  %v1928_v0 = vld.sshfl [vmem:[#allocation1 + $0x30] sm:$0xff pattern:$0x75316420] }
  0x62   :  { %384 = vst [vmem:[#allocation1 + $0x10] ss:$2 sm:$0xff] %v47_v14  ;;  %v1930_v33 = vld.sshfl [vmem:[#allocation1 + $0x38] sm:$0xff pattern:$0x75316420] }
  0x63   :  { %385 = vst [vmem:[#allocation1 + $0x20] ss:$2 sm:$0xff] %v48_v60  ;;  %v52_v60 = vld [vmem:[%s3310_s0 + $0x130] sm:$0x77] }
  0x64   :  { %3356 = vst [vmem:[#allocation44_spill] sm:$0xff] %v1928_v0  ;;  %v1941_v14 = vld.sshfl [vmem:[#allocation1] sm:$0xff pattern:$0x75316420]  ;;  %v77_v0 = vld [vmem:[%s3310_s0 + $0x1f8] sm:$0x77] }
  0x65   :  { %3357 = vst [vmem:[#allocation45_spill] sm:$0xff] %v1930_v33  ;;  %v1943_v32 = vld.sshfl [vmem:[#allocation1 + $0x8] sm:$0xff pattern:$0x75316420] }
  0x66   :  { %386 = vst [vmem:[#allocation1 + $0x30] ss:$2 sm:$0xff] %v49_v43  ;;  %v53_v43 = vld [vmem:[%s3310_s0 + $0x138] sm:$0x77] }
  0x67   :  { %3358 = vst [vmem:[#allocation46_spill] sm:$0xff] %v1941_v14 }
  0x68   :  { %3359 = vst [vmem:[#allocation47_spill] sm:$0xff] %v1943_v32 }
  0x69   :  { %v1945_v52 = vld.sshfl [vmem:[#allocation1 + $0x10] sm:$0xff pattern:$0x75316420]  ;;  %v1947_v58 = vld.sshfl [vmem:[#allocation1 + $0x18] sm:$0xff pattern:$0x75316420] }
  0x6a   :  { %3360 = vst [vmem:[#allocation48_spill] sm:$0xff] %v1945_v52  ;;  %v1949_v31 = vld.sshfl [vmem:[#allocation1 + $0x20] sm:$0xff pattern:$0x75316420] }
  0x6b   :  { %3361 = vst [vmem:[#allocation49_spill] sm:$0xff] %v1947_v58  ;;  %v1951_v49 = vld.sshfl [vmem:[#allocation1 + $0x28] sm:$0xff pattern:$0x75316420]  ;;  %v54_v58 = vld [vmem:[%s3310_s0 + $0x140] sm:$0x77] }
  0x6c   :  { %3362 = vst [vmem:[#allocation50_spill] sm:$0xff] %v1949_v31  ;;  %v58_v52 = vld [vmem:[%s3310_s0 + $0x160] sm:$0x77] }
  0x6d   :  { %3363 = vst [vmem:[#allocation51_spill] sm:$0xff] %v1951_v49  ;;  %v1956_v57 = vld.sshfl [vmem:[#allocation1 + $0x30] sm:$0xff pattern:$0x75316420]  ;;  %v55_v49 = vld [vmem:[%s3310_s0 + $0x148] sm:$0x77] }
  0x6e   :  { %395 = vst [vmem:[#allocation1] ss:$2 sm:$0xff] %v50_v53  ;;  %v1958_v30 = vld.sshfl [vmem:[#allocation1 + $0x38] sm:$0xff pattern:$0x75316420] }
  0x6f   :  { %396 = vst [vmem:[#allocation1 + $0x10] ss:$2 sm:$0xff] %v51_v59  ;;  %v56_v59 = vld [vmem:[%s3310_s0 + $0x150] sm:$0x77] }
  0x70   :  { %397 = vst [vmem:[#allocation1 + $0x20] ss:$2 sm:$0xff] %v52_v60 }
  0x71   :  { %3364 = vst [vmem:[#allocation52_spill] sm:$0xff] %v1956_v57 }
  0x72   :  { %3365 = vst [vmem:[#allocation53_spill] sm:$0xff] %v1958_v30 }
  0x73   :  { %398 = vst [vmem:[#allocation1 + $0x30] ss:$2 sm:$0xff] %v53_v43  ;;  %v57_v43 = vld [vmem:[%s3310_s0 + $0x158] sm:$0x77] }
  0x75   :  { %v1966_v53 = vld.sshfl [vmem:[#allocation1] sm:$0xff pattern:$0x75316420]  ;;  %v1968_v31 = vld.sshfl [vmem:[#allocation1 + $0x8] sm:$0xff pattern:$0x75316420] }
  0x76   :  { %v1973_v60 = vld.sshfl [vmem:[#allocation1 + $0x10] sm:$0xff pattern:$0x75316420]  ;;  %v1978_v30 = vld.sshfl [vmem:[#allocation1 + $0x18] sm:$0xff pattern:$0x75316420] }
  0x77   :  { %v1980_v57 = vld.sshfl [vmem:[#allocation1 + $0x20] sm:$0xff pattern:$0x75316420]  ;;  %v1982_v35 = vld.sshfl [vmem:[#allocation1 + $0x28] sm:$0xff pattern:$0x75316420] }
  0x78   :  { %3366 = vst [vmem:[#allocation54_spill] sm:$0xff] %v1980_v57 }
  0x79   :  { %3367 = vst [vmem:[#allocation55_spill] sm:$0xff] %v1982_v35 }
  0x7a   :  { %407 = vst [vmem:[#allocation1] ss:$2 sm:$0xff] %v54_v58  ;;  %v1984_v55 = vld.sshfl [vmem:[#allocation1 + $0x30] sm:$0xff pattern:$0x75316420] }
  0x7b   :  { %3368 = vst [vmem:[#allocation56_spill] sm:$0xff] %v1984_v55  ;;  %v1986_v28 = vld.sshfl [vmem:[#allocation1 + $0x38] sm:$0xff pattern:$0x75316420]  ;;  %v60_v58 = vld [vmem:[%s3310_s0 + $0x170] sm:$0x77] }
  0x7c   :  { %3369 = vst [vmem:[#allocation57_spill] sm:$0xff] %v1986_v28 }
  0x7d   :  { %408 = vst [vmem:[#allocation1 + $0x10] ss:$2 sm:$0xff] %v55_v49  ;;  %v61_v49 = vld [vmem:[%s3310_s0 + $0x178] sm:$0x77] }
  0x7e   :  { %409 = vst [vmem:[#allocation1 + $0x20] ss:$2 sm:$0xff] %v56_v59 }
  0x7f   :  { %410 = vst [vmem:[#allocation1 + $0x30] ss:$2 sm:$0xff] %v57_v43 }
  0x81   :  { %v1991_v34 = vld.sshfl [vmem:[#allocation1] sm:$0xff pattern:$0x75316420]  ;;  %v1993_v54 = vld.sshfl [vmem:[#allocation1 + $0x8] sm:$0xff pattern:$0x75316420] }
  0x82   :  { %3370 = vst [vmem:[#allocation58_spill] sm:$0xff] %v1991_v34 }
  0x83   :  { %3371 = vst [vmem:[#allocation59_spill] sm:$0xff] %v1993_v54  ;;  %v69_v54 = vld [vmem:[%s3310_s0 + $0x1b8] sm:$0x77] }
  0x84   :  { %419 = vst [vmem:[#allocation1] ss:$2 sm:$0xff] %v58_v52  ;;  %v2004_v59 = vld.sshfl [vmem:[#allocation1 + $0x10] sm:$0xff pattern:$0x75316420] }
  0x85   :  { %3372 = vst [vmem:[#allocation60_spill] sm:$0xff] %v2004_v59  ;;  %v2006_v43 = vld.sshfl [vmem:[#allocation1 + $0x18] sm:$0xff pattern:$0x75316420]  ;;  %v62_v52 = vld [vmem:[%s3310_s0 + $0x180] sm:$0x77] }
  0x86   :  { %3373 = vst [vmem:[#allocation61_spill] sm:$0xff] %v2006_v43  ;;  %v2008_v32 = vld.sshfl [vmem:[#allocation1 + $0x20] sm:$0xff pattern:$0x75316420] }
  0x87   :  { %3374 = vst [vmem:[#allocation62_spill] sm:$0xff] %v2008_v32  ;;  %v2010_v26 = vld.sshfl [vmem:[#allocation1 + $0x28] sm:$0xff pattern:$0x75316420]  ;;  %v66_v32 = vld [vmem:[%s3310_s0 + $0x1a0] sm:$0x77] }
  0x88   :  { %3375 = vst [vmem:[#allocation63_spill] sm:$0xff] %v2010_v26  ;;  %v2012_v51 = vld.sshfl [vmem:[#allocation1 + $0x30] sm:$0xff pattern:$0x75316420]  ;;  %v63_v26 = vld [vmem:[%s3310_s0 + $0x188] sm:$0x77] }
  0x89   :  { %3376 = vst [vmem:[#allocation64_spill] sm:$0xff] %v2012_v51  ;;  %v2014_v24 = vld.sshfl [vmem:[#allocation1 + $0x38] sm:$0xff pattern:$0x75316420] }
  0x8a   :  { %3377 = vst [vmem:[#allocation65_spill] sm:$0xff] %v2014_v24  ;;  %v64_v24 = vld [vmem:[%s3310_s0 + $0x190] sm:$0x77] }
  0x8b   :  { %422 = vst [vmem:[#allocation1 + $0x10] ss:$2 sm:$0xff] %v59_v27  ;;  %v2019_v14 = vld.sshfl [vmem:[#allocation1] sm:$0xff pattern:$0x75316420] }
  0x8c   :  { %423 = vst [vmem:[#allocation1 + $0x20] ss:$2 sm:$0xff] %v60_v58  ;;  %v2021_v59 = vld.sshfl [vmem:[#allocation1 + $0x8] sm:$0xff pattern:$0x75316420] }
  0x8d   :  { %424 = vst [vmem:[#allocation1 + $0x30] ss:$2 sm:$0xff] %v61_v49  ;;  %v65_v27 = vld [vmem:[%s3310_s0 + $0x198] sm:$0x77] }
  0x8e   :  { %3378 = vst [vmem:[#allocation66_spill] sm:$0xff] %v2019_v14 }
  0x8f   :  { %3379 = vst [vmem:[#allocation67_spill] sm:$0xff] %v2021_v59 }
  0x90   :  { %431 = vst [vmem:[#allocation1] ss:$2 sm:$0xff] %v62_v52 }
  0x92   :  { %v2032_v51 = vld.sshfl [vmem:[#allocation1 + $0x10] sm:$0xff pattern:$0x75316420]  ;;  %v2034_v58 = vld.sshfl [vmem:[#allocation1 + $0x18] sm:$0xff pattern:$0x75316420] }
  0x93   :  { %v2036_v49 = vld.sshfl [vmem:[#allocation1 + $0x20] sm:$0xff pattern:$0x75316420]  ;;  %v2038_v59 = vld.sshfl [vmem:[#allocation1 + $0x28] sm:$0xff pattern:$0x75316420] }
  0x94   :  { %v2040_v52 = vld.sshfl [vmem:[#allocation1 + $0x30] sm:$0xff pattern:$0x75316420]  ;;  %v2042_v14 = vld.sshfl [vmem:[#allocation1 + $0x38] sm:$0xff pattern:$0x75316420] }
  0x95   :  { %3380 = vst [vmem:[#allocation68_spill] sm:$0xff] %v2040_v52 }
  0x96   :  { %3381 = vst [vmem:[#allocation69_spill] sm:$0xff] %v2042_v14  ;;  %v104_v14 = vld [vmem:[%s3310_s0 + $0x2d0] sm:$0x77] }
  0x97   :  { %432 = vst [vmem:[#allocation1 + $0x10] ss:$2 sm:$0xff] %v63_v26  ;;  %v2047_v43 = vld.sshfl [vmem:[#allocation1] sm:$0xff pattern:$0x75316420] }
  0x98   :  { %433 = vst [vmem:[#allocation1 + $0x20] ss:$2 sm:$0xff] %v64_v24  ;;  %v2049_v25 = vld.sshfl [vmem:[#allocation1 + $0x8] sm:$0xff pattern:$0x75316420] }
  0x99   :  { %3382 = vst [vmem:[#allocation70_spill] sm:$0xff] %v2047_v43  ;;  %v87_v43 = vld [vmem:[%s3310_s0 + $0x248] sm:$0x77] }
  0x9a   :  { %434 = vst [vmem:[#allocation1 + $0x30] ss:$2 sm:$0xff] %v65_v27 }
  0x9b   :  { %3383 = vst [vmem:[#allocation71_spill] sm:$0xff] %v2049_v25 }
  0x9c   :  { %443 = vst [vmem:[#allocation1] ss:$2 sm:$0xff] %v66_v32  ;;  %v70_v32 = vld [vmem:[%s3310_s0 + $0x1c0] sm:$0x77] }
  0x9e   :  { %v2060_v26 = vld.sshfl [vmem:[#allocation1 + $0x10] sm:$0xff pattern:$0x75316420]  ;;  %v2062_v24 = vld.sshfl [vmem:[#allocation1 + $0x18] sm:$0xff pattern:$0x75316420] }
  0x9f   :  { %3384 = vst [vmem:[#allocation72_spill] sm:$0xff] %v2060_v26  ;;  %v2067_v27 = vld.sshfl [vmem:[#allocation1 + $0x20] sm:$0xff pattern:$0x75316420] }
  0xa0   :  { %3385 = vst [vmem:[#allocation73_spill] sm:$0xff] %v2062_v24  ;;  %v2069_v33 = vld.sshfl [vmem:[#allocation1 + $0x28] sm:$0xff pattern:$0x75316420] }
  0xa1   :  { %3386 = vst [vmem:[#allocation74_spill] sm:$0xff] %v2067_v27  ;;  %v2071_v22 = vld.sshfl [vmem:[#allocation1 + $0x30] sm:$0xff pattern:$0x75316420]  ;;  %v71_v24 = vld [vmem:[%s3310_s0 + $0x1c8] sm:$0x77] }
  0xa2   :  { %3387 = vst [vmem:[#allocation75_spill] sm:$0xff] %v2069_v33  ;;  %v2073_v48 = vld.sshfl [vmem:[#allocation1 + $0x38] sm:$0xff pattern:$0x75316420]  ;;  %v72_v33 = vld [vmem:[%s3310_s0 + $0x1d0] sm:$0x77] }
  0xa3   :  { %3388 = vst [vmem:[#allocation76_spill] sm:$0xff] %v2071_v22  ;;  %v2075_v21 = vld.sshfl [vmem:[#allocation1] sm:$0xff pattern:$0x75316420] }
  0xa4   :  { %3389 = vst [vmem:[#allocation77_spill] sm:$0xff] %v2073_v48  ;;  %v2077_v34 = vld.sshfl [vmem:[#allocation1 + $0x8] sm:$0xff pattern:$0x75316420]  ;;  %v73_v48 = vld [vmem:[%s3310_s0 + $0x1d8] sm:$0x77] }
  0xa5   :  { %444 = vst [vmem:[#allocation1 + $0x10] ss:$2 sm:$0xff] %v67_v50 }
  0xa6   :  { %3390 = vst [vmem:[#allocation78_spill] sm:$0xff] %v2075_v21 }
  0xa7   :  { %3391 = vst [vmem:[#allocation79_spill] sm:$0xff] %v2077_v34 }
  0xa8   :  { %449 = vst [vmem:[#allocation1 + $0x20] ss:$2 sm:$0xff] %v68_v23  ;;  %v74_v23 = vld [vmem:[%s3310_s0 + $0x1e0] sm:$0x77] }
  0xa9   :  { %450 = vst [vmem:[#allocation1 + $0x30] ss:$2 sm:$0xff] %v69_v54 }
  0xaa   :  { %455 = vst [vmem:[#allocation1] ss:$2 sm:$0xff] %v70_v32 }
  0xac   :  { %v2088_v50 = vld.sshfl [vmem:[#allocation1 + $0x10] sm:$0xff pattern:$0x75316420]  ;;  %v2090_v21 = vld.sshfl [vmem:[#allocation1 + $0x18] sm:$0xff pattern:$0x75316420] }
  0xad   :  { %3392 = vst [vmem:[#allocation80_spill] sm:$0xff] %v2088_v50  ;;  %v76_v50 = vld [vmem:[%s3310_s0 + $0x1f0] sm:$0x77] }
  0xae   :  { %3393 = vst [vmem:[#allocation81_spill] sm:$0xff] %v2090_v21  ;;  %v75_v21 = vld [vmem:[%s3310_s0 + $0x1e8] sm:$0x77] }
  0xaf   :  { %v2095_v54 = vld.sshfl [vmem:[#allocation1 + $0x20] sm:$0xff pattern:$0x75316420]  ;;  %v2097_v32 = vld.sshfl [vmem:[#allocation1 + $0x28] sm:$0xff pattern:$0x75316420] }
  0xb0   :  { %v2099_v34 = vld.sshfl [vmem:[#allocation1 + $0x30] sm:$0xff pattern:$0x75316420]  ;;  %v2101_v22 = vld.sshfl [vmem:[#allocation1 + $0x38] sm:$0xff pattern:$0x75316420] }
  0xb1   :  { %456 = vst [vmem:[#allocation1 + $0x10] ss:$2 sm:$0xff] %v71_v24  ;;  %v2103_v27 = vld.sshfl [vmem:[#allocation1] sm:$0xff pattern:$0x75316420] }
  0xb2   :  { %3394 = vst [vmem:[#allocation82_spill] sm:$0xff] %v2103_v27  ;;  %v2105_v26 = vld.sshfl [vmem:[#allocation1 + $0x8] sm:$0xff pattern:$0x75316420] }
  0xb3   :  { %457 = vst [vmem:[#allocation1 + $0x20] ss:$2 sm:$0xff] %v72_v33  ;;  %v78_v33 = vld [vmem:[%s3310_s0 + $0x200] sm:$0x77] }
  0xb4   :  { %3395 = vst [vmem:[#allocation83_spill] sm:$0xff] %v2105_v26  ;;  %v103_v26 = vld [vmem:[%s3310_s0 + $0x2c8] sm:$0x77] }
  0xb5   :  { %458 = vst [vmem:[#allocation1 + $0x30] ss:$2 sm:$0xff] %v73_v48 }
  0xb6   :  { %467 = vst [vmem:[#allocation1] ss:$2 sm:$0xff] %v74_v23 }
  0xb8   :  { %v2116_v24 = vld.sshfl [vmem:[#allocation1 + $0x10] sm:$0xff pattern:$0x75316420]  ;;  %v2118_v19 = vld.sshfl [vmem:[#allocation1 + $0x18] sm:$0xff pattern:$0x75316420] }
  0xb9   :  { %3396 = vst [vmem:[#allocation84_spill] sm:$0xff] %v2116_v24 }
  0xba   :  { %3397 = vst [vmem:[#allocation85_spill] sm:$0xff] %v2118_v19  ;;  %v2123_v48 = vld.sshfl [vmem:[#allocation1 + $0x20] sm:$0xff pattern:$0x75316420]  ;;  %v79_v19 = vld [vmem:[%s3310_s0 + $0x208] sm:$0x77] }
  0xbb   :  { %3398 = vst [vmem:[#allocation86_spill] sm:$0xff] %v2123_v48  ;;  %v2125_v23 = vld.sshfl [vmem:[#allocation1 + $0x28] sm:$0xff pattern:$0x75316420] }
  0xbc   :  { %3399 = vst [vmem:[#allocation87_spill] sm:$0xff] %v2125_v23  ;;  %v2127_v47 = vld.sshfl [vmem:[#allocation1 + $0x30] sm:$0xff pattern:$0x75316420] }
  0xbd   :  { %3400 = vst [vmem:[#allocation88_spill] sm:$0xff] %v2127_v47  ;;  %v2129_v20 = vld.sshfl [vmem:[#allocation1 + $0x38] sm:$0xff pattern:$0x75316420]  ;;  %v80_v23 = vld [vmem:[%s3310_s0 + $0x210] sm:$0x77] }
  0xbe   :  { %3401 = vst [vmem:[#allocation89_spill] sm:$0xff] %v2129_v20  ;;  %v2131_v25 = vld.sshfl [vmem:[#allocation1] sm:$0xff pattern:$0x75316420]  ;;  %v81_v20 = vld [vmem:[%s3310_s0 + $0x218] sm:$0x77] }
  0xbf   :  { %468 = vst [vmem:[#allocation1 + $0x10] ss:$2 sm:$0xff] %v75_v21  ;;  %v2133_v28 = vld.sshfl [vmem:[#allocation1 + $0x8] sm:$0xff pattern:$0x75316420] }
  0xc0   :  { %3402 = vst [vmem:[#allocation90_spill] sm:$0xff] %v2131_v25 }
  0xc1   :  { %469 = vst [vmem:[#allocation1 + $0x20] ss:$2 sm:$0xff] %v76_v50 }
  0xc2   :  { %3403 = vst [vmem:[#allocation91_spill] sm:$0xff] %v2133_v28 }
  0xc3   :  { %476 = vst [vmem:[#allocation1 + $0x30] ss:$2 sm:$0xff] %v77_v0  ;;  %v82_v0 = vld [vmem:[%s3310_s0 + $0x220] sm:$0x77] }
  0xc4   :  { %479 = vst [vmem:[#allocation1] ss:$2 sm:$0xff] %v78_v33 }
  0xc6   :  { %v2144_v21 = vld.sshfl [vmem:[#allocation1 + $0x10] sm:$0xff pattern:$0x75316420]  ;;  %v2146_v25 = vld.sshfl [vmem:[#allocation1 + $0x18] sm:$0xff pattern:$0x75316420] }
  0xc7   :  { %3404 = vst [vmem:[#allocation92_spill] sm:$0xff] %v2144_v21 }
  0xc8   :  { %3405 = vst [vmem:[#allocation93_spill] sm:$0xff] %v2146_v25  ;;  %v2151_v50 = vld.sshfl [vmem:[#allocation1 + $0x20] sm:$0xff pattern:$0x75316420]  ;;  %v83_v25 = vld [vmem:[%s3310_s0 + $0x228] sm:$0x77] }
  0xc9   :  { %3406 = vst [vmem:[#allocation94_spill] sm:$0xff] %v2151_v50  ;;  %v2153_v33 = vld.sshfl [vmem:[#allocation1 + $0x28] sm:$0xff pattern:$0x75316420]  ;;  %v85_v50 = vld [vmem:[%s3310_s0 + $0x238] sm:$0x77] }
  0xca   :  { %3407 = vst [vmem:[#allocation95_spill] sm:$0xff] %v2153_v33  ;;  %v2155_v28 = vld.sshfl [vmem:[#allocation1 + $0x30] sm:$0xff pattern:$0x75316420] }
  0xcb   :  { %v2157_v47 = vld.sshfl [vmem:[#allocation1 + $0x38] sm:$0xff pattern:$0x75316420]  ;;  %480 = vst [vmem:[#allocation1 + $0x10] ss:$2 sm:$0xff] %v79_v19 }
  0xcc   :  { %v2159_v48 = vld.sshfl [vmem:[#allocation1] sm:$0xff pattern:$0x75316420]  ;;  %481 = vst [vmem:[#allocation1 + $0x20] ss:$2 sm:$0xff] %v80_v23 }
  0xcd   :  { %v2161_v41 = vld.sshfl [vmem:[#allocation1 + $0x8] sm:$0xff pattern:$0x75316420]  ;;  %482 = vst [vmem:[#allocation1 + $0x30] ss:$2 sm:$0xff] %v81_v20 }
  0xce   :  { %491 = vst [vmem:[#allocation1] ss:$2 sm:$0xff] %v82_v0  ;;  %v84_v33 = vld [vmem:[%s3310_s0 + $0x230] sm:$0x77]  ;;  %v86_v20 = vld [vmem:[%s3310_s0 + $0x240] sm:$0x77] }
  0xd2   :  { %v2172_v19 = vld.sshfl [vmem:[#allocation1 + $0x10] sm:$0xff pattern:$0x75316420]  ;;  %v2174_v21 = vld.sshfl [vmem:[#allocation1 + $0x18] sm:$0xff pattern:$0x75316420] }
  0xd3   :  { %3408 = vst [vmem:[#allocation96_spill] sm:$0xff] %v2172_v19  ;;  %v2179_v23 = vld.sshfl [vmem:[#allocation1 + $0x20] sm:$0xff pattern:$0x75316420] }
  0xd4   :  { %3409 = vst [vmem:[#allocation97_spill] sm:$0xff] %v2174_v21  ;;  %v2181_v0 = vld.sshfl [vmem:[#allocation1 + $0x28] sm:$0xff pattern:$0x75316420] }
  0xd5   :  { %3410 = vst [vmem:[#allocation98_spill] sm:$0xff] %v2179_v23  ;;  %v2183_v10 = vld.sshfl [vmem:[#allocation1 + $0x30] sm:$0xff pattern:$0x75316420] }
  0xd6   :  { %3411 = vst [vmem:[#allocation99_spill] sm:$0xff] %v2181_v0  ;;  %v2185_v46 = vld.sshfl [vmem:[#allocation1 + $0x38] sm:$0xff pattern:$0x75316420]  ;;  %v88_v0 = vld [vmem:[%s3310_s0 + $0x250] sm:$0x77] }
  0xd7   :  { %3412 = vst [vmem:[#allocation100_spill] sm:$0xff] %v2183_v10  ;;  %v2187_v18 = vld.sshfl [vmem:[#allocation1] sm:$0xff pattern:$0x75316420] }
  0xd8   :  { %3413 = vst [vmem:[#allocation101_spill] sm:$0xff] %v2185_v46  ;;  %v2189_v24 = vld.sshfl [vmem:[#allocation1 + $0x8] sm:$0xff pattern:$0x75316420]  ;;  %v89_v46 = vld [vmem:[%s3310_s0 + $0x258] sm:$0x77] }
  0xd9   :  { %492 = vst [vmem:[#allocation1 + $0x10] ss:$2 sm:$0xff] %v83_v25 }
  0xda   :  { %3414 = vst [vmem:[#allocation102_spill] sm:$0xff] %v2187_v18 }
  0xdb   :  { %493 = vst [vmem:[#allocation1 + $0x20] ss:$2 sm:$0xff] %v84_v33 }
  0xdc   :  { %3415 = vst [vmem:[#allocation103_spill] sm:$0xff] %v2189_v24 }
  0xdd   :  { %494 = vst [vmem:[#allocation1 + $0x30] ss:$2 sm:$0xff] %v85_v50  ;;  %v90_v50 = vld [vmem:[%s3310_s0 + $0x260] sm:$0x77] }
  0xde   :  { %503 = vst [vmem:[#allocation1] ss:$2 sm:$0xff] %v86_v20 }
  0xe0   :  { %v2200_v25 = vld.sshfl [vmem:[#allocation1 + $0x10] sm:$0xff pattern:$0x75316420]  ;;  %v2202_v18 = vld.sshfl [vmem:[#allocation1 + $0x18] sm:$0xff pattern:$0x75316420] }
  0xe1   :  { %3416 = vst [vmem:[#allocation104_spill] sm:$0xff] %v2200_v25 }
  0xe2   :  { %3417 = vst [vmem:[#allocation105_spill] sm:$0xff] %v2202_v18  ;;  %v2207_v33 = vld.sshfl [vmem:[#allocation1 + $0x20] sm:$0xff pattern:$0x75316420]  ;;  %v91_v18 = vld [vmem:[%s3310_s0 + $0x268] sm:$0x77] }
  0xe3   :  { %3418 = vst [vmem:[#allocation106_spill] sm:$0xff] %v2207_v33  ;;  %v2209_v20 = vld.sshfl [vmem:[#allocation1 + $0x28] sm:$0xff pattern:$0x75316420] }
  0xe4   :  { %3419 = vst [vmem:[#allocation107_spill] sm:$0xff] %v2209_v20  ;;  %v2211_v24 = vld.sshfl [vmem:[#allocation1 + $0x30] sm:$0xff pattern:$0x75316420] }
  0xe5   :  { %3420 = vst [vmem:[#allocation108_spill] sm:$0xff] %v2211_v24  ;;  %v2213_v10 = vld.sshfl [vmem:[#allocation1 + $0x38] sm:$0xff pattern:$0x75316420]  ;;  %v92_v20 = vld [vmem:[%s3310_s0 + $0x270] sm:$0x77] }
  0xe6   :  { %3421 = vst [vmem:[#allocation109_spill] sm:$0xff] %v2213_v10  ;;  %v2215_v23 = vld.sshfl [vmem:[#allocation1] sm:$0xff pattern:$0x75316420]  ;;  %v93_v10 = vld [vmem:[%s3310_s0 + $0x278] sm:$0x77] }
  0xe7   :  { %504 = vst [vmem:[#allocation1 + $0x10] ss:$2 sm:$0xff] %v87_v43  ;;  %v2217_v55 = vld.sshfl [vmem:[#allocation1 + $0x8] sm:$0xff pattern:$0x75316420] }
  0xe8   :  { %505 = vst [vmem:[#allocation1 + $0x20] ss:$2 sm:$0xff] %v88_v0 }
  0xe9   :  { %506 = vst [vmem:[#allocation1 + $0x30] ss:$2 sm:$0xff] %v89_v46  ;;  %v94_v46 = vld [vmem:[%s3310_s0 + $0x280] sm:$0x77] }
  0xea   :  { %515 = vst [vmem:[#allocation1] ss:$2 sm:$0xff] %v90_v50 }
  0xee   :  { %v2228_v43 = vld.sshfl [vmem:[#allocation1 + $0x10] sm:$0xff pattern:$0x75316420]  ;;  %v2230_v24 = vld.sshfl [vmem:[#allocation1 + $0x18] sm:$0xff pattern:$0x75316420] }
  0xef   :  { %v2235_v0 = vld.sshfl [vmem:[#allocation1 + $0x20] sm:$0xff pattern:$0x75316420]  ;;  %v2237_v50 = vld.sshfl [vmem:[#allocation1 + $0x28] sm:$0xff pattern:$0x75316420] }
  0xf0   :  { %3422 = vst [vmem:[#allocation110_spill] sm:$0xff] %v2235_v0  ;;  %v2239_v33 = vld.sshfl [vmem:[#allocation1 + $0x30] sm:$0xff pattern:$0x75316420]  ;;  %v113_v0 = vld [vmem:[%s3310_s0 + $0x318] sm:$0x77] }
  0xf1   :  { %3423 = vst [vmem:[#allocation111_spill] sm:$0xff] %v2237_v50  ;;  %v2241_v25 = vld.sshfl [vmem:[#allocation1 + $0x38] sm:$0xff pattern:$0x75316420] }
  0xf2   :  { %3424 = vst [vmem:[#allocation112_spill] sm:$0xff] %v2239_v33  ;;  %v2243_v40 = vld.sshfl [vmem:[#allocation1] sm:$0xff pattern:$0x75316420] }
  0xf3   :  { %3425 = vst [vmem:[#allocation113_spill] sm:$0xff] %v2241_v25  ;;  %v2245_v7 = vld.sshfl [vmem:[#allocation1 + $0x8] sm:$0xff pattern:$0x75316420] }
  0xf4   :  { %516 = vst [vmem:[#allocation1 + $0x10] ss:$2 sm:$0xff] %v91_v18  ;;  %v97_v18 = vld [vmem:[%s3310_s0 + $0x298] sm:$0x77] }
  0xf5   :  { %3426 = vst [vmem:[#allocation114_spill] sm:$0xff] %v2243_v40 }
  0xf6   :  { %517 = vst [vmem:[#allocation1 + $0x20] ss:$2 sm:$0xff] %v92_v20 }
  0xf7   :  { %3427 = vst [vmem:[#allocation115_spill] sm:$0xff] %v2245_v7 }
  0xf8   :  { %518 = vst [vmem:[#allocation1 + $0x30] ss:$2 sm:$0xff] %v93_v10  ;;  %v98_v10 = vld [vmem:[%s3310_s0 + $0x2a0] sm:$0x77] }
  0xf9   :  { %527 = vst [vmem:[#allocation1] ss:$2 sm:$0xff] %v94_v46 }
  0xfb   :  { %v2253_v50 = vld.sshfl [vmem:[#allocation1 + $0x10] sm:$0xff pattern:$0x75316420]  ;;  %v2258_v40 = vld.sshfl [vmem:[#allocation1 + $0x18] sm:$0xff pattern:$0x75316420] }
  0xfc   :  { %3428 = vst [vmem:[#allocation116_spill] sm:$0xff] %v2253_v50 }
  0xfd   :  { %3429 = vst [vmem:[#allocation117_spill] sm:$0xff] %v2258_v40  ;;  %v2260_v20 = vld.sshfl [vmem:[#allocation1 + $0x20] sm:$0xff pattern:$0x75316420] }
  0xfe   :  { %3430 = vst [vmem:[#allocation118_spill] sm:$0xff] %v2260_v20  ;;  %v2265_v46 = vld.sshfl [vmem:[#allocation1 + $0x28] sm:$0xff pattern:$0x75316420] }
  0xff   :  { %3431 = vst [vmem:[#allocation119_spill] sm:$0xff] %v2265_v46  ;;  %v2267_v7 = vld.sshfl [vmem:[#allocation1 + $0x30] sm:$0xff pattern:$0x75316420]  ;;  %v99_v20 = vld [vmem:[%s3310_s0 + $0x2a8] sm:$0x77] }
 0x100   :  { %3432 = vst [vmem:[#allocation120_spill] sm:$0xff] %v2267_v7  ;;  %v2269_v25 = vld.sshfl [vmem:[#allocation1 + $0x38] sm:$0xff pattern:$0x75316420]  ;;  %v100_v46 = vld [vmem:[%s3310_s0 + $0x2b0] sm:$0x77] }
 0x101   :  { %3433 = vst [vmem:[#allocation121_spill] sm:$0xff] %v2269_v25  ;;  %v2271_v33 = vld.sshfl [vmem:[#allocation1] sm:$0xff pattern:$0x75316420]  ;;  %v101_v25 = vld [vmem:[%s3310_s0 + $0x2b8] sm:$0x77] }
 0x102   :  { %3434 = vst [vmem:[#allocation122_spill] sm:$0xff] %v2271_v33  ;;  %v2273_v50 = vld.sshfl [vmem:[#allocation1 + $0x8] sm:$0xff pattern:$0x75316420] }
 0x103   :  { %3435 = vst [vmem:[#allocation123_spill] sm:$0xff] %v2273_v50 }
 0x104   :  { %530 = vst [vmem:[#allocation1 + $0x10] ss:$2 sm:$0xff] %v95_v45 }
 0x105   :  { %531 = vst [vmem:[#allocation1 + $0x20] ss:$2 sm:$0xff] %v96_v17  ;;  %v102_v17 = vld [vmem:[%s3310_s0 + $0x2c0] sm:$0x77] }
 0x106   :  { %532 = vst [vmem:[#allocation1 + $0x30] ss:$2 sm:$0xff] %v97_v18 }
 0x107   :  { %539 = vst [vmem:[#allocation1] ss:$2 sm:$0xff] %v98_v10 }
 0x10b   :  { %v2284_v7 = vld.sshfl [vmem:[#allocation1 + $0x10] sm:$0xff pattern:$0x75316420]  ;;  %v2286_v33 = vld.sshfl [vmem:[#allocation1 + $0x18] sm:$0xff pattern:$0x75316420] }
 0x10c   :  { %v2291_v45 = vld.sshfl [vmem:[#allocation1 + $0x20] sm:$0xff pattern:$0x75316420]  ;;  %v2293_v18 = vld.sshfl [vmem:[#allocation1 + $0x28] sm:$0xff pattern:$0x75316420] }
 0x10d   :  { %v2295_v10 = vld.sshfl [vmem:[#allocation1 + $0x30] sm:$0xff pattern:$0x75316420]  ;;  %v2297_v50 = vld.sshfl [vmem:[#allocation1 + $0x38] sm:$0xff pattern:$0x75316420] }
 0x10e   :  { %3436 = vst [vmem:[#allocation124_spill] sm:$0xff] %v2295_v10  ;;  %v2299_v40 = vld.sshfl [vmem:[#allocation1] sm:$0xff pattern:$0x75316420] }
 0x10f   :  { %3437 = vst [vmem:[#allocation125_spill] sm:$0xff] %v2297_v50  ;;  %v2301_v21 = vld.sshfl [vmem:[#allocation1 + $0x8] sm:$0xff pattern:$0x75316420]  ;;  %v105_v50 = vld [vmem:[%s3310_s0 + $0x2d8] sm:$0x77] }
 0x110   :  { %540 = vst [vmem:[#allocation1 + $0x10] ss:$2 sm:$0xff] %v99_v20 }
 0x111   :  { %3438 = vst [vmem:[#allocation126_spill] sm:$0xff] %v2299_v40 }
 0x112   :  { %541 = vst [vmem:[#allocation1 + $0x20] ss:$2 sm:$0xff] %v100_v46 }
 0x113   :  { %3439 = vst [vmem:[#allocation127_spill] sm:$0xff] %v2301_v21 }
 0x114   :  { %542 = vst [vmem:[#allocation1 + $0x30] ss:$2 sm:$0xff] %v101_v25  ;;  %v106_v25 = vld [vmem:[%s3310_s0 + $0x2e0] sm:$0x77] }
 0x115   :  { %551 = vst [vmem:[#allocation1] ss:$2 sm:$0xff] %v102_v17 }
 0x117   :  { %v2312_v20 = vld.sshfl [vmem:[#allocation1 + $0x10] sm:$0xff pattern:$0x75316420]  ;;  %v2314_v40 = vld.sshfl [vmem:[#allocation1 + $0x18] sm:$0xff pattern:$0x75316420] }
 0x118   :  { %3440 = vst [vmem:[#allocation128_spill] sm:$0xff] %v2312_v20 }
 0x119   :  { %3441 = vst [vmem:[#allocation129_spill] sm:$0xff] %v2314_v40  ;;  %v2319_v46 = vld.sshfl [vmem:[#allocation1 + $0x20] sm:$0xff pattern:$0x75316420]  ;;  %v107_v40 = vld [vmem:[%s3310_s0 + $0x2e8] sm:$0x77] }
 0x11a   :  { %3442 = vst [vmem:[#allocation130_spill] sm:$0xff] %v2319_v46  ;;  %v2321_v17 = vld.sshfl [vmem:[#allocation1 + $0x28] sm:$0xff pattern:$0x75316420] }
 0x11b   :  { %3443 = vst [vmem:[#allocation131_spill] sm:$0xff] %v2321_v17  ;;  %v2323_v21 = vld.sshfl [vmem:[#allocation1 + $0x30] sm:$0xff pattern:$0x75316420] }
 0x11c   :  { %3444 = vst [vmem:[#allocation132_spill] sm:$0xff] %v2323_v21  ;;  %v2325_v35 = vld.sshfl [vmem:[#allocation1 + $0x38] sm:$0xff pattern:$0x75316420]  ;;  %v108_v17 = vld [vmem:[%s3310_s0 + $0x2f0] sm:$0x77] }
 0x11d   :  { %3445 = vst [vmem:[#allocation133_spill] sm:$0xff] %v2325_v35  ;;  %v2327_v56 = vld.sshfl [vmem:[#allocation1] sm:$0xff pattern:$0x75316420]  ;;  %v109_v35 = vld [vmem:[%s3310_s0 + $0x2f8] sm:$0x77] }
 0x11e   :  { %552 = vst [vmem:[#allocation1 + $0x10] ss:$2 sm:$0xff] %v103_v26  ;;  %v2329_v10 = vld.sshfl [vmem:[#allocation1 + $0x8] sm:$0xff pattern:$0x75316420] }
 0x11f   :  { %3446 = vst [vmem:[#allocation134_spill] sm:$0xff] %v2327_v56 }
 0x120   :  { %3447 = vst [vmem:[#allocation135_spill] sm:$0xff] %v2329_v10 }
 0x121   :  { %557 = vst [vmem:[#allocation1 + $0x20] ss:$2 sm:$0xff] %v104_v14  ;;  %v110_v14 = vld [vmem:[%s3310_s0 + $0x300] sm:$0x77] }
 0x122   :  { %558 = vst [vmem:[#allocation1 + $0x30] ss:$2 sm:$0xff] %v105_v50 }
 0x123   :  { %563 = vst [vmem:[#allocation1] ss:$2 sm:$0xff] %v106_v25 }
 0x125   :  { %v2340_v26 = vld.sshfl [vmem:[#allocation1 + $0x10] sm:$0xff pattern:$0x75316420]  ;;  %v2342_v56 = vld.sshfl [vmem:[#allocation1 + $0x18] sm:$0xff pattern:$0x75316420] }
 0x126   :  { %3448 = vst [vmem:[#allocation136_spill] sm:$0xff] %v2340_v26  ;;  %v112_v26 = vld [vmem:[%s3310_s0 + $0x310] sm:$0x77] }
 0x127   :  { %3449 = vst [vmem:[#allocation137_spill] sm:$0xff] %v2342_v56  ;;  %v111_v56 = vld [vmem:[%s3310_s0 + $0x308] sm:$0x77] }
 0x128   :  { %v2347_v50 = vld.sshfl [vmem:[#allocation1 + $0x20] sm:$0xff pattern:$0x75316420]  ;;  %v2349_v25 = vld.sshfl [vmem:[#allocation1 + $0x28] sm:$0xff pattern:$0x75316420] }
 0x129   :  { %v2351_v10 = vld.sshfl [vmem:[#allocation1 + $0x30] sm:$0xff pattern:$0x75316420]  ;;  %v2353_v21 = vld.sshfl [vmem:[#allocation1 + $0x38] sm:$0xff pattern:$0x75316420] }
 0x12a   :  { %564 = vst [vmem:[#allocation1 + $0x10] ss:$2 sm:$0xff] %v107_v40  ;;  %v2355_v46 = vld.sshfl [vmem:[#allocation1] sm:$0xff pattern:$0x75316420] }
 0x12b   :  { %3450 = vst [vmem:[#allocation138_spill] sm:$0xff] %v2355_v46  ;;  %v2357_v20 = vld.sshfl [vmem:[#allocation1 + $0x8] sm:$0xff pattern:$0x75316420] }
 0x12c   :  { %565 = vst [vmem:[#allocation1 + $0x20] ss:$2 sm:$0xff] %v108_v17 }
 0x12d   :  { %3451 = vst [vmem:[#allocation139_spill] sm:$0xff] %v2357_v20 }
 0x12e   :  { %566 = vst [vmem:[#allocation1 + $0x30] ss:$2 sm:$0xff] %v109_v35  ;;  %v114_v35 = vld [vmem:[%s3310_s0 + $0x320] sm:$0x77] }
 0x12f   :  { %575 = vst [vmem:[#allocation1] ss:$2 sm:$0xff] %v110_v14 }
 0x131   :  { %v2368_v40 = vld.sshfl [vmem:[#allocation1 + $0x10] sm:$0xff pattern:$0x75316420]  ;;  %v2370_v46 = vld.sshfl [vmem:[#allocation1 + $0x18] sm:$0xff pattern:$0x75316420] }
 0x132   :  { %3452 = vst [vmem:[#allocation140_spill] sm:$0xff] %v2368_v40 }
 0x133   :  { %3453 = vst [vmem:[#allocation141_spill] sm:$0xff] %v2370_v46  ;;  %v2375_v17 = vld.sshfl [vmem:[#allocation1 + $0x20] sm:$0xff pattern:$0x75316420]  ;;  %v115_v46 = vld [vmem:[%s3310_s0 + $0x328] sm:$0x77] }
 0x134   :  { %3454 = vst [vmem:[#allocation142_spill] sm:$0xff] %v2375_v17  ;;  %v2377_v14 = vld.sshfl [vmem:[#allocation1 + $0x28] sm:$0xff pattern:$0x75316420] }
 0x135   :  { %3455 = vst [vmem:[#allocation143_spill] sm:$0xff] %v2377_v14  ;;  %v2379_v20 = vld.sshfl [vmem:[#allocation1 + $0x30] sm:$0xff pattern:$0x75316420] }
 0x136   :  { %3456 = vst [vmem:[#allocation144_spill] sm:$0xff] %v2379_v20  ;;  %v2381_v6 = vld.sshfl [vmem:[#allocation1 + $0x38] sm:$0xff pattern:$0x75316420]  ;;  %v116_v14 = vld [vmem:[%s3310_s0 + $0x330] sm:$0x77] }
 0x137   :  { %3457 = vst [vmem:[#allocation145_spill] sm:$0xff] %v2381_v6  ;;  %v2383_v44 = vld.sshfl [vmem:[#allocation1] sm:$0xff pattern:$0x75316420]  ;;  %v117_v6 = vld [vmem:[%s3310_s0 + $0x338] sm:$0x77] }
 0x138   :  { %576 = vst [vmem:[#allocation1 + $0x10] ss:$2 sm:$0xff] %v111_v56  ;;  %v2385_v16 = vld.sshfl [vmem:[#allocation1 + $0x8] sm:$0xff pattern:$0x75316420] }
 0x139   :  { %3458 = vst [vmem:[#allocation146_spill] sm:$0xff] %v2383_v44 }
 0x13a   :  { %577 = vst [vmem:[#allocation1 + $0x20] ss:$2 sm:$0xff] %v112_v26 }
 0x13b   :  { %3459 = vst [vmem:[#allocation147_spill] sm:$0xff] %v2385_v16 }
 0x13c   :  { %584 = vst [vmem:[#allocation1 + $0x30] ss:$2 sm:$0xff] %v113_v0  ;;  %v118_v0 = vld [vmem:[%s3310_s0 + $0x340] sm:$0x77] }
 0x13d   :  { %587 = vst [vmem:[#allocation1] ss:$2 sm:$0xff] %v114_v35 }
 0x13f   :  { %v2396_v56 = vld.sshfl [vmem:[#allocation1 + $0x10] sm:$0xff pattern:$0x75316420]  ;;  %v2398_v44 = vld.sshfl [vmem:[#allocation1 + $0x18] sm:$0xff pattern:$0x75316420] }
 0x140   :  { %3460 = vst [vmem:[#allocation148_spill] sm:$0xff] %v2396_v56 }
 0x141   :  { %3461 = vst [vmem:[#allocation149_spill] sm:$0xff] %v2398_v44  ;;  %v2403_v26 = vld.sshfl [vmem:[#allocation1 + $0x20] sm:$0xff pattern:$0x75316420]  ;;  %v119_v44 = vld [vmem:[%s3310_s0 + $0x348] sm:$0x77] }
 0x142   :  { %3462 = vst [vmem:[#allocation150_spill] sm:$0xff] %v2403_v26  ;;  %v2405_v35 = vld.sshfl [vmem:[#allocation1 + $0x28] sm:$0xff pattern:$0x75316420]  ;;  %v121_v26 = vld [vmem:[%s3310_s0 + $0x358] sm:$0x77] }
 0x143   :  { %3463 = vst [vmem:[#allocation151_spill] sm:$0xff] %v2405_v35  ;;  %v2407_v16 = vld.sshfl [vmem:[#allocation1 + $0x30] sm:$0xff pattern:$0x75316420] }
 0x144   :  { %v2409_v20 = vld.sshfl [vmem:[#allocation1 + $0x38] sm:$0xff pattern:$0x75316420]  ;;  %588 = vst [vmem:[#allocation1 + $0x10] ss:$2 sm:$0xff] %v115_v46 }
 0x145   :  { %v2411_v17 = vld.sshfl [vmem:[#allocation1] sm:$0xff pattern:$0x75316420]  ;;  %589 = vst [vmem:[#allocation1 + $0x20] ss:$2 sm:$0xff] %v116_v14 }
 0x146   :  { %v2413_v40 = vld.sshfl [vmem:[#allocation1 + $0x8] sm:$0xff pattern:$0x75316420]  ;;  %590 = vst [vmem:[#allocation1 + $0x30] ss:$2 sm:$0xff] %v117_v6 }
 0x147   :  { %599 = vst [vmem:[#allocation1] ss:$2 sm:$0xff] %v118_v0  ;;  %v120_v35 = vld [vmem:[%s3310_s0 + $0x350] sm:$0x77]  ;;  %v122_v6 = vld [vmem:[%s3310_s0 + $0x360] sm:$0x77] }
 0x14b   :  { %v2424_v46 = vld.sshfl [vmem:[#allocation1 + $0x10] sm:$0xff pattern:$0x75316420]  ;;  %v2426_v56 = vld.sshfl [vmem:[#allocation1 + $0x18] sm:$0xff pattern:$0x75316420] }
 0x14c   :  { %3464 = vst [vmem:[#allocation152_spill] sm:$0xff] %v2424_v46  ;;  %v2431_v14 = vld.sshfl [vmem:[#allocation1 + $0x20] sm:$0xff pattern:$0x75316420]  ;;  %v1021_v46 = vsel %vm3313_vm0, %v1721_v12, 0.0  ;;  %v1050_v12 = vsel %vm3313_vm0, %v1723_v13, 0.0 }
 0x14d   :  { %3465 = vst [vmem:[#allocation153_spill] sm:$0xff] %v2426_v56  ;;  %v2433_v0 = vld.sshfl [vmem:[#allocation1 + $0x28] sm:$0xff pattern:$0x75316420]  ;;  %v129_v13 = vld [vmem:[%s3310_s0 + $0x398] sm:$0x77] }
 0x14e   :  { %3466 = vst [vmem:[#allocation154_spill] sm:$0xff] %v2431_v14  ;;  %v2435_v19 = vld.sshfl [vmem:[#allocation1 + $0x30] sm:$0xff pattern:$0x75316420]  ;;  %v123_v56 = vld [vmem:[%s3310_s0 + $0x368] sm:$0x77] }
 0x14f   :  { %3467 = vst [vmem:[#allocation155_spill] sm:$0xff] %v2433_v0  ;;  %v2437_v27 = vld.sshfl [vmem:[#allocation1 + $0x38] sm:$0xff pattern:$0x75316420]  ;;  %v124_v0 = vld [vmem:[%s3310_s0 + $0x370] sm:$0x77] }
 0x150   :  { %3468 = vst [vmem:[#allocation156_spill] sm:$0xff] %v2435_v19  ;;  %v2439_v52 = vld.sshfl [vmem:[#allocation1] sm:$0xff pattern:$0x75316420] }
 0x151   :  { %3469 = vst [vmem:[#allocation157_spill] sm:$0xff] %v2437_v27  ;;  %v2441_v57 = vld.sshfl [vmem:[#allocation1 + $0x8] sm:$0xff pattern:$0x75316420]  ;;  %v125_v27 = vld [vmem:[%s3310_s0 + $0x378] sm:$0x77] }
 0x152   :  { %600 = vst [vmem:[#allocation1 + $0x10] ss:$2 sm:$0xff] %v119_v44 }
 0x153   :  { %3470 = vst [vmem:[#allocation158_spill] sm:$0xff] %v2439_v52 }
 0x154   :  { %601 = vst [vmem:[#allocation1 + $0x20] ss:$2 sm:$0xff] %v120_v35 }
 0x155   :  { %3471 = vst [vmem:[#allocation159_spill] sm:$0xff] %v2441_v57 }
 0x156   :  { %602 = vst [vmem:[#allocation1 + $0x30] ss:$2 sm:$0xff] %v121_v26  ;;  %v126_v26 = vld [vmem:[%s3310_s0 + $0x380] sm:$0x77] }
 0x157   :  { %611 = vst [vmem:[#allocation1] ss:$2 sm:$0xff] %v122_v6 }
 0x159   :  { %v2452_v44 = vld.sshfl [vmem:[#allocation1 + $0x10] sm:$0xff pattern:$0x75316420]  ;;  %v2454_v52 = vld.sshfl [vmem:[#allocation1 + $0x18] sm:$0xff pattern:$0x75316420] }
 0x15a   :  { %3472 = vst [vmem:[#allocation160_spill] sm:$0xff] %v2452_v44 }
 0x15b   :  { %3473 = vst [vmem:[#allocation161_spill] sm:$0xff] %v2454_v52  ;;  %v2459_v35 = vld.sshfl [vmem:[#allocation1 + $0x20] sm:$0xff pattern:$0x75316420]  ;;  %v992_v52 = vsel %vm3313_vm0, %v1713_v9, 0.0  ;;  %v1022_v9 = vsel %vm3313_vm0, %v1781_v38, 0.0 }
 0x15c   :  { %3474 = vst [vmem:[#allocation162_spill] sm:$0xff] %v2459_v35  ;;  %v2461_v6 = vld.sshfl [vmem:[#allocation1 + $0x28] sm:$0xff pattern:$0x75316420]  ;;  %v963_v35 = vsel %vm3313_vm0, %v1711_v8, 0.0  ;;  %v966_v8 = vsel %vm3313_vm0, %v1840_v63, 0.0 }
 0x15d   :  { %3475 = vst [vmem:[#allocation163_spill] sm:$0xff] %v2461_v6  ;;  %v2463_v57 = vld.sshfl [vmem:[#allocation1 + $0x30] sm:$0xff pattern:$0x75316420]  ;;  %v964_v6 = vsel %vm3313_vm0, %v1777_v36, 0.0  ;;  %v997_v36 = vsel %vm3313_vm0, %v1902_v62, 0.0 }
 0x15e   :  { %3476 = vst [vmem:[#allocation164_spill] sm:$0xff] %v2463_v57  ;;  %v2465_v19 = vld.sshfl [vmem:[#allocation1 + $0x38] sm:$0xff pattern:$0x75316420]  ;;  %v1051_v38 = vsel %vm3313_vm0, %v1783_v39, 0.0  ;;  %v968_v62 = vsel %vm3313_vm0, %v1900_v61, 0.0 }
 0x15f   :  { %3477 = vst [vmem:[#allocation165_spill] sm:$0xff] %v2465_v19  ;;  %v2467_v14 = vld.sshfl [vmem:[#allocation1] sm:$0xff pattern:$0x75316420]  ;;  %v993_v19 = vsel %vm3313_vm0, %v1779_v37, 0.0  ;;  %v1024_v37 = vsel %vm3313_vm0, %v1847_v2, 0.0 }
 0x160   :  { %612 = vst [vmem:[#allocation1 + $0x10] ss:$2 sm:$0xff] %v123_v56  ;;  %v2469_v44 = vld.sshfl [vmem:[#allocation1 + $0x8] sm:$0xff pattern:$0x75316420]  ;;  %v995_v56 = vsel %vm3313_vm0, %v1845_v1, 0.0  ;;  %v994_v57 = vadd.f32 %v993_v19, %v992_v52 }
 0x161   :  { %613 = vst [vmem:[#allocation1 + $0x20] ss:$2 sm:$0xff] %v124_v0  ;;  %v965_v0 = vadd.f32 %v964_v6, %v963_v35  ;;  %v127_v1 = vld [vmem:[%s3310_s0 + $0x388] sm:$0x77]  ;;  %v128_v63 = vld [vmem:[%s3310_s0 + $0x390] sm:$0x77] }
 0x162   :  { %614 = vst [vmem:[#allocation1 + $0x30] ss:$2 sm:$0xff] %v125_v27  ;;  %v1023_v27 = vadd.f32 %v1022_v9, %v1021_v46  ;;  %v996_v19 = vadd.f32 %v995_v56, %v994_v57  ;;  %v999_v2 = vsel %vm3313_vm0, %v1968_v31, 0.0  ;;  %v1026_v57 = vsel %vm3313_vm0, %v1907_v5, 0.0  ;;  %v130_v61 = vld [vmem:[%s3310_s0 + $0x3a0] sm:$0x77] }
 0x163   :  { %623 = vst [vmem:[#allocation1] ss:$2 sm:$0xff] %v126_v26  ;;  %v967_v52 = vadd.f32 %v966_v8, %v965_v0 }
 0x164   :  { %v1025_v46 = vadd.f32 %v1024_v37, %v1023_v27  ;;  %v998_v6 = vadd.f32 %v997_v36, %v996_v19  ;;  %v970_v27 = vsel %vm3313_vm0, %v1966_v53, 0.0  ;;  %v972_v19 = vsel %vm3313_vm0, %v2032_v51, 0.0 }
 0x165   :  { %v969_v35 = vadd.f32 %v968_v62, %v967_v52  ;;  %v974_v62 = vsel %vm3313_vm0, %v2095_v54, 0.0  ;;  %v1005_v53 = vsel %vm3313_vm0, %v2157_v47, 0.0  ;;  %v1030_v51 = vsel %vm3313_vm0, %v2036_v49, 0.0  ;;  %v131_v49 = vld [vmem:[%s3310_s0 + $0x3a8] sm:$0x77] }
 0x166   :  { %v1000_v9 = vadd.f32 %v999_v2, %v998_v6  ;;  %v1027_v36 = vadd.f32 %v1026_v57, %v1025_v46  ;;  %v1003_v2 = vsel %vm3313_vm0, %v2097_v32, 0.0  ;;  %v1028_v57 = vsel %vm3313_vm0, %v1973_v60, 0.0 }
 0x167   :  { %v2510_v26 = vld.sshfl [vmem:[#allocation1 + $0x10] sm:$0xff pattern:$0x75316420]  ;;  %v2512_v39 = vld.sshfl [vmem:[#allocation1 + $0x18] sm:$0xff pattern:$0x75316420]  ;;  %v971_v52 = vadd.f32 %v970_v27, %v969_v35 }
 0x168   :  { %v2517_v56 = vld.sshfl [vmem:[#allocation1 + $0x20] sm:$0xff pattern:$0x75316420]  ;;  %v2519_v31 = vld.sshfl [vmem:[#allocation1 + $0x28] sm:$0xff pattern:$0x75316420] }
 0x169   :  { %v2521_v0 = vld.sshfl [vmem:[#allocation1 + $0x30] sm:$0xff pattern:$0x75316420]  ;;  %v2523_v5 = vld.sshfl [vmem:[#allocation1 + $0x38] sm:$0xff pattern:$0x75316420] }
 0x16a   :  { %624 = vst [vmem:[#allocation1 + $0x10] ss:$2 sm:$0xff] %v127_v1  ;;  %v2525_v8 = vld.sshfl [vmem:[#allocation1] sm:$0xff pattern:$0x75316420]  ;;  %v1001_v1 = vsel %vm3313_vm0, %v2034_v58, 0.0 }
 0x16b   :  { %625 = vst [vmem:[#allocation1 + $0x20] ss:$2 sm:$0xff] %v128_v63  ;;  %v2529_v37 = vld.sshfl [vmem:[#allocation1 + $0x8] sm:$0xff pattern:$0x75316420]  ;;  %v973_v63 = vadd.f32 %v972_v19, %v971_v52  ;;  %v1002_v46 = vadd.f32 %v1001_v1, %v1000_v9  ;;  %v976_v54 = vsel %vm3313_vm0, %v2155_v28, 0.0 }
 0x16c   :  { %626 = vst [vmem:[#allocation1 + $0x30] ss:$2 sm:$0xff] %v129_v13  ;;  %v1007_v58 = vsel %vm3313_vm0, %v2217_v55, 0.0  ;;  %v1029_v13 = vadd.f32 %v1028_v57, %v1027_v36  ;;  %v1032_v32 = vsel %vm3313_vm0, %v2099_v34, 0.0  ;;  %v1034_v6 = vsel %vm3313_vm0, %v2159_v48, 0.0 }
 0x16d   :  { %635 = vst [vmem:[#allocation1] ss:$2 sm:$0xff] %v130_v61  ;;  %v975_v47 = vadd.f32 %v974_v62, %v973_v63  ;;  %v1004_v35 = vadd.f32 %v1003_v2, %v1002_v46  ;;  %v1053_v60 = vsel %vm3313_vm0, %v1849_v3, 0.0  ;;  %v978_v28 = vsel %vm3313_vm0, %v2215_v23, 0.0  ;;  %v132_v48 = vld [vmem:[%s3310_s0 + $0x3b0] sm:$0x77] }
 0x16e   :  { %v1009_v55 = vsel %vm3313_vm0, %v2286_v33, 0.0  ;;  %v1031_v61 = vadd.f32 %v1030_v51, %v1029_v13  ;;  %v1036_v34 = vsel %vm3313_vm0, %v2228_v43, 0.0  ;;  %v133_v23 = vld [vmem:[%s3310_s0 + $0x3b8] sm:$0x77]  ;;  %v1052_v43 = vadd.f32 %v1051_v38, %v1050_v12  ;;  %v134_v62 = vld [vmem:[%s3310_s0 + $0x3c0] sm:$0x77] }
 0x16f   :  { %v977_v27 = vadd.f32 %v976_v54, %v975_v47  ;;  %v1006_v36 = vadd.f32 %v1005_v53, %v1004_v35  ;;  %v980_v54 = vsel %vm3313_vm0, %v2284_v7, 0.0  ;;  %v982_v12 = vsel %vm3313_vm0, %v2347_v50, 0.0 }
 0x170   :  { %v1033_v19 = vadd.f32 %v1032_v32, %v1031_v61  ;;  %v1011_v13 = vsel %vm3313_vm0, %v2349_v25, 0.0  ;;  %v1054_v47 = vadd.f32 %v1053_v60, %v1052_v43  ;;  %v984_v35 = vsel %vm3313_vm0, %v2407_v16, 0.0 }
 0x171   :  { %v2567_v9 = vld.sshfl [vmem:[#allocation1 + $0x10] sm:$0xff pattern:$0x75316420]  ;;  %v2569_v3 = vld.sshfl [vmem:[#allocation1 + $0x18] sm:$0xff pattern:$0x75316420]  ;;  %v979_v63 = vadd.f32 %v978_v28, %v977_v27  ;;  %v1008_v53 = vadd.f32 %v1007_v58, %v1006_v36 }
 0x172   :  { %v2574_v52 = vld.sshfl [vmem:[#allocation1 + $0x20] sm:$0xff pattern:$0x75316420]  ;;  %v2576_v33 = vld.sshfl [vmem:[#allocation1 + $0x28] sm:$0xff pattern:$0x75316420]  ;;  %v1035_v51 = vadd.f32 %v1034_v6, %v1033_v19 }
 0x173   :  { %v2581_v1 = vld.sshfl [vmem:[#allocation1 + $0x30] sm:$0xff pattern:$0x75316420]  ;;  %v2583_v2 = vld.sshfl [vmem:[#allocation1 + $0x38] sm:$0xff pattern:$0x75316420]  ;;  %v1010_v38 = vadd.f32 %v1009_v55, %v1008_v53  ;;  %v981_v32 = vadd.f32 %v980_v54, %v979_v63 }
 0x174   :  { %v2585_v46 = vld.sshfl [vmem:[#allocation1] sm:$0xff pattern:$0x75316420]  ;;  %v2587_v57 = vld.sshfl [vmem:[#allocation1 + $0x8] sm:$0xff pattern:$0x75316420] }
 0x175   :  { %638 = vst [vmem:[#allocation1 + $0x10] ss:$2 sm:$0xff] %v131_v49  ;;  %v1013_v58 = vsel %vm3313_vm0, %v2409_v20, 0.0  ;;  %v1012_v6 = vadd.f32 %v1011_v13, %v1010_v38  ;;  %v1037_v49 = vadd.f32 %v1036_v34, %v1035_v51  ;;  %v1038_v7 = vsel %vm3313_vm0, %v2291_v45, 0.0  ;;  %v135_v45 = vld [vmem:[%s3310_s0 + $0x3c8] sm:$0x77] }
 0x176   :  { %639 = vst [vmem:[#allocation1 + $0x20] ss:$2 sm:$0xff] %v132_v48  ;;  %v983_v50 = vadd.f32 %v982_v12, %v981_v32  ;;  %v986_v25 = vsel %vm3313_vm0, %v2467_v14, 0.0  ;;  %v1015_v28 = vsel %vm3313_vm0, %v2469_v44, 0.0  ;;  %v1040_v20 = vsel %vm3313_vm0, %v2351_v10, 0.0 }
 0x177   :  { %640 = vst [vmem:[#allocation1 + $0x30] ss:$2 sm:$0xff] %v133_v23  ;;  %v1014_v60 = vadd.f32 %v1013_v58, %v1012_v6  ;;  %v1039_v55 = vadd.f32 %v1038_v7, %v1037_v49  ;;  %v1055_v16 = vsel %vm3313_vm0, %v1909_v11, 0.0  ;;  %v1057_v61 = vsel %vm3313_vm0, %v1978_v30, 0.0  ;;  %v136_v48 = vld [vmem:[%s3310_s0 + $0x3d0] sm:$0x77] }
 0x178   :  { %647 = vst [vmem:[#allocation1] ss:$2 sm:$0xff] %v134_v62  ;;  %v985_v34 = vadd.f32 %v984_v35, %v983_v50  ;;  %v1042_v14 = vsel %vm3313_vm0, %v2411_v17, 0.0  ;;  %v1044_v44 = vsel %vm3313_vm0, %v2510_v26, 0.0  ;;  %v1056_v10 = vadd.f32 %v1055_v16, %v1054_v47  ;;  %v137_v17 = vld [vmem:[%s3310_s0 + $0x3d8] sm:$0x77] }
 0x179   :  { %v1041_v11 = vadd.f32 %v1040_v20, %v1039_v55  ;;  %v1059_v30 = vsel %vm3313_vm0, %v2038_v59, 0.0  ;;  %v1061_v27 = vsel %vm3313_vm0, %v2101_v22, 0.0  ;;  %v1063_v36 = vsel %vm3313_vm0, %v2161_v41, 0.0  ;;  %v138_v62 = vld [vmem:[%s3310_s0 + $0x3e0] sm:$0x77] }
 0x17a   :  { %v987_v19 = vadd.f32 %v986_v25, %v985_v34  ;;  %v1058_v43 = vadd.f32 %v1057_v61, %v1056_v10  ;;  %v1016_v53 = vadd.f32 %v1015_v28, %v1014_v60  ;;  %v1065_v7 = vsel %vm3313_vm0, %v2230_v24, 0.0  ;;  %v139_v24 = vld [vmem:[%s3310_s0 + $0x3e8] sm:$0x77] }
 0x17b   :  { %v1043_v51 = vadd.f32 %v1042_v14, %v1041_v11  ;;  %v1067_v28 = vsel %vm3313_vm0, %v2293_v18, 0.0  ;;  %v1079_v20 = vsel %vm3313_vm0, %v1728_v15, 0.0  ;;  %v1080_v60 = vsel %vm3313_vm0, %v1791_v42, 0.0  ;;  %v140_v18 = vld [vmem:[%s3310_s0 + $0x3f0] sm:$0x77]  ;;  %v3478_v34 = vld [vmem:[#allocation54_spill] sm:$0xff] }
 0x17c   :  { %v641_v26 = vld.sshfl [vmem:[#allocation1 + $0x10] sm:$0xff pattern:$0x75316420]  ;;  %v642_v23 = vld.sshfl [vmem:[#allocation1 + $0x18] sm:$0xff pattern:$0x75316420]  ;;  %v1060_v41 = vadd.f32 %v1059_v30, %v1058_v43 }
 0x17d   :  { %v643_v63 = vld.sshfl [vmem:[#allocation1 + $0x20] sm:$0xff pattern:$0x75316420]  ;;  %v644_v59 = vld.sshfl [vmem:[#allocation1 + $0x28] sm:$0xff pattern:$0x75316420]  ;;  %v1045_v13 = vadd.f32 %v1044_v44, %v1043_v51 }
 0x17e   :  { %v2633_v22 = vld.sshfl [vmem:[#allocation1 + $0x30] sm:$0xff pattern:$0x75316420]  ;;  %v2635_v54 = vld.sshfl [vmem:[#allocation1 + $0x38] sm:$0xff pattern:$0x75316420]  ;;  %v1062_v35 = vadd.f32 %v1061_v27, %v1060_v41 }
 0x17f   :  { %648 = vst [vmem:[#allocation1 + $0x10] ss:$2 sm:$0xff] %v135_v45  ;;  %v2637_v12 = vld.sshfl [vmem:[#allocation1] sm:$0xff pattern:$0x75316420]  ;;  %v988_v38 = vsel %vm3313_vm0, %v641_v26, 0.0  ;;  %v1081_v45 = vadd.f32 %v1080_v60, %v1079_v20 }
 0x180   :  { %649 = vst [vmem:[#allocation1 + $0x20] ss:$2 sm:$0xff] %v136_v48  ;;  %v2640_v32 = vld.sshfl [vmem:[#allocation1 + $0x8] sm:$0xff pattern:$0x75316420]  ;;  %v2642_v58 = vadd.f32 %v988_v38, %v987_v19  ;;  %v1017_v47 = vsel %vm3313_vm0, %v642_v23, 0.0  ;;  %v1064_v25 = vadd.f32 %v1063_v36, %v1062_v35 }
 0x181   :  { %650 = vst [vmem:[#allocation1 + $0x30] ss:$2 sm:$0xff] %v137_v17  ;;  %v2645_v6 = vadd.f32 %v1017_v47, %v1016_v53  ;;  %v1046_v49 = vsel %vm3313_vm0, %v643_v63, 0.0  ;;  %v1082_v55 = vsel %vm3313_vm0, %v1851_v4, 0.0  ;;  %v1069_v61 = vsel %vm3313_vm0, %v2353_v21, 0.0  ;;  %v3479_v23 = vld [vmem:[#allocation68_spill] sm:$0xff] }
 0x182   :  { %659 = vst [vmem:[#allocation1] ss:$2 sm:$0xff] %v138_v62  ;;  %v2650_v50 = vadd.f32 %v1046_v49, %v1045_v13  ;;  %v1066_v16 = vadd.f32 %v1065_v7, %v1064_v25  ;;  %v1071_v15 = vsel %vm3313_vm0, %v2413_v40, 0.0  ;;  %v1073_v42 = vsel %vm3313_vm0, %v2512_v39, 0.0  ;;  %v141_v21 = vld [vmem:[%s3310_s0 + $0x3f8] sm:$0x77] }
 0x183   :  { %v1084_v4 = vsel %vm3313_vm0, %v1914_v29, 0.0  ;;  %v1086_v14 = vsel %vm3313_vm0, %v3478_v34, 0.0  ;;  %v1083_v11 = vadd.f32 %v1082_v55, %v1081_v45  ;;  %v142_v40 = vld [vmem:[%s3310_s0 + $0x400] sm:$0x77]  ;;  %v1088_v19 = vsel %vm3313_vm0, %v3479_v23, 0.0  ;;  %v3480_v51 = vld [vmem:[#allocation82_spill] sm:$0xff] }
 0x184   :  { %v1068_v48 = vadd.f32 %v1067_v28, %v1066_v16  ;;  %v1075_v53 = vsel %vm3313_vm0, %v644_v59, 0.0  ;;  %v1090_v41 = vsel %vm3313_vm0, %v3480_v51, 0.0  ;;  %v3481_v38 = vld [vmem:[#allocation96_spill] sm:$0xff]  ;;  %v3482_v47 = vld [vmem:[#allocation2_spill] sm:$0xff]  ;;  %v3483_v25 = vld [vmem:[#allocation15_spill] sm:$0xff] }
 0x185   :  { %v1085_v17 = vadd.f32 %v1084_v4, %v1083_v11  ;;  %v1092_v13 = vsel %vm3313_vm0, %v3481_v38, 0.0  ;;  %v1108_v35 = vsel %vm3313_vm0, %v3482_v47, 0.0  ;;  %v1109_v28 = vsel %vm3313_vm0, %v3483_v25, 0.0  ;;  %v3484_v20 = vld [vmem:[#allocation28_spill] sm:$0xff]  ;;  %v3485_v55 = vld [vmem:[#allocation110_spill] sm:$0xff] }
 0x186   :  { %v2679_v44 = vld.sshfl [vmem:[#allocation1 + $0x10] sm:$0xff pattern:$0x75316420]  ;;  %v2681_v10 = vld.sshfl [vmem:[#allocation1 + $0x18] sm:$0xff pattern:$0x75316420]  ;;  %v1070_v36 = vadd.f32 %v1069_v61, %v1068_v48 }
 0x187   :  { %v2686_v39 = vld.sshfl [vmem:[#allocation1 + $0x20] sm:$0xff pattern:$0x75316420]  ;;  %v2688_v29 = vld.sshfl [vmem:[#allocation1 + $0x28] sm:$0xff pattern:$0x75316420]  ;;  %v1087_v63 = vadd.f32 %v1086_v14, %v1085_v17 }
 0x188   :  { %v2690_v30 = vld.sshfl [vmem:[#allocation1 + $0x30] sm:$0xff pattern:$0x75316420]  ;;  %v2692_v27 = vld.sshfl [vmem:[#allocation1 + $0x38] sm:$0xff pattern:$0x75316420]  ;;  %v1072_v62 = vadd.f32 %v1071_v15, %v1070_v36 }
 0x189   :  { %660 = vst [vmem:[#allocation1 + $0x10] ss:$2 sm:$0xff] %v139_v24  ;;  %v2694_v26 = vld.sshfl [vmem:[#allocation1] sm:$0xff pattern:$0x75316420]  ;;  %v1089_v7 = vadd.f32 %v1088_v19, %v1087_v63  ;;  %v1111_v60 = vsel %vm3313_vm0, %v3484_v20, 0.0 }
 0x18a   :  { %v2698_v43 = vld.sshfl [vmem:[#allocation1 + $0x8] sm:$0xff pattern:$0x75316420]  ;;  %665 = vst [vmem:[#allocation1 + $0x20] ss:$2 sm:$0xff] %v140_v18  ;;  %v1074_v49 = vadd.f32 %v1073_v42, %v1072_v62  ;;  %v1094_v59 = vsel %vm3313_vm0, %v3485_v55, 0.0  ;;  %v1110_v18 = vadd.f32 %v1109_v28, %v1108_v35 }
 0x18b   :  { %666 = vst [vmem:[#allocation1 + $0x30] ss:$2 sm:$0xff] %v141_v21  ;;  %v3486_v24 = vld [vmem:[#allocation124_spill] sm:$0xff]  ;;  %v3487_v61 = vld [vmem:[#allocation138_spill] sm:$0xff]  ;;  %v1091_v4 = vadd.f32 %v1090_v41, %v1089_v7  ;;  %v3489_v21 = vld [vmem:[#allocation41_spill] sm:$0xff] }
 0x18c   :  { %671 = vst [vmem:[#allocation1] ss:$2 sm:$0xff] %v142_v40  ;;  %v1096_v16 = vsel %vm3313_vm0, %v3486_v24, 0.0  ;;  %v1098_v45 = vsel %vm3313_vm0, %v3487_v61, 0.0  ;;  %v143_v15 = vld [vmem:[%s3310_s0 + $0x408] sm:$0x77]  ;;  %v1076_v42 = vadd.f32 %v1075_v53, %v1074_v49  ;;  %v1112_v36 = vadd.f32 %v1111_v60, %v1110_v18 }
 0x18d   :  { %v3488_v34 = vld [vmem:[#allocation152_spill] sm:$0xff]  ;;  %v1113_v48 = vsel %vm3313_vm0, %v3489_v21, 0.0  ;;  %v144_v11 = vld [vmem:[%s3310_s0 + $0x410] sm:$0x77]  ;;  %v1102_v40 = vsel %vm3313_vm0, %v2517_v56, 0.0  ;;  %v3491_v19 = vld [vmem:[#allocation69_spill] sm:$0xff]  ;;  %v1093_v41 = vadd.f32 %v1092_v13, %v1091_v4 }
 0x18e   :  { %v1100_v14 = vsel %vm3313_vm0, %v3488_v34, 0.0  ;;  %v3490_v17 = vld [vmem:[#allocation55_spill] sm:$0xff]  ;;  %v1117_v62 = vsel %vm3313_vm0, %v3491_v19, 0.0  ;;  %v145_v63 = vld [vmem:[%s3310_s0 + $0x418] sm:$0x77]  ;;  %v1114_v35 = vadd.f32 %v1113_v48, %v1112_v36  ;;  %v3495_v19 = vld [vmem:[#allocation125_spill] sm:$0xff] }
 0x18f   :  { %v1115_v23 = vsel %vm3313_vm0, %v3490_v17, 0.0  ;;  %v146_v56 = vld [vmem:[%s3310_s0 + $0x420] sm:$0x77]  ;;  %v1095_v25 = vadd.f32 %v1094_v59, %v1093_v41  ;;  %v3494_v17 = vld [vmem:[#allocation111_spill] sm:$0xff] }
 0x190   :  { %v2736_v53 = vld.sshfl [vmem:[#allocation1 + $0x10] sm:$0xff pattern:$0x75316420]  ;;  %v2738_v51 = vld.sshfl [vmem:[#allocation1 + $0x18] sm:$0xff pattern:$0x75316420]  ;;  %v1116_v60 = vadd.f32 %v1115_v23, %v1114_v35 }
 0x191   :  { %v667_v38 = vld.sshfl [vmem:[#allocation1 + $0x20] sm:$0xff pattern:$0x75316420]  ;;  %v668_v47 = vld.sshfl [vmem:[#allocation1 + $0x28] sm:$0xff pattern:$0x75316420]  ;;  %v1097_v61 = vadd.f32 %v1096_v16, %v1095_v25 }
 0x192   :  { %v669_v49 = vld.sshfl [vmem:[#allocation1 + $0x30] sm:$0xff pattern:$0x75316420]  ;;  %v670_v7 = vld.sshfl [vmem:[#allocation1 + $0x38] sm:$0xff pattern:$0x75316420] }
 0x193   :  { %672 = vst [vmem:[#allocation1 + $0x10] ss:$2 sm:$0xff] %v143_v15  ;;  %v675_v28 = vld.sshfl [vmem:[#allocation1] sm:$0xff pattern:$0x75316420]  ;;  %v990_v20 = vsel %vm3313_vm0, %v667_v38, 0.0  ;;  %v1099_v48 = vadd.f32 %v1098_v45, %v1097_v61 }
 0x194   :  { %673 = vst [vmem:[#allocation1 + $0x20] ss:$2 sm:$0xff] %v144_v11  ;;  %v676_v55 = vld.sshfl [vmem:[#allocation1 + $0x8] sm:$0xff pattern:$0x75316420]  ;;  %v2745_v24 = vadd.f32 %v990_v20, %v2642_v58  ;;  %v1019_v13 = vsel %vm3313_vm0, %v668_v47, 0.0  ;;  %v1118_v11 = vadd.f32 %v1117_v62, %v1116_v60 }
 0x195   :  { %674 = vst [vmem:[#allocation1 + $0x30] ss:$2 sm:$0xff] %v145_v63  ;;  %v2749_v18 = vadd.f32 %v1019_v13, %v2645_v6  ;;  %v1048_v4 = vsel %vm3313_vm0, %v669_v49, 0.0  ;;  %v1077_v59 = vsel %vm3313_vm0, %v670_v7, 0.0  ;;  %v3492_v15 = vld [vmem:[#allocation83_spill] sm:$0xff]  ;;  %v1104_v16 = vsel %vm3313_vm0, %v2633_v22, 0.0 }
 0x196   :  { %v1119_v34 = vsel %vm3313_vm0, %v3492_v15, 0.0  ;;  %683 = vst [vmem:[#allocation1] ss:$2 sm:$0xff] %v146_v56  ;;  %v2756_v21 = vadd.f32 %v1048_v4, %v2650_v50  ;;  %v2758_v58 = vadd.f32 %v1077_v59, %v1076_v42  ;;  %v3493_v6 = vld [vmem:[#allocation97_spill] sm:$0xff]  ;;  %v1123_v23 = vsel %vm3313_vm0, %v3494_v17, 0.0  ;;  %v3496_v45 = vld [vmem:[#allocation3_spill] sm:$0xff] }
 0x197   :  { %v1121_v36 = vsel %vm3313_vm0, %v3493_v6, 0.0  ;;  %v1125_v63 = vsel %vm3313_vm0, %v3495_v19, 0.0  ;;  %v147_v50 = vld [vmem:[%s3310_s0 + $0x428] sm:$0x77]  ;;  %v1101_v42 = vadd.f32 %v1100_v14, %v1099_v48  ;;  %v1120_v41 = vadd.f32 %v1119_v34, %v1118_v11  ;;  %v3497_v56 = vld [vmem:[#allocation16_spill] sm:$0xff]  ;;  %v3498_v49 = vld [vmem:[#allocation29_spill] sm:$0xff] }
 0x198   :  { %v1137_v62 = vsel %vm3313_vm0, %v3496_v45, 0.0  ;;  %v1138_v22 = vsel %vm3313_vm0, %v3497_v56, 0.0  ;;  %v148_v38 = vld [vmem:[%s3310_s0 + $0x430] sm:$0x77]  ;;  %v1106_v47 = vsel %vm3313_vm0, %v675_v28, 0.0  ;;  %v1140_v7 = vsel %vm3313_vm0, %v3498_v49, 0.0 }
 0x199   :  { %v1139_v35 = vadd.f32 %v1138_v22, %v1137_v62  ;;  %v3499_v25 = vld [vmem:[#allocation42_spill] sm:$0xff]  ;;  %v1103_v13 = vadd.f32 %v1102_v40, %v1101_v42  ;;  %v1122_v61 = vadd.f32 %v1121_v36, %v1120_v41  ;;  %v3500_v28 = vld [vmem:[#allocation56_spill] sm:$0xff]  ;;  %v3501_v6 = vld [vmem:[#allocation139_spill] sm:$0xff] }
 0x19a   :  { %v1142_v14 = vsel %vm3313_vm0, %v3499_v25, 0.0  ;;  %v677_v20 = vld.sshfl [vmem:[#allocation1 + $0x10] sm:$0xff pattern:$0x75316420]  ;;  %v1144_v11 = vsel %vm3313_vm0, %v3500_v28, 0.0  ;;  %v1127_v17 = vsel %vm3313_vm0, %v3501_v6, 0.0 }
 0x19b   :  { %v2783_v60 = vld.sshfl [vmem:[#allocation1 + $0x18] sm:$0xff pattern:$0x75316420]  ;;  %v2785_v4 = vld.sshfl [vmem:[#allocation1 + $0x20] sm:$0xff pattern:$0x75316420]  ;;  %v1141_v15 = vadd.f32 %v1140_v7, %v1139_v35  ;;  %v1105_v34 = vadd.f32 %v1104_v16, %v1103_v13  ;;  %v1124_v48 = vadd.f32 %v1123_v23, %v1122_v61 }
 0x19c   :  { %v2787_v59 = vld.sshfl [vmem:[#allocation1 + $0x28] sm:$0xff pattern:$0x75316420]  ;;  %684 = vst [vmem:[#allocation1 + $0x10] ss:$2 sm:$0xff] %v147_v50  ;;  %v3503_v41 = vld [vmem:[#allocation153_spill] sm:$0xff] }
 0x19d   :  { %v1143_v19 = vadd.f32 %v1142_v14, %v1141_v15  ;;  %685 = vst [vmem:[#allocation1 + $0x20] ss:$2 sm:$0xff] %v148_v38  ;;  %v2793_v45 = vadd.f32 %v1106_v47, %v1105_v34  ;;  %v1126_v40 = vadd.f32 %v1125_v63, %v1124_v48  ;;  %v3502_v36 = vld [vmem:[#allocation70_spill] sm:$0xff]  ;;  %v1129_v62 = vsel %vm3313_vm0, %v3503_v41, 0.0  ;;  %v3504_v56 = vld [vmem:[#allocation84_spill] sm:$0xff]  ;;  %v3507_v25 = vld [vmem:[#allocation17_spill] sm:$0xff] }
 0x19e   :  { %v1146_v42 = vsel %vm3313_vm0, %v3502_v36, 0.0  ;;  %v1148_v22 = vsel %vm3313_vm0, %v3504_v56, 0.0  ;;  %v1131_v50 = vsel %vm3313_vm0, %v2519_v31, 0.0  ;;  %v3505_v49 = vld [vmem:[#allocation4_spill] sm:$0xff]  ;;  %v3506_v63 = vld [vmem:[#allocation98_spill] sm:$0xff]  ;;  %v1167_v14 = vsel %vm3313_vm0, %v3507_v25, 0.0 }
 0x19f   :  { %v1145_v16 = vadd.f32 %v1144_v11, %v1143_v19  ;;  %v1128_v23 = vadd.f32 %v1127_v17, %v1126_v40  ;;  %v1166_v38 = vsel %vm3313_vm0, %v3505_v49, 0.0  ;;  %v1150_v7 = vsel %vm3313_vm0, %v3506_v63, 0.0  ;;  %v3508_v13 = vld [vmem:[#allocation30_spill] sm:$0xff]  ;;  %v3509_v28 = vld [vmem:[#allocation112_spill] sm:$0xff]  ;;  %v3510_v6 = vld [vmem:[#allocation43_spill] sm:$0xff] }
 0x1a0   :  { %v1169_v61 = vsel %vm3313_vm0, %v3508_v13, 0.0  ;;  %v1133_v15 = vsel %vm3313_vm0, %v2635_v54, 0.0  ;;  %v1168_v48 = vadd.f32 %v1167_v14, %v1166_v38  ;;  %v1152_v11 = vsel %vm3313_vm0, %v3509_v28, 0.0  ;;  %v3511_v41 = vld [vmem:[#allocation126_spill] sm:$0xff]  ;;  %v3513_v56 = vld [vmem:[#allocation140_spill] sm:$0xff]  ;;  %v3515_v63 = vld [vmem:[#allocation71_spill] sm:$0xff] }
 0x1a1   :  { %v1147_v35 = vadd.f32 %v1146_v42, %v1145_v16  ;;  %v1130_v47 = vadd.f32 %v1129_v62, %v1128_v23  ;;  %v1171_v17 = vsel %vm3313_vm0, %v3510_v6, 0.0  ;;  %v1135_v19 = vsel %vm3313_vm0, %v676_v55, 0.0  ;;  %v3512_v16 = vld [vmem:[#allocation57_spill] sm:$0xff] }
 0x1a2   :  { %v1170_v36 = vadd.f32 %v1169_v61, %v1168_v48  ;;  %v1154_v62 = vsel %vm3313_vm0, %v3511_v41, 0.0  ;;  %v1173_v54 = vsel %vm3313_vm0, %v3512_v16, 0.0  ;;  %v1160_v55 = vsel %vm3313_vm0, %v2521_v0, 0.0  ;;  %v3516_v61 = vld [vmem:[#allocation5_spill] sm:$0xff]  ;;  %v3519_v0 = vld [vmem:[#allocation18_spill] sm:$0xff] }
 0x1a3   :  { %v1149_v34 = vadd.f32 %v1148_v22, %v1147_v35  ;;  %v1132_v31 = vadd.f32 %v1131_v50, %v1130_v47  ;;  %v1156_v22 = vsel %vm3313_vm0, %v3513_v56, 0.0  ;;  %v3514_v50 = vld [vmem:[#allocation154_spill] sm:$0xff]  ;;  %v1162_v47 = vsel %vm3313_vm0, %v2637_v12, 0.0  ;;  %v3520_v12 = vld [vmem:[#allocation31_spill] sm:$0xff]  ;;  %v3525_v56 = vld [vmem:[#allocation44_spill] sm:$0xff] }
 0x1a4   :  { %v1158_v35 = vsel %vm3313_vm0, %v3514_v50, 0.0  ;;  %v1172_v49 = vadd.f32 %v1171_v17, %v1170_v36  ;;  %v1164_v14 = vsel %vm3313_vm0, %v677_v20, 0.0  ;;  %v1198_v6 = vsel %vm3313_vm0, %v3520_v12, 0.0 }
 0x1a5   :  { %v1151_v40 = vadd.f32 %v1150_v7, %v1149_v34  ;;  %v1134_v42 = vadd.f32 %v1133_v15, %v1132_v31  ;;  %v1175_v7 = vsel %vm3313_vm0, %v3515_v63, 0.0  ;;  %v1195_v15 = vsel %vm3313_vm0, %v3516_v61, 0.0  ;;  %v3517_v34 = vld [vmem:[#allocation85_spill] sm:$0xff]  ;;  %v3518_v31 = vld [vmem:[#allocation99_spill] sm:$0xff]  ;;  %v3526_v61 = vld [vmem:[#allocation58_spill] sm:$0xff] }
 0x1a6   :  { %v1174_v13 = vadd.f32 %v1173_v54, %v1172_v49  ;;  %v1177_v48 = vsel %vm3313_vm0, %v3517_v34, 0.0  ;;  %v1179_v28 = vsel %vm3313_vm0, %v3518_v31, 0.0  ;;  %v3524_v54 = vld [vmem:[#allocation155_spill] sm:$0xff]  ;;  %v1200_v50 = vsel %vm3313_vm0, %v3525_v56, 0.0  ;;  %v3527_v34 = vld [vmem:[#allocation72_spill] sm:$0xff] }
 0x1a7   :  { %v1153_v23 = vadd.f32 %v1152_v11, %v1151_v40  ;;  %v2826_v38 = vadd.f32 %v1135_v19, %v1134_v42  ;;  %v1196_v11 = vsel %vm3313_vm0, %v3519_v0, 0.0  ;;  %v3521_v40 = vld [vmem:[#allocation113_spill] sm:$0xff]  ;;  %v3522_v42 = vld [vmem:[#allocation127_spill] sm:$0xff]  ;;  %v1204_v31 = vsel %vm3313_vm0, %v3527_v34, 0.0 }
 0x1a8   :  { %v1176_v19 = vadd.f32 %v1175_v7, %v1174_v13  ;;  %v1181_v20 = vsel %vm3313_vm0, %v3521_v40, 0.0  ;;  %v1197_v36 = vadd.f32 %v1196_v11, %v1195_v15  ;;  %v1183_v41 = vsel %vm3313_vm0, %v3522_v42, 0.0  ;;  %v3532_v40 = vld [vmem:[#allocation32_spill] sm:$0xff] }
 0x1a9   :  { %v1155_v25 = vadd.f32 %v1154_v62, %v1153_v23  ;;  %v3523_v62 = vld [vmem:[#allocation141_spill] sm:$0xff]  ;;  %v1187_v23 = vsel %vm3313_vm0, %v3524_v54, 0.0  ;;  %v1193_v13 = vsel %vm3313_vm0, %v2783_v60, 0.0  ;;  %v1202_v15 = vsel %vm3313_vm0, %v3526_v61, 0.0  ;;  %v3533_v54 = vld [vmem:[#allocation114_spill] sm:$0xff] }
 0x1aa   :  { %v1185_v16 = vsel %vm3313_vm0, %v3523_v62, 0.0  ;;  %v1178_v63 = vadd.f32 %v1177_v48, %v1176_v19  ;;  %v1199_v7 = vadd.f32 %v1198_v6, %v1197_v36  ;;  %v3528_v48 = vld [vmem:[#allocation6_spill] sm:$0xff]  ;;  %v3531_v19 = vld [vmem:[#allocation19_spill] sm:$0xff]  ;;  %v1227_v36 = vsel %vm3313_vm0, %v3532_v40, 0.0  ;;  %v3536_v61 = vld [vmem:[#allocation45_spill] sm:$0xff] }
 0x1ab   :  { %v1157_v17 = vadd.f32 %v1156_v22, %v1155_v25  ;;  %v1189_v22 = vsel %vm3313_vm0, %v2523_v5, 0.0  ;;  %v1191_v25 = vsel %vm3313_vm0, %v2640_v32, 0.0  ;;  %v1224_v12 = vsel %vm3313_vm0, %v3528_v48, 0.0  ;;  %v3529_v5 = vld [vmem:[#allocation86_spill] sm:$0xff] }
 0x1ac   :  { %v1180_v11 = vadd.f32 %v1179_v28, %v1178_v63  ;;  %v1206_v6 = vsel %vm3313_vm0, %v3529_v5, 0.0  ;;  %v1225_v60 = vsel %vm3313_vm0, %v3531_v19, 0.0  ;;  %v1210_v56 = vsel %vm3313_vm0, %v3533_v54, 0.0  ;;  %v3535_v63 = vld [vmem:[#allocation142_spill] sm:$0xff] }
 0x1ad   :  { %v1159_v49 = vadd.f32 %v1158_v35, %v1157_v17  ;;  %v1201_v35 = vadd.f32 %v1200_v50, %v1199_v7  ;;  %v3530_v17 = vld [vmem:[#allocation100_spill] sm:$0xff]  ;;  %v1226_v28 = vadd.f32 %v1225_v60, %v1224_v12  ;;  %v1214_v7 = vsel %vm3313_vm0, %v3535_v63, 0.0  ;;  %v3544_v63 = vld [vmem:[#allocation101_spill] sm:$0xff] }
 0x1ae   :  { %v1208_v32 = vsel %vm3313_vm0, %v3530_v17, 0.0  ;;  %v1182_v62 = vadd.f32 %v1181_v20, %v1180_v11  ;;  %v3534_v50 = vld [vmem:[#allocation128_spill] sm:$0xff]  ;;  %v1229_v34 = vsel %vm3313_vm0, %v3536_v61, 0.0  ;;  %v1220_v11 = vsel %vm3313_vm0, %v2679_v44, 0.0  ;;  %v3542_v44 = vld [vmem:[#allocation33_spill] sm:$0xff] }
 0x1af   :  { %v1161_v0 = vadd.f32 %v1160_v55, %v1159_v49  ;;  %v1203_v55 = vadd.f32 %v1202_v15, %v1201_v35  ;;  %v1212_v49 = vsel %vm3313_vm0, %v3534_v50, 0.0  ;;  %v3537_v20 = vld [vmem:[#allocation156_spill] sm:$0xff]  ;;  %v3538_v35 = vld [vmem:[#allocation59_spill] sm:$0xff]  ;;  %v1237_v61 = vsel %vm3313_vm0, %v3544_v63, 0.0 }
 0x1b0   :  { %v1184_v5 = vadd.f32 %v1183_v41, %v1182_v62  ;;  %v1216_v15 = vsel %vm3313_vm0, %v3537_v20, 0.0  ;;  %v1231_v12 = vsel %vm3313_vm0, %v3538_v35, 0.0  ;;  %v3543_v50 = vld [vmem:[#allocation87_spill] sm:$0xff] }
 0x1b1   :  { %v1163_v42 = vadd.f32 %v1162_v47, %v1161_v0  ;;  %v1205_v17 = vadd.f32 %v1204_v31, %v1203_v55  ;;  %v1228_v47 = vadd.f32 %v1227_v36, %v1226_v28  ;;  %v1218_v0 = vsel %vm3313_vm0, %v2525_v8, 0.0  ;;  %v3539_v31 = vld [vmem:[#allocation73_spill] sm:$0xff]  ;;  %v3540_v36 = vld [vmem:[#allocation7_spill] sm:$0xff]  ;;  %v3541_v8 = vld [vmem:[#allocation20_spill] sm:$0xff] }
 0x1b2   :  { %v1186_v19 = vadd.f32 %v1185_v16, %v1184_v5  ;;  %v1233_v40 = vsel %vm3313_vm0, %v3539_v31, 0.0  ;;  %v1254_v62 = vsel %vm3313_vm0, %v3541_v8, 0.0  ;;  %v1256_v55 = vsel %vm3313_vm0, %v3542_v44, 0.0 }
 0x1b3   :  { %v2883_v48 = vadd.f32 %v1164_v14, %v1163_v42  ;;  %v1207_v60 = vadd.f32 %v1206_v6, %v1205_v17  ;;  %v2895_v14 = vsel %vm3313_vm0, %v2785_v4, 0.0  ;;  %v1230_v41 = vadd.f32 %v1229_v34, %v1228_v47  ;;  %v3545_v34 = vld [vmem:[#allocation115_spill] sm:$0xff]  ;;  %v3546_v17 = vld [vmem:[#allocation46_spill] sm:$0xff] }
 0x1b4   :  { %v1253_v42 = vsel %vm3313_vm0, %v3540_v36, 0.0  ;;  %v1188_v28 = vadd.f32 %v1187_v23, %v1186_v19  ;;  %v1235_v4 = vsel %vm3313_vm0, %v3543_v50, 0.0  ;;  %v1239_v5 = vsel %vm3313_vm0, %v3545_v34, 0.0  ;;  %v3547_v23 = vld [vmem:[#allocation129_spill] sm:$0xff]  ;;  %v3553_v34 = vld [vmem:[#allocation8_spill] sm:$0xff] }
 0x1b5   :  { %v1209_v16 = vadd.f32 %v1208_v32, %v1207_v60  ;;  %v1232_v6 = vadd.f32 %v1231_v12, %v1230_v41  ;;  %v1255_v54 = vadd.f32 %v1254_v62, %v1253_v42  ;;  %v1258_v47 = vsel %vm3313_vm0, %v3546_v17, 0.0  ;;  %v3548_v12 = vld [vmem:[#allocation143_spill] sm:$0xff]  ;;  %v3549_v60 = vld [vmem:[#allocation157_spill] sm:$0xff]  ;;  %v3550_v42 = vld [vmem:[#allocation60_spill] sm:$0xff] }
 0x1b6   :  { %v1190_v20 = vadd.f32 %v1189_v22, %v1188_v28  ;;  %v1241_v32 = vsel %vm3313_vm0, %v3547_v23, 0.0  ;;  %v1243_v19 = vsel %vm3313_vm0, %v3548_v12, 0.0  ;;  %v1245_v41 = vsel %vm3313_vm0, %v3549_v60, 0.0  ;;  %v3554_v17 = vld [vmem:[#allocation21_spill] sm:$0xff]  ;;  %v3558_v12 = vld [vmem:[#allocation130_spill] sm:$0xff] }
 0x1b7   :  { %v1211_v35 = vadd.f32 %v1210_v56, %v1209_v16  ;;  %v1234_v31 = vadd.f32 %v1233_v40, %v1232_v6  ;;  %v1257_v36 = vadd.f32 %v1256_v55, %v1255_v54  ;;  %v1260_v8 = vsel %vm3313_vm0, %v3550_v42, 0.0  ;;  %v3551_v55 = vld [vmem:[#allocation74_spill] sm:$0xff]  ;;  %v3559_v42 = vld [vmem:[#allocation47_spill] sm:$0xff] }
 0x1b8   :  { %v1192_v62 = vadd.f32 %v1191_v25, %v1190_v20  ;;  %v1247_v22 = vsel %vm3313_vm0, %v2529_v37, 0.0  ;;  %v1249_v56 = vsel %vm3313_vm0, %v2681_v10, 0.0  ;;  %v1251_v40 = vsel %vm3313_vm0, %v2787_v59, 0.0 }
 0x1b9   :  { %v1213_v44 = vadd.f32 %v1212_v49, %v1211_v35  ;;  %v1236_v50 = vadd.f32 %v1235_v4, %v1234_v31  ;;  %v1259_v63 = vadd.f32 %v1258_v47, %v1257_v36  ;;  %v1262_v28 = vsel %vm3313_vm0, %v3551_v55, 0.0  ;;  %v3552_v49 = vld [vmem:[#allocation88_spill] sm:$0xff]  ;;  %v3555_v47 = vld [vmem:[#allocation34_spill] sm:$0xff] }
 0x1ba   :  { %v2929_v16 = vadd.f32 %v1193_v13, %v1192_v62  ;;  %v1264_v4 = vsel %vm3313_vm0, %v3552_v49, 0.0  ;;  %v1282_v37 = vsel %vm3313_vm0, %v3553_v34, 0.0  ;;  %v1283_v10 = vsel %vm3313_vm0, %v3554_v17, 0.0  ;;  %v3556_v36 = vld [vmem:[#allocation102_spill] sm:$0xff] }
 0x1bb   :  { %v1215_v6 = vadd.f32 %v1214_v7, %v1213_v44  ;;  %v1238_v54 = vadd.f32 %v1237_v61, %v1236_v50  ;;  %v1261_v25 = vadd.f32 %v1260_v8, %v1259_v63  ;;  %v1285_v59 = vsel %vm3313_vm0, %v3555_v47, 0.0  ;;  %v3557_v61 = vld [vmem:[#allocation116_spill] sm:$0xff]  ;;  %v681_v62 = vld.sshfl [vmem:[#allocation1 + $0x30] sm:$0xff pattern:$0x75316420] }
 0x1bc   :  { %v1284_v13 = vadd.f32 %v1283_v10, %v1282_v37  ;;  %v1266_v7 = vsel %vm3313_vm0, %v3556_v36, 0.0  ;;  %v1268_v23 = vsel %vm3313_vm0, %v3557_v61, 0.0  ;;  %v1270_v60 = vsel %vm3313_vm0, %v3558_v12, 0.0  ;;  %v3566_v36 = vld [vmem:[#allocation103_spill] sm:$0xff] }
 0x1bd   :  { %v1217_v20 = vadd.f32 %v1216_v15, %v1215_v6  ;;  %v1240_v35 = vadd.f32 %v1239_v5, %v1238_v54  ;;  %v1263_v31 = vadd.f32 %v1262_v28, %v1261_v25  ;;  %v1287_v8 = vsel %vm3313_vm0, %v3559_v42, 0.0  ;;  %v3560_v5 = vld [vmem:[#allocation144_spill] sm:$0xff]  ;;  %v3561_v28 = vld [vmem:[#allocation158_spill] sm:$0xff]  ;;  %v3562_v25 = vld [vmem:[#allocation61_spill] sm:$0xff] }
 0x1be   :  { %v1286_v15 = vadd.f32 %v1285_v59, %v1284_v13  ;;  %v1272_v55 = vsel %vm3313_vm0, %v3560_v5, 0.0  ;;  %v1274_v6 = vsel %vm3313_vm0, %v3561_v28, 0.0  ;;  %v1276_v54 = vsel %vm3313_vm0, %v2567_v9, 0.0  ;;  %v3564_v59 = vld [vmem:[#allocation9_spill] sm:$0xff]  ;;  %v3568_v12 = vld [vmem:[#allocation35_spill] sm:$0xff]  ;;  %v3572_v28 = vld [vmem:[#allocation48_spill] sm:$0xff] }
 0x1bf   :  { %v1219_v44 = vadd.f32 %v1218_v0, %v1217_v20  ;;  %v1242_v50 = vadd.f32 %v1241_v32, %v1240_v35  ;;  %v1265_v63 = vadd.f32 %v1264_v4, %v1263_v31  ;;  %v1289_v49 = vsel %vm3313_vm0, %v3562_v25, 0.0  ;;  %v3563_v4 = vld [vmem:[#allocation75_spill] sm:$0xff]  ;;  %v3565_v31 = vld [vmem:[#allocation89_spill] sm:$0xff] }
 0x1c0   :  { %v1288_v10 = vadd.f32 %v1287_v8, %v1286_v15  ;;  %v1278_v0 = vsel %vm3313_vm0, %v2686_v39, 0.0  ;;  %v2958_v32 = vsel %vm3313_vm0, %v681_v62, 0.0  ;;  %v1291_v47 = vsel %vm3313_vm0, %v3563_v4, 0.0  ;;  %v3571_v15 = vld [vmem:[#allocation145_spill] sm:$0xff] }
 0x1c1   :  { %v1221_v34 = vadd.f32 %v1220_v11, %v1219_v44  ;;  %v1244_v37 = vadd.f32 %v1243_v19, %v1242_v50  ;;  %v1267_v17 = vadd.f32 %v1266_v7, %v1265_v63  ;;  %v1311_v20 = vsel %vm3313_vm0, %v3564_v59, 0.0  ;;  %v3567_v7 = vld [vmem:[#allocation22_spill] sm:$0xff]  ;;  %v3569_v50 = vld [vmem:[#allocation117_spill] sm:$0xff] }
 0x1c2   :  { %v1290_v19 = vadd.f32 %v1289_v49, %v1288_v10  ;;  %v1293_v13 = vsel %vm3313_vm0, %v3565_v31, 0.0  ;;  %v1295_v39 = vsel %vm3313_vm0, %v3566_v36, 0.0  ;;  %v1312_v61 = vsel %vm3313_vm0, %v3567_v7, 0.0  ;;  %v682_v49 = vld.sshfl [vmem:[#allocation1 + $0x38] sm:$0xff pattern:$0x75316420] }
 0x1c3   :  { %v2965_v9 = vadd.f32 %v2895_v14, %v1221_v34  ;;  %v1246_v35 = vadd.f32 %v1245_v41, %v1244_v37  ;;  %v1269_v11 = vadd.f32 %v1268_v23, %v1267_v17  ;;  %v1314_v42 = vsel %vm3313_vm0, %v3568_v12, 0.0  ;;  %v3570_v23 = vld [vmem:[#allocation131_spill] sm:$0xff]  ;;  %v3574_v59 = vld [vmem:[#allocation62_spill] sm:$0xff]  ;;  %v3575_v31 = vld [vmem:[#allocation76_spill] sm:$0xff] }
 0x1c4   :  { %v1292_v44 = vadd.f32 %v1291_v47, %v1290_v19  ;;  %v1313_v14 = vadd.f32 %v1312_v61, %v1311_v20  ;;  %v1297_v41 = vsel %vm3313_vm0, %v3569_v50, 0.0  ;;  %v1299_v63 = vsel %vm3313_vm0, %v3570_v23, 0.0  ;;  %v3576_v36 = vld [vmem:[#allocation10_spill] sm:$0xff]  ;;  %v3577_v7 = vld [vmem:[#allocation23_spill] sm:$0xff]  ;;  %v3581_v50 = vld [vmem:[#allocation49_spill] sm:$0xff] }
 0x1c5   :  { %v1248_v8 = vadd.f32 %v1247_v22, %v1246_v35  ;;  %v1271_v62 = vadd.f32 %v1270_v60, %v1269_v11  ;;  %v1301_v5 = vsel %vm3313_vm0, %v3571_v15, 0.0  ;;  %v1316_v25 = vsel %vm3313_vm0, %v3572_v28, 0.0  ;;  %v3573_v60 = vld [vmem:[#allocation159_spill] sm:$0xff]  ;;  %v686_v15 = vld.sshfl [vmem:[#allocation1] sm:$0xff pattern:$0x75316420] }
 0x1c6   :  { %v1294_v17 = vadd.f32 %v1293_v13, %v1292_v44  ;;  %v1315_v22 = vadd.f32 %v1314_v42, %v1313_v14  ;;  %v1303_v10 = vsel %vm3313_vm0, %v3573_v60, 0.0  ;;  %v1305_v4 = vsel %vm3313_vm0, %v2569_v3, 0.0  ;;  %v3578_v42 = vld [vmem:[#allocation90_spill] sm:$0xff]  ;;  %v3580_v44 = vld [vmem:[#allocation36_spill] sm:$0xff] }
 0x1c7   :  { %v1250_v34 = vadd.f32 %v1249_v56, %v1248_v8  ;;  %v1273_v37 = vadd.f32 %v1272_v55, %v1271_v62  ;;  %v2989_v47 = vsel %vm3313_vm0, %v2688_v29, 0.0  ;;  %v1318_v20 = vsel %vm3313_vm0, %v3574_v59, 0.0  ;;  %v3579_v8 = vld [vmem:[#allocation104_spill] sm:$0xff] }
 0x1c8   :  { %v1296_v56 = vadd.f32 %v1295_v39, %v1294_v17  ;;  %v1317_v55 = vadd.f32 %v1316_v25, %v1315_v22  ;;  %v2996_v19 = vsel %vm3313_vm0, %v682_v49, 0.0  ;;  %v1320_v13 = vsel %vm3313_vm0, %v3575_v31, 0.0  ;;  %v3582_v49 = vld [vmem:[#allocation118_spill] sm:$0xff]  ;;  %v3585_v60 = vld [vmem:[#allocation160_spill] sm:$0xff] }
 0x1c9   :  { %v2993_v35 = vadd.f32 %v1251_v40, %v1250_v34  ;;  %v1275_v11 = vadd.f32 %v1274_v6, %v1273_v37  ;;  %v1340_v3 = vsel %vm3313_vm0, %v3576_v36, 0.0  ;;  %v1341_v29 = vsel %vm3313_vm0, %v3577_v7, 0.0  ;;  %v3583_v37 = vld [vmem:[#allocation132_spill] sm:$0xff]  ;;  %v3587_v7 = vld [vmem:[#allocation77_spill] sm:$0xff] }
 0x1ca   :  { %v1298_v61 = vadd.f32 %v1297_v41, %v1296_v56  ;;  %v1319_v12 = vadd.f32 %v1318_v20, %v1317_v55  ;;  %v1322_v40 = vsel %vm3313_vm0, %v3578_v42, 0.0  ;;  %v1342_v6 = vadd.f32 %v1341_v29, %v1340_v3  ;;  %v3586_v20 = vld [vmem:[#allocation63_spill] sm:$0xff] }
 0x1cb   :  { %v1277_v39 = vadd.f32 %v1276_v54, %v1275_v11  ;;  %v1324_v62 = vsel %vm3313_vm0, %v3579_v8, 0.0  ;;  %v1343_v14 = vsel %vm3313_vm0, %v3580_v44, 0.0  ;;  %v1345_v23 = vsel %vm3313_vm0, %v3581_v50, 0.0  ;;  %v3584_v54 = vld [vmem:[#allocation146_spill] sm:$0xff]  ;;  %v3592_v44 = vld [vmem:[#allocation37_spill] sm:$0xff] }
 0x1cc   :  { %v1300_v28 = vadd.f32 %v1299_v63, %v1298_v61  ;;  %v1321_v25 = vadd.f32 %v1320_v13, %v1319_v12  ;;  %v1326_v41 = vsel %vm3313_vm0, %v3582_v49, 0.0  ;;  %v1344_v34 = vadd.f32 %v1343_v14, %v1342_v6  ;;  %v3589_v6 = vld [vmem:[#allocation105_spill] sm:$0xff] }
 0x1cd   :  { %v1328_v17 = vsel %vm3313_vm0, %v3583_v37, 0.0  ;;  %v1330_v22 = vsel %vm3313_vm0, %v3584_v54, 0.0  ;;  %v1332_v59 = vsel %vm3313_vm0, %v3585_v60, 0.0  ;;  %v1347_v11 = vsel %vm3313_vm0, %v3586_v20, 0.0  ;;  %v3595_v54 = vld [vmem:[#allocation50_spill] sm:$0xff] }
 0x1ce   :  { %v1302_v56 = vadd.f32 %v1301_v5, %v1300_v28  ;;  %v1323_v55 = vadd.f32 %v1322_v40, %v1321_v25  ;;  %v1334_v63 = vsel %vm3313_vm0, %v2574_v52, 0.0  ;;  %v1346_v31 = vadd.f32 %v1345_v23, %v1344_v34  ;;  %v3588_v5 = vld [vmem:[#allocation91_spill] sm:$0xff]  ;;  %v687_v28 = vld.sshfl [vmem:[#allocation1 + $0x8] sm:$0xff pattern:$0x75316420]  ;;  %v3594_v34 = vld [vmem:[#allocation133_spill] sm:$0xff] }
 0x1cf   :  { %v1279_v13 = vadd.f32 %v1278_v0, %v1277_v39  ;;  %v3026_v36 = vsel %vm3313_vm0, %v2690_v30, 0.0  ;;  %v3029_v3 = vsel %vm3313_vm0, %v686_v15, 0.0  ;;  %v1349_v29 = vsel %vm3313_vm0, %v3587_v7, 0.0  ;;  %v3590_v0 = vld [vmem:[#allocation11_spill] sm:$0xff]  ;;  %v3591_v30 = vld [vmem:[#allocation24_spill] sm:$0xff] }
 0x1d0   :  { %v1304_v61 = vadd.f32 %v1303_v10, %v1302_v56  ;;  %v1325_v12 = vadd.f32 %v1324_v62, %v1323_v55  ;;  %v1348_v42 = vadd.f32 %v1347_v11, %v1346_v31  ;;  %v1351_v40 = vsel %vm3313_vm0, %v3588_v5, 0.0  ;;  %v3593_v10 = vld [vmem:[#allocation119_spill] sm:$0xff]  ;;  %v3597_v31 = vld [vmem:[#allocation161_spill] sm:$0xff] }
 0x1d1   :  { %v1353_v52 = vsel %vm3313_vm0, %v3589_v6, 0.0  ;;  %v1369_v39 = vsel %vm3313_vm0, %v3590_v0, 0.0  ;;  %v1370_v8 = vsel %vm3313_vm0, %v3591_v30, 0.0  ;;  %v1372_v14 = vsel %vm3313_vm0, %v3592_v44, 0.0  ;;  %v3596_v56 = vld [vmem:[#allocation147_spill] sm:$0xff]  ;;  %v3600_v0 = vld [vmem:[#allocation92_spill] sm:$0xff] }
 0x1d2   :  { %v1327_v50 = vadd.f32 %v1326_v41, %v1325_v12  ;;  %v1350_v23 = vadd.f32 %v1349_v29, %v1348_v42  ;;  %v1355_v62 = vsel %vm3313_vm0, %v3593_v10, 0.0  ;;  %v1371_v15 = vadd.f32 %v1370_v8, %v1369_v39  ;;  %v3601_v39 = vld [vmem:[#allocation12_spill] sm:$0xff] }
 0x1d3   :  { %v3046_v25 = vadd.f32 %v2958_v32, %v1279_v13  ;;  %v1306_v49 = vadd.f32 %v1305_v4, %v1304_v61  ;;  %v1357_v37 = vsel %vm3313_vm0, %v3594_v34, 0.0  ;;  %v1374_v60 = vsel %vm3313_vm0, %v3595_v54, 0.0  ;;  %v3598_v13 = vld [vmem:[#allocation64_spill] sm:$0xff] }
 0x1d4   :  { %v1329_v20 = vadd.f32 %v1328_v17, %v1327_v50  ;;  %v1352_v11 = vadd.f32 %v1351_v40, %v1350_v23  ;;  %v1359_v41 = vsel %vm3313_vm0, %v3596_v56, 0.0  ;;  %v1373_v55 = vadd.f32 %v1372_v14, %v1371_v15  ;;  %v3599_v40 = vld [vmem:[#allocation78_spill] sm:$0xff]  ;;  %v3604_v23 = vld [vmem:[#allocation120_spill] sm:$0xff] }
 0x1d5   :  { %v1361_v7 = vsel %vm3313_vm0, %v3597_v31, 0.0  ;;  %v1363_v32 = vsel %vm3313_vm0, %v2576_v33, 0.0  ;;  %v3060_v4 = vsel %vm3313_vm0, %v2692_v27, 0.0  ;;  %v1376_v29 = vsel %vm3313_vm0, %v3598_v13, 0.0  ;;  %v3603_v14 = vld [vmem:[#allocation106_spill] sm:$0xff]  ;;  %v3608_v56 = vld [vmem:[#allocation148_spill] sm:$0xff] }
 0x1d6   :  { %v1331_v61 = vadd.f32 %v1330_v22, %v1329_v20  ;;  %v1354_v17 = vadd.f32 %v1353_v52, %v1352_v11  ;;  %v3065_v12 = vsel %vm3313_vm0, %v687_v28, 0.0  ;;  %v1375_v42 = vadd.f32 %v1374_v60, %v1373_v55  ;;  %v3602_v22 = vld [vmem:[#allocation25_spill] sm:$0xff]  ;;  %v3605_v15 = vld [vmem:[#allocation38_spill] sm:$0xff] }
 0x1d7   :  { %v1308_v5 = vadd.f32 %v2989_v47, %v1306_v49  ;;  %v1378_v6 = vsel %vm3313_vm0, %v3599_v40, 0.0  ;;  %v1380_v33 = vsel %vm3313_vm0, %v3600_v0, 0.0  ;;  %v1398_v27 = vsel %vm3313_vm0, %v3601_v39, 0.0  ;;  %v688_v49 = vld.sshfl [vmem:[#allocation1 + $0x10] sm:$0xff pattern:$0x75316420] }
 0x1d8   :  { %v1333_v30 = vadd.f32 %v1332_v59, %v1331_v61  ;;  %v1356_v8 = vadd.f32 %v1355_v62, %v1354_v17  ;;  %v1377_v44 = vadd.f32 %v1376_v29, %v1375_v42  ;;  %v1399_v52 = vsel %vm3313_vm0, %v3602_v22, 0.0  ;;  %v3606_v60 = vld [vmem:[#allocation134_spill] sm:$0xff]  ;;  %v3607_v62 = vld [vmem:[#allocation51_spill] sm:$0xff]  ;;  %v3610_v42 = vld [vmem:[#allocation65_spill] sm:$0xff] }
 0x1d9   :  { %v1382_v50 = vsel %vm3313_vm0, %v3603_v14, 0.0  ;;  %v1384_v47 = vsel %vm3313_vm0, %v3604_v23, 0.0  ;;  %v1400_v10 = vadd.f32 %v1399_v52, %v1398_v27  ;;  %v1401_v28 = vsel %vm3313_vm0, %v3605_v15, 0.0  ;;  %v3609_v31 = vld [vmem:[#allocation162_spill] sm:$0xff]  ;;  %v3614_v22 = vld [vmem:[#allocation13_spill] sm:$0xff] }
 0x1da   :  { %v1358_v34 = vadd.f32 %v1357_v37, %v1356_v8  ;;  %v1379_v54 = vadd.f32 %v1378_v6, %v1377_v44  ;;  %v1386_v59 = vsel %vm3313_vm0, %v3606_v60, 0.0  ;;  %v1403_v20 = vsel %vm3313_vm0, %v3607_v62, 0.0  ;;  %v3611_v8 = vld [vmem:[#allocation79_spill] sm:$0xff]  ;;  %v3615_v52 = vld [vmem:[#allocation26_spill] sm:$0xff]  ;;  %v3618_v60 = vld [vmem:[#allocation52_spill] sm:$0xff] }
 0x1db   :  { %v3087_v11 = vadd.f32 %v2996_v19, %v1308_v5  ;;  %v1388_v55 = vsel %vm3313_vm0, %v3608_v56, 0.0  ;;  %v1390_v13 = vsel %vm3313_vm0, %v3609_v31, 0.0  ;;  %v1402_v29 = vadd.f32 %v1401_v28, %v1400_v10  ;;  %v3613_v44 = vld [vmem:[#allocation107_spill] sm:$0xff] }
 0x1dc   :  { %v1335_v61 = vadd.f32 %v1334_v63, %v1333_v30  ;;  %v1360_v17 = vadd.f32 %v1359_v41, %v1358_v34  ;;  %v1381_v37 = vadd.f32 %v1380_v33, %v1379_v54  ;;  %v1405_v40 = vsel %vm3313_vm0, %v3610_v42, 0.0  ;;  %v3612_v41 = vld [vmem:[#allocation93_spill] sm:$0xff]  ;;  %v3616_v10 = vld [vmem:[#allocation39_spill] sm:$0xff] }
 0x1dd   :  { %v1392_v6 = vsel %vm3313_vm0, %v2581_v1, 0.0  ;;  %v3099_v19 = vsel %vm3313_vm0, %v2694_v26, 0.0  ;;  %v3102_v5 = vsel %vm3313_vm0, %v688_v49, 0.0  ;;  %v1404_v0 = vadd.f32 %v1403_v20, %v1402_v29  ;;  %v3617_v34 = vld [vmem:[#allocation121_spill] sm:$0xff]  ;;  %v3619_v31 = vld [vmem:[#allocation135_spill] sm:$0xff] }
 0x1de   :  { %v1362_v39 = vadd.f32 %v1361_v7, %v1360_v17  ;;  %v1383_v27 = vadd.f32 %v1382_v50, %v1381_v37  ;;  %v1407_v63 = vsel %vm3313_vm0, %v3611_v8, 0.0  ;;  %v1409_v33 = vsel %vm3313_vm0, %v3612_v41, 0.0  ;;  %v689_v20 = vld.sshfl [vmem:[#allocation1 + $0x18] sm:$0xff pattern:$0x75316420]  ;;  %v3620_v17 = vld [vmem:[#allocation149_spill] sm:$0xff] }
 0x1df   :  { %v1406_v30 = vadd.f32 %v1405_v40, %v1404_v0  ;;  %v1411_v1 = vsel %vm3313_vm0, %v3613_v44, 0.0  ;;  %v1427_v26 = vsel %vm3313_vm0, %v3614_v22, 0.0  ;;  %v1428_v14 = vsel %vm3313_vm0, %v3615_v52, 0.0  ;;  %v3621_v37 = vld [vmem:[#allocation163_spill] sm:$0xff]  ;;  %v3622_v40 = vld [vmem:[#allocation66_spill] sm:$0xff] }
 0x1e0   :  { %v1337_v23 = vadd.f32 %v3026_v36, %v1335_v61  ;;  %v1385_v7 = vadd.f32 %v1384_v47, %v1383_v27  ;;  %v1429_v50 = vadd.f32 %v1428_v14, %v1427_v26  ;;  %v1430_v15 = vsel %vm3313_vm0, %v3616_v10, 0.0  ;;  %v3624_v26 = vld [vmem:[#allocation94_spill] sm:$0xff] }
 0x1e1   :  { %v1364_v28 = vadd.f32 %v1363_v32, %v1362_v39  ;;  %v1408_v49 = vadd.f32 %v1407_v63, %v1406_v30  ;;  %v1413_v54 = vsel %vm3313_vm0, %v3617_v34, 0.0  ;;  %v1432_v62 = vsel %vm3313_vm0, %v3618_v60, 0.0  ;;  %v3623_v30 = vld [vmem:[#allocation80_spill] sm:$0xff] }
 0x1e2   :  { %v1387_v56 = vadd.f32 %v1386_v59, %v1385_v7  ;;  %v1415_v29 = vsel %vm3313_vm0, %v3619_v31, 0.0  ;;  %v1417_v36 = vsel %vm3313_vm0, %v3620_v17, 0.0  ;;  %v1431_v47 = vadd.f32 %v1430_v15, %v1429_v50  ;;  %v3628_v50 = vld [vmem:[#allocation108_spill] sm:$0xff] }
 0x1e3   :  { %v1410_v61 = vadd.f32 %v1409_v33, %v1408_v49  ;;  %v1419_v32 = vsel %vm3313_vm0, %v3621_v37, 0.0  ;;  %v1421_v42 = vsel %vm3313_vm0, %v2583_v2, 0.0  ;;  %v1434_v0 = vsel %vm3313_vm0, %v3622_v40, 0.0  ;;  %v690_v49 = vld.sshfl [vmem:[#allocation1 + $0x20] sm:$0xff pattern:$0x75316420] }
 0x1e4   :  { %v3132_v39 = vadd.f32 %v3029_v3, %v1337_v23  ;;  %v1389_v59 = vadd.f32 %v1388_v55, %v1387_v56  ;;  %v1423_v27 = vsel %vm3313_vm0, %v2698_v43, 0.0  ;;  %v1433_v8 = vadd.f32 %v1432_v62, %v1431_v47  ;;  %v3625_v55 = vld [vmem:[#allocation14_spill] sm:$0xff]  ;;  %v3626_v43 = vld [vmem:[#allocation27_spill] sm:$0xff]  ;;  %v3630_v60 = vld [vmem:[#allocation136_spill] sm:$0xff] }
 0x1e5   :  { %v1366_v63 = vadd.f32 %v3060_v4, %v1364_v28  ;;  %v1412_v41 = vadd.f32 %v1411_v1, %v1410_v61  ;;  %v1425_v33 = vsel %vm3313_vm0, %v689_v20, 0.0  ;;  %v1436_v44 = vsel %vm3313_vm0, %v3623_v30, 0.0  ;;  %v3627_v4 = vld [vmem:[#allocation40_spill] sm:$0xff]  ;;  %v3631_v20 = vld [vmem:[#allocation53_spill] sm:$0xff]  ;;  %v3632_v47 = vld [vmem:[#allocation150_spill] sm:$0xff] }
 0x1e6   :  { %v1391_v2 = vadd.f32 %v1390_v13, %v1389_v59  ;;  %v1435_v22 = vadd.f32 %v1434_v0, %v1433_v8  ;;  %v1438_v52 = vsel %vm3313_vm0, %v3624_v26, 0.0  ;;  %v1457_v14 = vsel %vm1456_vm1, %v3625_v55, 0.0  ;;  %v3629_v13 = vld [vmem:[#allocation122_spill] sm:$0xff]  ;;  %v3633_v0 = vld [vmem:[#allocation164_spill] sm:$0xff]  ;;  %v3636_v26 = vld [vmem:[#allocation95_spill] sm:$0xff] }
 0x1e7   :  { %v1414_v3 = vadd.f32 %v1413_v54, %v1412_v41  ;;  %v1458_v23 = vsel %vm1456_vm1, %v3626_v43, 0.0  ;;  %v1460_v1 = vsel %vm1456_vm1, %v3627_v4, 0.0  ;;  %v1440_v10 = vsel %vm3313_vm0, %v3628_v50, 0.0  ;;  %v3641_v50 = vld [vmem:[#allocation165_spill] sm:$0xff] }
 0x1e8   :  { %v1437_v7 = vadd.f32 %v1436_v44, %v1435_v22  ;;  %v1442_v15 = vsel %vm3313_vm0, %v3629_v13, 0.0  ;;  %v1459_v28 = vadd.f32 %v1458_v23, %v1457_v14  ;;  %v1393_v34 = vadd.f32 %v1392_v6, %v1391_v2  ;;  %v3637_v14 = vld [vmem:[#allocation109_spill] sm:$0xff]  ;;  %v3638_v23 = vld [vmem:[#allocation123_spill] sm:$0xff]  ;;  %v3183_v13 = vpop.permute.xlu0 %1507 }
 0x1e9   :  { %v1416_v54 = vadd.f32 %v1415_v29, %v1414_v3  ;;  %v1444_v62 = vsel %vm3313_vm0, %v3630_v60, 0.0  ;;  %v1462_v56 = vsel %vm1456_vm1, %v3631_v20, 0.0  ;;  %v1368_v31 = vadd.f32 %v3065_v12, %v1366_v63  ;;  %v3634_v29 = vld [vmem:[#allocation67_spill] sm:$0xff] }
 0x1ea   :  { %v1439_v17 = vadd.f32 %v1438_v52, %v1437_v7  ;;  %v1446_v61 = vsel %vm3313_vm0, %v3632_v47, 0.0  ;;  %v1461_v37 = vadd.f32 %v1460_v1, %v1459_v28  ;;  %v1448_v59 = vsel %vm3313_vm0, %v3633_v0, 0.0  ;;  %v3639_v1 = vld [vmem:[#allocation137_spill] sm:$0xff] }
 0x1eb   :  { %v1418_v40 = vadd.f32 %v1417_v36, %v1416_v54  ;;  %v1450_v6 = vsel %vm3313_vm0, %v2585_v46, 0.0  ;;  %v1464_v8 = vsel %vm1456_vm1, %v3634_v29, 0.0  ;;  %v1452_v30 = vsel %vm3313_vm0, %v2736_v53, 0.0  ;;  %v3635_v36 = vld [vmem:[#allocation81_spill] sm:$0xff] }
 0x1ec   :  { %v1441_v41 = vadd.f32 %v1440_v10, %v1439_v17  ;;  %v1454_v12 = vsel %vm3313_vm0, %v690_v49, 0.0  ;;  %v1463_v63 = vadd.f32 %v1462_v56, %v1461_v37  ;;  %v1395_v44 = vadd.f32 %v3099_v19, %v1393_v34  ;;  %v691_v46 = vld.sshfl [vmem:[#allocation1 + $0x28] sm:$0xff pattern:$0x75316420] }
 0x1ed   :  { %v1420_v2 = vadd.f32 %v1419_v32, %v1418_v40  ;;  %v1466_v22 = vsel %vm1456_vm1, %v3635_v36, 0.0  ;;  %v1468_v52 = vsel %vm1456_vm1, %v3636_v26, 0.0  ;;  %v1470_v43 = vsel %vm1456_vm1, %v3637_v14, 0.0  ;;  %v3640_v32 = vld [vmem:[#allocation151_spill] sm:$0xff] }
 0x1ee   :  { %v1443_v3 = vadd.f32 %v1442_v15, %v1441_v41  ;;  %v1465_v55 = vadd.f32 %v1464_v8, %v1463_v63  ;;  %v1472_v53 = vsel %vm1456_vm1, %v3638_v23, 0.0  ;;  %v1474_v19 = vsel %vm1456_vm1, %v3639_v1, 0.0 }
 0x1ef   :  { %v1422_v4 = vadd.f32 %v1421_v42, %v1420_v2  ;;  %v1476_v7 = vsel %vm1456_vm1, %v3640_v32, 0.0  ;;  %v1478_v10 = vsel %vm1456_vm1, %v3641_v50, 0.0  ;;  %v1480_v49 = vsel %vm1456_vm1, %v2587_v57, 0.0 }
 0x1f0   :  { %v1445_v15 = vadd.f32 %v1444_v62, %v1443_v3  ;;  %v1467_v28 = vadd.f32 %v1466_v22, %v1465_v55  ;;  %v1482_v34 = vsel %vm1456_vm1, %v2738_v51, 0.0  ;;  %v3190_v54 = vsel %vm1456_vm1, %v691_v46, 0.0 }
 0x1f1   :  { %v1424_v42 = vadd.f32 %v1423_v27, %v1422_v4  ;;  %v1486_v60 = vmul.f32 0.06666667, %v2745_v24  ;;  %v1487_v20 = vmul.f32 0.06666667, %v2749_v18  ;;  %v1488_v47 = vmul.f32 0.06666667, %v2756_v21 }
 0x1f2   :  { %v1447_v56 = vadd.f32 %v1446_v61, %v1445_v15  ;;  %v1469_v17 = vadd.f32 %v1468_v52, %v1467_v28  ;;  %v1489_v62 = vmul.f32 0.06666667, %v2758_v58  ;;  %v1397_v37 = vadd.f32 %v3102_v5, %v1395_v44 }
 0x1f3   :  { %v1490_v57 = vmul.f32 0.06666667, %v2793_v45  ;;  %v1491_v51 = vmul.f32 0.06666667, %v2826_v38  ;;  %v1492_v27 = vmul.f32 0.06666667, %v2883_v48  ;;  %v1426_v40 = vadd.f32 %v1425_v33, %v1424_v42 }
 0x1f4   :  { %v1449_v0 = vadd.f32 %v1448_v59, %v1447_v56  ;;  %v1471_v29 = vadd.f32 %v1470_v43, %v1469_v17  ;;  %v1493_v24 = vmul.f32 0.06666667, %v2929_v16  ;;  %v1494_v18 = vmul.f32 0.06666667, %v2965_v9 }
 0x1f5   :  { %v1495_v61 = vmul.f32 0.06666667, %v2993_v35  ;;  %v1496_v21 = vmul.f32 0.06666667, %v3046_v25  ;;  %v1497_v5 = vmul.f32 0.06666667, %v3087_v11  ;;  %v1510_v48 = vmul.f32 %v3183_v13, %v1486_v60 }
 0x1f6   :  { %v1451_v58 = vadd.f32 %v1450_v6, %v1449_v0  ;;  %v1473_v8 = vadd.f32 %v1472_v53, %v1471_v29  ;;  %v1498_v45 = vmul.f32 0.06666667, %v3132_v39  ;;  %v1499_v38 = vmul.f32 0.06666667, %v1368_v31  ;;  %v1532_v39 = vpop.permute.xlu0 %1531 }
 0x1f7   :  { %v1500_v41 = vmul.f32 0.06666667, %v1397_v37  ;;  %v1511_v33 = vmul.f32 %v3183_v13, %v1487_v20  ;;  %v1501_v63 = vmul.f32 0.06666667, %v1426_v40  ;;  %v1512_v9 = vmul.f32 %v3183_v13, %v1488_v47 }
 0x1f8   :  { %v1453_v59 = vadd.f32 %v1452_v30, %v1451_v58  ;;  %v1475_v16 = vadd.f32 %v1474_v19, %v1473_v8  ;;  %v1513_v35 = vmul.f32 %v3183_v13, %v1489_v62  ;;  %v1514_v25 = vmul.f32 %v3183_v13, %v1490_v57 }
 0x1f9   :  { %v1515_v6 = vmul.f32 %v3183_v13, %v1491_v51  ;;  %v1516_v11 = vmul.f32 %v3183_v13, %v1492_v27  ;;  %v1517_v2 = vmul.f32 %v3183_v13, %v1493_v24  ;;  %v1518_v36 = vmul.f32 %v3183_v13, %v1494_v18 }
 0x1fa   :  { %v1455_v31 = vadd.f32 %v1454_v12, %v1453_v59  ;;  %v1477_v44 = vadd.f32 %v1476_v7, %v1475_v16  ;;  %v1519_v30 = vmul.f32 %v3183_v13, %v1495_v61  ;;  %v1520_v22 = vmul.f32 %v3183_v13, %v1496_v21 }
 0x1fb   :  { %v1521_v26 = vmul.f32 %v3183_v13, %v1497_v5  ;;  %v1522_v52 = vmul.f32 %v3183_v13, %v1498_v45  ;;  %v1523_v3 = vmul.f32 %v3183_v13, %v1499_v38  ;;  %v1524_v55 = vmul.f32 %v3183_v13, %v1500_v41 }
 0x1fc   :  { %v1479_v46 = vadd.f32 %v1478_v10, %v1477_v44  ;;  %v1525_v12 = vmul.f32 %v3183_v13, %v1501_v63  ;;  %v1502_v14 = vmul.f32 0.06666667, %v1455_v31  ;;  %v1534_v43 = vadd.f32 %v1532_v39, %v1510_v48 }
 0x1fd   :  { %v1535_v23 = vadd.f32 %v1532_v39, %v1511_v33  ;;  %v3222_v53 = vadd.f32 %v1532_v39, %v1512_v9  ;;  %v1537_v1 = vadd.f32 %v1532_v39, %v1513_v35  ;;  %v1538_v19 = vadd.f32 %v1532_v39, %v1514_v25 }
 0x1fe   :  { %v1481_v4 = vadd.f32 %v1480_v49, %v1479_v46  ;;  %v1539_v32 = vadd.f32 %v1532_v39, %v1515_v6  ;;  %v3224_v7 = vadd.f32 %v1532_v39, %v1516_v11  ;;  %v1541_v50 = vadd.f32 %v1532_v39, %v1517_v2 }
 0x1ff   :  { %v1542_v15 = vadd.f32 %v1532_v39, %v1518_v36  ;;  %v1543_v10 = vadd.f32 %v1532_v39, %v1519_v30  ;;  %v3226_v42 = vadd.f32 %v1532_v39, %v1520_v22  ;;  %v1545_v60 = vadd.f32 %v1532_v39, %v1521_v26 }
 0x200   :  { %v1483_v28 = vadd.f32 %v1482_v34, %v1481_v4  ;;  %v3228_v20 = vadd.f32 %v1532_v39, %v1522_v52  ;;  %v1526_v56 = vmul.f32 %v3183_v13, %v1502_v14  ;;  %v1547_v17 = vadd.f32 %v1532_v39, %v1523_v3 }
 0x201   :  { %v3231_v47 = vadd.f32 %v1532_v39, %v1524_v55  ;;  %v1549_v49 = vadd.f32 %v1532_v39, %v1525_v12  ;;  %vm1552_vm2 = vcmp.gt.f32.partialorder %v1534_v43, 0.0  ;;  %vm1553_vm3 = vcmp.gt.f32.partialorder %v1535_v23, 0.0 }
 0x202   :  { %v1485_v62 = vadd.f32 %v3190_v54, %v1483_v28  ;;  %vm1554_vm4 = vcmp.gt.f32.partialorder %v3222_v53, 0.0  ;;  %vm1555_vm5 = vcmp.gt.f32.partialorder %v1537_v1, 0.0  ;;  %vm1556_vm6 = vcmp.gt.f32.partialorder %v1538_v19, 0.0 }
 0x203   :  { %vm1557_vm7 = vcmp.gt.f32.partialorder %v1539_v32, 0.0  ;;  %vm1558_vm8 = vcmp.gt.f32.partialorder %v3224_v7, 0.0  ;;  %vm1559_vm9 = vcmp.gt.f32.partialorder %v1541_v50, 0.0  ;;  %vm1560_vm10 = vcmp.gt.f32.partialorder %v1542_v15, 0.0 }
 0x204   :  { %v1503_v34 = vmul.f32 0.06666667, %v1485_v62  ;;  %vm1561_vm11 = vcmp.gt.f32.partialorder %v1543_v10, 0.0  ;;  %vm1563_vm13 = vcmp.gt.f32.partialorder %v1545_v60, 0.0  ;;  %vm1565_vm14 = vcmp.gt.f32.partialorder %v1547_v17, 0.0 }
 0x205   :  { %vm1567_vm15 = vcmp.gt.f32.partialorder %v1549_v49, 0.0  ;;  %v1570_v37 = vmul.f32 0.2, %v1534_v43  ;;  %v1571_v57 = vmul.f32 0.2, %v1535_v23  ;;  %v1550_v21 = vadd.f32 %v1532_v39, %v1526_v56 }
 0x206   :  { %v1527_v54 = vmul.f32 %v3183_v13, %v1503_v34  ;;  %v1572_v51 = vmul.f32 0.2, %v3222_v53  ;;  %v1573_v27 = vmul.f32 0.2, %v1537_v1  ;;  %v1574_v40 = vmul.f32 0.2, %v1538_v19 }
 0x207   :  { %v1575_v0 = vmul.f32 0.2, %v1539_v32  ;;  %v1576_v24 = vmul.f32 0.2, %v3224_v7  ;;  %v1577_v18 = vmul.f32 0.2, %v1541_v50  ;;  %v1588_v41 = vsel %vm1552_vm2, %v1534_v43, %v1570_v37 }
 0x208   :  { %v1551_v29 = vadd.f32 %v1532_v39, %v1527_v54  ;;  %v1579_v61 = vmul.f32 0.2, %v1543_v10  ;;  %vm1564_vm0 = vcmp.gt.f32.partialorder %v3228_v20, 0.0  ;;  %v1578_v58 = vmul.f32 0.2, %v1542_v15 }
 0x209   :  { %v1581_v8 = vmul.f32 0.2, %v1545_v60  ;;  %v1583_v5 = vmul.f32 0.2, %v1547_v17  ;;  %vm1566_vm12 = vcmp.gt.f32.partialorder %v3231_v47, 0.0  ;;  %v1589_v59 = vsel %vm1553_vm3, %v1535_v23, %v1571_v57 }
 0x20a   :  { %v1580_v13 = vmul.f32 0.2, %v3226_v42  ;;  %v1582_v45 = vmul.f32 0.2, %v3228_v20  ;;  %v1585_v38 = vmul.f32 0.2, %v1549_v49  ;;  %v1591_v16 = vsel %vm1555_vm5, %v1537_v1, %v1573_v27 }
 0x20b   :  { %vm1569_vm1 = vcmp.gt.f32.partialorder %v1551_v29, 0.0  ;;  %v1584_v48 = vmul.f32 0.2, %v3231_v47  ;;  %v1587_v33 = vmul.f32 0.2, %v1551_v29  ;;  %v1593_v63 = vsel %vm1557_vm7, %v1539_v32, %v1575_v0 }
 0x20c   :  { %v1595_v9 = vsel %vm1559_vm9, %v1541_v50, %v1577_v18  ;;  %v1597_v35 = vsel %vm1561_vm11, %v1543_v10, %v1579_v61  ;;  %v1590_v25 = vsel %vm1554_vm4, %v3222_v53, %v1572_v51  ;;  %v1592_v6 = vsel %vm1556_vm6, %v1538_v19, %v1574_v40 }
 0x20d   :  { %v1599_v11 = vsel %vm1563_vm13, %v1545_v60, %v1581_v8  ;;  %v1601_v39 = vsel %vm1565_vm14, %v1547_v17, %v1583_v5  ;;  %v1594_v31 = vsel %vm1558_vm8, %v3224_v7, %v1576_v24  ;;  %v1596_v44 = vsel %vm1560_vm10, %v1542_v15, %v1578_v58 }
 0x20e   :  { %v1603_v2 = vsel %vm1567_vm15, %v1549_v49, %v1585_v38  ;;  %v1624_v36 = vrot.slane %v1589_v59, 4  ;;  %v1625_v30 = vrot.slane %v1591_v16, 4  ;;  %v1626_v22 = vrot.slane %v1593_v63, 4 }
 0x20f   :  { %v1627_v26 = vrot.slane %v1595_v9, 4  ;;  %v1628_v52 = vrot.slane %v1597_v35, 4  ;;  %vm3642_vm2 = vcmp.gt.f32.partialorder %v3226_v42, 0.0  ;;  %v1605_v3 = vsel %vm1569_vm1, %v1551_v29, %v1587_v33 }
 0x210   :  { %v1598_v46 = vsel %vm3642_vm2, %v3226_v42, %v1580_v13  ;;  %v1629_v55 = vrot.slane %v1599_v11, 4  ;;  %v1630_v12 = vrot.slane %v1601_v39, 4  ;;  %vm3643_vm3 = vcmask 1043456  }
 0x211   :  { %v1634_v14 = vsel %vm3643_vm3, %v1588_v41, %v1624_v36  ;;  %vm3644_vm4 = vmmov %vm3643_vm3  ;;  %v1586_v4 = vmul.f32 0.2, %v1550_v21  ;;  %v1631_v1 = vrot.slane %v1603_v2, 4  ;;  %vm1568_vm9 = vcmp.gt.f32.partialorder %v1550_v21, 0.0 }
 0x212   :  { %v1635_v43 = vsel %vm3644_vm4, %v1590_v25, %v1625_v30  ;;  %vm3645_vm5 = vmmov %vm3643_vm3  ;;  %1652 = vst [vmem:[%s3312_s3] sm:$0x77] %v1634_v14  ;;  %v1632_v7 = vrot.slane %v1605_v3, 4  ;;  %v1600_v50 = vsel %vm1564_vm0, %v3228_v20, %v1582_v45  ;;  %vm1660_vm10 = vcmask 227332  }
 0x213   :  { %v1636_v23 = vsel %vm3645_vm5, %v1592_v6, %v1626_v22  ;;  %vm3646_vm6 = vmmov %vm3643_vm3  ;;  %1653 = vst [vmem:[%s3312_s3 + $0x8] sm:$0x77] %v1635_v43  ;;  %v1602_v15 = vsel %vm1566_vm12, %v3231_v47, %v1584_v48  ;;  %v1604_v28 = vsel %vm1568_vm9, %v1550_v21, %v1586_v4  ;;  %vm3652_vm12 = vcmask 1042432  }
 0x214   :  { %v1637_v53 = vsel %vm3646_vm6, %v1594_v31, %v1627_v26  ;;  %vm3647_vm7 = vmmov %vm3643_vm3  ;;  %1654 = vst [vmem:[%s3312_s3 + $0x10] sm:$0x77] %v1636_v23 }
 0x215   :  { %v1638_v19 = vsel %vm3647_vm7, %v1596_v44, %v1628_v52  ;;  %vm3648_vm8 = vmmov %vm3643_vm3  ;;  %1655 = vst [vmem:[%s3312_s3 + $0x18] sm:$0x77] %v1637_v53 }
 0x216   :  { %v1639_v32 = vsel %vm3648_vm8, %v1598_v46, %v1629_v55  ;;  %vm3649_vm11 = vmmov %vm3643_vm3  ;;  %1656 = vst [vmem:[%s3312_s3 + $0x20] sm:$0x77] %v1638_v19 }
 0x217   :  { %v1640_v10 = vsel %vm3649_vm11, %v1600_v50, %v1630_v12  ;;  %vm3650_vm13 = vmmov %vm3643_vm3  ;;  %1657 = vst [vmem:[%s3312_s3 + $0x28] sm:$0x77] %v1639_v32 }
 0x218   :  { %v1641_v42 = vsel %vm3650_vm13, %v1602_v15, %v1631_v1  ;;  %vm3651_vm0 = vmmov %vm3643_vm3  ;;  %1658 = vst [vmem:[%s3312_s3 + $0x30] sm:$0x77] %v1640_v10 }
 0x219   :  { %v1642_v60 = vsel %vm3651_vm0, %v1604_v28, %v1632_v7  ;;  %vm1661_vm14 = vmor %vm1660_vm10, %vm3652_vm12  ;;  %1659 = vst [vmem:[%s3312_s3 + $0x38] sm:$0x77] %v1641_v42 }
 0x21a   :  { %1662 = vst.msk [vmem:[%s3312_s3 + $0x40] sm:$0x77] %vm1661_vm14, %v1642_v60 }

// kernel: feature_extractor_forward.18
= control target key start
LH: loop header
LB: loop body
LE: loop exit
PB: predicated region body
PF: predicated region fallthrough
CT: control target
= control target key end

     0   :  { %vm60_vm0 = vcmask 1045504   ;;  %v198_v2 = vmov 0   ;;  %vm56_vm1 = vcmask 441344   ;;  %vm180_vm2 = vcmask 61440   ;;  %s355_s0 = inlined_call_operand.vmem [shape: f32[54,520], index: 0, kind: input, shape index: {}]   ;;  %s356_s1 = inlined_call_operand.vmem [shape: f32[5,54], index: 1, kind: input, shape index: {}]   ;;  %s357_s2 = inlined_call_operand.vmem [shape: f32[5,1], index: 2, kind: input, shape index: {}]   ;;  %s358_s3 = inlined_call_operand.vmem [shape: f32[5,520], index: 3, kind: output, shape index: {}]  }
   0x1   :  { %v45_v0 = vld [vmem:[%s355_s0 + $0xf0] sm:$0x3f]  ;;  %v40_v1 = vld [vmem:[%s355_s0 + $0xc8] sm:$0xff]  ;;  %197 = vset.pattern.permute.xlu0 %v198_v2  ;;  %v47_v3 = vld [vmem:[%s355_s0 + $0x100] sm:$0x3f] }
   0x2   :  { %186 = vmatpush.msk.msra.mxu0 %vm60_vm0, %v45_v0  ;;  %v48_v4 = vld [vmem:[%s355_s0 + $0x108] sm:$0x3f]  ;;  %v35_v5 = vld [vmem:[%s355_s0 + $0xa0] sm:$0xff]  ;;  %190 = vmatpush.msk.msra.mxu2 %vm60_vm0, %v47_v3  ;;  %v42_v6 = vld [vmem:[%s355_s0 + $0xd8] sm:$0xff] }
   0x3   :  { %192 = vmatpush.msk.msra.mxu3 %vm60_vm0, %v48_v4  ;;  %v43_v7 = vld [vmem:[%s355_s0 + $0xe0] sm:$0xff]  ;;  %v37_v8 = vld [vmem:[%s355_s0 + $0xb0] sm:$0xff]  ;;  %v38_v9 = vld [vmem:[%s355_s0 + $0xb8] sm:$0xff] }
   0x4   :  { %86 = vmatpush.msra.mxu0 %v40_v1  ;;  %v30_v10 = vld [vmem:[%s355_s0 + $0x78] sm:$0xff]  ;;  %126 = vmatpush.msra.mxu2 %v42_v6  ;;  %v32_v12 = vld [vmem:[%s355_s0 + $0x88] sm:$0xff]  ;;  %v33_v13 = vld [vmem:[%s355_s0 + $0x90] sm:$0xff] }
   0x5   :  { %146 = vmatpush.msra.mxu3 %v43_v7  ;;  %v46_v11 = vld [vmem:[%s355_s0 + $0xf8] sm:$0x3f]  ;;  %v41_v14 = vld [vmem:[%s355_s0 + $0xd0] sm:$0xff]  ;;  %v27_v16 = vld [vmem:[%s355_s0 + $0x60] sm:$0xff] }
   0x6   :  { %87 = vmatpush.msra.mxu0 %v35_v5  ;;  %188 = vmatpush.msk.msra.mxu1 %vm60_vm0, %v46_v11  ;;  %v25_v15 = vld [vmem:[%s355_s0 + $0x50] sm:$0xff]  ;;  %v28_v17 = vld [vmem:[%s355_s0 + $0x68] sm:$0xff]  ;;  %v31_v20 = vld [vmem:[%s355_s0 + $0x80] sm:$0xff] }
   0x7   :  { %127 = vmatpush.msra.mxu2 %v37_v8  ;;  %147 = vmatpush.msra.mxu3 %v38_v9  ;;  %v36_v18 = vld [vmem:[%s355_s0 + $0xa8] sm:$0xff]  ;;  %v22_v21 = vld [vmem:[%s355_s0 + $0x38] sm:$0xff]  ;;  %v23_v22 = vld [vmem:[%s355_s0 + $0x40] sm:$0xff] }
   0x8   :  { %88 = vmatpush.msra.mxu0 %v30_v10  ;;  %106 = vmatpush.msra.mxu1 %v41_v14  ;;  %v20_v19 = vld [vmem:[%s355_s0 + $0x28] sm:$0xff]  ;;  %v15_v23 = vld [vmem:[%s355_s0] sm:$0xff]  ;;  %v26_v24 = vld [vmem:[%s355_s0 + $0x58] sm:$0xff] }
   0x9   :  { %128 = vmatpush.msra.mxu2 %v32_v12  ;;  %148 = vmatpush.msra.mxu3 %v33_v13  ;;  %v49_v25 = vld [vmem:[%s355_s0 + $0x110] sm:$0x3f]  ;;  %v14_v27 = vld [vmem:[%s356_s1] sm:$0x1f]  ;;  %v18_v28 = vld [vmem:[%s355_s0 + $0x18] sm:$0xff] }
   0xa   :  { %89 = vmatpush.msra.mxu0 %v25_v15  ;;  %107 = vmatpush.msra.mxu1 %v36_v18  ;;  %v17_v26 = vld [vmem:[%s355_s0 + $0x10] sm:$0xff]  ;;  %v44_v29 = vld [vmem:[%s355_s0 + $0xe8] sm:$0xff]  ;;  %v39_v31 = vld [vmem:[%s355_s0 + $0xc0] sm:$0xff] }
   0xb   :  { %129 = vmatpush.msra.mxu2 %v27_v16  ;;  %149 = vmatpush.msra.mxu3 %v28_v17  ;;  %v21_v30 = vld [vmem:[%s355_s0 + $0x30] sm:$0xff]  ;;  %v50_v32 = vld [vmem:[%s357_s2] sm:$0x1f]  ;;  %v16_v33 = vld [vmem:[%s355_s0 + $0x8] sm:$0xff] }
   0xc   :  { %90 = vmatpush.msra.mxu0 %v20_v19  ;;  %108 = vmatpush.msra.mxu1 %v31_v20  ;;  %v34_v34 = vld [vmem:[%s355_s0 + $0x98] sm:$0xff]  ;;  %v29_v35 = vld [vmem:[%s355_s0 + $0x70] sm:$0xff]  ;;  %v24_v36 = vld [vmem:[%s355_s0 + $0x48] sm:$0xff] }
   0xd   :  { %130 = vmatpush.msra.mxu2 %v22_v21  ;;  %150 = vmatpush.msra.mxu3 %v23_v22  ;;  %v19_v37 = vld [vmem:[%s355_s0 + $0x20] sm:$0xff] }
   0xe   :  { %91 = vmatpush.msra.mxu0 %v15_v23  ;;  %109 = vmatpush.msra.mxu1 %v26_v24 }
   0xf   :  { %131 = vmatpush.msra.mxu2 %v17_v26  ;;  %187 = vmatmul.msk.f32.vlgmr.msra.gmra.mxu0 %vm56_vm1, %v14_v27 }
  0x10   :  { %194 = vmatpush.msk.msrb.mxu0 %vm60_vm0, %v49_v25  ;;  %151 = vmatpush.msra.mxu3 %v18_v28 }
  0x11   :  { %191 = vmatmul.msk.f32.vlgmr.msra.gmra.mxu2 %vm56_vm1, %v14_v27  ;;  %193 = vmatmul.msk.f32.vlgmr.msra.gmra.mxu3 %vm56_vm1, %v14_v27 }
  0x12   :  { %166 = vmatpush.msrb.mxu0 %v44_v29  ;;  %110 = vmatpush.msra.mxu1 %v21_v30 }
  0x13   :  { %53 = vperm.xlu0 %197, %v50_v32  }
  0x14   :  { %167 = vmatpush.msrb.mxu0 %v39_v31  ;;  %111 = vmatpush.msra.mxu1 %v16_v33 }
  0x15   :  { %189 = vmatmul.msk.f32.vlgmr.msra.gmra.mxu1 %vm56_vm1, %v14_v27 }
  0x16   :  { %168 = vmatpush.msrb.mxu0 %v34_v34 }
  0x18   :  { %169 = vmatpush.msrb.mxu0 %v29_v35 }
  0x1a   :  { %170 = vmatpush.msrb.mxu0 %v24_v36 }
  0x1c   :  { %171 = vmatpush.msrb.mxu0 %v19_v37 }
  0x1d   :  { %195 = vmatmul.msk.f32.vlgmr.msrb.gmra.mxu0 %vm56_vm1, %v14_v27 }
  0x85   :  { %v54_v38 = vpop.permute.xlu0 %53 }
  0x8c   :  { %v93_v39 = vpop.f32.mrf.mxu0 }
  0x8d   :  { %v94_v40 = vadd.f32 %v93_v39, %v54_v38 }
  0x8f   :  { %176 = vst [vmem:[%s358_s3] sm:$0x1f] %v94_v40 }
  0x92   :  { %v113_v41 = vpop.f32.mrf.mxu1 }
  0x93   :  { %v114_v42 = vadd.f32 %v113_v41, %v54_v38 }
  0x94   :  { %v133_v43 = vpop.f32.mrf.mxu2  ;;  %v153_v45 = vpop.f32.mrf.mxu3 }
  0x95   :  { %177 = vst [vmem:[%s358_s3 + $0x8] sm:$0x1f] %v114_v42  ;;  %v134_v44 = vadd.f32 %v133_v43, %v54_v38  ;;  %v154_v46 = vadd.f32 %v153_v45, %v54_v38 }
  0x97   :  { %178 = vst [vmem:[%s358_s3 + $0x10] sm:$0x1f] %v134_v44 }
  0x98   :  { %179 = vst [vmem:[%s358_s3 + $0x18] sm:$0x1f] %v154_v46 }
  0x9a   :  { %v173_v47 = vpop.f32.mrf.mxu0 }
  0x9b   :  { %v174_v48 = vadd.f32 %v173_v47, %v54_v38 }
  0x9d   :  { %181 = vst.msk [vmem:[%s358_s3 + $0x20] sm:$0x1f] %vm180_vm2, %v174_v48 }

// kernel: feature_extractor_forward.19
= control target key start
LH: loop header
LB: loop body
LE: loop exit
PB: predicated region body
PF: predicated region fallthrough
CT: control target
= control target key end

     0   :  { %vm17_vm0 = vcmask 782336   ;;  %s94_s0 = inlined_call_operand.vmem [shape: f32[9,5,96], index: 0, kind: input, shape index: {}]   ;;  %s95_s1 = inlined_call_operand.vmem [shape: f32[5,96], index: 1, kind: output, shape index: {}]  }
   0x1   :  { %v8_v0 = vld [vmem:[%s94_s0] sm:$0x1f]  ;;  %v9_v1 = vld [vmem:[%s94_s0 + $0x8] sm:$0x1f]  ;;  %v10_v2 = vld [vmem:[%s94_s0 + $0x10] sm:$0x1f] }
   0x2   :  { %v11_v3 = vld [vmem:[%s94_s0 + $0x18] sm:$0x1f]  ;;  %v18_v4 = vsel %vm17_vm0, %v8_v0, 0.0  ;;  %v19_v5 = vsel %vm17_vm0, %v9_v1, 0.0  ;;  %v21_v6 = vsel %vm17_vm0, %v10_v2, 0.0 }
   0x3   :  { %v12_v7 = vld [vmem:[%s94_s0 + $0x20] sm:$0x1f]  ;;  %v20_v8 = vadd.f32 %v19_v5, %v18_v4  ;;  %v23_v9 = vsel %vm17_vm0, %v11_v3, 0.0  ;;  %v13_v10 = vld [vmem:[%s94_s0 + $0x28] sm:$0x1f] }
   0x4   :  { %v25_v12 = vsel %vm17_vm0, %v12_v7, 0.0  ;;  %v14_v13 = vld [vmem:[%s94_s0 + $0x30] sm:$0x1f]  ;;  %v27_v15 = vsel %vm17_vm0, %v13_v10, 0.0  ;;  %v15_v16 = vld [vmem:[%s94_s0 + $0x38] sm:$0x1f] }
   0x5   :  { %v22_v11 = vadd.f32 %v21_v6, %v20_v8  ;;  %v29_v18 = vsel %vm17_vm0, %v14_v13, 0.0  ;;  %v16_v19 = vld [vmem:[%s94_s0 + $0x40] sm:$0x1f]  ;;  %v31_v21 = vsel %vm17_vm0, %v15_v16, 0.0 }
   0x6   :  { %v33_v23 = vsel %vm17_vm0, %v16_v19, 0.0 }
   0x7   :  { %v24_v14 = vadd.f32 %v23_v9, %v22_v11 }
   0x9   :  { %v26_v17 = vadd.f32 %v25_v12, %v24_v14 }
   0xb   :  { %v28_v20 = vadd.f32 %v27_v15, %v26_v17 }
   0xd   :  { %v30_v22 = vadd.f32 %v29_v18, %v28_v20 }
   0xf   :  { %v32_v24 = vadd.f32 %v31_v21, %v30_v22 }
  0x11   :  { %v34_v25 = vadd.f32 %v33_v23, %v32_v24 }
  0x13   :  { %v35_v26 = vmul.f32 0.11111111, %v34_v25 }
  0x15   :  { %vm36_vm1 = vcmp.gt.f32.partialorder %v35_v26, 0.0  ;;  %v37_v27 = vmul.f32 0.2, %v35_v26 }
  0x17   :  { %v38_v28 = vsel %vm36_vm1, %v35_v26, %v37_v27 }
  0x18   :  { %39 = vst.msk [vmem:[%s95_s1] sm:$0x1f] %vm17_vm0, %v38_v28 }

// kernel: feature_extractor_forward.20
= control target key start
LH: loop header
LB: loop body
LE: loop exit
PB: predicated region body
PF: predicated region fallthrough
CT: control target
= control target key end

     0   :  { %vm31_vm0 = vcmask 1044480   ;;  %v65_v2 = vmov 0   ;;  %vm27_vm1 = vcmask 367616   ;;  %vm55_vm2 = vcmask 785408   ;;  %s113_s0 = inlined_call_operand.vmem [shape: f32[45,96], index: 0, kind: input, shape index: {}]   ;;  %s114_s2 = inlined_call_operand.vmem [shape: f32[8,1], index: 2, kind: input, shape index: {}]   ;;  %s115_s1 = inlined_call_operand.vmem [shape: f32[8,45], index: 1, kind: input, shape index: {}]   ;;  %s116_s3 = inlined_call_operand.vmem [shape: f32[8,96], index: 3, kind: output, shape index: {}]  }
   0x1   :  { %v20_v0 = vld [vmem:[%s113_s0 + $0x28] sm:$0x1f]  ;;  %v19_v1 = vld [vmem:[%s113_s0 + $0x20] sm:$0xff]  ;;  %64 = vset.pattern.permute.xlu0 %v65_v2  ;;  %v18_v3 = vld [vmem:[%s113_s0 + $0x18] sm:$0xff] }
   0x2   :  { %61 = vmatpush.msk.msra.mxu0 %vm31_vm0, %v20_v0  ;;  %v21_v4 = vld [vmem:[%s114_s2] sm:$0xff]  ;;  %v17_v5 = vld [vmem:[%s113_s0 + $0x10] sm:$0xff]  ;;  %v16_v6 = vld [vmem:[%s113_s0 + $0x8] sm:$0xff] }
   0x3   :  { %24 = vperm.xlu0 %64, %v21_v4   ;;  %v15_v7 = vld [vmem:[%s113_s0] sm:$0xff] }
   0x4   :  { %46 = vmatpush.msra.mxu0 %v19_v1  ;;  %v14_v8 = vld [vmem:[%s115_s1] sm:$0xff] }
   0x6   :  { %47 = vmatpush.msra.mxu0 %v18_v3 }
   0x8   :  { %48 = vmatpush.msra.mxu0 %v17_v5 }
   0xa   :  { %49 = vmatpush.msra.mxu0 %v16_v6 }
   0xc   :  { %50 = vmatpush.msra.mxu0 %v15_v7 }
   0xd   :  { %62 = vmatmul.msk.f32.vlgmr.msra.gmra.mxu0 %vm27_vm1, %v14_v8 }
  0x75   :  { %v25_v9 = vpop.permute.xlu0 %24 }
  0x8a   :  { %v52_v10 = vpop.f32.mrf.mxu0 }
  0x8b   :  { %v53_v11 = vadd.f32 %v52_v10, %v25_v9 }
  0x8d   :  { %56 = vst.msk [vmem:[%s116_s3] sm:$0xff] %vm55_vm2, %v53_v11 }

// kernel: feature_extractor_forward.21
= control target key start
LH: loop header
LB: loop body
LE: loop exit
PB: predicated region body
PF: predicated region fallthrough
CT: control target
= control target key end

     0   :  { %v87_v2 = vmov 0   ;;  %vm37_vm0 = vcmask 588800   ;;  %vm67_vm1 = vcmask 785408   ;;  %s153_s0 = inlined_call_operand.vmem [shape: f32[72,96], index: 0, kind: input, shape index: {}]   ;;  %s154_s2 = inlined_call_operand.vmem [shape: f32[16,1], index: 2, kind: input, shape index: {}]   ;;  %s155_s1 = inlined_call_operand.vmem [shape: f32[16,72], index: 1, kind: input, shape index: {}]   ;;  %s156_s3 = inlined_call_operand.vmem [shape: f32[16,96], index: 3, kind: output, shape index: {}]  }
   0x1   :  { %v24_v0 = vld [vmem:[%s153_s0 + $0x40] sm:$0xff]  ;;  %v23_v1 = vld [vmem:[%s153_s0 + $0x38] sm:$0xff]  ;;  %86 = vset.pattern.permute.xlu0 %v87_v2  ;;  %v22_v3 = vld [vmem:[%s153_s0 + $0x30] sm:$0xff] }
   0x2   :  { %51 = vmatpush.msra.mxu0 %v24_v0  ;;  %76 = vmatpush.msra.mxu1 %v24_v0  ;;  %v25_v4 = vld [vmem:[%s154_s2] sm:$0xff]  ;;  %v21_v5 = vld [vmem:[%s153_s0 + $0x28] sm:$0xff]  ;;  %v19_v7 = vld [vmem:[%s153_s0 + $0x18] sm:$0xff] }
   0x3   :  { %29 = vperm.xlu0 %86, %v25_v4   ;;  %v20_v6 = vld [vmem:[%s153_s0 + $0x20] sm:$0xff]  ;;  %v26_v8 = vld [vmem:[%s154_s2 + $0x8] sm:$0xff]  ;;  %v18_v9 = vld [vmem:[%s153_s0 + $0x10] sm:$0xff] }
   0x4   :  { %52 = vmatpush.msra.mxu0 %v23_v1  ;;  %77 = vmatpush.msra.mxu1 %v23_v1  ;;  %v17_v10 = vld [vmem:[%s153_s0 + $0x8] sm:$0xff]  ;;  %v16_v11 = vld [vmem:[%s153_s0] sm:$0xff] }
   0x5   :  { %v14_v12 = vld [vmem:[%s155_s1] sm:$0xff]  ;;  %v15_v13 = vld [vmem:[%s155_s1 + $0x8] sm:$0xff] }
   0x6   :  { %53 = vmatpush.msra.mxu0 %v22_v3  ;;  %78 = vmatpush.msra.mxu1 %v22_v3 }
   0x8   :  { %54 = vmatpush.msra.mxu0 %v21_v5  ;;  %79 = vmatpush.msra.mxu1 %v21_v5 }
   0xa   :  { %55 = vmatpush.msra.mxu0 %v20_v6  ;;  %80 = vmatpush.msra.mxu1 %v20_v6 }
   0xb   :  { %34 = vperm.xlu0 %86, %v26_v8  }
   0xc   :  { %56 = vmatpush.msra.mxu0 %v19_v7  ;;  %81 = vmatpush.msra.mxu1 %v19_v7 }
   0xe   :  { %57 = vmatpush.msra.mxu0 %v18_v9  ;;  %82 = vmatpush.msra.mxu1 %v18_v9 }
  0x10   :  { %58 = vmatpush.msra.mxu0 %v17_v10  ;;  %83 = vmatpush.msra.mxu1 %v17_v10 }
  0x12   :  { %59 = vmatpush.msra.mxu0 %v16_v11  ;;  %84 = vmatpush.msra.mxu1 %v16_v11 }
  0x13   :  { %74 = vmatmul.msk.f32.vlgmr.msra.gmra.mxu0 %vm37_vm0, %v14_v12  ;;  %75 = vmatmul.msk.f32.vlgmr.msra.gmra.mxu1 %vm37_vm0, %v15_v13 }
  0x75   :  { %v30_v14 = vpop.permute.xlu0 %29 }
  0x7d   :  { %v35_v15 = vpop.permute.xlu0 %34 }
  0x90   :  { %v61_v16 = vpop.f32.mrf.mxu0  ;;  %v64_v17 = vpop.f32.mrf.mxu1 }
  0x91   :  { %v62_v18 = vadd.f32 %v61_v16, %v30_v14  ;;  %v65_v19 = vadd.f32 %v64_v17, %v35_v15 }
  0x93   :  { %68 = vst.msk [vmem:[%s156_s3] sm:$0xff] %vm67_vm1, %v62_v18 }
  0x94   :  { %69 = vst.msk [vmem:[%s156_s3 + $0x8] sm:$0xff] %vm67_vm1, %v65_v19 }

// kernel: feature_extractor_forward.22
= control target key start
LH: loop header
LB: loop body
LE: loop exit
PB: predicated region body
PF: predicated region fallthrough
CT: control target
= control target key end

     0   :  { %v183_v3 = vmov 0   ;;  %vm64_vm0 = vcmask 130048   ;;  %vm135_vm1 = vcmask 785408   ;;  %s314_s0 = inlined_call_operand.vmem [shape: f32[144,96], index: 0, kind: input, shape index: {}]   ;;  %s315_s1 = inlined_call_operand.vmem [shape: f32[32,144], index: 1, kind: input, shape index: {}]   ;;  %s316_s2 = inlined_call_operand.vmem [shape: f32[32,1], index: 2, kind: input, shape index: {}]   ;;  %s317_s3 = inlined_call_operand.vmem [shape: f32[32,96], index: 3, kind: output, shape index: {}]  }
   0x1   :  { %v37_v0 = vld [vmem:[%s314_s0 + $0x78] sm:$0xff]  ;;  %v36_v1 = vld [vmem:[%s314_s0 + $0x70] sm:$0xff]  ;;  %v35_v2 = vld [vmem:[%s314_s0 + $0x68] sm:$0xff]  ;;  %182 = vset.pattern.permute.xlu1 %v183_v3  ;;  %181 = vset.pattern.permute.xlu0 %v183_v3 }
   0x2   :  { %77 = vmatpush.msra.mxu0 %v37_v0  ;;  %148 = vmatpush.msra.mxu2 %v37_v0  ;;  %v39_v4 = vld [vmem:[%s314_s0 + $0x88] sm:$0xff]  ;;  %v34_v5 = vld [vmem:[%s314_s0 + $0x60] sm:$0xff]  ;;  %v33_v8 = vld [vmem:[%s314_s0 + $0x58] sm:$0xff] }
   0x3   :  { %149 = vmatpush.msra.mxu3 %v37_v0  ;;  %120 = vmatpush.msra.mxu1 %v39_v4  ;;  %v38_v6 = vld [vmem:[%s314_s0 + $0x80] sm:$0xff]  ;;  %v15_v7 = vld [vmem:[%s315_s1 + $0x8] sm:$0xff]  ;;  %v32_v9 = vld [vmem:[%s314_s0 + $0x50] sm:$0xff] }
   0x4   :  { %78 = vmatpush.msra.mxu0 %v36_v1  ;;  %150 = vmatpush.msra.mxu2 %v36_v1  ;;  %v42_v10 = vld [vmem:[%s316_s2 + $0x10] sm:$0xff]  ;;  %v31_v11 = vld [vmem:[%s314_s0 + $0x48] sm:$0xff]  ;;  %v40_v12 = vld [vmem:[%s316_s2] sm:$0xff] }
   0x5   :  { %151 = vmatpush.msra.mxu3 %v36_v1  ;;  %121 = vmatpush.msra.mxu1 %v38_v6  ;;  %v30_v13 = vld [vmem:[%s314_s0 + $0x40] sm:$0xff]  ;;  %v17_v14 = vld [vmem:[%s315_s1 + $0x18] sm:$0xff]  ;;  %v28_v16 = vld [vmem:[%s314_s0 + $0x30] sm:$0xff] }
   0x6   :  { %79 = vmatpush.msra.mxu0 %v35_v2  ;;  %152 = vmatpush.msra.mxu2 %v35_v2  ;;  %v29_v15 = vld [vmem:[%s314_s0 + $0x38] sm:$0xff]  ;;  %v27_v18 = vld [vmem:[%s314_s0 + $0x28] sm:$0xff]  ;;  %v26_v20 = vld [vmem:[%s314_s0 + $0x20] sm:$0xff] }
   0x7   :  { %153 = vmatpush.msra.mxu3 %v35_v2  ;;  %144 = vmatmul.msk.f32.vlgmr.msra.gmra.mxu1 %vm64_vm0, %v15_v7  ;;  %v43_v17 = vld [vmem:[%s316_s2 + $0x18] sm:$0xff]  ;;  %v41_v19 = vld [vmem:[%s316_s2 + $0x8] sm:$0xff]  ;;  %v24_v23 = vld [vmem:[%s314_s0 + $0x10] sm:$0xff] }
   0x8   :  { %80 = vmatpush.msra.mxu0 %v34_v5  ;;  %154 = vmatpush.msra.mxu2 %v34_v5  ;;  %v19_v21 = vld [vmem:[%s315_s1 + $0x28] sm:$0xff]  ;;  %v25_v22 = vld [vmem:[%s314_s0 + $0x18] sm:$0xff]  ;;  %v22_v25 = vld [vmem:[%s314_s0] sm:$0xff] }
   0x9   :  { %155 = vmatpush.msra.mxu3 %v34_v5  ;;  %56 = vperm.xlu1 %182, %v42_v10   ;;  %v23_v24 = vld [vmem:[%s314_s0 + $0x8] sm:$0xff]  ;;  %v14_v26 = vld [vmem:[%s315_s1] sm:$0xff]  ;;  %v16_v27 = vld [vmem:[%s315_s1 + $0x10] sm:$0xff] }
   0xa   :  { %81 = vmatpush.msra.mxu0 %v33_v8  ;;  %156 = vmatpush.msra.mxu2 %v33_v8  ;;  %v18_v28 = vld [vmem:[%s315_s1 + $0x20] sm:$0xff]  ;;  %v21_v29 = vld [vmem:[%s315_s1 + $0x38] sm:$0xff]  ;;  %v20_v30 = vld [vmem:[%s315_s1 + $0x30] sm:$0xff] }
   0xb   :  { %157 = vmatpush.msra.mxu3 %v33_v8  ;;  %46 = vperm.xlu0 %181, %v40_v12  }
   0xc   :  { %82 = vmatpush.msra.mxu0 %v32_v9  ;;  %158 = vmatpush.msra.mxu2 %v32_v9 }
   0xd   :  { %159 = vmatpush.msra.mxu3 %v32_v9 }
   0xe   :  { %83 = vmatpush.msra.mxu0 %v31_v11  ;;  %160 = vmatpush.msra.mxu2 %v31_v11 }
   0xf   :  { %161 = vmatpush.msra.mxu3 %v31_v11  ;;  %145 = vmatmul.msk.f32.gmra.mxu1 %vm64_vm0, %v17_v14 }
  0x10   :  { %84 = vmatpush.msra.mxu0 %v30_v13  ;;  %162 = vmatpush.msra.mxu2 %v30_v13 }
  0x11   :  { %163 = vmatpush.msra.mxu3 %v30_v13  ;;  %61 = vperm.xlu1 %182, %v43_v17  }
  0x12   :  { %85 = vmatpush.msra.mxu0 %v29_v15  ;;  %164 = vmatpush.msra.mxu2 %v29_v15 }
  0x13   :  { %165 = vmatpush.msra.mxu3 %v29_v15  ;;  %51 = vperm.xlu0 %181, %v41_v19  }
  0x14   :  { %86 = vmatpush.msra.mxu0 %v28_v16  ;;  %166 = vmatpush.msra.mxu2 %v28_v16 }
  0x15   :  { %167 = vmatpush.msra.mxu3 %v28_v16 }
  0x16   :  { %87 = vmatpush.msra.mxu0 %v27_v18  ;;  %168 = vmatpush.msra.mxu2 %v27_v18 }
  0x17   :  { %169 = vmatpush.msra.mxu3 %v27_v18  ;;  %146 = vmatmul.msk.f32.gmra.mxu1 %vm64_vm0, %v19_v21 }
  0x18   :  { %88 = vmatpush.msra.mxu0 %v26_v20  ;;  %170 = vmatpush.msra.mxu2 %v26_v20 }
  0x19   :  { %171 = vmatpush.msra.mxu3 %v26_v20 }
  0x1a   :  { %89 = vmatpush.msra.mxu0 %v25_v22  ;;  %172 = vmatpush.msra.mxu2 %v25_v22 }
  0x1b   :  { %173 = vmatpush.msra.mxu3 %v25_v22 }
  0x1c   :  { %90 = vmatpush.msra.mxu0 %v24_v23  ;;  %174 = vmatpush.msra.mxu2 %v24_v23 }
  0x1d   :  { %175 = vmatpush.msra.mxu3 %v24_v23 }
  0x1e   :  { %91 = vmatpush.msra.mxu0 %v23_v24  ;;  %176 = vmatpush.msra.mxu2 %v23_v24 }
  0x1f   :  { %177 = vmatpush.msra.mxu3 %v23_v24  ;;  %147 = vmatmul.msk.f32.gmra.mxu1 %vm64_vm0, %v21_v29 }
  0x20   :  { %92 = vmatpush.msra.mxu0 %v22_v25  ;;  %178 = vmatpush.msra.mxu2 %v22_v25 }
  0x21   :  { %179 = vmatpush.msra.mxu3 %v22_v25  ;;  %93 = vmatmul.f32.vlgmr.msra.gmra.mxu0 %v14_v26 }
  0x22   :  { %96 = vmatmul.f32.vlgmr.msra.gmra.mxu2 %v16_v27  ;;  %99 = vmatmul.f32.vlgmr.msra.gmra.mxu3 %v18_v28 }
  0x2a   :  { %102 = vmatmul.f32.gmra.mxu3 %v20_v30 }
  0x7b   :  { %v57_v37 = vpop.permute.xlu1 %56 }
  0x7d   :  { %v47_v32 = vpop.permute.xlu0 %46 }
  0x83   :  { %v62_v46 = vpop.permute.xlu1 %61 }
  0x84   :  { %v123_v31 = vpop.f32.mrf.mxu1 }
  0x85   :  { %v52_v38 = vpop.permute.xlu0 %51 }
  0x8c   :  { %v126_v33 = vpop.f32.mrf.mxu1 }
  0x94   :  { %v129_v39 = vpop.f32.mrf.mxu1 }
  0x9c   :  { %v132_v48 = vpop.f32.mrf.mxu1 }
  0x9e   :  { %v94_v34 = vpop.f32.mrf.mxu0 }
  0x9f   :  { %v95_v35 = vadd.f32 %v94_v34, %v47_v32 }
  0xa1   :  { %v124_v36 = vadd.f32 %v123_v31, %v95_v35 }
  0xa3   :  { %136 = vst.msk [vmem:[%s317_s3] sm:$0xff] %vm135_vm1, %v124_v36 }
  0xa5   :  { %v97_v40 = vpop.f32.mrf.mxu2  ;;  %v100_v41 = vpop.f32.mrf.mxu3 }
  0xa6   :  { %v98_v42 = vadd.f32 %v97_v40, %v52_v38  ;;  %v101_v43 = vadd.f32 %v100_v41, %v57_v37 }
  0xa8   :  { %v127_v44 = vadd.f32 %v126_v33, %v98_v42  ;;  %v130_v45 = vadd.f32 %v129_v39, %v101_v43 }
  0xaa   :  { %137 = vst.msk [vmem:[%s317_s3 + $0x8] sm:$0xff] %vm135_vm1, %v127_v44 }
  0xab   :  { %138 = vst.msk [vmem:[%s317_s3 + $0x10] sm:$0xff] %vm135_vm1, %v130_v45 }
  0xad   :  { %v103_v47 = vpop.f32.mrf.mxu3 }
  0xae   :  { %v104_v49 = vadd.f32 %v103_v47, %v62_v46 }
  0xb0   :  { %v133_v50 = vadd.f32 %v132_v48, %v104_v49 }
  0xb2   :  { %139 = vst.msk [vmem:[%s317_s3 + $0x18] sm:$0xff] %vm135_vm1, %v133_v50 }

// kernel: feature_extractor_forward.23
= control target key start
LH: loop header
LB: loop body
LE: loop exit
PB: predicated region body
PF: predicated region fallthrough
CT: control target
= control target key end

     0   :  { %v335_v0 = vmov 0   ;;  %vm94_vm0 = vcmask 64512   ;;  %s716_s1 = inlined_call_operand.vmem [shape: f32[32,1], index: 1, kind: input, shape index: {}]   ;;  %s717_s2 = inlined_call_operand.vmem [shape: f32[32,1], index: 2, kind: input, shape index: {}]   ;;  %s718_s0 = inlined_call_operand.vmem [shape: f32[20,32,8], index: 0, kind: input, shape index: {}]   ;;  %s719_s3 = inlined_call_operand.vmem [shape: f32[32,8], index: 3, kind: output, shape index: {}]  }
   0x1   :  { %333 = vset.pattern.permute.xlu1 %v335_v0  ;;  %332 = vset.pattern.permute.xlu0 %v335_v0  ;;  %v257_v1 = vld [vmem:[%s716_s1 + $0x10] sm:$0xff]  ;;  %v255_v2 = vld [vmem:[%s716_s1] sm:$0xff]  ;;  %v258_v4 = vld [vmem:[%s716_s1 + $0x18] sm:$0xff] }
   0x2   :  { %271 = vperm.xlu1 %333, %v257_v1   ;;  %261 = vperm.xlu0 %332, %v255_v2   ;;  %v283_v3 = vld [vmem:[%s717_s2] sm:$0xff]  ;;  %v256_v5 = vld [vmem:[%s716_s1 + $0x8] sm:$0xff]  ;;  %v286_v7 = vld [vmem:[%s717_s2 + $0x18] sm:$0xff] }
   0x3   :  { %334 = vset.pattern.permute.xlu2 %v335_v0  ;;  %v284_v6 = vld [vmem:[%s717_s2 + $0x8] sm:$0xff]  ;;  %v285_v8 = vld [vmem:[%s717_s2 + $0x10] sm:$0xff]  ;;  %v14_v9 = vld [vmem:[%s718_s0] sm:$0xff] }
   0x4   :  { %289 = vperm.xlu2 %334, %v283_v3   ;;  %v18_v10 = vld [vmem:[%s718_s0 + $0x20] sm:$0xff]  ;;  %v95_v11 = vsel %vm94_vm0, %v14_v9, 0.0  ;;  %v16_v12 = vld [vmem:[%s718_s0 + $0x10] sm:$0xff]  ;;  %v17_v29 = vld [vmem:[%s718_s0 + $0x18] sm:$0xff] }
   0x5   :  { %v20_v13 = vld [vmem:[%s718_s0 + $0x30] sm:$0xff]  ;;  %v22_v14 = vld [vmem:[%s718_s0 + $0x40] sm:$0xff]  ;;  %v96_v15 = vsel %vm94_vm0, %v18_v10, 0.0  ;;  %v173_v19 = vsel %vm94_vm0, %v16_v12, 0.0  ;;  %v21_v33 = vld [vmem:[%s718_s0 + $0x38] sm:$0xff]  ;;  %v212_v34 = vsel %vm94_vm0, %v17_v29, 0.0 }
   0x6   :  { %v97_v16 = vadd.f32 %v96_v15, %v95_v11  ;;  %v98_v17 = vsel %vm94_vm0, %v22_v14, 0.0  ;;  %v26_v18 = vld [vmem:[%s718_s0 + $0x60] sm:$0xff]  ;;  %v174_v20 = vsel %vm94_vm0, %v20_v13, 0.0  ;;  %v24_v23 = vld [vmem:[%s718_s0 + $0x50] sm:$0xff]  ;;  %v15_v35 = vld [vmem:[%s718_s0 + $0x8] sm:$0xff]  ;;  %v213_v40 = vsel %vm94_vm0, %v21_v33, 0.0 }
   0x7   :  { %v100_v22 = vsel %vm94_vm0, %v26_v18, 0.0  ;;  %v30_v24 = vld [vmem:[%s718_s0 + $0x80] sm:$0xff]  ;;  %v175_v27 = vadd.f32 %v174_v20, %v173_v19  ;;  %v176_v30 = vsel %vm94_vm0, %v24_v23, 0.0  ;;  %v19_v36 = vld [vmem:[%s718_s0 + $0x28] sm:$0xff]  ;;  %v28_v37 = vld [vmem:[%s718_s0 + $0x70] sm:$0xff]  ;;  %v134_v41 = vsel %vm94_vm0, %v15_v35, 0.0 }
   0x8   :  { %v99_v21 = vadd.f32 %v98_v17, %v97_v16  ;;  %v102_v26 = vsel %vm94_vm0, %v30_v24, 0.0  ;;  %v34_v28 = vld [vmem:[%s718_s0 + $0xa0] sm:$0xff]  ;;  %v25_v39 = vld [vmem:[%s718_s0 + $0x58] sm:$0xff]  ;;  %v135_v42 = vsel %vm94_vm0, %v19_v36, 0.0  ;;  %v214_v45 = vadd.f32 %v213_v40, %v212_v34  ;;  %v23_v46 = vld [vmem:[%s718_s0 + $0x48] sm:$0xff] }
   0x9   :  { %v104_v32 = vsel %vm94_vm0, %v34_v28, 0.0  ;;  %v38_v38 = vld [vmem:[%s718_s0 + $0xc0] sm:$0xff]  ;;  %v177_v47 = vadd.f32 %v176_v30, %v175_v27  ;;  %v29_v49 = vld [vmem:[%s718_s0 + $0x78] sm:$0xff]  ;;  %v215_v50 = vsel %vm94_vm0, %v25_v39, 0.0  ;;  %v136_v51 = vadd.f32 %v135_v42, %v134_v41  ;;  %v27_v55 = vld [vmem:[%s718_s0 + $0x68] sm:$0xff] }
   0xa   :  { %276 = vperm.xlu1 %333, %v258_v4   ;;  %266 = vperm.xlu0 %332, %v256_v5   ;;  %v101_v25 = vadd.f32 %v100_v22, %v99_v21  ;;  %v106_v44 = vsel %vm94_vm0, %v38_v38, 0.0  ;;  %v42_v48 = vld [vmem:[%s718_s0 + $0xe0] sm:$0xff]  ;;  %v137_v52 = vsel %vm94_vm0, %v23_v46, 0.0  ;;  %v178_v53 = vsel %vm94_vm0, %v28_v37, 0.0  ;;  %v32_v56 = vld [vmem:[%s718_s0 + $0x90] sm:$0xff]  ;;  %v33_v58 = vld [vmem:[%s718_s0 + $0x98] sm:$0xff] }
   0xb   :  { %v216_v54 = vadd.f32 %v215_v50, %v214_v45  ;;  %v217_v59 = vsel %vm94_vm0, %v29_v49, 0.0  ;;  %v138_v60 = vadd.f32 %v137_v52, %v136_v51  ;;  %v139_v61 = vsel %vm94_vm0, %v27_v55, 0.0  ;;  %v31_v63 = vld [vmem:[%s718_s0 + $0x88] sm:$0xff]  ;;  %v46_v1 = vld [vmem:[%s718_s0 + $0x100] sm:$0xff]  ;;  %v37_v10 = vld [vmem:[%s718_s0 + $0xb8] sm:$0xff] }
   0xc   :  { %294 = vperm.xlu2 %334, %v284_v6   ;;  %v103_v31 = vadd.f32 %v102_v26, %v101_v25  ;;  %v108_v62 = vsel %vm94_vm0, %v42_v48, 0.0  ;;  %v179_v0 = vadd.f32 %v178_v53, %v177_v47  ;;  %v141_v4 = vsel %vm94_vm0, %v31_v63, 0.0  ;;  %v39_v14 = vld [vmem:[%s718_s0 + $0xc8] sm:$0xff]  ;;  %v50_v16 = vld [vmem:[%s718_s0 + $0x120] sm:$0xff]  ;;  %v40_v23 = vld [vmem:[%s718_s0 + $0xd0] sm:$0xff] }
   0xd   :  { %v218_v2 = vadd.f32 %v217_v59, %v216_v54  ;;  %v140_v3 = vadd.f32 %v139_v61, %v138_v60  ;;  %v180_v5 = vsel %vm94_vm0, %v32_v56, 0.0  ;;  %v219_v6 = vsel %vm94_vm0, %v33_v58, 0.0  ;;  %v43_v22 = vld [vmem:[%s718_s0 + $0xe8] sm:$0xff]  ;;  %v41_v25 = vld [vmem:[%s718_s0 + $0xd8] sm:$0xff]  ;;  %v54_v30 = vld [vmem:[%s718_s0 + $0x140] sm:$0xff] }
   0xe   :  { %v105_v43 = vadd.f32 %v104_v32, %v103_v31  ;;  %v110_v13 = vsel %vm94_vm0, %v46_v1, 0.0  ;;  %v181_v15 = vadd.f32 %v180_v5, %v179_v0  ;;  %v145_v19 = vsel %vm94_vm0, %v39_v14, 0.0  ;;  %v47_v32 = vld [vmem:[%s718_s0 + $0x108] sm:$0xff]  ;;  %v44_v35 = vld [vmem:[%s718_s0 + $0xf0] sm:$0xff]  ;;  %v45_v37 = vld [vmem:[%s718_s0 + $0xf8] sm:$0xff] }
   0xf   :  { %v142_v11 = vadd.f32 %v141_v4, %v140_v3  ;;  %v220_v17 = vadd.f32 %v219_v6, %v218_v2  ;;  %v221_v21 = vsel %vm94_vm0, %v37_v10, 0.0  ;;  %v112_v27 = vsel %vm94_vm0, %v50_v16, 0.0  ;;  %v58_v42 = vld [vmem:[%s718_s0 + $0x160] sm:$0xff]  ;;  %v48_v47 = vld [vmem:[%s718_s0 + $0x110] sm:$0xff]  ;;  %v49_v49 = vld [vmem:[%s718_s0 + $0x118] sm:$0xff] }
  0x10   :  { %v107_v57 = vadd.f32 %v106_v44, %v105_v43  ;;  %v147_v28 = vsel %vm94_vm0, %v43_v22, 0.0  ;;  %v184_v33 = vsel %vm94_vm0, %v40_v23, 0.0  ;;  %v223_v34 = vsel %vm94_vm0, %v41_v25, 0.0  ;;  %v51_v44 = vld [vmem:[%s718_s0 + $0x128] sm:$0xff]  ;;  %v62_v54 = vld [vmem:[%s718_s0 + $0x180] sm:$0xff]  ;;  %v52_v59 = vld [vmem:[%s718_s0 + $0x130] sm:$0xff] }
  0x11   :  { %v222_v31 = vadd.f32 %v221_v21, %v220_v17  ;;  %v114_v39 = vsel %vm94_vm0, %v54_v30, 0.0  ;;  %v149_v40 = vsel %vm94_vm0, %v47_v32, 0.0  ;;  %v186_v45 = vsel %vm94_vm0, %v44_v35, 0.0  ;;  %v55_v56 = vld [vmem:[%s718_s0 + $0x148] sm:$0xff]  ;;  %v53_v61 = vld [vmem:[%s718_s0 + $0x138] sm:$0xff]  ;;  %v66_v2 = vld [vmem:[%s718_s0 + $0x1a0] sm:$0xff] }
  0x12   :  { %304 = vperm.xlu1 %333, %v286_v7   ;;  %299 = vperm.xlu0 %332, %v285_v8   ;;  %v35_v7 = vld [vmem:[%s718_s0 + $0xa8] sm:$0xff]  ;;  %v36_v8 = vld [vmem:[%s718_s0 + $0xb0] sm:$0xff]  ;;  %v109_v9 = vadd.f32 %v108_v62, %v107_v57  ;;  %v225_v46 = vsel %vm94_vm0, %v45_v37, 0.0  ;;  %v116_v51 = vsel %vm94_vm0, %v58_v42, 0.0  ;;  %v151_v52 = vsel %vm94_vm0, %v51_v44, 0.0  ;;  %v70_v14 = vld [vmem:[%s718_s0 + $0x1c0] sm:$0xff] }
  0x13   :  { %v143_v12 = vsel %vm94_vm0, %v35_v7, 0.0  ;;  %v182_v20 = vsel %vm94_vm0, %v36_v8, 0.0  ;;  %v224_v43 = vadd.f32 %v223_v34, %v222_v31  ;;  %v188_v57 = vsel %vm94_vm0, %v48_v47, 0.0  ;;  %v59_v4 = vld [vmem:[%s718_s0 + $0x168] sm:$0xff]  ;;  %v56_v7 = vld [vmem:[%s718_s0 + $0x150] sm:$0xff]  ;;  %v61_v21 = vld [vmem:[%s718_s0 + $0x178] sm:$0xff] }
  0x14   :  { %v144_v18 = vadd.f32 %v143_v12, %v142_v11  ;;  %v111_v24 = vadd.f32 %v110_v13, %v109_v9  ;;  %v183_v29 = vadd.f32 %v182_v20, %v181_v15  ;;  %v227_v58 = vsel %vm94_vm0, %v49_v49, 0.0  ;;  %v57_v9 = vld [vmem:[%s718_s0 + $0x158] sm:$0xff]  ;;  %v63_v16 = vld [vmem:[%s718_s0 + $0x188] sm:$0xff]  ;;  %v64_v31 = vld [vmem:[%s718_s0 + $0x190] sm:$0xff] }
  0x15   :  { %v226_v55 = vadd.f32 %v225_v46, %v224_v43  ;;  %v118_v63 = vsel %vm94_vm0, %v62_v54, 0.0  ;;  %v153_v0 = vsel %vm94_vm0, %v55_v56, 0.0  ;;  %v190_v5 = vsel %vm94_vm0, %v52_v59, 0.0  ;;  %v68_v43 = vld [vmem:[%s718_s0 + $0x1b0] sm:$0xff] }
  0x16   :  { %v146_v26 = vadd.f32 %v145_v19, %v144_v18  ;;  %v113_v36 = vadd.f32 %v112_v27, %v111_v24  ;;  %v185_v41 = vadd.f32 %v184_v33, %v183_v29  ;;  %v229_v6 = vsel %vm94_vm0, %v53_v61, 0.0  ;;  %v60_v19 = vld [vmem:[%s718_s0 + $0x170] sm:$0xff]  ;;  %v65_v33 = vld [vmem:[%s718_s0 + $0x198] sm:$0xff] }
  0x17   :  { %v228_v3 = vadd.f32 %v227_v58, %v226_v55  ;;  %v120_v11 = vsel %vm94_vm0, %v66_v2, 0.0  ;;  %v155_v12 = vsel %vm94_vm0, %v59_v4, 0.0  ;;  %v192_v17 = vsel %vm94_vm0, %v56_v7, 0.0  ;;  %v72_v55 = vld [vmem:[%s718_s0 + $0x1d0] sm:$0xff] }
  0x18   :  { %v148_v38 = vadd.f32 %v147_v28, %v146_v26  ;;  %v115_v48 = vadd.f32 %v114_v39, %v113_v36  ;;  %v187_v53 = vadd.f32 %v186_v45, %v185_v41  ;;  %v231_v18 = vsel %vm94_vm0, %v57_v9, 0.0  ;;  %v74_v26 = vld [vmem:[%s718_s0 + $0x1e0] sm:$0xff]  ;;  %v67_v28 = vld [vmem:[%s718_s0 + $0x1a8] sm:$0xff]  ;;  %v69_v45 = vld [vmem:[%s718_s0 + $0x1b8] sm:$0xff] }
  0x19   :  { %v230_v15 = vadd.f32 %v229_v6, %v228_v3  ;;  %v122_v23 = vsel %vm94_vm0, %v70_v14, 0.0  ;;  %v157_v24 = vsel %vm94_vm0, %v63_v16, 0.0  ;;  %v194_v29 = vsel %vm94_vm0, %v60_v19, 0.0  ;;  %v76_v3 = vld [vmem:[%s718_s0 + $0x1f0] sm:$0xff] }
  0x1a   :  { %v150_v50 = vadd.f32 %v149_v40, %v148_v38  ;;  %v117_v60 = vadd.f32 %v116_v51, %v115_v48  ;;  %v189_v1 = vadd.f32 %v188_v57, %v187_v53  ;;  %v233_v30 = vsel %vm94_vm0, %v61_v21, 0.0  ;;  %v78_v38 = vld [vmem:[%s718_s0 + $0x200] sm:$0xff]  ;;  %v71_v40 = vld [vmem:[%s718_s0 + $0x1c8] sm:$0xff]  ;;  %v73_v57 = vld [vmem:[%s718_s0 + $0x1d8] sm:$0xff] }
  0x1b   :  { %v232_v27 = vadd.f32 %v231_v18, %v230_v15  ;;  %v124_v35 = vsel %vm94_vm0, %v74_v26, 0.0  ;;  %v159_v36 = vsel %vm94_vm0, %v67_v28, 0.0  ;;  %v196_v41 = vsel %vm94_vm0, %v64_v31, 0.0  ;;  %v80_v15 = vld [vmem:[%s718_s0 + $0x210] sm:$0xff]  ;;  %v85_v28 = vld [vmem:[%s718_s0 + $0x238] sm:$0xff] }
  0x1c   :  { %v152_v62 = vadd.f32 %v151_v52, %v150_v50  ;;  %v119_v8 = vadd.f32 %v118_v63, %v117_v60  ;;  %v191_v13 = vadd.f32 %v190_v5, %v189_v1  ;;  %v235_v42 = vsel %vm94_vm0, %v65_v33, 0.0  ;;  %v82_v50 = vld [vmem:[%s718_s0 + $0x220] sm:$0xff]  ;;  %v75_v52 = vld [vmem:[%s718_s0 + $0x1e8] sm:$0xff]  ;;  %v77_v5 = vld [vmem:[%s718_s0 + $0x1f8] sm:$0xff] }
  0x1d   :  { %v234_v39 = vadd.f32 %v233_v30, %v232_v27  ;;  %v126_v47 = vsel %vm94_vm0, %v78_v38, 0.0  ;;  %v161_v48 = vsel %vm94_vm0, %v71_v40, 0.0  ;;  %v198_v53 = vsel %vm94_vm0, %v68_v43, 0.0  ;;  %v84_v26 = vld [vmem:[%s718_s0 + $0x230] sm:$0xff]  ;;  %v91_v33 = vld [vmem:[%s718_s0 + $0x268] sm:$0xff]  ;;  %v89_v38 = vld [vmem:[%s718_s0 + $0x258] sm:$0xff] }
  0x1e   :  { %v154_v10 = vadd.f32 %v153_v0, %v152_v62  ;;  %v121_v20 = vadd.f32 %v120_v11, %v119_v8  ;;  %v193_v25 = vadd.f32 %v192_v17, %v191_v13  ;;  %v237_v54 = vsel %vm94_vm0, %v69_v45, 0.0  ;;  %v86_v62 = vld [vmem:[%s718_s0 + $0x240] sm:$0xff]  ;;  %v79_v0 = vld [vmem:[%s718_s0 + $0x208] sm:$0xff]  ;;  %v81_v17 = vld [vmem:[%s718_s0 + $0x218] sm:$0xff] }
  0x1f   :  { %v236_v51 = vadd.f32 %v235_v42, %v234_v39  ;;  %v128_v59 = vsel %vm94_vm0, %v82_v50, 0.0  ;;  %v163_v60 = vsel %vm94_vm0, %v75_v52, 0.0  ;;  %v200_v1 = vsel %vm94_vm0, %v72_v55, 0.0  ;;  %v93_v50 = vld [vmem:[%s718_s0 + $0x278] sm:$0xff] }
  0x20   :  { %v156_v22 = vadd.f32 %v155_v12, %v154_v10  ;;  %v123_v32 = vadd.f32 %v122_v23, %v121_v20  ;;  %v195_v37 = vadd.f32 %v194_v29, %v193_v25  ;;  %v239_v2 = vsel %vm94_vm0, %v73_v57, 0.0  ;;  %v90_v10 = vld [vmem:[%s718_s0 + $0x260] sm:$0xff]  ;;  %v83_v12 = vld [vmem:[%s718_s0 + $0x228] sm:$0xff] }
  0x21   :  { %v238_v63 = vadd.f32 %v237_v54, %v236_v51  ;;  %v130_v7 = vsel %vm94_vm0, %v86_v62, 0.0  ;;  %v165_v8 = vsel %vm94_vm0, %v79_v0, 0.0  ;;  %v202_v13 = vsel %vm94_vm0, %v76_v3, 0.0  ;;  %v87_v23 = vld [vmem:[%s718_s0 + $0x248] sm:$0xff] }
  0x22   :  { %v158_v34 = vadd.f32 %v157_v24, %v156_v22  ;;  %v125_v44 = vadd.f32 %v124_v35, %v123_v32  ;;  %v197_v49 = vadd.f32 %v196_v41, %v195_v37  ;;  %v241_v14 = vsel %vm94_vm0, %v77_v5, 0.0 }
  0x23   :  { %v240_v11 = vadd.f32 %v239_v2, %v238_v63  ;;  %v132_v19 = vsel %vm94_vm0, %v90_v10, 0.0  ;;  %v167_v20 = vsel %vm94_vm0, %v83_v12, 0.0  ;;  %v204_v24 = vsel %vm94_vm0, %v80_v15, 0.0 }
  0x24   :  { %v160_v46 = vadd.f32 %v159_v36, %v158_v34  ;;  %v127_v56 = vadd.f32 %v126_v47, %v125_v44  ;;  %v199_v61 = vadd.f32 %v198_v53, %v197_v49  ;;  %v243_v25 = vsel %vm94_vm0, %v81_v17, 0.0  ;;  %v88_v36 = vld [vmem:[%s718_s0 + $0x250] sm:$0xff] }
  0x25   :  { %v242_v22 = vadd.f32 %v241_v14, %v240_v11  ;;  %v169_v30 = vsel %vm94_vm0, %v87_v23, 0.0  ;;  %v206_v34 = vsel %vm94_vm0, %v84_v26, 0.0  ;;  %v245_v35 = vsel %vm94_vm0, %v85_v28, 0.0 }
  0x26   :  { %v162_v58 = vadd.f32 %v161_v48, %v160_v46  ;;  %v129_v4 = vadd.f32 %v128_v59, %v127_v56  ;;  %v201_v9 = vadd.f32 %v200_v1, %v199_v61  ;;  %v171_v40 = vsel %vm94_vm0, %v91_v33, 0.0  ;;  %v92_v48 = vld [vmem:[%s718_s0 + $0x270] sm:$0xff] }
  0x27   :  { %v244_v32 = vadd.f32 %v243_v25, %v242_v22  ;;  %v208_v45 = vsel %vm94_vm0, %v88_v36, 0.0  ;;  %v247_v47 = vsel %vm94_vm0, %v89_v38, 0.0  ;;  %v210_v55 = vsel %vm94_vm0, %v92_v48, 0.0 }
  0x28   :  { %v164_v6 = vadd.f32 %v163_v60, %v162_v58  ;;  %v131_v16 = vadd.f32 %v130_v7, %v129_v4  ;;  %v203_v21 = vadd.f32 %v202_v13, %v201_v9  ;;  %v249_v56 = vsel %vm94_vm0, %v93_v50, 0.0 }
  0x29   :  { %v246_v43 = vadd.f32 %v245_v35, %v244_v32 }
  0x2a   :  { %v166_v18 = vadd.f32 %v165_v8, %v164_v6  ;;  %v133_v27 = vadd.f32 %v132_v19, %v131_v16  ;;  %v205_v31 = vadd.f32 %v204_v24, %v203_v21 }
  0x2b   :  { %v248_v54 = vadd.f32 %v247_v47, %v246_v43 }
  0x2c   :  { %v168_v29 = vadd.f32 %v167_v20, %v166_v18  ;;  %v251_v37 = vmul.f32 0.05, %v133_v27  ;;  %v207_v42 = vadd.f32 %v206_v34, %v205_v31 }
  0x2d   :  { %v250_v61 = vadd.f32 %v249_v56, %v248_v54 }
  0x2e   :  { %v170_v39 = vadd.f32 %v169_v30, %v168_v29  ;;  %v209_v52 = vadd.f32 %v208_v45, %v207_v42 }
  0x2f   :  { %v254_v3 = vmul.f32 0.05, %v250_v61 }
  0x30   :  { %v172_v51 = vadd.f32 %v171_v40, %v170_v39  ;;  %v211_v59 = vadd.f32 %v210_v55, %v209_v52 }
  0x32   :  { %v252_v58 = vmul.f32 0.05, %v172_v51  ;;  %v253_v2 = vmul.f32 0.05, %v211_v59 }
  0x5e   :  { %v290_v41 = vpop.permute.xlu2 %289 }
  0x66   :  { %v295_v1 = vpop.permute.xlu2 %294 }
  0x74   :  { %v272_v44 = vpop.permute.xlu1 %271  ;;  %v262_v46 = vpop.permute.xlu0 %261 }
  0x75   :  { %v279_v49 = vmul.f32 %v262_v46, %v251_v37  ;;  %v281_v6 = vmul.f32 %v272_v44, %v253_v2 }
  0x77   :  { %v307_v53 = vadd.f32 %v290_v41, %v279_v49 }
  0x79   :  { %vm311_vm1 = vcmp.gt.f32.partialorder %v307_v53, 0.0  ;;  %v315_v57 = vmul.f32 0.2, %v307_v53 }
  0x7b   :  { %v319_v60 = vsel %vm311_vm1, %v307_v53, %v315_v57 }
  0x7c   :  { %323 = vst.msk [vmem:[%s719_s3] sm:$0xff] %vm94_vm0, %v319_v60  ;;  %v277_v62 = vpop.permute.xlu1 %276  ;;  %v267_v63 = vpop.permute.xlu0 %266 }
  0x7d   :  { %v280_v0 = vmul.f32 %v267_v63, %v252_v58  ;;  %v282_v7 = vmul.f32 %v277_v62, %v254_v3 }
  0x7f   :  { %v308_v4 = vadd.f32 %v295_v1, %v280_v0 }
  0x81   :  { %vm312_vm2 = vcmp.gt.f32.partialorder %v308_v4, 0.0  ;;  %v316_v5 = vmul.f32 0.2, %v308_v4 }
  0x83   :  { %v320_v8 = vsel %vm312_vm2, %v308_v4, %v316_v5 }
  0x84   :  { %324 = vst.msk [vmem:[%s719_s3 + $0x8] sm:$0xff] %vm94_vm0, %v320_v8  ;;  %v305_v9 = vpop.permute.xlu1 %304  ;;  %v300_v10 = vpop.permute.xlu0 %299 }
  0x85   :  { %v310_v11 = vadd.f32 %v305_v9, %v282_v7  ;;  %v309_v12 = vadd.f32 %v300_v10, %v281_v6 }
  0x87   :  { %vm314_vm3 = vcmp.gt.f32.partialorder %v310_v11, 0.0  ;;  %v318_v13 = vmul.f32 0.2, %v310_v11  ;;  %vm313_vm4 = vcmp.gt.f32.partialorder %v309_v12, 0.0  ;;  %v317_v14 = vmul.f32 0.2, %v309_v12 }
  0x89   :  { %v322_v15 = vsel %vm314_vm3, %v310_v11, %v318_v13  ;;  %v321_v16 = vsel %vm313_vm4, %v309_v12, %v317_v14 }
  0x8a   :  { %326 = vst.msk [vmem:[%s719_s3 + $0x18] sm:$0xff] %vm94_vm0, %v322_v15 }
  0x8b   :  { %325 = vst.msk [vmem:[%s719_s3 + $0x10] sm:$0xff] %vm94_vm0, %v321_v16 }

</bundles_post_ra>
